<compile_context>
chip_gen: v5e
topology: v5e:2x2
jax: 0.10.0
libtpu: 0.0.40
codegen_flags: <defaults>
</compile_context>

<pallas_src>
import math
from functools import partial

import jax
import jax.numpy as jnp
from jax.experimental import pallas as pl
from jax.experimental.pallas import tpu as pltpu

LOG2PI = math.log(2.0 * math.pi)
MIXTURE_WEIGHTS = (3.0 / 20.0, 3.0 / 4.0, 1.0 / 10.0)
LN_EPS = 0.1  # RecVAE Encoder LayerNorm eps (intentionally large, per module)

# CompositePrior fixed, non-trainable parameters (fill_(0)/fill_(0)/fill_(10),
# requires_grad=False) -> compile-time constants.
MU_PRIOR = 0.0
LOGVAR_PRIOR = 0.0
LOGVAR_UNIFORM_PRIOR = 10.0

LANE = 128


def _round_up(n, m):
    return ((n + m - 1) // m) * m


def _swish(v):
    return v * jax.nn.sigmoid(v)


def _layernorm_masked(v, gamma, beta, lane_mask, true_dim, eps=LN_EPS):
    # Lane-padded LayerNorm.  Padded lanes of `v` are exactly zero, so a plain
    # sum / true_dim gives the correct mean.  Variance uses masked centered
    # values (two-pass form) so the large means coming from the growing
    # residual sums cannot cancel catastrophically.  gamma/beta are zero in
    # padded lanes and the centered value is masked to zero there, so padded
    # lanes stay exactly zero on the output.
    inv_n = 1.0 / float(true_dim)
    mean = jnp.sum(v, axis=-1, keepdims=True) * inv_n
    d = jnp.where(lane_mask, v - mean, 0.0)
    var = jnp.sum(d * d, axis=-1, keepdims=True) * inv_n
    return d * jax.lax.rsqrt(var + eps) * gamma + beta


def _composite_prior_kernel(
    x_ref, z_ref,
    w1_ref, w2_ref, w3_ref, w4_ref, w5_ref, wh_ref,
    vec_ref, bh_ref,
    out_ref,
    acc_ref, ss_ref,
    *, hidden_dim, hidden_pad, latent_pad,
):
    k = pl.program_id(1)

    @pl.when(k == 0)
    def _init():
        acc_ref[...] = jnp.zeros_like(acc_ref)
        ss_ref[...] = jnp.zeros_like(ss_ref)

    # ---- layer-1, K-tiled accumulation ----------------------------------
    # fc1(x / ||x||) = (x @ W1) / ||x|| + b1  ->  accumulate x@W1 and sum(x^2)
    # over K tiles, normalize once on the last tile.
    x = x_ref[...]                                    # (block_m, block_k) bf16
    xf = x.astype(jnp.float32)
    ss_ref[...] += jnp.sum(xf * xf, axis=-1, keepdims=True)
    acc_ref[...] += jnp.dot(x, w1_ref[...], preferred_element_type=jnp.float32)

    @pl.when(k == pl.num_programs(1) - 1)
    def _finish():
        # packed resident vector slab: rows 0-4 biases, 5-9 gammas, 10-14 betas
        def b(r):
            return vec_ref[r:r + 1, :]

        def g(r):
            return vec_ref[5 + r:6 + r, :]

        def be(r):
            return vec_ref[10 + r:11 + r, :]

        def lin(inp, w_ref):
            # bf16 MXU inputs, f32 accumulation.
            return jnp.dot(inp.astype(jnp.bfloat16), w_ref[...],
                           preferred_element_type=jnp.float32)

        lane_mask = (jax.lax.broadcasted_iota(jnp.int32, (1, hidden_pad), 1)
                     < hidden_dim)
        ln = partial(_layernorm_masked, lane_mask=lane_mask, true_dim=hidden_dim)

        # torch F-style normalization has no eps; 1e-12 only guards the
        # all-zero padded batch rows (documented behavior difference for
        # near-zero rows, irrelevant for count vectors).
        inv_norm = jax.lax.rsqrt(ss_ref[...] + 1e-12)

        h1 = ln(_swish(acc_ref[...] * inv_norm + b(0)), g(0), be(0))
        h2 = ln(_swish(lin(h1, w2_ref) + b(1) + h1), g(1), be(1))
        s2 = h1 + h2                      # running residual sums
        h3 = ln(_swish(lin(h2, w3_ref) + b(2) + s2), g(2), be(2))
        s3 = s2 + h3
        h4 = ln(_swish(lin(h3, w4_ref) + b(3) + s3), g(3), be(3))
        s4 = s3 + h4
        h5 = ln(_swish(lin(h4, w5_ref) + b(4) + s4), g(4), be(4))

        # Fused (mu | logvar) head: one matmul, slice at a lane-tile boundary.
        head = lin(h5, wh_ref) + bh_ref[...]          # (block_m, 2 * latent_pad)
        post_mu = head[:, :latent_pad]
        post_logvar = head[:, latent_pad:]

        # ---- composite prior: mixture of 3 log-normal densities ----------
        z = z_ref[...]
        zc = z if MU_PRIOR == 0.0 else z - MU_PRIOR
        zc2 = zc * zc                                  # shared by stnd & unif
        g_stnd = (-0.5 * (LOGVAR_PRIOR + LOG2PI
                          + zc2 * math.exp(-LOGVAR_PRIOR))
                  + math.log(MIXTURE_WEIGHTS[0]))
        dz = z - post_mu
        g_post = (-0.5 * (post_logvar + LOG2PI
                          + dz * dz * jnp.exp(-post_logvar))
                  + math.log(MIXTURE_WEIGHTS[1]))
        g_unif = (-0.5 * (LOGVAR_UNIFORM_PRIOR + LOG2PI
                          + zc2 * math.exp(-LOGVAR_UNIFORM_PRIOR))
                  + math.log(MIXTURE_WEIGHTS[2]))

        # logsumexp over the 3 mixture components (elementwise, stable).
        m = jnp.maximum(jnp.maximum(g_stnd, g_post), g_unif)
        out_ref[...] = m + jnp.log(jnp.exp(g_stnd - m) + jnp.exp(g_post - m)
                                   + jnp.exp(g_unif - m))


def prepare_composite_prior_params(enc_params, input_dim, *, block_k=512):
    """One-time padding / bf16 repack of the frozen encoder_old parameters.

    enc_params: flat list with every Linear weight pre-transposed to
    (in_features, out_features):
      [w1,b1,g1,be1, w2,b2,g2,be2, w3,b3,g3,be3, w4,b4,g4,be4, w5,b5,g5,be5,
       wmu,bmu, wlv,blv]
    """
    (w1, b1, g1, be1, w2, b2, g2, be2, w3, b3, g3, be3,
     w4, b4, g4, be4, w5, b5, g5, be5, wmu, bmu, wlv, blv) = enc_params
    hidden_dim = int(w1.shape[1])
    latent_dim = int(wmu.shape[1])

    block_k = _round_up(min(int(block_k), _round_up(int(input_dim), LANE)), LANE)
    d_pad = _round_up(int(input_dim), block_k)
    h_pad = _round_up(hidden_dim, LANE)
    l_pad = _round_up(latent_dim, LANE)

    def pad_w(w, rows, cols):   # bf16 weights for the MXU, zero-padded
        out = jnp.zeros((rows, cols), jnp.bfloat16)
        return out.at[:w.shape[0], :w.shape[1]].set(
            jnp.asarray(w).astype(jnp.bfloat16))

    w1_p = pad_w(w1, d_pad, h_pad)
    w2_p = pad_w(w2, h_pad, h_pad)
    w3_p = pad_w(w3, h_pad, h_pad)
    w4_p = pad_w(w4, h_pad, h_pad)
    w5_p = pad_w(w5, h_pad, h_pad)

    # fused (mu | logvar) head -> single (h_pad, 2*l_pad) matmul.
    wh = jnp.zeros((h_pad, 2 * l_pad), jnp.bfloat16)
    wh = wh.at[:hidden_dim, :latent_dim].set(jnp.asarray(wmu).astype(jnp.bfloat16))
    wh = wh.at[:hidden_dim, l_pad:l_pad + latent_dim].set(
        jnp.asarray(wlv).astype(jnp.bfloat16))
    bh = jnp.zeros((1, 2 * l_pad), jnp.float32)
    bh = bh.at[:, :latent_dim].set(jnp.asarray(bmu, jnp.float32).reshape(1, -1))
    bh = bh.at[:, l_pad:l_pad + latent_dim].set(
        jnp.asarray(blv, jnp.float32).reshape(1, -1))

    # Pack the 15 (hidden_dim,) bias / gamma / beta vectors into one resident
    # (16, h_pad) slab: one DMA + one VMEM buffer instead of 15.
    vec = jnp.zeros((16, h_pad), jnp.float32)
    for r, v in enumerate([b1, b2, b3, b4, b5, g1, g2, g3, g4, g5,
                           be1, be2, be3, be4, be5]):
        vec = vec.at[r, :hidden_dim].set(jnp.asarray(v, jnp.float32).reshape(-1))

    return dict(
        w1=w1_p, w2=w2_p, w3=w3_p, w4=w4_p, w5=w5_p, wh=wh, vec=vec, bh=bh,
        input_dim=int(input_dim), hidden_dim=hidden_dim, latent_dim=latent_dim,
        d_pad=d_pad, h_pad=h_pad, l_pad=l_pad, block_k=block_k,
    )


def _vmem_cap_bytes():
    # ~7/8 of physical VMEM per TensorCore (64 MiB v7x, 128 MiB v5e/v6e);
    # fall back to a v7x-safe value if the query is unavailable.
    try:
        return int(pltpu.get_tpu_info().vmem_capacity_bytes) * 7 // 8
    except Exception:
        return 56 * 1024 * 1024


def composite_prior_forward(x, z, prepared, *, block_m=None):
    """x: (B, input_dim), z: (B, latent_dim); prepared from prepare_*_params."""
    p = prepared
    B = x.shape[0]
    input_dim, hidden_dim, latent_dim = p["input_dim"], p["hidden_dim"], p["latent_dim"]
    d_pad, h_pad, l_pad, block_k = p["d_pad"], p["h_pad"], p["l_pad"], p["block_k"]
    assert x.shape[1] == input_dim and z.shape[1] == latent_dim

    if block_m is None:
        # Fill the MXU M dimension: never below 128 rows; cap at 256 so the
        # ~10 live f32 (block_m, h_pad) intermediates stay VMEM-friendly on
        # v7x (v5e/v6e could go to 512 at large B).
        block_m = min(256, max(128, _round_up(B, 16)))
    b_pad = _round_up(B, block_m)
    num_k = d_pad // block_k
    grid = (b_pad // block_m, num_k)

    # Layout plumbing (outside the kernel): pad batch rows, cast x to bf16 so
    # the dominant HBM stream and its VMEM tile are halved.
    x_p = (jnp.zeros((b_pad, d_pad), jnp.bfloat16)
           .at[:B, :input_dim].set(x.astype(jnp.bfloat16)))
    z_p = (jnp.zeros((b_pad, l_pad), jnp.float32)
           .at[:B, :latent_dim].set(z.astype(jnp.float32)))

    def resident(arr):
        # Constant block index + single buffer: fetched once, half the VMEM
        # footprint of the default double-buffering.
        return pl.BlockSpec(arr.shape, lambda i, k: (0, 0),
                            pipeline_mode=pl.Buffered(1))

    in_specs = [
        pl.BlockSpec((block_m, block_k), lambda i, k: (i, k)),   # x (K-tiled)
        pl.BlockSpec((block_m, l_pad), lambda i, k: (i, 0)),     # z
        pl.BlockSpec((block_k, h_pad), lambda i, k: (k, 0)),     # w1 (K-tiled)
        resident(p["w2"]), resident(p["w3"]),
        resident(p["w4"]), resident(p["w5"]),
        resident(p["wh"]), resident(p["vec"]), resident(p["bh"]),
    ]
    out_specs = pl.BlockSpec((block_m, l_pad), lambda i, k: (i, 0))

    # VMEM budget: single-buffered residents + double-buffered x/w1/z/out
    # tiles + scratch + live f32 intermediates, with ~30% headroom.
    nbytes = lambda a: int(a.size) * a.dtype.itemsize
    resident_bytes = sum(nbytes(p[n]) for n in
                         ("w2", "w3", "w4", "w5", "wh", "vec", "bh"))
    pipelined_bytes = 2 * (block_m * block_k * 2 + block_k * h_pad * 2
                           + 2 * block_m * l_pad * 4)
    scratch_bytes = block_m * h_pad * 4 + block_m * LANE * 4
    live_bytes = 10 * block_m * h_pad * 4
    needed = int(1.3 * (resident_bytes + pipelined_bytes
                        + scratch_bytes + live_bytes))
    vmem_limit = min(_vmem_cap_bytes(), max(needed, 32 * 1024 * 1024))

    flops = 2 * B * (input_dim * hidden_dim + 4 * hidden_dim * hidden_dim
                     + 2 * hidden_dim * latent_dim)
    transcendentals = B * (6 * hidden_dim + 5 * latent_dim)
    bytes_accessed = (2 * B * input_dim + 8 * B * latent_dim
                      + nbytes(p["w1"]) + resident_bytes)

    kernel = partial(_composite_prior_kernel, hidden_dim=hidden_dim,
                     hidden_pad=h_pad, latent_pad=l_pad)

    out_p = pl.pallas_call(
        kernel,
        out_shape=jax.ShapeDtypeStruct((b_pad, l_pad), jnp.float32),
        grid_spec=pltpu.PrefetchScalarGridSpec(
            num_scalar_prefetch=0,
            grid=grid,
            in_specs=in_specs,
            out_specs=out_specs,
            scratch_shapes=[pltpu.VMEM((block_m, h_pad), jnp.float32),  # acc
                            pltpu.VMEM((block_m, 1), jnp.float32)],      # ||x||^2
        ),
        compiler_params=pltpu.CompilerParams(
            # batch axis independent -> megacore-shardable; K axis carries the
            # layer-1 accumulator -> "arbitrary".
            dimension_semantics=("parallel", "arbitrary"),
            vmem_limit_bytes=int(vmem_limit),
        ),
        cost_estimate=pl.CostEstimate(
            flops=int(flops),
            transcendentals=int(transcendentals),
            bytes_accessed=int(bytes_accessed)),
    )(x_p, z_p, p["w1"], p["w2"], p["w3"], p["w4"], p["w5"],
      p["wh"], p["vec"], p["bh"])

    return out_p[:B, :latent_dim]


def _reference_forward(x, z, enc_params):
    """Pure-JAX reference mirroring the module (bf16 matmul inputs, f32 math)."""
    (w1, b1, g1, be1, w2, b2, g2, be2, w3, b3, g3, be3,
     w4, b4, g4, be4, w5, b5, g5, be5, wmu, bmu, wlv, blv) = enc_params

    def lin(a, w, b):
        return jnp.dot(a.astype(jnp.bfloat16), w.astype(jnp.bfloat16),
                       preferred_element_type=jnp.float32) + b

    def ln(v, g, be):
        mean = jnp.mean(v, axis=-1, keepdims=True)
        var = jnp.mean((v - mean) ** 2, axis=-1, keepdims=True)
        return (v - mean) * jax.lax.rsqrt(var + LN_EPS) * g + be

    xn = x * jax.lax.rsqrt(jnp.sum(x * x, axis=-1, keepdims=True) + 1e-12)
    h1 = ln(_swish(lin(xn, w1, b1)), g1, be1)
    h2 = ln(_swish(lin(h1, w2, b2) + h1), g2, be2)
    h3 = ln(_swish(lin(h2, w3, b3) + h1 + h2), g3, be3)
    h4 = ln(_swish(lin(h3, w4, b4) + h1 + h2 + h3), g4, be4)
    h5 = ln(_swish(lin(h4, w5, b5) + h1 + h2 + h3 + h4), g5, be5)
    post_mu = lin(h5, wmu, bmu)
    post_logvar = lin(h5, wlv, blv)

    def lnp(zz, mu, logvar):
        return -0.5 * (logvar + LOG2PI + (zz - mu) ** 2 * jnp.exp(-logvar))

    gp0 = lnp(z, MU_PRIOR, LOGVAR_PRIOR) + math.log(MIXTURE_WEIGHTS[0])
    gp1 = lnp(z, post_mu, post_logvar) + math.log(MIXTURE_WEIGHTS[1])
    gp2 = lnp(z, MU_PRIOR, LOGVAR_UNIFORM_PRIOR) + math.log(MIXTURE_WEIGHTS[2])
    m = jnp.maximum(jnp.maximum(gp0, gp1), gp2)
    return m + jnp.log(jnp.exp(gp0 - m) + jnp.exp(gp1 - m) + jnp.exp(gp2 - m))


def make_params(key, hidden_dim, latent_dim, input_dim):
    """Deterministic synthetic parameters (torch Linear W transposed to (in, out))."""
    keys = jax.random.split(key, 16)
    ki = iter(range(16))

    def linear(k, d_in, d_out):
        w = 0.1 * jax.random.normal(k, (d_in, d_out), jnp.float32)
        b = 0.01 * jax.random.normal(jax.random.fold_in(k, 1), (1, d_out), jnp.float32)
        return w, b

    def ln(k, d):
        gamma = 1.0 + 0.05 * jax.random.normal(k, (1, d), jnp.float32)
        beta = 0.05 * jax.random.normal(jax.random.fold_in(k, 1), (1, d), jnp.float32)
        return gamma, beta

    params = []
    dims_in = [input_dim, hidden_dim, hidden_dim, hidden_dim, hidden_dim]
    for d_in in dims_in:
        w, b = linear(keys[next(ki)], d_in, hidden_dim)
        gamma, beta = ln(keys[next(ki)], hidden_dim)
        params += [w, b, gamma, beta]

    wmu, bmu = linear(keys[next(ki)], hidden_dim, latent_dim)
    wlv, blv = linear(keys[next(ki)], hidden_dim, latent_dim)
    params += [wmu, bmu, wlv, blv]
    return params


if __name__ == "__main__":
    # Small shapes; input_dim=384 with block_k=128 exercises the K-tiled
    # (num_k = 3) first-layer accumulation path.
    hidden_dim, latent_dim, input_dim = 32, 16, 384
    batch = 8

    key = jax.random.PRNGKey(0)
    kx, kz, kp = jax.random.split(key, 3)
    # strictly positive-ish input so the L2 norm is nonzero (RecVAE count vector)
    x = jnp.abs(jax.random.normal(kx, (batch, input_dim), jnp.float32)) + 0.1
    z = jax.random.normal(kz, (batch, latent_dim), jnp.float32)
    params = make_params(kp, hidden_dim, latent_dim, input_dim)

    prepared = prepare_composite_prior_params(params, input_dim, block_k=128)
    out = composite_prior_forward(x, z, prepared)
    jax.block_until_ready(out)
    assert out.shape == (batch, latent_dim) and out.dtype == jnp.float32

    ref = _reference_forward(x, z, params)
    jax.block_until_ready(ref)
    assert bool(jnp.all(jnp.isfinite(out)))
    err = float(jnp.max(jnp.abs(out - ref)))
    assert bool(jnp.allclose(out, ref, rtol=2e-2, atol=2e-2)), f"max abs err {err}"

    print("KERNEL_OK")
</pallas_src>

<mosaic_0001>
module attributes {stable_mosaic.version = 11 : i64} {
  func.func @_composite_prior_kernel(%arg0: i32, %arg1: i32, %arg2: memref<128x128xbf16, #tpu.memory_space<vmem>>, %arg3: memref<128x128xf32, #tpu.memory_space<vmem>>, %arg4: memref<128x128xbf16, #tpu.memory_space<vmem>>, %arg5: memref<128x128xbf16, #tpu.memory_space<vmem>>, %arg6: memref<128x128xbf16, #tpu.memory_space<vmem>>, %arg7: memref<128x128xbf16, #tpu.memory_space<vmem>>, %arg8: memref<128x128xbf16, #tpu.memory_space<vmem>>, %arg9: memref<128x256xbf16, #tpu.memory_space<vmem>>, %arg10: memref<16x128xf32, #tpu.memory_space<vmem>>, %arg11: memref<1x256xf32, #tpu.memory_space<vmem>>, %arg12: memref<128x128xf32, #tpu.memory_space<vmem>>, %arg13: memref<128x128xf32, #tpu.memory_space<vmem>>, %arg14: memref<128x1xf32, #tpu.memory_space<vmem>>) attributes {dimension_semantics = [#tpu.dimension_semantics<parallel>, #tpu.dimension_semantics<arbitrary>], iteration_bounds = array<i64: 1, 3>, scalar_prefetch = 0 : i64, scratch_operands = 2 : i64, tpu.core_type = #tpu.core_type<tc>, window_params = [{transform_indices = @transform_0, window_bounds = array<i64: 128, 128>}, {transform_indices = @transform_1, window_bounds = array<i64: 128, 128>}, {transform_indices = @transform_2, window_bounds = array<i64: 128, 128>}, {pipeline_mode = #tpu.pipeline_mode<synchronous>, transform_indices = @transform_3, window_bounds = array<i64: 128, 128>}, {pipeline_mode = #tpu.pipeline_mode<synchronous>, transform_indices = @transform_4, window_bounds = array<i64: 128, 128>}, {pipeline_mode = #tpu.pipeline_mode<synchronous>, transform_indices = @transform_5, window_bounds = array<i64: 128, 128>}, {pipeline_mode = #tpu.pipeline_mode<synchronous>, transform_indices = @transform_6, window_bounds = array<i64: 128, 128>}, {pipeline_mode = #tpu.pipeline_mode<synchronous>, transform_indices = @transform_7, window_bounds = array<i64: 128, 256>}, {pipeline_mode = #tpu.pipeline_mode<synchronous>, transform_indices = @transform_8, window_bounds = array<i64: 16, 128>}, {pipeline_mode = #tpu.pipeline_mode<synchronous>, transform_indices = @transform_9, window_bounds = array<i64: 1, 256>}, {transform_indices = @transform_10, window_bounds = array<i64: 128, 128>}]} {
    %c0_i32 = arith.constant 0 : i32
    %0 = arith.cmpi eq, %arg1, %c0_i32 : i32
    %1 = arith.extui %0 : i1 to i32
    %c0_i32_0 = arith.constant 0 : i32
    %2 = arith.cmpi ne, %1, %c0_i32_0 : i32
    scf.if %2 {
      %cst_14 = arith.constant 0.000000e+00 : f32
      %19 = vector.broadcast %cst_14 : f32 to vector<128x128xf32>
      %c0_15 = arith.constant 0 : index
      %c0_16 = arith.constant 0 : index
      %20 = vector.load %arg13[%c0_15, %c0_16] : memref<128x128xf32, #tpu.memory_space<vmem>>, vector<128x128xf32>
      tpu.vector_store %arg13[%c0_15, %c0_16], %19 {strides = array<i32>} : memref<128x128xf32, #tpu.memory_space<vmem>>, vector<128x128xf32>,
      %cst_17 = arith.constant 0.000000e+00 : f32
      %21 = vector.broadcast %cst_17 : f32 to vector<128x1xf32>
      %c0_18 = arith.constant 0 : index
      %c0_19 = arith.constant 0 : index
      %22 = vector.load %arg14[%c0_18, %c0_19] : memref<128x1xf32, #tpu.memory_space<vmem>>, vector<128x1xf32>
      tpu.vector_store %arg14[%c0_18, %c0_19], %21 {strides = array<i32>} : memref<128x1xf32, #tpu.memory_space<vmem>>, vector<128x1xf32>,
    } else {
    }
    %c0 = arith.constant 0 : index
    %c0_1 = arith.constant 0 : index
    %3 = vector.load %arg2[%c0, %c0_1] : memref<128x128xbf16, #tpu.memory_space<vmem>>, vector<128x128xbf16>
    %4 = arith.extf %3 : vector<128x128xbf16> to vector<128x128xf32>
    %c0_2 = arith.constant 0 : index
    %c0_3 = arith.constant 0 : index
    %5 = vector.load %arg14[%c0_2, %c0_3] : memref<128x1xf32, #tpu.memory_space<vmem>>, vector<128x1xf32>
    %6 = arith.mulf %4, %4 : vector<128x128xf32>
    %cst = arith.constant dense<0.000000e+00> : vector<128xf32>
    %7 = vector.multi_reduction <add>, %6, %cst [1] : vector<128x128xf32> to vector<128xf32>
    %8 = vector.shape_cast %7 : vector<128xf32> to vector<128x1xf32>
    %9 = arith.addf %5, %8 : vector<128x1xf32>
    %c0_4 = arith.constant 0 : index
    %c0_5 = arith.constant 0 : index
    %10 = vector.load %arg14[%c0_4, %c0_5] : memref<128x1xf32, #tpu.memory_space<vmem>>, vector<128x1xf32>
    tpu.vector_store %arg14[%c0_4, %c0_5], %9 {strides = array<i32>} : memref<128x1xf32, #tpu.memory_space<vmem>>, vector<128x1xf32>,
    %c0_6 = arith.constant 0 : index
    %c0_7 = arith.constant 0 : index
    %11 = vector.load %arg13[%c0_6, %c0_7] : memref<128x128xf32, #tpu.memory_space<vmem>>, vector<128x128xf32>
    %c0_8 = arith.constant 0 : index
    %c0_9 = arith.constant 0 : index
    %12 = vector.load %arg4[%c0_8, %c0_9] : memref<128x128xbf16, #tpu.memory_space<vmem>>, vector<128x128xbf16>
    %cst_10 = arith.constant dense<0.000000e+00> : vector<128x128xf32>
    %13 = tpu.matmul %3, %12, %cst_10 {dimension_numbers = #tpu.dot_dimension_numbers<[1], [0], [0], [1], [0, 0, 1, 1], [], []>} : vector<128x128xbf16>, vector<128x128xbf16>, vector<128x128xf32> -> vector<128x128xf32>
    %14 = arith.addf %11, %13 : vector<128x128xf32>
    %c0_11 = arith.constant 0 : index
    %c0_12 = arith.constant 0 : index
    %15 = vector.load %arg13[%c0_11, %c0_12] : memref<128x128xf32, #tpu.memory_space<vmem>>, vector<128x128xf32>
    tpu.vector_store %arg13[%c0_11, %c0_12], %14 {strides = array<i32>} : memref<128x128xf32, #tpu.memory_space<vmem>>, vector<128x128xf32>,
    %c2_i32 = arith.constant 2 : i32
    %16 = arith.cmpi eq, %arg1, %c2_i32 : i32
    %17 = arith.extui %16 : i1 to i32
    %c0_i32_13 = arith.constant 0 : i32
    %18 = arith.cmpi ne, %17, %c0_i32_13 : i32
    scf.if %18 {
      %19 = tpu.iota {dimensions = array<i32: 1>} : vector<1x128xi32>
      %c32_i32 = arith.constant 32 : i32
      %20 = vector.broadcast %c32_i32 : i32 to vector<1x128xi32>
      %21 = arith.cmpi slt, %19, %20 : vector<1x128xi32>
      %c0_14 = arith.constant 0 : index
      %c0_15 = arith.constant 0 : index
      %22 = vector.load %arg14[%c0_14, %c0_15] : memref<128x1xf32, #tpu.memory_space<vmem>>, vector<128x1xf32>
      %cst_16 = arith.constant 9.99999996E-13 : f32
      %23 = vector.broadcast %cst_16 : f32 to vector<128x1xf32>
      %24 = arith.addf %22, %23 : vector<128x1xf32>
      %25 = math.rsqrt %24 : vector<128x1xf32>
      %c0_17 = arith.constant 0 : index
      %c0_18 = arith.constant 0 : index
      %26 = vector.load %arg13[%c0_17, %c0_18] : memref<128x128xf32, #tpu.memory_space<vmem>>, vector<128x128xf32>
      %27 = vector.broadcast %25 : vector<128x1xf32> to vector<128x128xf32>
      %28 = arith.mulf %26, %27 : vector<128x128xf32>
      %c0_19 = arith.constant 0 : index
      %c0_20 = arith.constant 0 : index
      %29 = vector.load %arg10[%c0_19, %c0_20] : memref<16x128xf32, #tpu.memory_space<vmem>>, vector<1x128xf32>
      %30 = vector.broadcast %29 : vector<1x128xf32> to vector<128x128xf32>
      %31 = arith.addf %28, %30 : vector<128x128xf32>
      %32 = arith.negf %31 : vector<128x128xf32>
      %33 = math.exp %32 : vector<128x128xf32>
      %cst_21 = arith.constant 1.000000e+00 : f32
      %34 = vector.broadcast %cst_21 : f32 to vector<128x128xf32>
      %35 = arith.addf %34, %33 : vector<128x128xf32>
      %36 = arith.divf %34, %35 : vector<128x128xf32>
      %37 = arith.mulf %31, %36 : vector<128x128xf32>
      %c5 = arith.constant 5 : index
      %c0_22 = arith.constant 0 : index
      %38 = vector.load %arg10[%c5, %c0_22] : memref<16x128xf32, #tpu.memory_space<vmem>>, vector<1x128xf32>
      %c10 = arith.constant 10 : index
      %c0_23 = arith.constant 0 : index
      %39 = vector.load %arg10[%c10, %c0_23] : memref<16x128xf32, #tpu.memory_space<vmem>>, vector<1x128xf32>
      %cst_24 = arith.constant dense<0.000000e+00> : vector<128xf32>
      %40 = vector.multi_reduction <add>, %37, %cst_24 [1] : vector<128x128xf32> to vector<128xf32>
      %41 = vector.shape_cast %40 : vector<128xf32> to vector<128x1xf32>
      %cst_25 = arith.constant 3.125000e-02 : f32
      %42 = vector.broadcast %cst_25 : f32 to vector<128x1xf32>
      %43 = arith.mulf %41, %42 : vector<128x1xf32>
      %44 = vector.broadcast %43 : vector<128x1xf32> to vector<128x128xf32>
      %45 = arith.subf %37, %44 : vector<128x128xf32>
      %cst_26 = arith.constant 0.000000e+00 : f32
      %46 = vector.shape_cast %21 : vector<1x128xi1> to vector<1x128xi1>
      %47 = vector.broadcast %46 : vector<1x128xi1> to vector<128x128xi1>
      %48 = vector.broadcast %cst_26 : f32 to vector<128x128xf32>
      %49 = arith.select %47, %45, %48 : vector<128x128xi1>, vector<128x128xf32>
      %50 = arith.mulf %49, %49 : vector<128x128xf32>
      %cst_27 = arith.constant dense<0.000000e+00> : vector<128xf32>
      %51 = vector.multi_reduction <add>, %50, %cst_27 [1] : vector<128x128xf32> to vector<128xf32>
      %52 = vector.shape_cast %51 : vector<128xf32> to vector<128x1xf32>
      %cst_28 = arith.constant 3.125000e-02 : f32
      %53 = vector.broadcast %cst_28 : f32 to vector<128x1xf32>
      %54 = arith.mulf %52, %53 : vector<128x1xf32>
      %cst_29 = arith.constant 1.000000e-01 : f32
      %55 = vector.broadcast %cst_29 : f32 to vector<128x1xf32>
      %56 = arith.addf %54, %55 : vector<128x1xf32>
      %57 = math.rsqrt %56 : vector<128x1xf32>
      %58 = vector.broadcast %57 : vector<128x1xf32> to vector<128x128xf32>
      %59 = arith.mulf %49, %58 : vector<128x128xf32>
      %60 = vector.broadcast %38 : vector<1x128xf32> to vector<128x128xf32>
      %61 = arith.mulf %59, %60 : vector<128x128xf32>
      %62 = vector.broadcast %39 : vector<1x128xf32> to vector<128x128xf32>
      %63 = arith.addf %61, %62 : vector<128x128xf32>
      %64 = arith.truncf %63 : vector<128x128xf32> to vector<128x128xbf16>
      %c0_30 = arith.constant 0 : index
      %c0_31 = arith.constant 0 : index
      %65 = vector.load %arg5[%c0_30, %c0_31] : memref<128x128xbf16, #tpu.memory_space<vmem>>, vector<128x128xbf16>
      %cst_32 = arith.constant dense<0.000000e+00> : vector<128x128xf32>
      %66 = tpu.matmul %64, %65, %cst_32 {dimension_numbers = #tpu.dot_dimension_numbers<[1], [0], [0], [1], [0, 0, 1, 1], [], []>} : vector<128x128xbf16>, vector<128x128xbf16>, vector<128x128xf32> -> vector<128x128xf32>
      %c1 = arith.constant 1 : index
      %c0_33 = arith.constant 0 : index
      %67 = vector.load %arg10[%c1, %c0_33] : memref<16x128xf32, #tpu.memory_space<vmem>>, vector<1x128xf32>
      %68 = vector.broadcast %67 : vector<1x128xf32> to vector<128x128xf32>
      %69 = arith.addf %66, %68 : vector<128x128xf32>
      %70 = arith.addf %69, %63 : vector<128x128xf32>
      %71 = arith.negf %70 : vector<128x128xf32>
      %72 = math.exp %71 : vector<128x128xf32>
      %cst_34 = arith.constant 1.000000e+00 : f32
      %73 = vector.broadcast %cst_34 : f32 to vector<128x128xf32>
      %74 = arith.addf %73, %72 : vector<128x128xf32>
      %75 = arith.divf %73, %74 : vector<128x128xf32>
      %76 = arith.mulf %70, %75 : vector<128x128xf32>
      %c6 = arith.constant 6 : index
      %c0_35 = arith.constant 0 : index
      %77 = vector.load %arg10[%c6, %c0_35] : memref<16x128xf32, #tpu.memory_space<vmem>>, vector<1x128xf32>
      %c11 = arith.constant 11 : index
      %c0_36 = arith.constant 0 : index
      %78 = vector.load %arg10[%c11, %c0_36] : memref<16x128xf32, #tpu.memory_space<vmem>>, vector<1x128xf32>
      %cst_37 = arith.constant dense<0.000000e+00> : vector<128xf32>
      %79 = vector.multi_reduction <add>, %76, %cst_37 [1] : vector<128x128xf32> to vector<128xf32>
      %80 = vector.shape_cast %79 : vector<128xf32> to vector<128x1xf32>
      %cst_38 = arith.constant 3.125000e-02 : f32
      %81 = vector.broadcast %cst_38 : f32 to vector<128x1xf32>
      %82 = arith.mulf %80, %81 : vector<128x1xf32>
      %83 = vector.broadcast %82 : vector<128x1xf32> to vector<128x128xf32>
      %84 = arith.subf %76, %83 : vector<128x128xf32>
      %cst_39 = arith.constant 0.000000e+00 : f32
      %85 = vector.shape_cast %21 : vector<1x128xi1> to vector<1x128xi1>
      %86 = vector.broadcast %85 : vector<1x128xi1> to vector<128x128xi1>
      %87 = vector.broadcast %cst_39 : f32 to vector<128x128xf32>
      %88 = arith.select %86, %84, %87 : vector<128x128xi1>, vector<128x128xf32>
      %89 = arith.mulf %88, %88 : vector<128x128xf32>
      %cst_40 = arith.constant dense<0.000000e+00> : vector<128xf32>
      %90 = vector.multi_reduction <add>, %89, %cst_40 [1] : vector<128x128xf32> to vector<128xf32>
      %91 = vector.shape_cast %90 : vector<128xf32> to vector<128x1xf32>
      %cst_41 = arith.constant 3.125000e-02 : f32
      %92 = vector.broadcast %cst_41 : f32 to vector<128x1xf32>
      %93 = arith.mulf %91, %92 : vector<128x1xf32>
      %cst_42 = arith.constant 1.000000e-01 : f32
      %94 = vector.broadcast %cst_42 : f32 to vector<128x1xf32>
      %95 = arith.addf %93, %94 : vector<128x1xf32>
      %96 = math.rsqrt %95 : vector<128x1xf32>
      %97 = vector.broadcast %96 : vector<128x1xf32> to vector<128x128xf32>
      %98 = arith.mulf %88, %97 : vector<128x128xf32>
      %99 = vector.broadcast %77 : vector<1x128xf32> to vector<128x128xf32>
      %100 = arith.mulf %98, %99 : vector<128x128xf32>
      %101 = vector.broadcast %78 : vector<1x128xf32> to vector<128x128xf32>
      %102 = arith.addf %100, %101 : vector<128x128xf32>
      %103 = arith.addf %63, %102 : vector<128x128xf32>
      %104 = arith.truncf %102 : vector<128x128xf32> to vector<128x128xbf16>
      %c0_43 = arith.constant 0 : index
      %c0_44 = arith.constant 0 : index
      %105 = vector.load %arg6[%c0_43, %c0_44] : memref<128x128xbf16, #tpu.memory_space<vmem>>, vector<128x128xbf16>
      %cst_45 = arith.constant dense<0.000000e+00> : vector<128x128xf32>
      %106 = tpu.matmul %104, %105, %cst_45 {dimension_numbers = #tpu.dot_dimension_numbers<[1], [0], [0], [1], [0, 0, 1, 1], [], []>} : vector<128x128xbf16>, vector<128x128xbf16>, vector<128x128xf32> -> vector<128x128xf32>
      %c2 = arith.constant 2 : index
      %c0_46 = arith.constant 0 : index
      %107 = vector.load %arg10[%c2, %c0_46] : memref<16x128xf32, #tpu.memory_space<vmem>>, vector<1x128xf32>
      %108 = vector.broadcast %107 : vector<1x128xf32> to vector<128x128xf32>
      %109 = arith.addf %106, %108 : vector<128x128xf32>
      %110 = arith.addf %109, %103 : vector<128x128xf32>
      %111 = arith.negf %110 : vector<128x128xf32>
      %112 = math.exp %111 : vector<128x128xf32>
      %cst_47 = arith.constant 1.000000e+00 : f32
      %113 = vector.broadcast %cst_47 : f32 to vector<128x128xf32>
      %114 = arith.addf %113, %112 : vector<128x128xf32>
      %115 = arith.divf %113, %114 : vector<128x128xf32>
      %116 = arith.mulf %110, %115 : vector<128x128xf32>
      %c7 = arith.constant 7 : index
      %c0_48 = arith.constant 0 : index
      %117 = vector.load %arg10[%c7, %c0_48] : memref<16x128xf32, #tpu.memory_space<vmem>>, vector<1x128xf32>
      %c12 = arith.constant 12 : index
      %c0_49 = arith.constant 0 : index
      %118 = vector.load %arg10[%c12, %c0_49] : memref<16x128xf32, #tpu.memory_space<vmem>>, vector<1x128xf32>
      %cst_50 = arith.constant dense<0.000000e+00> : vector<128xf32>
      %119 = vector.multi_reduction <add>, %116, %cst_50 [1] : vector<128x128xf32> to vector<128xf32>
      %120 = vector.shape_cast %119 : vector<128xf32> to vector<128x1xf32>
      %cst_51 = arith.constant 3.125000e-02 : f32
      %121 = vector.broadcast %cst_51 : f32 to vector<128x1xf32>
      %122 = arith.mulf %120, %121 : vector<128x1xf32>
      %123 = vector.broadcast %122 : vector<128x1xf32> to vector<128x128xf32>
      %124 = arith.subf %116, %123 : vector<128x128xf32>
      %cst_52 = arith.constant 0.000000e+00 : f32
      %125 = vector.shape_cast %21 : vector<1x128xi1> to vector<1x128xi1>
      %126 = vector.broadcast %125 : vector<1x128xi1> to vector<128x128xi1>
      %127 = vector.broadcast %cst_52 : f32 to vector<128x128xf32>
      %128 = arith.select %126, %124, %127 : vector<128x128xi1>, vector<128x128xf32>
      %129 = arith.mulf %128, %128 : vector<128x128xf32>
      %cst_53 = arith.constant dense<0.000000e+00> : vector<128xf32>
      %130 = vector.multi_reduction <add>, %129, %cst_53 [1] : vector<128x128xf32> to vector<128xf32>
      %131 = vector.shape_cast %130 : vector<128xf32> to vector<128x1xf32>
      %cst_54 = arith.constant 3.125000e-02 : f32
      %132 = vector.broadcast %cst_54 : f32 to vector<128x1xf32>
      %133 = arith.mulf %131, %132 : vector<128x1xf32>
      %cst_55 = arith.constant 1.000000e-01 : f32
      %134 = vector.broadcast %cst_55 : f32 to vector<128x1xf32>
      %135 = arith.addf %133, %134 : vector<128x1xf32>
      %136 = math.rsqrt %135 : vector<128x1xf32>
      %137 = vector.broadcast %136 : vector<128x1xf32> to vector<128x128xf32>
      %138 = arith.mulf %128, %137 : vector<128x128xf32>
      %139 = vector.broadcast %117 : vector<1x128xf32> to vector<128x128xf32>
      %140 = arith.mulf %138, %139 : vector<128x128xf32>
      %141 = vector.broadcast %118 : vector<1x128xf32> to vector<128x128xf32>
      %142 = arith.addf %140, %141 : vector<128x128xf32>
      %143 = arith.addf %103, %142 : vector<128x128xf32>
      %144 = arith.truncf %142 : vector<128x128xf32> to vector<128x128xbf16>
      %c0_56 = arith.constant 0 : index
      %c0_57 = arith.constant 0 : index
      %145 = vector.load %arg7[%c0_56, %c0_57] : memref<128x128xbf16, #tpu.memory_space<vmem>>, vector<128x128xbf16>
      %cst_58 = arith.constant dense<0.000000e+00> : vector<128x128xf32>
      %146 = tpu.matmul %144, %145, %cst_58 {dimension_numbers = #tpu.dot_dimension_numbers<[1], [0], [0], [1], [0, 0, 1, 1], [], []>} : vector<128x128xbf16>, vector<128x128xbf16>, vector<128x128xf32> -> vector<128x128xf32>
      %c3 = arith.constant 3 : index
      %c0_59 = arith.constant 0 : index
      %147 = vector.load %arg10[%c3, %c0_59] : memref<16x128xf32, #tpu.memory_space<vmem>>, vector<1x128xf32>
      %148 = vector.broadcast %147 : vector<1x128xf32> to vector<128x128xf32>
      %149 = arith.addf %146, %148 : vector<128x128xf32>
      %150 = arith.addf %149, %143 : vector<128x128xf32>
      %151 = arith.negf %150 : vector<128x128xf32>
      %152 = math.exp %151 : vector<128x128xf32>
      %cst_60 = arith.constant 1.000000e+00 : f32
      %153 = vector.broadcast %cst_60 : f32 to vector<128x128xf32>
      %154 = arith.addf %153, %152 : vector<128x128xf32>
      %155 = arith.divf %153, %154 : vector<128x128xf32>
      %156 = arith.mulf %150, %155 : vector<128x128xf32>
      %c8 = arith.constant 8 : index
      %c0_61 = arith.constant 0 : index
      %157 = vector.load %arg10[%c8, %c0_61] : memref<16x128xf32, #tpu.memory_space<vmem>>, vector<1x128xf32>
      %c13 = arith.constant 13 : index
      %c0_62 = arith.constant 0 : index
      %158 = vector.load %arg10[%c13, %c0_62] : memref<16x128xf32, #tpu.memory_space<vmem>>, vector<1x128xf32>
      %cst_63 = arith.constant dense<0.000000e+00> : vector<128xf32>
      %159 = vector.multi_reduction <add>, %156, %cst_63 [1] : vector<128x128xf32> to vector<128xf32>
      %160 = vector.shape_cast %159 : vector<128xf32> to vector<128x1xf32>
      %cst_64 = arith.constant 3.125000e-02 : f32
      %161 = vector.broadcast %cst_64 : f32 to vector<128x1xf32>
      %162 = arith.mulf %160, %161 : vector<128x1xf32>
      %163 = vector.broadcast %162 : vector<128x1xf32> to vector<128x128xf32>
      %164 = arith.subf %156, %163 : vector<128x128xf32>
      %cst_65 = arith.constant 0.000000e+00 : f32
      %165 = vector.shape_cast %21 : vector<1x128xi1> to vector<1x128xi1>
      %166 = vector.broadcast %165 : vector<1x128xi1> to vector<128x128xi1>
      %167 = vector.broadcast %cst_65 : f32 to vector<128x128xf32>
      %168 = arith.select %166, %164, %167 : vector<128x128xi1>, vector<128x128xf32>
      %169 = arith.mulf %168, %168 : vector<128x128xf32>
      %cst_66 = arith.constant dense<0.000000e+00> : vector<128xf32>
      %170 = vector.multi_reduction <add>, %169, %cst_66 [1] : vector<128x128xf32> to vector<128xf32>
      %171 = vector.shape_cast %170 : vector<128xf32> to vector<128x1xf32>
      %cst_67 = arith.constant 3.125000e-02 : f32
      %172 = vector.broadcast %cst_67 : f32 to vector<128x1xf32>
      %173 = arith.mulf %171, %172 : vector<128x1xf32>
      %cst_68 = arith.constant 1.000000e-01 : f32
      %174 = vector.broadcast %cst_68 : f32 to vector<128x1xf32>
      %175 = arith.addf %173, %174 : vector<128x1xf32>
      %176 = math.rsqrt %175 : vector<128x1xf32>
      %177 = vector.broadcast %176 : vector<128x1xf32> to vector<128x128xf32>
      %178 = arith.mulf %168, %177 : vector<128x128xf32>
      %179 = vector.broadcast %157 : vector<1x128xf32> to vector<128x128xf32>
      %180 = arith.mulf %178, %179 : vector<128x128xf32>
      %181 = vector.broadcast %158 : vector<1x128xf32> to vector<128x128xf32>
      %182 = arith.addf %180, %181 : vector<128x128xf32>
      %183 = arith.addf %143, %182 : vector<128x128xf32>
      %184 = arith.truncf %182 : vector<128x128xf32> to vector<128x128xbf16>
      %c0_69 = arith.constant 0 : index
      %c0_70 = arith.constant 0 : index
      %185 = vector.load %arg8[%c0_69, %c0_70] : memref<128x128xbf16, #tpu.memory_space<vmem>>, vector<128x128xbf16>
      %cst_71 = arith.constant dense<0.000000e+00> : vector<128x128xf32>
      %186 = tpu.matmul %184, %185, %cst_71 {dimension_numbers = #tpu.dot_dimension_numbers<[1], [0], [0], [1], [0, 0, 1, 1], [], []>} : vector<128x128xbf16>, vector<128x128xbf16>, vector<128x128xf32> -> vector<128x128xf32>
      %c4 = arith.constant 4 : index
      %c0_72 = arith.constant 0 : index
      %187 = vector.load %arg10[%c4, %c0_72] : memref<16x128xf32, #tpu.memory_space<vmem>>, vector<1x128xf32>
      %188 = vector.broadcast %187 : vector<1x128xf32> to vector<128x128xf32>
      %189 = arith.addf %186, %188 : vector<128x128xf32>
      %190 = arith.addf %189, %183 : vector<128x128xf32>
      %191 = arith.negf %190 : vector<128x128xf32>
      %192 = math.exp %191 : vector<128x128xf32>
      %cst_73 = arith.constant 1.000000e+00 : f32
      %193 = vector.broadcast %cst_73 : f32 to vector<128x128xf32>
      %194 = arith.addf %193, %192 : vector<128x128xf32>
      %195 = arith.divf %193, %194 : vector<128x128xf32>
      %196 = arith.mulf %190, %195 : vector<128x128xf32>
      %c9 = arith.constant 9 : index
      %c0_74 = arith.constant 0 : index
      %197 = vector.load %arg10[%c9, %c0_74] : memref<16x128xf32, #tpu.memory_space<vmem>>, vector<1x128xf32>
      %c14 = arith.constant 14 : index
      %c0_75 = arith.constant 0 : index
      %198 = vector.load %arg10[%c14, %c0_75] : memref<16x128xf32, #tpu.memory_space<vmem>>, vector<1x128xf32>
      %cst_76 = arith.constant dense<0.000000e+00> : vector<128xf32>
      %199 = vector.multi_reduction <add>, %196, %cst_76 [1] : vector<128x128xf32> to vector<128xf32>
      %200 = vector.shape_cast %199 : vector<128xf32> to vector<128x1xf32>
      %cst_77 = arith.constant 3.125000e-02 : f32
      %201 = vector.broadcast %cst_77 : f32 to vector<128x1xf32>
      %202 = arith.mulf %200, %201 : vector<128x1xf32>
      %203 = vector.broadcast %202 : vector<128x1xf32> to vector<128x128xf32>
      %204 = arith.subf %196, %203 : vector<128x128xf32>
      %cst_78 = arith.constant 0.000000e+00 : f32
      %205 = vector.shape_cast %21 : vector<1x128xi1> to vector<1x128xi1>
      %206 = vector.broadcast %205 : vector<1x128xi1> to vector<128x128xi1>
      %207 = vector.broadcast %cst_78 : f32 to vector<128x128xf32>
      %208 = arith.select %206, %204, %207 : vector<128x128xi1>, vector<128x128xf32>
      %209 = arith.mulf %208, %208 : vector<128x128xf32>
      %cst_79 = arith.constant dense<0.000000e+00> : vector<128xf32>
      %210 = vector.multi_reduction <add>, %209, %cst_79 [1] : vector<128x128xf32> to vector<128xf32>
      %211 = vector.shape_cast %210 : vector<128xf32> to vector<128x1xf32>
      %cst_80 = arith.constant 3.125000e-02 : f32
      %212 = vector.broadcast %cst_80 : f32 to vector<128x1xf32>
      %213 = arith.mulf %211, %212 : vector<128x1xf32>
      %cst_81 = arith.constant 1.000000e-01 : f32
      %214 = vector.broadcast %cst_81 : f32 to vector<128x1xf32>
      %215 = arith.addf %213, %214 : vector<128x1xf32>
      %216 = math.rsqrt %215 : vector<128x1xf32>
      %217 = vector.broadcast %216 : vector<128x1xf32> to vector<128x128xf32>
      %218 = arith.mulf %208, %217 : vector<128x128xf32>
      %219 = vector.broadcast %197 : vector<1x128xf32> to vector<128x128xf32>
      %220 = arith.mulf %218, %219 : vector<128x128xf32>
      %221 = vector.broadcast %198 : vector<1x128xf32> to vector<128x128xf32>
      %222 = arith.addf %220, %221 : vector<128x128xf32>
      %223 = arith.truncf %222 : vector<128x128xf32> to vector<128x128xbf16>
      %c0_82 = arith.constant 0 : index
      %c0_83 = arith.constant 0 : index
      %224 = vector.load %arg9[%c0_82, %c0_83] : memref<128x256xbf16, #tpu.memory_space<vmem>>, vector<128x256xbf16>
      %cst_84 = arith.constant dense<0.000000e+00> : vector<128x256xf32>
      %225 = tpu.matmul %223, %224, %cst_84 {dimension_numbers = #tpu.dot_dimension_numbers<[1], [0], [0], [1], [0, 0, 1, 1], [], []>} : vector<128x128xbf16>, vector<128x256xbf16>, vector<128x256xf32> -> vector<128x256xf32>
      %c0_85 = arith.constant 0 : index
      %c0_86 = arith.constant 0 : index
      %226 = vector.load %arg11[%c0_85, %c0_86] : memref<1x256xf32, #tpu.memory_space<vmem>>, vector<1x256xf32>
      %227 = vector.broadcast %226 : vector<1x256xf32> to vector<128x256xf32>
      %228 = arith.addf %225, %227 : vector<128x256xf32>
      %229 = vector.extract_strided_slice %228 {offsets = [0, 0], sizes = [128, 128], strides = [1, 1]} : vector<128x256xf32> to vector<128x128xf32>
      %230 = vector.extract_strided_slice %228 {offsets = [0, 128], sizes = [128, 128], strides = [1, 1]} : vector<128x256xf32> to vector<128x128xf32>
      %c0_87 = arith.constant 0 : index
      %c0_88 = arith.constant 0 : index
      %231 = vector.load %arg3[%c0_87, %c0_88] : memref<128x128xf32, #tpu.memory_space<vmem>>, vector<128x128xf32>
      %232 = arith.mulf %231, %231 : vector<128x128xf32>
      %cst_89 = arith.constant 1.000000e+00 : f32
      %233 = vector.broadcast %cst_89 : f32 to vector<128x128xf32>
      %234 = arith.mulf %232, %233 : vector<128x128xf32>
      %cst_90 = arith.constant 1.83787704 : f32
      %235 = vector.broadcast %cst_90 : f32 to vector<128x128xf32>
      %236 = arith.addf %235, %234 : vector<128x128xf32>
      %cst_91 = arith.constant -5.000000e-01 : f32
      %237 = vector.broadcast %cst_91 : f32 to vector<128x128xf32>
      %238 = arith.mulf %237, %236 : vector<128x128xf32>
      %cst_92 = arith.constant -1.897120e+00 : f32
      %239 = vector.broadcast %cst_92 : f32 to vector<128x128xf32>
      %240 = arith.addf %238, %239 : vector<128x128xf32>
      %241 = arith.subf %231, %229 : vector<128x128xf32>
      %cst_93 = arith.constant 1.83787704 : f32
      %242 = vector.broadcast %cst_93 : f32 to vector<128x128xf32>
      %243 = arith.addf %230, %242 : vector<128x128xf32>
      %244 = arith.mulf %241, %241 : vector<128x128xf32>
      %cst_94 = arith.constant 0.000000e+00 : f32
      %245 = vector.broadcast %cst_94 : f32 to vector<128x128xf32>
      %246 = arith.subf %245, %230 : vector<128x128xf32>
      %247 = math.exp %246 : vector<128x128xf32>
      %248 = arith.mulf %244, %247 : vector<128x128xf32>
      %249 = arith.addf %243, %248 : vector<128x128xf32>
      %cst_95 = arith.constant -5.000000e-01 : f32
      %250 = vector.broadcast %cst_95 : f32 to vector<128x128xf32>
      %251 = arith.mulf %250, %249 : vector<128x128xf32>
      %cst_96 = arith.constant -0.287682086 : f32
      %252 = vector.broadcast %cst_96 : f32 to vector<128x128xf32>
      %253 = arith.addf %251, %252 : vector<128x128xf32>
      %cst_97 = arith.constant 4.5399931E-5 : f32
      %254 = vector.broadcast %cst_97 : f32 to vector<128x128xf32>
      %255 = arith.mulf %232, %254 : vector<128x128xf32>
      %cst_98 = arith.constant 11.8378773 : f32
      %256 = vector.broadcast %cst_98 : f32 to vector<128x128xf32>
      %257 = arith.addf %256, %255 : vector<128x128xf32>
      %cst_99 = arith.constant -5.000000e-01 : f32
      %258 = vector.broadcast %cst_99 : f32 to vector<128x128xf32>
      %259 = arith.mulf %258, %257 : vector<128x128xf32>
      %cst_100 = arith.constant -2.30258512 : f32
      %260 = vector.broadcast %cst_100 : f32 to vector<128x128xf32>
      %261 = arith.addf %259, %260 : vector<128x128xf32>
      %262 = arith.maximumf %240, %253 : vector<128x128xf32>
      %263 = arith.maximumf %262, %261 : vector<128x128xf32>
      %264 = arith.subf %240, %263 : vector<128x128xf32>
      %265 = math.exp %264 : vector<128x128xf32>
      %266 = arith.subf %253, %263 : vector<128x128xf32>
      %267 = math.exp %266 : vector<128x128xf32>
      %268 = arith.addf %265, %267 : vector<128x128xf32>
      %269 = arith.subf %261, %263 : vector<128x128xf32>
      %270 = math.exp %269 : vector<128x128xf32>
      %271 = arith.addf %268, %270 : vector<128x128xf32>
      %272 = math.log %271 : vector<128x128xf32>
      %273 = arith.addf %263, %272 : vector<128x128xf32>
      %c0_101 = arith.constant 0 : index
      %c0_102 = arith.constant 0 : index
      %274 = vector.load %arg12[%c0_101, %c0_102] : memref<128x128xf32, #tpu.memory_space<vmem>>, vector<128x128xf32>
      tpu.vector_store %arg12[%c0_101, %c0_102], %273 {strides = array<i32>} : memref<128x128xf32, #tpu.memory_space<vmem>>, vector<128x128xf32>,
    } else {
    }
    return
  }
  func.func @transform_0(%arg0: i32, %arg1: i32) -> (i32, i32) {
    %c0_i32 = arith.constant 0 : i32
    return %arg0, %arg1 : i32, i32
  }
  func.func @transform_1(%arg0: i32, %arg1: i32) -> (i32, i32) {
    %c0_i32 = arith.constant 0 : i32
    %c0_i32_0 = arith.constant 0 : i32
    return %arg0, %c0_i32 : i32, i32
  }
  func.func @transform_2(%arg0: i32, %arg1: i32) -> (i32, i32) {
    %c0_i32 = arith.constant 0 : i32
    %c0_i32_0 = arith.constant 0 : i32
    return %arg1, %c0_i32 : i32, i32
  }
  func.func @transform_3(%arg0: i32, %arg1: i32) -> (i32, i32) {
    %c0_i32 = arith.constant 0 : i32
    %c0_i32_0 = arith.constant 0 : i32
    %c0_i32_1 = arith.constant 0 : i32
    return %c0_i32, %c0_i32_0 : i32, i32
  }
  func.func @transform_4(%arg0: i32, %arg1: i32) -> (i32, i32) {
    %c0_i32 = arith.constant 0 : i32
    %c0_i32_0 = arith.constant 0 : i32
    %c0_i32_1 = arith.constant 0 : i32
    return %c0_i32, %c0_i32_0 : i32, i32
  }
  func.func @transform_5(%arg0: i32, %arg1: i32) -> (i32, i32) {
    %c0_i32 = arith.constant 0 : i32
    %c0_i32_0 = arith.constant 0 : i32
    %c0_i32_1 = arith.constant 0 : i32
    return %c0_i32, %c0_i32_0 : i32, i32
  }
  func.func @transform_6(%arg0: i32, %arg1: i32) -> (i32, i32) {
    %c0_i32 = arith.constant 0 : i32
    %c0_i32_0 = arith.constant 0 : i32
    %c0_i32_1 = arith.constant 0 : i32
    return %c0_i32, %c0_i32_0 : i32, i32
  }
  func.func @transform_7(%arg0: i32, %arg1: i32) -> (i32, i32) {
    %c0_i32 = arith.constant 0 : i32
    %c0_i32_0 = arith.constant 0 : i32
    %c0_i32_1 = arith.constant 0 : i32
    return %c0_i32, %c0_i32_0 : i32, i32
  }
  func.func @transform_8(%arg0: i32, %arg1: i32) -> (i32, i32) {
    %c0_i32 = arith.constant 0 : i32
    %c0_i32_0 = arith.constant 0 : i32
    %c0_i32_1 = arith.constant 0 : i32
    return %c0_i32, %c0_i32_0 : i32, i32
  }
  func.func @transform_9(%arg0: i32, %arg1: i32) -> (i32, i32) {
    %c0_i32 = arith.constant 0 : i32
    %c0_i32_0 = arith.constant 0 : i32
    %c0_i32_1 = arith.constant 0 : i32
    return %c0_i32, %c0_i32_0 : i32, i32
  }
  func.func @transform_10(%arg0: i32, %arg1: i32) -> (i32, i32) {
    %c0_i32 = arith.constant 0 : i32
    %c0_i32_0 = arith.constant 0 : i32
    return %arg0, %c0_i32 : i32, i32
  }
}

</mosaic_0001>

<bundles_post_ra>
// kernel: tpu_custom_call.1
= control target key start
LH: loop header
LB: loop body
LE: loop exit
PB: predicated region body
PF: predicated region fallthrough
CT: control target
= control target key end

     0   :  { %s11333_s0 = inlined_call_operand.hbm [shape: bf16[128,384], index: 0, kind: input, shape index: {}]   ;;  %s11334_s1 = inlined_call_operand.hbm [shape: f32[128,128], index: 1, kind: input, shape index: {}]   ;;  %s11335_s2 = inlined_call_operand.hbm [shape: bf16[384,128], index: 2, kind: input, shape index: {}]   ;;  %s11336_s3 = inlined_call_operand.hbm [shape: bf16[128,128], index: 3, kind: input, shape index: {}]   ;;  %s11337_s4 = inlined_call_operand.hbm [shape: bf16[128,128], index: 4, kind: input, shape index: {}]   ;;  %s11338_s5 = inlined_call_operand.hbm [shape: bf16[128,128], index: 5, kind: input, shape index: {}]   ;;  %s11339_s6 = inlined_call_operand.hbm [shape: bf16[128,128], index: 6, kind: input, shape index: {}]   ;;  %s11340_s7 = inlined_call_operand.hbm [shape: bf16[128,256], index: 7, kind: input, shape index: {}]   ;;  %s11341_s8 = inlined_call_operand.hbm [shape: f32[16,128], index: 8, kind: input, shape index: {}]   ;;  %s11342_s9 = inlined_call_operand.vmem [shape: f32[1,256], index: 9, kind: input, shape index: {}]   ;;  %s11343_s10 = inlined_call_operand.hbm [shape: f32[128,128], index: 10, kind: output, shape index: {}]  }
   0x1   :  { %11355 = sst [smem:[#allocation32_spill]] %s11333_s0 }
   0x2   :  { %11356 = sst [smem:[#allocation33_spill]] %s11334_s1 }
   0x3   :  { %11357 = sst [smem:[#allocation34_spill]] %s11336_s3 }
   0x4   :  { %11358 = sst [smem:[#allocation35_spill]] %s11337_s4 }
   0x5   :  { %11359 = sst [smem:[#allocation36_spill]] %s11338_s5 }
   0x6   :  { %11360 = sst [smem:[#allocation37_spill]] %s11339_s6 }
   0x7   :  { %15 = vsyncpa [#allocation5], 0 }
   0x8   :  { %17 = vsyncpa [#allocation5 + $0x1], 0 }
   0x9   :  { %18 = vsyncpa [#allocation8], 0 }
   0xa   :  { %19 = vsyncpa [#allocation12], 0 }
   0xb   :  { %20 = vsyncpa [#allocation15], 0 }
   0xc   :  { %21 = vsyncpa [#allocation18], 0 }
   0xd   :  { %22 = vsyncpa [#allocation6], 0  ;;  %s8038_s13 = smov 0   ;;  %s8040_s14 = smov 0  }
   0xe   :  { %s8042_s15 = smov 0   ;;  %s8044_s16 = smov 0  }
   0xf   :  { %s8046_s17 = smov 0   ;;  %s8048_s18 = smov 0  }
  0x10 LB: > { %11361 = sst [smem:[#allocation28_spill]] %s7952_s15  ;;  %s8069_s19 = sadd.s32 4294967295, %s7964_s18   ;;  %s7964_s18 = sphi %s8048_s18, %s28_s18   ;;  %s7960_s17 = sphi %s8046_s17, %s11473_s17   ;;  %s7956_s16 = sphi %s8044_s16, %s11472_s16   ;;  %s7952_s15 = sphi %s8042_s15, %s11468_s15   ;;  %s7948_s14 = sphi %s8040_s14, %s11471_s14   ;;  %s7944_s13 = sphi %s8038_s13, %s11470_s13  }
  0x11   : > { %11362 = sst [smem:[#allocation29_spill]] %s7964_s18  ;;  %p6277_p0 = scmp.ge.s32.totalorder %s7964_s18, 1 }
  0x12   : > { %p63_p1 = scmp.eq.s32.totalorder %s8069_s19, 0  ;;  %p298_p2 = scmp.lt.s32.totalorder %s7964_s18, 4 }
  0x13   : > { %s11363_s1 = sld [smem:[#allocation33_spill]]  ;;  %s7966_s24 = smov [#allocation7]  }
  0x14   : > { %p8077_p3 = pnand %p6277_p0, %p298_p2  ;;  %s314_s25 = sshll.u32 %s7966_s24, 4  ;;  %s315_s25 = int_to_ptr.vmem [resolvable:$true] %s314_s25 }
  0x15   : > { %s11366_s4 = sld [smem:[#allocation35_spill]]  ;;  %s11344_s30 = smov 128  }
  0x16   : > { %p6784_p4 = pneg %p8077_p3  ;;  %s11346_s11 = smov 8  }
  0x17   : > { %s7969_s12 = smov [#allocation11]   ;;  %s11367_s6 = sld [smem:[#allocation37_spill]] }
  0x18   : > { %p8085_p5 = pnand %p6784_p4, %p63_p1  ;;  %s342_s20 = sshll.u32 %s7969_s12, 4  ;;  %s343_s20 = int_to_ptr.vmem [resolvable:$true] %s342_s20 }
  0x19   : > { %s312_s22 = sshll.u32 %s11363_s1, 4  ;;  %s11348_s28 = smov 64   ;;  %s313_s22 = int_to_ptr.hbm [resolvable:$true] %s312_s22 }
  0x1a   : > { %6787 = dma.hbm_to_vmem [thread:$0]  (!%p8085_p5), %s313_s22, 2048, %s315_s25, [#allocation8], %s11344_s30, %s11344_s30, %s11346_s11  }
  0x1b   : > { %s340_s29 = sshll.u32 %s11366_s4, 4  ;;  %s11350_s1 = smov 4   ;;  %s341_s29 = int_to_ptr.hbm [resolvable:$true] %s340_s29 }
  0x1c   : > { %6793 = dma.hbm_to_vmem [thread:$0]  (!%p8085_p5), %s341_s29, 1024, %s343_s20, [#allocation12], %s11348_s28, %s11348_s28, %s11350_s1  }
  0x1d   : > { %s368_s27 = sshll.u32 %s11367_s6, 4  ;;  %s7972_s22 = smov [#allocation14]   ;;  %s369_s27 = int_to_ptr.hbm [resolvable:$true] %s368_s27 }
  0x1e   : > { %s370_s25 = sshll.u32 %s7972_s22, 4  ;;  %s37_s12 = sadd.s32 1, %s7960_s17  ;;  %s371_s25 = int_to_ptr.vmem [resolvable:$true] %s370_s25 }
  0x1f   : > { %6799 = dma.hbm_to_vmem [thread:$0]  (!%p8085_p5), %s369_s27, 1024, %s371_s25, [#allocation15], %s11348_s28, %s11348_s28, %s11350_s1  }
  0x20   : > { %p38_p6 = scmp.ge.s32.totalorder %s37_s12, 3  ;;  %s49_s21 = sadd.s32 1, %s7952_s15 }
  0x21   : > { %p56_p7 = scmp.ne.s32.totalorder %s7952_s15, %s7948_s14  ;;  %p57_p8 = scmp.eq.s32.totalorder %s7964_s18, 0 }
  0x22   : > { %s11475_s12 = smov (%p38_p6, %s37_s12), 0  ;;  %p62_p10 = scmp.ne.s32.totalorder %s7948_s14, %s7944_s13 }
  0x23   : > { %11368 = sst [smem:[#allocation30_spill]] %s11475_s12  ;;  %p8117_p9 = por %p57_p8, %p56_p7 }
  0x24   : > { %s45_s20 = ssub.s32 %s7960_s17, %s11475_s12  ;;  %p6820_p11 = scmp.lt.s32.totalorder %s7964_s18, 3 }
  0x25   : > { %p47_p12 = scmp.eq.s32.totalorder %s45_s20, 0  ;;  %p8128_p13 = por %p63_p1, %p62_p10 }
  0x26   : > { %s415_s27 = sand.u32 1, %s7964_s18   ;;  %s417_s22 = sand.u32 1, %s7952_s15  }
  0x27   : > { %s8135_s25 = scalar_select %p47_p12, %s7952_s15, %s49_s21  }
  0x28   : > { %s8137_s30 = sshll.u32 %s417_s22, 6  ;;  %s6287_s11 = sshll.u32 %s7960_s17, 2 }
  0x29   : > { %11371 = sst [smem:[#allocation31_spill]] %s8135_s25  ;;  %s419_s4 = scalar_lea.vmem [#allocation4], %s8137_s30 }
  0x2a   : > { %s11372_s0 = sld [smem:[#allocation32_spill]]  ;;  %s429_s20 = sshll.u32 %s419_s4, 4  ;;  %s430_s20 = int_to_ptr.vmem [resolvable:$true] %s429_s20 }
  0x2b   : > { %p8148_p0 = pnand %p6820_p11, %p8117_p9  ;;  %s11374_s3 = sld [smem:[#allocation34_spill]] }
  0x2c   : > { %s7973_s4 = smov 192   ;;  %s11376_s28 = smov 64  }
  0x2d   : > { %s11377_s5 = sld [smem:[#allocation36_spill]]  ;;  %s7974_s15 = smov [#allocation10]  }
  0x2e   : > { %s328_s18 = sshll.u32 %s7974_s15, 4  ;;  %s11378_s13 = smov 8   ;;  %s329_s18 = int_to_ptr.vmem [resolvable:$true] %s328_s18 }
  0x2f   : > { %s7977_s22 = smov [#allocation17]   ;;  %s465_s26 = sand.u32 (!%p8077_p3), 1, %s8069_s19  }
  0x30   : > { %s426_s1 = scalar_lea.hbm %s11372_s0, %s6287_s11  ;;  %s8155_s11 = scalar_lea.sflag [#allocation5], %s415_s27 }
  0x31   : > { %s427_s6 = sshll.u32 %s426_s1, 4  ;;  %s326_s25 = sshll.u32 %s11374_s3, 4  ;;  %s428_s6 = int_to_ptr.hbm [resolvable:$true] %s427_s6  ;;  %s327_s25 = int_to_ptr.hbm [resolvable:$true] %s326_s25 }
  0x32   : > { %s11375_s1 = smov 4   ;;  %s7975_s27 = smov [#allocation13]  }
  0x33   : > { %6809 = dma.hbm_to_vmem [thread:$0]  (!%p8148_p0), %s428_s6, 1024, %s430_s20, %s8155_s11, %s7973_s4, %s11376_s28, %s11375_s1  }
  0x34   : > { %s354_s0 = sshll.u32 %s11377_s5, 4  ;;  %s356_s21 = sshll.u32 %s7975_s27, 4  ;;  %s355_s0 = int_to_ptr.hbm [resolvable:$true] %s354_s0  ;;  %s357_s21 = int_to_ptr.vmem [resolvable:$true] %s356_s21 }
  0x35   : > { %6790 = dma.hbm_to_vmem [thread:$0]  (!%p8085_p5), %s327_s25, 1024, %s329_s18, [#allocation8], %s11376_s28, %s11376_s28, %s11375_s1  }
  0x36   : > { %s382_s20 = sshll.u32 %s11340_s7, 4  ;;  %s396_s18 = sshll.u32 %s11341_s8, 4  ;;  %s383_s20 = int_to_ptr.hbm [resolvable:$true] %s382_s20  ;;  %s397_s18 = int_to_ptr.hbm [resolvable:$true] %s396_s18 }
  0x37   : > { %6796 = dma.hbm_to_vmem [thread:$0]  (!%p8085_p5), %s355_s0, 1024, %s357_s21, [#allocation12], %s11376_s28, %s11376_s28, %s11375_s1  }
  0x38   : > { %s7976_s25 = smov [#allocation16]   ;;  %s11379_s27 = smov 128  }
  0x39   : > { %s384_s29 = sshll.u32 %s7976_s25, 4  ;;  %s398_s6 = sshll.u32 %s7977_s22, 4  ;;  %s385_s29 = int_to_ptr.vmem [resolvable:$true] %s384_s29  ;;  %s399_s6 = int_to_ptr.vmem [resolvable:$true] %s398_s6 }
  0x3a   : > { %6802 = dma.hbm_to_vmem [thread:$0]  (!%p8085_p5), %s383_s20, 2048, %s385_s29, [#allocation15], %s11379_s27, %s11379_s27, %s11378_s13  }
  0x3b   : > { %s6643_s3 = sshll.u32 %s7960_s17, 6  ;;  %s443_s4 = scalar_lea.vmem [#allocation9], %s8137_s30 }
  0x3c   : > { %6805 = dma.hbm_to_vmem [thread:$0]  (!%p8085_p5), %s397_s18, 256, %s399_s6, [#allocation18], %s11379_s27, %s11379_s27, %s11378_s13  }
  0x3d   : > { %s448_s15 = scalar_lea.hbm %s11335_s2, %s6643_s3  ;;  %s451_s25 = sshll.u32 %s443_s4, 4  ;;  %s452_s25 = int_to_ptr.vmem [resolvable:$true] %s451_s25 }
  0x3e   : > { %s449_s5 = sshll.u32 %s448_s15, 4  ;;  %463 = sbr.rel (%p8077_p3) target bundleno = 2995 (0xbb3), region = 60  ;;  %s450_s5 = int_to_ptr.hbm [resolvable:$true] %s449_s5 }
  0x3f   : > { %6812 = dma.hbm_to_vmem [thread:$0]  (!%p8148_p0), %s450_s5, 1024, %s452_s25, %s8155_s11, %s11376_s28, %s11376_s28, %s11375_s1  }
  0x40   : > { %s467_s20 = sand.u32 (!%p8077_p3), 1, %s7948_s14   ;;  %s466_s3 = scalar_lea.sflag (!%p8077_p3), [#allocation5], %s465_s26 }
  0x41   : > { %s6292_s18 = sshll.u32 (!%p8077_p3), %s467_s20, 6 }
  0x42   : > { %s8206_s30 = scalar_lea.vmem (!%p8077_p3), [#allocation4], %s6292_s18 }
  0x43   : > { %7911 = dma.done.wait (%p8128_p13), %s466_s3, 1024  }
  0x44   : > { %7913 = vsyncadd (%p8128_p13), %s466_s3, 4294966272 }
  0x45   : > { %7915 = dma.done.wait (%p63_p1), [#allocation8], 2048  }
  0x46   : > { %7917 = vsyncadd (%p63_p1), [#allocation8], 4294965248  ;;  %s8216_s5 = scalar_lea.vmem [#allocation9], %s6292_s18 }
  0x47   : > { %7919 = dma.done.wait (%p8128_p13), %s466_s3, 1024  }
  0x48   : > { %7921 = vsyncadd (%p8128_p13), %s466_s3, 4294966272 }
  0x49   : > { %7923 = dma.done.wait (%p63_p1), [#allocation8], 1024  }
  0x4a   : > { %7925 = vsyncadd (%p63_p1), [#allocation8], 4294966272 }
  0x4b   : > { %7927 = dma.done.wait (%p63_p1), [#allocation12], 2048  }
  0x4c   : > { %7929 = vsyncadd (%p63_p1), [#allocation12], 4294965248 }
  0x4d   : > { %7931 = dma.done.wait (%p63_p1), [#allocation15], 3072  }
  0x4e   : > { %7933 = vsyncadd (%p63_p1), [#allocation15], 4294964224 }
  0x4f   : > { %7935 = dma.done.wait (%p63_p1), [#allocation18], 256  }
  0x50   : > { %7937 = vsyncadd (%p63_p1), [#allocation18], 4294967040  ;;  %p6301_p2 = scmp.ne.s32.totalorder %s7956_s16, 0 }
  0x52   : > { %559 = sbr.rel (%p6301_p2) target bundleno = 120 (0x78), region = 100 }
  0x57   : > { %v7978_v0 = vmov 0.0   ;;  %vm576_vm0 = vcmask 7168  }
  0x58   : > { %560 = vst [vmem:[#allocation2 + $0x30] sm:$0xff] %v7978_v0 }
  0x59   : > { %561 = vst [vmem:[#allocation2] sm:$0xff] %v7978_v0 }
  0x5a   : > { %562 = vst [vmem:[#allocation2 + $0x58] sm:$0xff] %v7978_v0 }
  0x5b   : > { %563 = vst [vmem:[#allocation2 + $0x18] sm:$0xff] %v7978_v0 }
  0x5c   : > { %564 = vst [vmem:[#allocation2 + $0x50] sm:$0xff] %v7978_v0 }
  0x5d   : > { %565 = vst [vmem:[#allocation2 + $0x68] sm:$0xff] %v7978_v0 }
  0x5e   : > { %566 = vst [vmem:[#allocation2 + $0x8] sm:$0xff] %v7978_v0 }
  0x5f   : > { %567 = vst [vmem:[#allocation2 + $0x48] sm:$0xff] %v7978_v0 }
  0x60   : > { %568 = vst [vmem:[#allocation2 + $0x40] sm:$0xff] %v7978_v0 }
  0x61   : > { %569 = vst [vmem:[#allocation2 + $0x20] sm:$0xff] %v7978_v0 }
  0x62   : > { %570 = vst [vmem:[#allocation2 + $0x10] sm:$0xff] %v7978_v0 }
  0x63   : > { %571 = vst [vmem:[#allocation2 + $0x38] sm:$0xff] %v7978_v0 }
  0x64   : > { %572 = vst [vmem:[#allocation2 + $0x60] sm:$0xff] %v7978_v0 }
  0x65   : > { %573 = vst [vmem:[#allocation2 + $0x70] sm:$0xff] %v7978_v0 }
  0x66   : > { %574 = vst [vmem:[#allocation2 + $0x78] sm:$0xff] %v7978_v0 }
  0x67   : > { %575 = vst [vmem:[#allocation2 + $0x28] sm:$0xff] %v7978_v0 }
  0x68   : > { %577 = vst.msk [vmem:[#allocation3] sm:$0xff] %vm576_vm0, %v7978_v0 }
  0x69   : > { %578 = vst.msk [vmem:[#allocation3 + $0x8] sm:$0xff] %vm576_vm0, %v7978_v0 }
  0x6a   : > { %579 = vst.msk [vmem:[#allocation3 + $0x10] sm:$0xff] %vm576_vm0, %v7978_v0 }
  0x6b   : > { %580 = vst.msk [vmem:[#allocation3 + $0x18] sm:$0xff] %vm576_vm0, %v7978_v0 }
  0x6c   : > { %581 = vst.msk [vmem:[#allocation3 + $0x20] sm:$0xff] %vm576_vm0, %v7978_v0 }
  0x6d   : > { %582 = vst.msk [vmem:[#allocation3 + $0x28] sm:$0xff] %vm576_vm0, %v7978_v0 }
  0x6e   : > { %583 = vst.msk [vmem:[#allocation3 + $0x30] sm:$0xff] %vm576_vm0, %v7978_v0 }
  0x6f   : > { %584 = vst.msk [vmem:[#allocation3 + $0x38] sm:$0xff] %vm576_vm0, %v7978_v0 }
  0x70   : > { %585 = vst.msk [vmem:[#allocation3 + $0x40] sm:$0xff] %vm576_vm0, %v7978_v0 }
  0x71   : > { %586 = vst.msk [vmem:[#allocation3 + $0x48] sm:$0xff] %vm576_vm0, %v7978_v0 }
  0x72   : > { %587 = vst.msk [vmem:[#allocation3 + $0x50] sm:$0xff] %vm576_vm0, %v7978_v0 }
  0x73   : > { %588 = vst.msk [vmem:[#allocation3 + $0x58] sm:$0xff] %vm576_vm0, %v7978_v0 }
  0x74   : > { %589 = vst.msk [vmem:[#allocation3 + $0x60] sm:$0xff] %vm576_vm0, %v7978_v0 }
  0x75   : > { %590 = vst.msk [vmem:[#allocation3 + $0x68] sm:$0xff] %vm576_vm0, %v7978_v0 }
  0x76   : > { %591 = vst.msk [vmem:[#allocation3 + $0x70] sm:$0xff] %vm576_vm0, %v7978_v0 }
  0x77   : > { %592 = vst.msk [vmem:[#allocation3 + $0x78] sm:$0xff] %vm576_vm0, %v7978_v0 }
  0x78 PF: > { %v6659_v1 = vld [vmem:[%s8216_s5 + $0x38] sm:$0xff]  ;;  %v6658_v2 = vld [vmem:[%s8216_s5 + $0x30] sm:$0xff]  ;;  %v593_v3 = vld [vmem:[%s8206_s30] sm:$0xff]   ;;  %vm705_vm1 = vcmask 7168   ;;  %p6366_p1 = scmp.ne.s32.totalorder %s7956_s16, 2 }
  0x79   : > { %850 = vmatpush.bf16.msra.mxu0 %v6659_v1  ;;  %6708 = vmatpush.bf16.msra.mxu1 %v6659_v1  ;;  %v597_v4 = vld [vmem:[%s8206_s30 + $0x10] sm:$0xff]   ;;  %v595_v5 = vld [vmem:[%s8206_s30 + $0x8] sm:$0xff]   ;;  %v609_v6 = vunpack.c.l.bf16 %v593_v3  ;;  %v610_v13 = vunpack.c.h.bf16 %v593_v3  ;;  %v6656_v14 = vld [vmem:[%s8216_s5 + $0x20] sm:$0xff] }
  0x7a   : > { %6709 = vmatpush.bf16.msra.mxu2 %v6659_v1  ;;  %6710 = vmatpush.bf16.msra.mxu3 %v6659_v1  ;;  %v613_v7 = vunpack.c.l.bf16 %v597_v4  ;;  %v611_v8 = vunpack.c.l.bf16 %v595_v5  ;;  %v6657_v9 = vld [vmem:[%s8216_s5 + $0x28] sm:$0xff]  ;;  %v6655_v16 = vld [vmem:[%s8216_s5 + $0x18] sm:$0xff]  ;;  %v614_v17 = vunpack.c.h.bf16 %v597_v4  ;;  %v612_v18 = vunpack.c.h.bf16 %v595_v5  ;;  %v6654_v23 = vld [vmem:[%s8216_s5 + $0x10] sm:$0xff] }
  0x7b   : > { %v641_v10 = vmul.f32 %v609_v6, %v609_v6  ;;  %v642_v15 = vmul.f32 %v610_v13, %v610_v13  ;;  %v599_v19 = vld [vmem:[%s8206_s30 + $0x18] sm:$0xff]   ;;  %v601_v24 = vld [vmem:[%s8206_s30 + $0x20] sm:$0xff]   ;;  %v6653_v28 = vld [vmem:[%s8216_s5 + $0x8] sm:$0xff] }
  0x7c   : > { %v645_v11 = vmul.f32 %v613_v7, %v613_v7  ;;  %v643_v12 = vmul.f32 %v611_v8, %v611_v8  ;;  %v646_v20 = vmul.f32 %v614_v17, %v614_v17  ;;  %v644_v21 = vmul.f32 %v612_v18, %v612_v18  ;;  %v604_v31 = vld [vmem:[%s8206_s30 + $0x2c] sm:$0xff]   ;;  %v603_v32 = vld [vmem:[%s8206_s30 + $0x28] sm:$0xf]  ;;  %v6652_v33 = vld [vmem:[%s8216_s5] sm:$0xff] }
  0x7d   : > { %851 = vmatpush.bf16.msra.mxu0 %v6658_v2  ;;  %6711 = vmatpush.bf16.msra.mxu1 %v6658_v2  ;;  %v615_v22 = vunpack.c.l.bf16 %v599_v19  ;;  %v617_v25 = vunpack.c.l.bf16 %v601_v24  ;;  %v616_v26 = vunpack.c.h.bf16 %v599_v19  ;;  %v618_v34 = vunpack.c.h.bf16 %v601_v24  ;;  %v6644_v37 = vld [vmem:[%s8206_s30] sm:$0xff]  ;;  %v6646_v38 = vld [vmem:[%s8206_s30 + $0x10] sm:$0xff]  ;;  %v607_v44 = vld [vmem:[%s8206_s30 + $0x38] sm:$0xff]  }
  0x7e   : > { %6712 = vmatpush.bf16.msra.mxu2 %v6658_v2  ;;  %6713 = vmatpush.bf16.msra.mxu3 %v6658_v2  ;;  %v620_v35 = vunpack.c.l.bf16 %v604_v31  ;;  %v619_v36 = vunpack.c.l.bf16 %v603_v32  ;;  %v6648_v39 = vld [vmem:[%s8206_s30 + $0x20] sm:$0xff]  ;;  %v6650_v40 = vld [vmem:[%s8206_s30 + $0x30] sm:$0xff]  ;;  %v621_v46 = vunpack.c.h.bf16 %v604_v31  ;;  %v623_v47 = vunpack.c.l.bf16 %v607_v44  ;;  %v6647_v53 = vld [vmem:[%s8206_s30 + $0x18] sm:$0xff] }
  0x7f   : > { %657 = vadd.xlane.f32.xlu0 %v641_v10  ;;  %665 = vadd.xlane.f32.xlu2 %v645_v11  ;;  %v647_v27 = vmul.f32 %v615_v22, %v615_v22  ;;  %v649_v29 = vmul.f32 %v617_v25, %v617_v25  ;;  %v648_v30 = vmul.f32 %v616_v26, %v616_v26  ;;  %v606_v45 = vld [vmem:[%s8206_s30 + $0x34] sm:$0xf]  ;;  %v624_v52 = vunpack.c.h.bf16 %v607_v44  ;;  %v6645_v54 = vld [vmem:[%s8206_s30 + $0x8] sm:$0xff]  ;;  %v6651_v56 = vld [vmem:[%s8206_s30 + $0x38] sm:$0xff] }
  0x80   : > { %661 = vadd.xlane.f32.xlu1 %v643_v12  ;;  %v650_v41 = vmul.f32 %v618_v34, %v618_v34  ;;  %v652_v42 = vmul.f32 %v620_v35, %v620_v35  ;;  %v651_v43 = vmul.f32 %v619_v36, %v619_v36  ;;  %v622_v48 = vunpack.c.l.bf16 %v606_v45  ;;  %v6649_v55 = vld [vmem:[%s8206_s30 + $0x28] sm:$0xff]  ;;  %v625_v58 = vld [vmem:[#allocation3] sm:$0xff]  ;;  %v627_v0 = vld [vmem:[#allocation3 + $0x10] sm:$0xff] }
  0x81   : > { %852 = vmatpush.bf16.msra.mxu0 %v6657_v9  ;;  %6714 = vmatpush.bf16.msra.mxu1 %v6657_v9  ;;  %v653_v49 = vmul.f32 %v621_v46, %v621_v46  ;;  %v655_v50 = vmul.f32 %v623_v47, %v623_v47  ;;  %v656_v57 = vmul.f32 %v624_v52, %v624_v52  ;;  %v629_v59 = vld [vmem:[#allocation3 + $0x20] sm:$0xff]  ;;  %v626_v3 = vld [vmem:[#allocation3 + $0x8] sm:$0xff]  ;;  %v628_v7 = vld [vmem:[#allocation3 + $0x18] sm:$0xff] }
  0x82   : > { %6715 = vmatpush.bf16.msra.mxu2 %v6657_v9  ;;  %6716 = vmatpush.bf16.msra.mxu3 %v6657_v9  ;;  %v654_v51 = vmul.f32 %v622_v48, %v622_v48  ;;  %v630_v6 = vld [vmem:[#allocation3 + $0x28] sm:$0xff]  ;;  %v631_v12 = vld [vmem:[#allocation3 + $0x30] sm:$0xff]  ;;  %v637_v32 = vld [vmem:[#allocation3 + $0x60] sm:$0xff] }
  0x83   : > { %v635_v24 = vld [vmem:[#allocation3 + $0x50] sm:$0xff]  ;;  %v638_v36 = vld [vmem:[#allocation3 + $0x68] sm:$0xff]  ;;  %v730_v45 = vld [vmem:[#allocation2 + $0x40] sm:$0xff] }
  0x84   : > { %v726_v31 = vld [vmem:[#allocation2 + $0x50] sm:$0xff]  ;;  %v734_v46 = vld [vmem:[#allocation2 + $0x60] sm:$0xff]  ;;  %v727_v48 = vld [vmem:[#allocation2 + $0x68] sm:$0xff] }
  0x85   : > { %853 = vmatpush.bf16.msra.mxu0 %v6656_v14  ;;  %6717 = vmatpush.bf16.msra.mxu1 %v6656_v14  ;;  %v639_v35 = vld [vmem:[#allocation3 + $0x70] sm:$0xff]  ;;  %v723_v47 = vld [vmem:[#allocation2] sm:$0xff] }
  0x86   : > { %6718 = vmatpush.bf16.msra.mxu2 %v6656_v14  ;;  %6719 = vmatpush.bf16.msra.mxu3 %v6656_v14 }
  0x87   : > { %659 = vadd.xlane.f32.xlu0 %v642_v15  ;;  %667 = vadd.xlane.f32.xlu2 %v646_v20  ;;  %v633_v15 = vld [vmem:[#allocation3 + $0x40] sm:$0xff] }
  0x88   : > { %663 = vadd.xlane.f32.xlu1 %v644_v21  ;;  %v634_v21 = vld [vmem:[#allocation3 + $0x48] sm:$0xff] }
  0x89   : > { %854 = vmatpush.bf16.msra.mxu0 %v6655_v16  ;;  %6720 = vmatpush.bf16.msra.mxu1 %v6655_v16 }
  0x8a   : > { %6721 = vmatpush.bf16.msra.mxu2 %v6655_v16  ;;  %6722 = vmatpush.bf16.msra.mxu3 %v6655_v16  ;;  %v632_v16 = vld [vmem:[#allocation3 + $0x38] sm:$0xff] }
  0x8d   : > { %855 = vmatpush.bf16.msra.mxu0 %v6654_v23  ;;  %6723 = vmatpush.bf16.msra.mxu1 %v6654_v23 }
  0x8e   : > { %6724 = vmatpush.bf16.msra.mxu2 %v6654_v23  ;;  %6725 = vmatpush.bf16.msra.mxu3 %v6654_v23  ;;  %v636_v23 = vld [vmem:[#allocation3 + $0x58] sm:$0xff] }
  0x8f   : > { %669 = vadd.xlane.f32.xlu0 %v647_v27  ;;  %673 = vadd.xlane.f32.xlu2 %v649_v29 }
  0x90   : > { %671 = vadd.xlane.f32.xlu1 %v648_v30  ;;  %v722_v30 = vld [vmem:[#allocation2 + $0x30] sm:$0xff] }
  0x91   : > { %856 = vmatpush.bf16.msra.mxu0 %v6653_v28  ;;  %6726 = vmatpush.bf16.msra.mxu1 %v6653_v28 }
  0x92   : > { %6727 = vmatpush.bf16.msra.mxu2 %v6653_v28  ;;  %6728 = vmatpush.bf16.msra.mxu3 %v6653_v28 }
  0x95   : > { %857 = vmatpush.bf16.msra.mxu0 %v6652_v33  ;;  %6729 = vmatpush.bf16.msra.mxu1 %v6652_v33 }
  0x96   : > { %6730 = vmatpush.bf16.msra.mxu2 %v6652_v33  ;;  %6731 = vmatpush.bf16.msra.mxu3 %v6652_v33 }
  0x97   : > { %675 = vadd.xlane.f32.xlu0 %v650_v41  ;;  %679 = vadd.xlane.f32.xlu2 %v652_v42 }
  0x98   : > { %858 = vmatmul.bf16.vlgmr.msra.gmra.mxu0 %v6644_v37  ;;  %868 = vmatmul.bf16.vlgmr.msra.gmra.mxu1 %v6646_v38 }
  0x99   : > { %878 = vmatmul.bf16.vlgmr.msra.gmra.mxu2 %v6648_v39  ;;  %888 = vmatmul.bf16.vlgmr.msra.gmra.mxu3 %v6650_v40 }
  0x9a   : > { %677 = vadd.xlane.f32.xlu1 %v651_v43 }
  0x9f   : > { %681 = vadd.xlane.f32.xlu0 %v653_v49  ;;  %685 = vadd.xlane.f32.xlu2 %v655_v50 }
  0xa2   : > { %683 = vadd.xlane.f32.xlu1 %v654_v51  ;;  %v640_v51 = vld [vmem:[#allocation3 + $0x78] sm:$0xff] }
  0xa7   : > { %687 = vadd.xlane.f32.xlu0 %v656_v57 }
  0xa8   : > { %873 = vmatmul.bf16.gmra.mxu1 %v6647_v53  ;;  %863 = vmatmul.bf16.gmra.mxu0 %v6645_v54 }
  0xa9   : > { %883 = vmatmul.bf16.gmra.mxu2 %v6649_v55  ;;  %893 = vmatmul.bf16.gmra.mxu3 %v6651_v56 }
  0xf2   : > { %v658_v60 = vpop.xlane.xlu0 %657  ;;  %v666_v61 = vpop.xlane.xlu2 %665 }
  0xf3   : > { %v689_v62 = vadd.f32 %v658_v60, %v625_v58  ;;  %v693_v63 = vadd.f32 %v666_v61, %v629_v59  ;;  %v662_v1 = vpop.xlane.xlu1 %661  ;;  %v731_v60 = vld [vmem:[#allocation2 + $0x20] sm:$0xff]  ;;  %v735_v61 = vld [vmem:[#allocation2 + $0x70] sm:$0xff] }
  0xf4   : > { %v691_v2 = vadd.f32 %v662_v1, %v627_v0 }
  0xf5   : > { %706 = vst.msk [vmem:[#allocation3] sm:$0xff] %vm705_vm1, %v689_v62  ;;  %v724_v62 = vld [vmem:[#allocation2 + $0x58] sm:$0xff] }
  0xf6   : > { %710 = vst.msk [vmem:[#allocation3 + $0x20] sm:$0xff] %vm705_vm1, %v693_v63  ;;  %v728_v63 = vld [vmem:[#allocation2 + $0x8] sm:$0xff] }
  0xf7   : > { %708 = vst.msk [vmem:[#allocation3 + $0x10] sm:$0xff] %vm705_vm1, %v691_v2 }
  0xfa   : > { %v660_v4 = vpop.xlane.xlu0 %659  ;;  %v668_v8 = vpop.xlane.xlu2 %667 }
  0xfb   : > { %v690_v5 = vadd.f32 %v660_v4, %v626_v3  ;;  %v664_v9 = vpop.xlane.xlu1 %663  ;;  %v694_v10 = vadd.f32 %v668_v8, %v630_v6  ;;  %v732_v8 = vld [vmem:[#allocation2 + $0x10] sm:$0xff] }
  0xfc   : > { %v692_v11 = vadd.f32 %v664_v9, %v628_v7  ;;  %v736_v9 = vld [vmem:[#allocation2 + $0x78] sm:$0xff] }
  0xfd   : > { %707 = vst.msk [vmem:[#allocation3 + $0x8] sm:$0xff] %vm705_vm1, %v690_v5 }
  0xfe   : > { %711 = vst.msk [vmem:[#allocation3 + $0x28] sm:$0xff] %vm705_vm1, %v694_v10  ;;  %v725_v10 = vld [vmem:[#allocation2 + $0x18] sm:$0xff] }
  0xff   : > { %709 = vst.msk [vmem:[#allocation3 + $0x18] sm:$0xff] %vm705_vm1, %v692_v11  ;;  %v729_v11 = vld [vmem:[#allocation2 + $0x48] sm:$0xff] }
 0x102   : > { %v670_v13 = vpop.xlane.xlu0 %669  ;;  %v674_v17 = vpop.xlane.xlu2 %673 }
 0x103   : > { %v695_v14 = vadd.f32 %v670_v13, %v631_v12  ;;  %v672_v18 = vpop.xlane.xlu1 %671  ;;  %v697_v19 = vadd.f32 %v674_v17, %v633_v15 }
 0x104   : > { %v696_v20 = vadd.f32 %v672_v18, %v632_v16 }
 0x105   : > { %712 = vst.msk [vmem:[#allocation3 + $0x30] sm:$0xff] %vm705_vm1, %v695_v14 }
 0x106   : > { %714 = vst.msk [vmem:[#allocation3 + $0x40] sm:$0xff] %vm705_vm1, %v697_v19 }
 0x107   : > { %713 = vst.msk [vmem:[#allocation3 + $0x38] sm:$0xff] %vm705_vm1, %v696_v20  ;;  %v733_v20 = vld [vmem:[#allocation2 + $0x38] sm:$0xff] }
 0x10a   : > { %v676_v22 = vpop.xlane.xlu0 %675  ;;  %v680_v26 = vpop.xlane.xlu2 %679 }
 0x10b   : > { %v698_v25 = vadd.f32 %v676_v22, %v634_v21  ;;  %v700_v28 = vadd.f32 %v680_v26, %v636_v23  ;;  %v737_v21 = vld [vmem:[#allocation2 + $0x28] sm:$0xff] }
 0x10d   : > { %v678_v27 = vpop.xlane.xlu1 %677  ;;  %715 = vst.msk [vmem:[#allocation3 + $0x48] sm:$0xff] %vm705_vm1, %v698_v25 }
 0x10e   : > { %v699_v29 = vadd.f32 %v678_v27, %v635_v24  ;;  %717 = vst.msk [vmem:[#allocation3 + $0x58] sm:$0xff] %vm705_vm1, %v700_v28 }
 0x110   : > { %716 = vst.msk [vmem:[#allocation3 + $0x50] sm:$0xff] %vm705_vm1, %v699_v29 }
 0x112   : > { %v682_v39 = vpop.xlane.xlu0 %681  ;;  %v686_v40 = vpop.xlane.xlu2 %685 }
 0x113   : > { %v701_v41 = vadd.f32 %v682_v39, %v637_v32  ;;  %v703_v42 = vadd.f32 %v686_v40, %v639_v35 }
 0x115   : > { %v859_v33 = vpop.f32.mrf.mxu0  ;;  %v869_v34 = vpop.f32.mrf.mxu1  ;;  %718 = vst.msk [vmem:[#allocation3 + $0x60] sm:$0xff] %vm705_vm1, %v701_v41 }
 0x116   : > { %v899_v37 = vadd.f32 %v859_v33, %v722_v30  ;;  %v903_v38 = vadd.f32 %v869_v34, %v726_v31  ;;  %v684_v43 = vpop.xlane.xlu1 %683  ;;  %720 = vst.msk [vmem:[#allocation3 + $0x70] sm:$0xff] %vm705_vm1, %v703_v42 }
 0x117   : > { %v702_v44 = vadd.f32 %v684_v43, %v638_v36 }
 0x118   : > { %915 = vst [vmem:[#allocation2 + $0x30] sm:$0xff] %v899_v37 }
 0x119   : > { %919 = vst [vmem:[#allocation2 + $0x50] sm:$0xff] %v903_v38 }
 0x11a   : > { %719 = vst.msk [vmem:[#allocation3 + $0x68] sm:$0xff] %vm705_vm1, %v702_v44  ;;  %v688_v58 = vpop.xlane.xlu0 %687 }
 0x11b   : > { %v704_v59 = vadd.f32 %v688_v58, %v640_v51 }
 0x11c   : > { %v879_v49 = vpop.f32.mrf.mxu2  ;;  %v889_v50 = vpop.f32.mrf.mxu3 }
 0x11d   : > { %v907_v52 = vadd.f32 %v879_v49, %v730_v45  ;;  %v911_v53 = vadd.f32 %v889_v50, %v734_v46  ;;  %v861_v54 = vpop.f32.mrf.mxu0  ;;  %v871_v55 = vpop.f32.mrf.mxu1  ;;  %721 = vst.msk [vmem:[#allocation3 + $0x78] sm:$0xff] %vm705_vm1, %v704_v59 }
 0x11e   : > { %v900_v56 = vadd.f32 %v861_v54, %v723_v47  ;;  %v904_v57 = vadd.f32 %v871_v55, %v727_v48 }
 0x11f   : > { %923 = vst [vmem:[#allocation2 + $0x40] sm:$0xff] %v907_v52 }
 0x120   : > { %927 = vst [vmem:[#allocation2 + $0x60] sm:$0xff] %v911_v53 }
 0x121   : > { %916 = vst [vmem:[#allocation2] sm:$0xff] %v900_v56 }
 0x122   : > { %920 = vst [vmem:[#allocation2 + $0x68] sm:$0xff] %v904_v57 }
 0x124   : > { %v881_v0 = vpop.f32.mrf.mxu2  ;;  %v891_v1 = vpop.f32.mrf.mxu3 }
 0x125   : > { %v908_v2 = vadd.f32 %v881_v0, %v731_v60  ;;  %v912_v3 = vadd.f32 %v891_v1, %v735_v61  ;;  %v864_v4 = vpop.f32.mrf.mxu0  ;;  %v874_v5 = vpop.f32.mrf.mxu1 }
 0x126   : > { %v901_v6 = vadd.f32 %v864_v4, %v724_v62  ;;  %v905_v7 = vadd.f32 %v874_v5, %v728_v63 }
 0x127   : > { %924 = vst [vmem:[#allocation2 + $0x20] sm:$0xff] %v908_v2 }
 0x128   : > { %928 = vst [vmem:[#allocation2 + $0x70] sm:$0xff] %v912_v3 }
 0x129   : > { %917 = vst [vmem:[#allocation2 + $0x58] sm:$0xff] %v901_v6 }
 0x12a   : > { %921 = vst [vmem:[#allocation2 + $0x8] sm:$0xff] %v905_v7 }
 0x12c   : > { %v884_v12 = vpop.f32.mrf.mxu2  ;;  %v894_v13 = vpop.f32.mrf.mxu3 }
 0x12d   : > { %v909_v14 = vadd.f32 %v884_v12, %v732_v8  ;;  %v913_v15 = vadd.f32 %v894_v13, %v736_v9  ;;  %v866_v16 = vpop.f32.mrf.mxu0  ;;  %v876_v17 = vpop.f32.mrf.mxu1 }
 0x12e   : > { %v902_v18 = vadd.f32 %v866_v16, %v725_v10  ;;  %v906_v19 = vadd.f32 %v876_v17, %v729_v11 }
 0x12f   : > { %925 = vst [vmem:[#allocation2 + $0x10] sm:$0xff] %v909_v14 }
 0x130   : > { %929 = vst [vmem:[#allocation2 + $0x78] sm:$0xff] %v913_v15 }
 0x131   : > { %918 = vst [vmem:[#allocation2 + $0x18] sm:$0xff] %v902_v18 }
 0x132   : > { %922 = vst [vmem:[#allocation2 + $0x48] sm:$0xff] %v906_v19 }
 0x134   : > { %v886_v22 = vpop.f32.mrf.mxu2  ;;  %v896_v23 = vpop.f32.mrf.mxu3  ;;  %934 = sbr.rel (%p6366_p1) target bundleno = 2989 (0xbad), region = 104 }
 0x135   : > { %v910_v24 = vadd.f32 %v886_v22, %v733_v20  ;;  %v914_v25 = vadd.f32 %v896_v23, %v737_v21 }
 0x137   : > { %926 = vst [vmem:[#allocation2 + $0x38] sm:$0xff] %v910_v24 }
 0x138   : > { %930 = vst [vmem:[#allocation2 + $0x28] sm:$0xff] %v914_v25 }
 0x139   : > { %v940_v26 = vld [vmem:[#allocation3 + $0x10] sm:$0xff]  ;;  %v938_v27 = vld [vmem:[#allocation3] sm:$0xff]  ;;  %v941_v28 = vld [vmem:[#allocation3 + $0x18] sm:$0xff]  ;;  %v7979_v29 = vmov 0  }
 0x13a   : > { %6896 = vset.pattern.permute.xlu1 %v7979_v29  ;;  %6895 = vset.pattern.permute.xlu0 %v7979_v29  ;;  %v956_v30 = vadd.f32 1e-12, %v940_v26  ;;  %v954_v31 = vadd.f32 1e-12, %v938_v27  ;;  %v8297_v32 = vadd.f32 1e-12, %v941_v28 }
 0x13b   : > { %v939_v33 = vld [vmem:[#allocation3 + $0x8] sm:$0xff]  ;;  %v945_v34 = vld [vmem:[#allocation3 + $0x38] sm:$0xff]  ;;  %v944_v35 = vld [vmem:[#allocation3 + $0x30] sm:$0xff]  ;;  %6897 = vset.pattern.permute.xlu2 %v7979_v29 }
 0x13c   : > { %6913 = vrsqrt.f32 %v956_v30  ;;  %v948_v36 = vld [vmem:[#allocation3 + $0x50] sm:$0xff]  ;;  %v947_v37 = vld [vmem:[#allocation3 + $0x48] sm:$0xff]  ;;  %v942_v38 = vld [vmem:[#allocation3 + $0x20] sm:$0xff]  ;;  %v8299_v39 = vadd.f32 1e-12, %v939_v33  ;;  %vm996_vm2 = vweird.f32 %v956_v30  ;;  %vm976_vm4 = vweird.f32 %v954_v31 }
 0x13d   : > { %6915 = vrsqrt.f32 %v954_v31  ;;  %v8301_v40 = vadd.f32 1e-12, %v945_v34  ;;  %v8303_v41 = vadd.f32 1e-12, %v944_v35  ;;  %v8306_v42 = vadd.f32 1e-12, %v948_v36 }
 0x13e   : > { %6917 = vrsqrt.f32 %v8297_v32  ;;  %v8308_v43 = vadd.f32 1e-12, %v947_v37  ;;  %v8312_v44 = vadd.f32 1e-12, %v942_v38  ;;  %v943_v45 = vld [vmem:[#allocation3 + $0x28] sm:$0xff]  ;;  %vm1006_vm8 = vweird.f32 %v8297_v32  ;;  %v946_v28 = vld [vmem:[#allocation3 + $0x40] sm:$0xff] }
 0x13f   : > { %6919 = vrsqrt.f32 %v8299_v39  ;;  %v8323_v54 = vadd.f32 1e-12, %v943_v45  ;;  %vm986_vm10 = vweird.f32 %v8299_v39  ;;  %v8398_v38 = vadd.f32 1e-12, %v946_v28  ;;  %v951_v5 = vld [vmem:[#allocation3 + $0x68] sm:$0xff] }
 0x140   : > { %6921 = vrsqrt.f32 %v8301_v40  ;;  %vm1016_vm14 = vweird.f32 %v8312_v44  ;;  %vm1046_vm0 = vweird.f32 %v8301_v40 }
 0x141   : > { %6923 = vrsqrt.f32 %v8303_v41 }
 0x142   : > { %v6914_v46 = vpop.eup %6913  ;;  %6925 = vrsqrt.f32 %v8306_v42 }
 0x143   : > { %v6916_v47 = vpop.eup %6915  ;;  %v991_v48 = vmul.f32 %v6914_v46, %v956_v30  ;;  %6927 = vrsqrt.f32 %v8308_v43  ;;  %vm997_vm3 = vweird.f32 %v6914_v46 }
 0x144   : > { %v8315_v49 = vpop.eup %6917  ;;  %v971_v50 = vmul.f32 %v6916_v47, %v954_v31  ;;  %6929 = vrsqrt.f32 %v8312_v44  ;;  %vm977_vm5 = vweird.f32 %v6916_v47  ;;  %vm8344_vm6 = vmor %vm996_vm2, %vm997_vm3  ;;  %v949_v31 = vld [vmem:[#allocation3 + $0x58] sm:$0xff]  ;;  %vm1036_vm2 = vweird.f32 %v8303_v41 }
 0x145   : > { %v8318_v51 = vpop.eup %6919  ;;  %v992_v52 = vmul.f32 %v6914_v46, %v991_v48  ;;  %v1001_v53 = vmul.f32 %v8315_v49, %v8297_v32  ;;  %6931 = vrsqrt.f32 %v8323_v54  ;;  %vm8352_vm7 = vmor %vm976_vm4, %vm977_vm5  ;;  %vm1007_vm9 = vweird.f32 %v8315_v49 }
 0x146   : > { %v8325_v55 = vpop.eup %6921  ;;  %v972_v56 = vmul.f32 %v6916_v47, %v971_v50  ;;  %v981_v57 = vmul.f32 %v8318_v51, %v8299_v39  ;;  %vm987_vm11 = vweird.f32 %v8318_v51  ;;  %vm8375_vm12 = vmor %vm1006_vm8, %vm1007_vm9  ;;  %6933 = vrsqrt.f32 %v8398_v38 }
 0x147   : > { %v8329_v58 = vpop.eup %6923  ;;  %v993_v59 = vmul.f32 0.5, %v992_v52  ;;  %v1002_v60 = vmul.f32 %v8315_v49, %v1001_v53  ;;  %v1041_v61 = vmul.f32 %v8325_v55, %v8301_v40  ;;  %vm8382_vm13 = vmor %vm986_vm10, %vm987_vm11  ;;  %vm1047_vm1 = vweird.f32 %v8325_v55 }
 0x148   : > { %v973_v62 = vmul.f32 0.5, %v972_v56  ;;  %v982_v63 = vmul.f32 %v8318_v51, %v981_v57  ;;  %v1031_v0 = vmul.f32 %v8329_v58, %v8303_v41  ;;  %v8340_v4 = vpop.eup %6925  ;;  %vm1037_vm3 = vweird.f32 %v8329_v58  ;;  %vm8415_vm5 = vmor %vm1046_vm0, %vm1047_vm1 }
 0x149   : > { %v994_v1 = vsub.f32 1.5, %v993_v59  ;;  %v1003_v2 = vmul.f32 0.5, %v1002_v60  ;;  %v1042_v3 = vmul.f32 %v8325_v55, %v1041_v61  ;;  %v8349_v9 = vpop.eup %6927  ;;  %v1071_v18 = vmul.f32 %v8340_v4, %v8306_v42 }
 0x14a   : > { %v974_v6 = vsub.f32 1.5, %v973_v62  ;;  %v983_v7 = vmul.f32 0.5, %v982_v63  ;;  %v1032_v8 = vmul.f32 %v8329_v58, %v1031_v0  ;;  %v6930_v15 = vpop.eup %6929  ;;  %v1061_v21 = vmul.f32 %v8349_v9, %v8308_v43 }
 0x14b   : > { %v995_v10 = vmul.f32 %v6914_v46, %v994_v1  ;;  %v1004_v12 = vsub.f32 1.5, %v1003_v2  ;;  %v1043_v17 = vmul.f32 0.5, %v1042_v3  ;;  %v8368_v22 = vpop.eup %6931  ;;  %v1011_v27 = vmul.f32 %v6930_v15, %v8312_v44 }
 0x14c   : > { %v975_v13 = vmul.f32 %v6916_v47, %v974_v6  ;;  %v984_v14 = vsub.f32 1.5, %v983_v7  ;;  %v1033_v20 = vmul.f32 0.5, %v1032_v8  ;;  %v1072_v30 = vmul.f32 %v8340_v4, %v1071_v18  ;;  %v6934_v44 = vpop.eup %6933 }
 0x14d   : > { %v999_v16 = vsel %vm8344_vm6, %v6914_v46, %v995_v10  ;;  %v1005_v23 = vmul.f32 %v8315_v49, %v1004_v12  ;;  %v1044_v29 = vsub.f32 1.5, %v1043_v17  ;;  %v1062_v33 = vmul.f32 %v8349_v9, %v1061_v21  ;;  %vm8422_vm6 = vmor %vm1036_vm2, %vm1037_vm3 }
 0x14e   : > { %1158 = vperm.xlu1 %6896, %v999_v16   ;;  %v979_v19 = vsel %vm8352_vm7, %v6916_v47, %v975_v13  ;;  %v985_v25 = vmul.f32 %v8318_v51, %v984_v14  ;;  %v1034_v32 = vsub.f32 1.5, %v1033_v20  ;;  %v1012_v34 = vmul.f32 %v6930_v15, %v1011_v27  ;;  %v950_v47 = vld [vmem:[#allocation3 + $0x60] sm:$0xff] }
 0x14f   : > { %1148 = vperm.xlu0 %6895, %v979_v19   ;;  %v1021_v35 = vmul.f32 %v8368_v22, %v8323_v54  ;;  %v1009_v36 = vsel %vm8375_vm12, %v8315_v49, %v1005_v23  ;;  %vm1017_vm15 = vweird.f32 %v6930_v15  ;;  %v8401_v46 = vadd.f32 1e-12, %v949_v31 }
 0x150   : > { %v989_v37 = vsel %vm8382_vm13, %v8318_v51, %v985_v25  ;;  %v1013_v39 = vmul.f32 0.5, %v1012_v34  ;;  %v1045_v50 = vmul.f32 %v8325_v55, %v1044_v29  ;;  %v1073_v51 = vmul.f32 0.5, %v1072_v30  ;;  %vm1018_vm4 = vmor %vm1016_vm14, %vm1017_vm15 }
 0x151   : > { %v1022_v45 = vmul.f32 %v8368_v22, %v1021_v35  ;;  %6935 = vrsqrt.f32 %v8401_v46  ;;  %v8413_v40 = vadd.f32 1e-12, %v950_v47  ;;  %v1035_v53 = vmul.f32 %v8329_v58, %v1034_v32 }
 0x152   : > { %v1014_v48 = vsub.f32 1.5, %v1013_v39  ;;  %v1063_v56 = vmul.f32 0.5, %v1062_v33  ;;  %vm1026_vm7 = vweird.f32 %v8323_v54  ;;  %vm1027_vm8 = vweird.f32 %v8368_v22  ;;  %v1134_v33 = vld [vmem:[#allocation2 + $0x50] sm:$0xff]  ;;  %v1135_v39 = vld [vmem:[#allocation2 + $0x68] sm:$0xff] }
 0x153   : > { %v1023_v49 = vmul.f32 0.5, %v1022_v45  ;;  %v1049_v62 = vsel %vm8415_vm5, %v8325_v55, %v1045_v50  ;;  %v1074_v63 = vsub.f32 1.5, %v1073_v51  ;;  %6937 = vrsqrt.f32 %v8413_v40  ;;  %vm8441_vm11 = vmor %vm1026_vm7, %vm1027_vm8 }
 0x154   : > { %v1015_v57 = vmul.f32 %v6930_v15, %v1014_v48  ;;  %v1039_v41 = vsel %vm8422_vm6, %v8329_v58, %v1035_v53  ;;  %v1064_v1 = vsub.f32 1.5, %v1063_v56  ;;  %v1051_v3 = vmul.f32 %v6934_v44, %v8398_v38  ;;  %v1130_v48 = vld [vmem:[#allocation2 + $0x30] sm:$0xff] }
 0x155   : > { %v1024_v59 = vsub.f32 1.5, %v1023_v49  ;;  %vm1076_vm9 = vweird.f32 %v8306_v42  ;;  %vm1077_vm10 = vweird.f32 %v8340_v4  ;;  %vm1066_vm12 = vweird.f32 %v8308_v43 }
 0x156   : > { %1163 = vperm.xlu1 %6896, %v1009_v36   ;;  %v1019_v61 = vsel %vm1018_vm4, %v6930_v15, %v1015_v57  ;;  %vm1067_vm13 = vweird.f32 %v8349_v9  ;;  %v1052_v58 = vmul.f32 %v6934_v44, %v1051_v3  ;;  %v1075_v7 = vmul.f32 %v8340_v4, %v1074_v63  ;;  %vm8449_vm14 = vmor %vm1076_vm9, %vm1077_vm10  ;;  %v8465_v36 = vld [vmem:[#allocation17] ss:$0 sm:$0xff] }
 0x157   : > { %1153 = vperm.xlu0 %6895, %v989_v37   ;;  %1168 = vperm.xlu2 %6897, %v1019_v61   ;;  %v6936_v0 = vpop.eup %6935  ;;  %v1025_v2 = vmul.f32 %v8368_v22, %v1024_v59  ;;  %v967_v42 = vadd.f32 1e-12, %v951_v5  ;;  %v1065_v54 = vmul.f32 %v8349_v9, %v1064_v1  ;;  %vm1068_vm15 = vmor %vm1066_vm12, %vm1067_vm13  ;;  %vm1056_vm0 = vweird.f32 %v8398_v38  ;;  %v1131_v63 = vld [vmem:[#allocation2] sm:$0xff] }
 0x158   : > { %v1081_v6 = vmul.f32 %v6936_v0, %v8401_v46  ;;  %v1053_v11 = vmul.f32 0.5, %v1052_v58  ;;  %vm1057_vm1 = vweird.f32 %v6934_v44  ;;  %v1079_v14 = vsel %vm8449_vm14, %v8340_v4, %v1075_v7 }
 0x159   : > { %v1029_v10 = vsel %vm8441_vm11, %v8368_v22, %v1025_v2  ;;  %v6938_v43 = vpop.eup %6937  ;;  %6939 = vrsqrt.f32 %v967_v42  ;;  %v1069_v15 = vsel %vm1068_vm15, %v8349_v9, %v1065_v54  ;;  %vm1058_vm2 = vmor %vm1056_vm0, %vm1057_vm1  ;;  %vm1086_vm3 = vweird.f32 %v8401_v46  ;;  %v1132_v46 = vld [vmem:[#allocation2 + $0x58] sm:$0xff] }
 0x15a   : > { %v1082_v12 = vmul.f32 %v6936_v0, %v1081_v6  ;;  %v1054_v13 = vsub.f32 1.5, %v1053_v11  ;;  %v1091_v18 = vmul.f32 %v6938_v43, %v8413_v40  ;;  %vm1087_vm4 = vweird.f32 %v6936_v0 }
 0x15b   : > { %vm1088_vm5 = vmor %vm1086_vm3, %vm1087_vm4  ;;  %vm1096_vm6 = vweird.f32 %v8413_v40  ;;  %vm1097_vm7 = vweird.f32 %v6938_v43  ;;  %vm1106_vm9 = vweird.f32 %v967_v42 }
 0x15c   : > { %v1055_v16 = vmul.f32 %v6934_v44, %v1054_v13  ;;  %v1083_v17 = vmul.f32 0.5, %v1082_v12  ;;  %v1092_v21 = vmul.f32 %v6938_v43, %v1091_v18  ;;  %vm1098_vm8 = vmor %vm1096_vm6, %vm1097_vm7  ;;  %v1138_v13 = vld [vmem:[#allocation2 + $0x40] sm:$0xff] }
 0x15e   : > { %1183 = vperm.xlu1 %6896, %v1049_v62   ;;  %v1059_v19 = vsel %vm1058_vm2, %v6934_v44, %v1055_v16  ;;  %v1084_v20 = vsub.f32 1.5, %v1083_v17  ;;  %v1093_v23 = vmul.f32 0.5, %v1092_v21  ;;  %v1133_v44 = vld [vmem:[#allocation2 + $0x18] sm:$0xff]  ;;  %v1136_v16 = vld [vmem:[#allocation2 + $0x8] sm:$0xff] }
 0x15f   : > { %1178 = vperm.xlu0 %6895, %v1039_v41   ;;  %1173 = vperm.xlu2 %6897, %v1029_v10   ;;  %v6940_v22 = vpop.eup %6939 }
 0x160   : > { %v1085_v4 = vmul.f32 %v6936_v0, %v1084_v20  ;;  %v1101_v24 = vmul.f32 %v6940_v22, %v967_v42  ;;  %v1094_v25 = vsub.f32 1.5, %v1093_v23  ;;  %vm1107_vm10 = vweird.f32 %v6940_v22  ;;  %v1137_v20 = vld [vmem:[#allocation2 + $0x48] sm:$0xff] }
 0x161   : > { %vm1108_vm11 = vmor %vm1106_vm9, %vm1107_vm10 }
 0x162   : > { %v1089_v9 = vsel %vm1088_vm5, %v6936_v0, %v1085_v4  ;;  %v1102_v26 = vmul.f32 %v6940_v22, %v1101_v24  ;;  %v1095_v27 = vmul.f32 %v6938_v43, %v1094_v25 }
 0x164   : > { %v1103_v28 = vmul.f32 0.5, %v1102_v26  ;;  %v1099_v29 = vsel %vm1098_vm8, %v6938_v43, %v1095_v27 }
 0x166   : > { %1198 = vperm.xlu1 %6896, %v1079_v14   ;;  %v1104_v30 = vsub.f32 1.5, %v1103_v28 }
 0x167   : > { %1193 = vperm.xlu0 %6895, %v1069_v15   ;;  %1188 = vperm.xlu2 %6897, %v1059_v19  }
 0x168   : > { %v1105_v31 = vmul.f32 %v6940_v22, %v1104_v30 }
 0x16a   : > { %v1109_v32 = vsel %vm1108_vm11, %v6940_v22, %v1105_v31 }
 0x16f   : > { %1203 = vperm.xlu2 %6897, %v1089_v9  }
 0x177   : > { %1208 = vperm.xlu2 %6897, %v1099_v29  }
 0x17f   : > { %1213 = vperm.xlu2 %6897, %v1109_v32  }
 0x1b1   : > { %v1169_v34 = vpop.permute.xlu2 %1168 }
 0x1b2   : > { %v1230_v35 = vmul.f32 %v1169_v34, %v1134_v33 }
 0x1b4   : > { %v8468_v37 = vadd.f32 %v8465_v36, %v1230_v35 }
 0x1b6   : > { %v6371_v38 = vmul.f32 -1.442695, %v8468_v37 }
 0x1b8   : > { %6941 = vpow2.f32 %v6371_v38 }
 0x1b9   : > { %v1174_v45 = vpop.permute.xlu2 %1173 }
 0x1ba   : > { %v1231_v47 = vmul.f32 %v1174_v45, %v1135_v39 }
 0x1bc   : > { %v8472_v50 = vadd.f32 %v8465_v36, %v1231_v47 }
 0x1be   : > { %v6942_v52 = vpop.eup %6941  ;;  %v6372_v56 = vmul.f32 -1.442695, %v8472_v50 }
 0x1bf   : > { %v8478_v59 = vadd.f32 1.0, %v6942_v52 }
 0x1c0   : > { %v1159_v49 = vpop.permute.xlu1 %1158  ;;  %6943 = vpow2.f32 %v6372_v56  ;;  %v1139_v56 = vld [vmem:[#allocation2 + $0x20] sm:$0xff] }
 0x1c1   : > { %v1228_v51 = vmul.f32 %v1159_v49, %v1132_v46  ;;  %v1149_v40 = vpop.permute.xlu0 %1148  ;;  %6945 = vrcp.f32 %v8478_v59  ;;  %v1395_v15 = vand.u32 2147483648, %v8478_v59  ;;  %v1189_v17 = vpop.permute.xlu2 %1188  ;;  %v1393_v18 = vand.u32 2147483647, %v8478_v59 }
 0x1c2   : > { %v1226_v53 = vmul.f32 %v1149_v40, %v1130_v48  ;;  %v8508_v22 = vmul.f32 %v1189_v17, %v1138_v13  ;;  %vm1389_vm12 = vweird.f32 %v8478_v59 }
 0x1c3   : > { %v8476_v57 = vadd.f32 %v8465_v36, %v1228_v51  ;;  %v8513_v25 = vor.u32 1.1754944e-38, %v1395_v15  ;;  %vm8520_vm0 = vcmp.eq.f32.partialorder %v1393_v18, 8.507059e+37 }
 0x1c4   : > { %v8481_v60 = vadd.f32 %v8465_v36, %v1226_v53 }
 0x1c5   : > { %v6369_v61 = vmul.f32 -1.442695, %v8476_v57 }
 0x1c6   : > { %v6367_v62 = vmul.f32 -1.442695, %v8481_v60  ;;  %v6944_v2 = vpop.eup %6943 }
 0x1c7   : > { %6947 = vpow2.f32 %v6369_v61  ;;  %v8486_v5 = vpop.eup %6945  ;;  %v8491_v6 = vadd.f32 1.0, %v6944_v2  ;;  %v953_v2 = vld [vmem:[#allocation3 + $0x78] sm:$0xff] }
 0x1c8   : > { %v1164_v0 = vpop.permute.xlu1 %1163  ;;  %6949 = vpow2.f32 %v6367_v62  ;;  %v1385_v42 = vmul.f32 %v8486_v5, %v8478_v59  ;;  %vm1390_vm13 = vweird.f32 %v8486_v5 }
 0x1c9   : > { %v1229_v41 = vmul.f32 %v1164_v0, %v1133_v44  ;;  %v1154_v1 = vpop.permute.xlu0 %1153  ;;  %6951 = vrcp.f32 %v8491_v6  ;;  %vm8541_vm4 = vmor %vm1389_vm12, %vm1390_vm13  ;;  %vm1404_vm5 = vweird.f32 %v8491_v6 }
 0x1ca   : > { %v1227_v3 = vmul.f32 %v1154_v1, %v1131_v63  ;;  %v1386_v14 = vsub.f32 1.0, %v1385_v42  ;;  %v1408_v63 = vand.u32 2147483647, %v8491_v6  ;;  %v1410_v1 = vand.u32 2147483648, %v8491_v6 }
 0x1cb   : > { %v8489_v55 = vadd.f32 %v8465_v36, %v1229_v41 }
 0x1cc   : > { %v8494_v58 = vadd.f32 %v8465_v36, %v1227_v3  ;;  %v1387_v9 = vmul.f32 %v8486_v5, %v1386_v14  ;;  %v8575_v14 = vadd.f32 1e-12, %v953_v2  ;;  %vm8586_vm12 = vcmp.eq.f32.partialorder %v1408_v63, 8.507059e+37 }
 0x1cd   : > { %v6948_v7 = vpop.eup %6947  ;;  %v6370_v8 = vmul.f32 -1.442695, %v8489_v55 }
 0x1ce   : > { %v6950_v54 = vpop.eup %6949  ;;  %v1310_v10 = vadd.f32 1.0, %v6948_v7  ;;  %v6368_v12 = vmul.f32 -1.442695, %v8494_v58  ;;  %v1388_v48 = vadd.f32 %v8486_v5, %v1387_v9 }
 0x1cf   : > { %v8500_v11 = vadd.f32 1.0, %v6950_v54  ;;  %6953 = vpow2.f32 %v6370_v8  ;;  %v8506_v19 = vpop.eup %6951 }
 0x1d0   : > { %6955 = vrcp.f32 %v1310_v10  ;;  %v1184_v21 = vpop.permute.xlu1 %1183  ;;  %v1363_v4 = vand.u32 2147483647, %v1310_v10  ;;  %v1365_v24 = vand.u32 2147483648, %v1310_v10  ;;  %vm1359_vm14 = vweird.f32 %v1310_v10 }
 0x1d1   : > { %v1179_v43 = vpop.permute.xlu0 %1178  ;;  %6957 = vrcp.f32 %v8500_v11  ;;  %v1333_v28 = vand.u32 2147483647, %v8500_v11  ;;  %v1335_v29 = vand.u32 2147483648, %v8500_v11  ;;  %v1233_v32 = vmul.f32 %v1184_v21, %v1137_v20  ;;  %v952_v20 = vld [vmem:[#allocation3 + $0x70] sm:$0xff] }
 0x1d2   : > { %6959 = vpow2.f32 %v6368_v12  ;;  %v1232_v27 = vmul.f32 %v1179_v43, %v1136_v16  ;;  %vm1329_vm15 = vweird.f32 %v8500_v11  ;;  %vm8524_vm1 = vcmp.eq.f32.partialorder %v1363_v4, 8.507059e+37 }
 0x1d3   : > { %v1400_v39 = vmul.f32 %v8506_v19, %v8491_v6  ;;  %v1366_v47 = vor.u32 1.1754944e-38, %v1365_v24  ;;  %vm8533_vm3 = vcmp.eq.f32.partialorder %v1333_v28, 8.507059e+37  ;;  %v1336_v40 = vor.u32 1.1754944e-38, %v1335_v29 }
 0x1d4   : > { %v8546_v53 = vadd.f32 %v8465_v36, %v1232_v27  ;;  %vm1405_vm6 = vweird.f32 %v8506_v19  ;;  %v1392_v7 = vsel %vm8541_vm4, %v8486_v5, %v1388_v48  ;;  %v8565_v42 = vadd.f32 %v8465_v36, %v1233_v32 }
 0x1d5   : > { %v6954_v23 = vpop.eup %6953  ;;  %v1401_v41 = vsub.f32 1.0, %v1400_v39  ;;  %v1397_v9 = vsel %vm8520_vm0, %v8513_v25, %v1392_v7  ;;  %v8599_v29 = vadd.f32 1e-12, %v952_v20  ;;  %v8611_v32 = vadd.f32 %v8465_v36, %v8508_v22 }
 0x1d6   : > { %v6956_v26 = vpop.eup %6955  ;;  %v8517_v30 = vadd.f32 1.0, %v6954_v23  ;;  %v6373_v12 = vmul.f32 -1.442695, %v8546_v53  ;;  %v6374_v28 = vmul.f32 -1.442695, %v8565_v42 }
 0x1d7   : > { %v6958_v31 = vpop.eup %6957  ;;  %v1355_v33 = vmul.f32 %v6956_v26, %v1310_v10  ;;  %vm1360_vm2 = vweird.f32 %v6956_v26  ;;  %v1402_v18 = vmul.f32 %v8506_v19, %v1401_v41 }
 0x1d8   : > { %v1325_v38 = vmul.f32 %v6958_v31, %v8500_v11  ;;  %6961 = vrcp.f32 %v8517_v30  ;;  %v6960_v45 = vpop.eup %6959  ;;  %vm8555_vm7 = vmor %vm1359_vm14, %vm1360_vm2  ;;  %vm1330_vm8 = vweird.f32 %v6958_v31  ;;  %vm1374_vm9 = vweird.f32 %v8517_v30 }
 0x1d9   : > { %v1356_v46 = vsub.f32 1.0, %v1355_v33  ;;  %v1194_v61 = vpop.permute.xlu0 %1193  ;;  %v8548_v62 = vadd.f32 1.0, %v6960_v45  ;;  %vm1331_vm10 = vmor %vm1329_vm15, %vm1330_vm8  ;;  %v1378_v13 = vand.u32 2147483647, %v8517_v30  ;;  %v1380_v17 = vand.u32 2147483648, %v8517_v30 }
 0x1da   : > { %v1326_v49 = vsub.f32 1.0, %v1325_v38  ;;  %v1235_v54 = vmul.f32 %v1194_v61, %v1139_v56  ;;  %v1403_v35 = vadd.f32 %v8506_v19, %v1402_v18  ;;  %vm8625_vm15 = vmor %vm1404_vm5, %vm1405_vm6  ;;  %v6375_v45 = vmul.f32 -1.442695, %v8611_v32 }
 0x1db   : > { %v1357_v44 = vmul.f32 %v6956_v26, %v1356_v46  ;;  %6963 = vrcp.f32 %v8548_v62  ;;  %v1381_v25 = vor.u32 1.1754944e-38, %v1380_v17  ;;  %vm1379_vm14 = vcmp.eq.f32.partialorder %v1378_v13, 8.507059e+37 }
 0x1dc   : > { %v1327_v0 = vmul.f32 %v6958_v31, %v1326_v49  ;;  %6965 = vpow2.f32 %v6373_v12  ;;  %v8614_v33 = vadd.f32 %v8465_v36, %v1235_v54  ;;  %v1348_v39 = vand.u32 2147483647, %v8548_v62 }
 0x1dd   : > { %v1358_v3 = vadd.f32 %v6956_v26, %v1357_v44  ;;  %6967 = vrsqrt.f32 %v8575_v14  ;;  %v1407_v52 = vsel %vm8625_vm15, %v8506_v19, %v1403_v35  ;;  %vm1126_vm5 = vweird.f32 %v8575_v14 }
 0x1de   : > { %v6962_v8 = vpop.eup %6961  ;;  %v1328_v10 = vadd.f32 %v6958_v31, %v1327_v0  ;;  %6969 = vpow2.f32 %v6374_v28 }
 0x1df   : > { %v1362_v43 = vsel %vm8555_vm7, %v6956_v26, %v1358_v3  ;;  %v1370_v5 = vmul.f32 %v6962_v8, %v8517_v30  ;;  %vm1375_vm11 = vweird.f32 %v6962_v8  ;;  %v1411_v26 = vor.u32 1.1754944e-38, %v1410_v1 }
 0x1e0   : > { %v1367_v15 = vsel %vm8524_vm1, %v1366_v47, %v1362_v43  ;;  %v1332_v16 = vsel %vm1331_vm10, %v6958_v31, %v1328_v10  ;;  %vm8604_vm13 = vmor %vm1374_vm9, %vm1375_vm11  ;;  %v8618_v30 = vmul.f32 %v1397_v9, %v8468_v37  ;;  %v1350_v47 = vand.u32 2147483648, %v8548_v62 }
 0x1e1   : > { %v8582_v21 = vmul.f32 %v1367_v15, %v8476_v57  ;;  %v1337_v11 = vsel %vm8533_vm3, %v1336_v40, %v1332_v16  ;;  %v1371_v4 = vsub.f32 1.0, %v1370_v5  ;;  %v6964_v57 = vpop.eup %6963  ;;  %6971 = vrsqrt.f32 %v8599_v29 }
 0x1e2   : > { %v8591_v24 = vmul.f32 %v1337_v11, %v8481_v60  ;;  %v1340_v31 = vmul.f32 %v6964_v57, %v8548_v62  ;;  %v6376_v37 = vmul.f32 -1.442695, %v8614_v33  ;;  %v6966_v48 = vpop.eup %6965  ;;  %vm1345_vm0 = vweird.f32 %v6964_v57 }
 0x1e3   : > { %1586 = vadd.xlane.f32.xlu2 %v8582_v21  ;;  %v1372_v27 = vmul.f32 %v6962_v8, %v1371_v4  ;;  %6973 = vpow2.f32 %v6375_v45  ;;  %v8635_v6 = vpop.eup %6967  ;;  %v1314_v56 = vadd.f32 1.0, %v6966_v48  ;;  %vm1344_vm1 = vweird.f32 %v8548_v62 }
 0x1e4   : > { %1582 = vadd.xlane.f32.xlu0 %v8591_v24  ;;  %v1341_v38 = vsub.f32 1.0, %v1340_v31  ;;  %6975 = vpow2.f32 %v6376_v37  ;;  %v1121_v44 = vmul.f32 %v8635_v6, %v8575_v14  ;;  %v6970_v63 = vpop.eup %6969  ;;  %vm1346_vm2 = vmor %vm1344_vm1, %vm1345_vm0  ;;  %v1351_v59 = vor.u32 1.1754944e-38, %v1350_v47 }
 0x1e5   : > { %v1373_v34 = vadd.f32 %v6962_v8, %v1372_v27  ;;  %6977 = vrcp.f32 %v1314_v56  ;;  %vm1349_vm3 = vcmp.eq.f32.partialorder %v1348_v39, 8.507059e+37  ;;  %v1412_v19 = vsel %vm8586_vm12, %v1411_v26, %v1407_v52 }
 0x1e6   : > { %v1342_v51 = vmul.f32 %v6964_v57, %v1341_v38  ;;  %v8650_v0 = vadd.f32 1.0, %v6970_v63  ;;  %v1122_v1 = vmul.f32 %v8635_v6, %v1121_v44  ;;  %v1423_v11 = vand.u32 2147483647, %v1314_v56 }
 0x1e7   : > { %v1377_v46 = vsel %vm8604_vm13, %v6962_v8, %v1373_v34  ;;  %v8652_v41 = vpop.eup %6971  ;;  %v8660_v8 = vmul.f32 %v1412_v19, %v8472_v50  ;;  %v1425_v50 = vand.u32 2147483648, %v1314_v56  ;;  %vm1127_vm6 = vweird.f32 %v8635_v6 }
 0x1e8   : > { %v1382_v49 = vsel %vm1379_vm14, %v1381_v25, %v1377_v46  ;;  %v1343_v61 = vadd.f32 %v6964_v57, %v1342_v51  ;;  %6979 = vrcp.f32 %v8650_v0  ;;  %v1123_v12 = vmul.f32 0.5, %v1122_v1  ;;  %vm8678_vm10 = vmor %vm1126_vm5, %vm1127_vm6 }
 0x1e9   : > { %v8638_v40 = vmul.f32 %v1382_v49, %v8489_v55  ;;  %v6974_v2 = vpop.eup %6973  ;;  %v1111_v43 = vmul.f32 %v8652_v41, %v8599_v29  ;;  %vm1419_vm7 = vweird.f32 %v1314_v56  ;;  %v1426_v26 = vor.u32 1.1754944e-38, %v1425_v50 }
 0x1ea   : > { %v1347_v55 = vsel %vm1346_vm2, %v6964_v57, %v1343_v61  ;;  %v6976_v7 = vpop.eup %6975  ;;  %v8663_v54 = vadd.f32 1.0, %v6974_v2  ;;  %v1124_v16 = vsub.f32 1.5, %v1123_v12  ;;  %vm1424_vm9 = vcmp.eq.f32.partialorder %v1423_v11, 8.507059e+37  ;;  %v1143_v11 = vld [vmem:[#allocation2 + $0x70] sm:$0xff] }
 0x1eb   : > { %1590 = vadd.xlane.f32.xlu2 %v8618_v30  ;;  %v1352_v62 = vsel %vm1349_vm3, %v1351_v59, %v1347_v55  ;;  %v6978_v10 = vpop.eup %6977  ;;  %v8667_v5 = vadd.f32 1.0, %v6976_v7  ;;  %v1112_v18 = vmul.f32 %v8652_v41, %v1111_v43  ;;  %vm1434_vm11 = vweird.f32 %v8650_v0  ;;  %v1141_v43 = vld [vmem:[#allocation2 + $0x38] sm:$0xff] }
 0x1ec   : > { %1588 = vadd.xlane.f32.xlu0 %v8638_v40  ;;  %v8656_v3 = vmul.f32 %v1352_v62, %v8494_v58  ;;  %v1415_v13 = vmul.f32 %v6978_v10, %v1314_v56  ;;  %6981 = vrcp.f32 %v8663_v54  ;;  %vm1420_vm4 = vweird.f32 %v6978_v10 }
 0x1ed   : > { %6983 = vrcp.f32 %v8667_v5  ;;  %vm1421_vm8 = vmor %vm1419_vm7, %vm1420_vm4  ;;  %v1125_v57 = vmul.f32 %v8635_v6, %v1124_v16  ;;  %v1113_v28 = vmul.f32 0.5, %v1112_v18  ;;  %v1440_v38 = vand.u32 2147483648, %v8650_v0  ;;  %v1199_v18 = vpop.permute.xlu1 %1198 }
 0x1ee   : > { %1584 = vadd.xlane.f32.xlu1 %v8656_v3  ;;  %v6980_v58 = vpop.eup %6979  ;;  %v1416_v15 = vsub.f32 1.0, %v1415_v13  ;;  %v1438_v45 = vand.u32 2147483647, %v8650_v0  ;;  %vm1449_vm14 = vweird.f32 %v8663_v54  ;;  %vm1116_vm0 = vweird.f32 %v8599_v29 }
 0x1ef   : > { %v1430_v17 = vmul.f32 %v6980_v58, %v8650_v0  ;;  %vm1435_vm12 = vweird.f32 %v6980_v58  ;;  %v1129_v46 = vsel %vm8678_vm10, %v8635_v6, %v1125_v57  ;;  %v1114_v37 = vsub.f32 1.5, %v1113_v28 }
 0x1f0   : > { %v1417_v20 = vmul.f32 %v6978_v10, %v1416_v15  ;;  %vm8691_vm13 = vmor %vm1434_vm11, %vm1435_vm12  ;;  %v1441_v51 = vor.u32 1.1754944e-38, %v1440_v38  ;;  %v1455_v6 = vand.u32 2147483648, %v8663_v54  ;;  %vm1439_vm1 = vcmp.eq.f32.partialorder %v1438_v45, 8.507059e+37 }
 0x1f1   : > { %v1431_v4 = vsub.f32 1.0, %v1430_v17  ;;  %vm1117_vm2 = vweird.f32 %v8652_v41  ;;  %v1453_v56 = vand.u32 2147483647, %v8663_v54  ;;  %v1115_v44 = vmul.f32 %v8652_v41, %v1114_v37  ;;  %v1140_v17 = vld [vmem:[#allocation2 + $0x10] sm:$0xff] }
 0x1f2   : > { %v6982_v23 = vpop.eup %6981  ;;  %v1418_v9 = vadd.f32 %v6978_v10, %v1417_v20  ;;  %vm1118_vm4 = vmor %vm1116_vm0, %vm1117_vm2  ;;  %v1456_v59 = vor.u32 1.1754944e-38, %v1455_v6  ;;  %v1470_v7 = vand.u32 2147483648, %v8667_v5  ;;  %vm1464_vm7 = vweird.f32 %v8667_v5 }
 0x1f3   : > { %1592 = vadd.xlane.f32.xlu2 %v8660_v8  ;;  %v1432_v27 = vmul.f32 %v6980_v58, %v1431_v4  ;;  %v1445_v60 = vmul.f32 %v6982_v23, %v8663_v54  ;;  %v6984_v14 = vpop.eup %6983  ;;  %vm1450_vm15 = vweird.f32 %v6982_v23  ;;  %vm1454_vm5 = vcmp.eq.f32.partialorder %v1453_v56, 8.507059e+37 }
 0x1f4   : > { %v1422_v25 = vsel %vm1421_vm8, %v6978_v10, %v1418_v9  ;;  %vm1451_vm3 = vmor %vm1449_vm14, %vm1450_vm15  ;;  %v1119_v19 = vsel %vm1118_vm4, %v8652_v41, %v1115_v44  ;;  %vm1465_vm6 = vweird.f32 %v6984_v14  ;;  %v1471_v10 = vor.u32 1.1754944e-38, %v1470_v7 }
 0x1f5   : > { %v1427_v34 = vsel %vm1424_vm9, %v1426_v26, %v1422_v25  ;;  %v1433_v35 = vadd.f32 %v6980_v58, %v1432_v27  ;;  %v1446_v39 = vsub.f32 1.0, %v1445_v60  ;;  %vm1466_vm8 = vmor %vm1464_vm7, %vm1465_vm6 }
 0x1f6   : > { %v8685_v22 = vmul.f32 %v1427_v34, %v8546_v53  ;;  %v1460_v53 = vmul.f32 %v6984_v14, %v8667_v5 }
 0x1f7   : > { %v1447_v48 = vmul.f32 %v6982_v23, %v1446_v39  ;;  %v1437_v49 = vsel %vm8691_vm13, %v6980_v58, %v1433_v35 }
 0x1f8   : > { %v1442_v61 = vsel %vm1439_vm1, %v1441_v51, %v1437_v49  ;;  %v1461_v63 = vsub.f32 1.0, %v1460_v53 }
 0x1f9   : > { %v1448_v52 = vadd.f32 %v6982_v23, %v1447_v48  ;;  %v8706_v55 = vmul.f32 %v1442_v61, %v8565_v42  ;;  %v1468_v42 = vand.u32 2147483647, %v8667_v5  ;;  %v1142_v5 = vld [vmem:[#allocation2 + $0x60] sm:$0xff] }
 0x1fa   : > { %v1462_v0 = vmul.f32 %v6984_v14, %v1461_v63 }
 0x1fb   : > { %1594 = vadd.xlane.f32.xlu2 %v8685_v22  ;;  %v1452_v29 = vsel %vm1451_vm3, %v6982_v23, %v1448_v52  ;;  %vm1469_vm9 = vcmp.eq.f32.partialorder %v1468_v42, 8.507059e+37 }
 0x1fc   : > { %v1457_v62 = vsel %vm1454_vm5, %v1456_v59, %v1452_v29  ;;  %v1463_v2 = vadd.f32 %v6984_v14, %v1462_v0 }
 0x1fd   : > { %v8711_v1 = vmul.f32 %v1457_v62, %v8611_v32  ;;  %v1204_v32 = vpop.permute.xlu2 %1203 }
 0x1fe   : > { %v1467_v54 = vsel %vm1466_vm8, %v6984_v14, %v1463_v2  ;;  %v1237_v13 = vmul.f32 %v1204_v32, %v1141_v43 }
 0x1ff   : > { %v1472_v41 = vsel %vm1469_vm9, %v1471_v10, %v1467_v54 }
 0x200   : > { %1223 = vperm.xlu0 %6895, %v1129_v46   ;;  %v8718_v12 = vmul.f32 %v1472_v41, %v8614_v33  ;;  %v8722_v58 = vadd.f32 %v8465_v36, %v1237_v13  ;;  %v1236_v33 = vmul.f32 %v1199_v18, %v1140_v17  ;;  %v935_v46 = vlaneseq }
 0x202   : > { %v6378_v50 = vmul.f32 -1.442695, %v8722_v58  ;;  %v8730_v57 = vadd.f32 %v8465_v36, %v1236_v33  ;;  %v8747_v49 = vand.u32 127, %v935_v46 }
 0x203   : > { %1596 = vadd.xlane.f32.xlu2 %v8706_v55 }
 0x204   : > { %6985 = vpow2.f32 %v6378_v50  ;;  %v6377_v28 = vmul.f32 -1.442695, %v8730_v57  ;;  %vm937_vm10 = vcmp.lt.s32.totalorder %v8747_v49, 32 }
 0x205   : > { %v1209_v15 = vpop.permute.xlu2 %1208 }
 0x206   : > { %v1238_v16 = vmul.f32 %v1209_v15, %v1142_v5 }
 0x207   : > { %1218 = vperm.xlu1 %6896, %v1119_v19  }
 0x208   : > { %v8726_v20 = vadd.f32 %v8465_v36, %v1238_v16 }
 0x20a   : > { %v6379_v23 = vmul.f32 -1.442695, %v8726_v20  ;;  %v6986_v9 = vpop.eup %6985 }
 0x20b   : > { %1598 = vadd.xlane.f32.xlu2 %v8711_v1  ;;  %v1319_v27 = vadd.f32 1.0, %v6986_v9 }
 0x20c   : > { %6987 = vpow2.f32 %v6379_v23 }
 0x20d   : > { %v1214_v4 = vpop.permute.xlu2 %1213  ;;  %6989 = vrcp.f32 %v1319_v27  ;;  %vm1494_vm11 = vweird.f32 %v1319_v27  ;;  %v1500_v59 = vand.u32 2147483648, %v1319_v27  ;;  %v1498_v0 = vand.u32 2147483647, %v1319_v27 }
 0x20e   : > { %v1239_v26 = vmul.f32 %v1214_v4, %v1143_v11  ;;  %6991 = vpow2.f32 %v6377_v28 }
 0x20f   : > { %v1501_v41 = vor.u32 1.1754944e-38, %v1500_v59  ;;  %vm1499_vm14 = vcmp.eq.f32.partialorder %v1498_v0, 8.507059e+37 }
 0x210   : > { %v8734_v60 = vadd.f32 %v8465_v36, %v1239_v26 }
 0x212   : > { %v6380_v25 = vmul.f32 -1.442695, %v8734_v60  ;;  %v6988_v31 = vpop.eup %6987 }
 0x213   : > { %1600 = vadd.xlane.f32.xlu2 %v8718_v12  ;;  %v8737_v14 = vadd.f32 1.0, %v6988_v31  ;;  %v6990_v34 = vpop.eup %6989 }
 0x214   : > { %6993 = vpow2.f32 %v6380_v25  ;;  %v6992_v35 = vpop.eup %6991  ;;  %v1490_v38 = vmul.f32 %v6990_v34, %v1319_v27  ;;  %vm1495_vm12 = vweird.f32 %v6990_v34 }
 0x215   : > { %6995 = vrcp.f32 %v8737_v14  ;;  %v8740_v39 = vadd.f32 1.0, %v6992_v35  ;;  %vm8761_vm13 = vmor %vm1494_vm11, %vm1495_vm12  ;;  %vm1509_vm15 = vweird.f32 %v8737_v14  ;;  %v1515_v18 = vand.u32 2147483648, %v8737_v14 }
 0x216   : > { %v1491_v47 = vsub.f32 1.0, %v1490_v38  ;;  %v1513_v23 = vand.u32 2147483647, %v8737_v14 }
 0x217   : > { %6997 = vrcp.f32 %v8740_v39  ;;  %vm1479_vm4 = vweird.f32 %v8740_v39 }
 0x218   : > { %v1492_v51 = vmul.f32 %v6990_v34, %v1491_v47  ;;  %vm1514_vm2 = vcmp.eq.f32.partialorder %v1513_v23, 8.507059e+37 }
 0x21a   : > { %v6994_v45 = vpop.eup %6993  ;;  %v1493_v19 = vadd.f32 %v6990_v34, %v1492_v51 }
 0x21b   : > { %v8743_v37 = vadd.f32 1.0, %v6994_v45  ;;  %v8745_v48 = vpop.eup %6995 }
 0x21c   : > { %v1505_v6 = vmul.f32 %v8745_v48, %v8737_v14  ;;  %v1497_v43 = vsel %vm8761_vm13, %v6990_v34, %v1493_v19  ;;  %vm1510_vm0 = vweird.f32 %v8745_v48  ;;  %v1516_v14 = vor.u32 1.1754944e-38, %v1515_v18 }
 0x21d   : > { %6999 = vrcp.f32 %v8743_v37  ;;  %v8752_v61 = vpop.eup %6997  ;;  %v1502_v17 = vsel %vm1499_vm14, %v1501_v41, %v1497_v43  ;;  %vm8788_vm1 = vmor %vm1509_vm15, %vm1510_vm0  ;;  %vm1524_vm5 = vweird.f32 %v8743_v37 }
 0x21e   : > { %v1506_v62 = vsub.f32 1.0, %v1505_v6  ;;  %v1475_v42 = vmul.f32 %v8752_v61, %v8740_v39  ;;  %v8794_v31 = vmul.f32 %v1502_v17, %v8722_v58  ;;  %vm1480_vm3 = vweird.f32 %v8752_v61 }
 0x21f   : > { %vm1481_vm7 = vmor %vm1479_vm4, %vm1480_vm3 }
 0x220   : > { %v1507_v13 = vmul.f32 %v8745_v48, %v1506_v62  ;;  %v1476_v5 = vsub.f32 1.0, %v1475_v42 }
 0x222   : > { %v1508_v4 = vadd.f32 %v8745_v48, %v1507_v13  ;;  %v1477_v27 = vmul.f32 %v8752_v61, %v1476_v5  ;;  %v1144_v5 = vld [vmem:[#allocation2 + $0x78] sm:$0xff] }
 0x223   : > { %v8767_v54 = vpop.eup %6999 }
 0x224   : > { %v1520_v50 = vmul.f32 %v8767_v54, %v8743_v37  ;;  %v1512_v45 = vsel %vm8788_vm1, %v8745_v48, %v1508_v4  ;;  %v1478_v46 = vadd.f32 %v8752_v61, %v1477_v27  ;;  %vm1525_vm6 = vweird.f32 %v8767_v54 }
 0x225   : > { %v1517_v51 = vsel %vm1514_vm2, %v1516_v14, %v1512_v45  ;;  %vm8833_vm8 = vmor %vm1524_vm5, %vm1525_vm6 }
 0x226   : > { %v1521_v28 = vsub.f32 1.0, %v1520_v50 }
 0x228   : > { %v1522_v47 = vmul.f32 %v8767_v54, %v1521_v28 }
 0x256   : > { %v1587_v53 = vpop.xlane.xlu2 %1586 }
 0x257   : > { %v1616_v52 = vmul.f32 0.03125, %v1587_v53  ;;  %v1583_v56 = vpop.xlane.xlu0 %1582  ;;  %v1485_v53 = vand.u32 2147483648, %v8740_v39 }
 0x258   : > { %v1614_v44 = vmul.f32 0.03125, %v1583_v56  ;;  %v1482_v56 = vsel %vm1481_vm7, %v8752_v61, %v1478_v46 }
 0x259   : > { %v1632_v63 = vsub.f32 %v8582_v21, %v1616_v52  ;;  %v1530_v52 = vand.u32 2147483648, %v8743_v37  ;;  %v1486_v59 = vor.u32 1.1754944e-38, %v1485_v53 }
 0x25a   : > { %v1630_v29 = vsub.f32 %v8591_v24, %v1614_v44  ;;  %v1528_v44 = vand.u32 2147483647, %v8743_v37  ;;  %v1145_v37 = vld [vmem:[#allocation2 + $0x28] sm:$0xff] }
 0x25b   : > { %v8759_v2 = vsel %vm937_vm10, %v1632_v63, 0.0  ;;  %v8831_v63 = vmul.f32 %v1517_v51, %v8726_v20  ;;  %v1531_v62 = vor.u32 1.1754944e-38, %v1530_v52 }
 0x25c   : > { %v1666_v21 = vmul.f32 %v8759_v2, %v8759_v2  ;;  %v8773_v24 = vsel %vm937_vm10, %v1630_v29, 0.0  ;;  %vm1529_vm11 = vcmp.eq.f32.partialorder %v1528_v44, 8.507059e+37 }
 0x25d   : > { %v1664_v10 = vmul.f32 %v8773_v24, %v8773_v24 }
 0x25e   : > { %v1591_v32 = vpop.xlane.xlu2 %1590  ;;  %1684 = vadd.xlane.f32.xlu2 %v1666_v21 }
 0x25f   : > { %v1589_v15 = vpop.xlane.xlu0 %1588  ;;  %1680 = vadd.xlane.f32.xlu1 %v1664_v10  ;;  %v1618_v33 = vmul.f32 0.03125, %v1591_v32 }
 0x260   : > { %v1617_v16 = vmul.f32 0.03125, %v1589_v15 }
 0x261   : > { %v1585_v9 = vpop.xlane.xlu1 %1584  ;;  %v1634_v35 = vsub.f32 %v8618_v30, %v1618_v33 }
 0x262   : > { %v1633_v11 = vsub.f32 %v8638_v40, %v1617_v16  ;;  %v1615_v25 = vmul.f32 0.03125, %v1585_v9 }
 0x263   : > { %v8824_v6 = vsel %vm937_vm10, %v1634_v35, 0.0 }
 0x264   : > { %v8798_v34 = vsel %vm937_vm10, %v1633_v11, 0.0  ;;  %v1631_v38 = vsub.f32 %v8656_v3, %v1615_v25  ;;  %v1483_v3 = vand.u32 2147483647, %v8740_v39  ;;  %v1523_v39 = vadd.f32 %v8767_v54, %v1522_v47 }
 0x265   : > { %v1667_v40 = vmul.f32 %v8798_v34, %v8798_v34  ;;  %v1668_v19 = vmul.f32 %v8824_v6, %v8824_v6 }
 0x266   : > { %1604 = vadd.xlane.f32.xlu2 %v8794_v31  ;;  %v1593_v58 = vpop.xlane.xlu2 %1592  ;;  %v8813_v30 = vsel %vm937_vm10, %v1631_v38, 0.0  ;;  %vm1484_vm9 = vcmp.eq.f32.partialorder %v1483_v3, 8.507059e+37  ;;  %v1527_v20 = vsel %vm8833_vm8, %v8767_v54, %v1523_v39 }
 0x267   : > { %1686 = vadd.xlane.f32.xlu1 %v1667_v40  ;;  %v1665_v48 = vmul.f32 %v8813_v30, %v8813_v30  ;;  %v1619_v0 = vmul.f32 0.03125, %v1593_v58  ;;  %v1487_v61 = vsel %vm1484_vm9, %v1486_v59, %v1482_v56  ;;  %v1532_v41 = vsel %vm1529_vm11, %v1531_v62, %v1527_v20 }
 0x268   : > { %v8844_v42 = vmul.f32 %v1487_v61, %v8730_v57  ;;  %v8849_v43 = vmul.f32 %v1532_v41, %v8734_v60 }
 0x269   : > { %1682 = vadd.xlane.f32.xlu0 %v1665_v48  ;;  %v1635_v21 = vsub.f32 %v8660_v8, %v1619_v0 }
 0x26b   : > { %v8854_v54 = vsel %vm937_vm10, %v1635_v21, 0.0 }
 0x26c   : > { %v1669_v50 = vmul.f32 %v8854_v54, %v8854_v54 }
 0x26e   : > { %1606 = vadd.xlane.f32.xlu2 %v8831_v63  ;;  %v1595_v7 = vpop.xlane.xlu2 %1594 }
 0x26f   : > { %1688 = vadd.xlane.f32.xlu1 %v1668_v19  ;;  %v1620_v15 = vmul.f32 0.03125, %v1595_v7 }
 0x271   : > { %1602 = vadd.xlane.f32.xlu0 %v8844_v42  ;;  %v1636_v16 = vsub.f32 %v8685_v22, %v1620_v15 }
 0x272   : > { %v1224_v10 = vpop.permute.xlu0 %1223 }
 0x273   : > { %v1241_v32 = vmul.f32 %v1224_v10, %v1145_v37  ;;  %v8867_v4 = vsel %vm937_vm10, %v1636_v16, 0.0  ;;  %v6665_v16 = vld [vmem:[#allocation10 + $0x28] sm:$0xff] }
 0x275   : > { %v1259_v13 = vadd.f32 %v8465_v36, %v1241_v32 }
 0x276   : > { %v1597_v8 = vpop.xlane.xlu2 %1596 }
 0x277   : > { %1608 = vadd.xlane.f32.xlu1 %v8849_v43  ;;  %v6382_v57 = vmul.f32 -1.442695, %v1259_v13  ;;  %v1621_v60 = vmul.f32 0.03125, %v1597_v8  ;;  %v6666_v8 = vld [vmem:[#allocation10 + $0x30] sm:$0xff] }
 0x279   : > { %7001 = vpow2.f32 %v6382_v57  ;;  %v1219_v17 = vpop.permute.xlu1 %1218  ;;  %1690 = vadd.xlane.f32.xlu0 %v1669_v50  ;;  %v1637_v33 = vsub.f32 %v8706_v55, %v1621_v60  ;;  %v1670_v55 = vmul.f32 %v8867_v4, %v8867_v4 }
 0x27a   : > { %v1240_v18 = vmul.f32 %v1219_v17, %v1144_v5 }
 0x27b   : > { %v8863_v11 = vsel %vm937_vm10, %v1637_v33, 0.0 }
 0x27c   : > { %v1258_v23 = vadd.f32 %v8465_v36, %v1240_v18  ;;  %v1671_v22 = vmul.f32 %v8863_v11, %v8863_v11 }
 0x27e   : > { %v6381_v27 = vmul.f32 -1.442695, %v1258_v23  ;;  %v1599_v28 = vpop.xlane.xlu2 %1598  ;;  %1694 = vadd.xlane.f32.xlu2 %v1671_v22 }
 0x27f   : > { %v7002_v9 = vpop.eup %7001  ;;  %v1622_v25 = vmul.f32 0.03125, %v1599_v28 }
 0x280   : > { %v1323_v26 = vadd.f32 1.0, %v7002_v9 }
 0x281   : > { %1692 = vadd.xlane.f32.xlu0 %v1670_v55  ;;  %v1638_v40 = vsub.f32 %v8711_v1, %v1622_v25 }
 0x282   : > { %7003 = vrcp.f32 %v1323_v26  ;;  %v1560_v48 = vand.u32 2147483648, %v1323_v26  ;;  %v1558_v51 = vand.u32 2147483647, %v1323_v26  ;;  %vm1554_vm13 = vweird.f32 %v1323_v26 }
 0x283   : > { %7005 = vpow2.f32 %v6381_v27  ;;  %v8877_v36 = vsel %vm937_vm10, %v1638_v40, 0.0 }
 0x284   : > { %v1672_v14 = vmul.f32 %v8877_v36, %v8877_v36  ;;  %v1561_v44 = vor.u32 1.1754944e-38, %v1560_v48  ;;  %vm1559_vm15 = vcmp.eq.f32.partialorder %v1558_v51, 8.507059e+37  ;;  %v6662_v48 = vld [vmem:[#allocation10 + $0x10] sm:$0xff] }
 0x286   : > { %v1601_v45 = vpop.xlane.xlu2 %1600  ;;  %1696 = vadd.xlane.f32.xlu1 %v1672_v14  ;;  %v6663_v14 = vld [vmem:[#allocation10 + $0x18] sm:$0xff] }
 0x287   : > { %v1623_v46 = vmul.f32 0.03125, %v1601_v45 }
 0x288   : > { %v7004_v35 = vpop.eup %7003 }
 0x289   : > { %v7006_v38 = vpop.eup %7005  ;;  %v1550_v58 = vmul.f32 %v7004_v35, %v1323_v26  ;;  %v1639_v53 = vsub.f32 %v8718_v12, %v1623_v46  ;;  %vm1555_vm12 = vweird.f32 %v7004_v35 }
 0x28a   : > { %v1322_v47 = vadd.f32 1.0, %v7006_v38  ;;  %vm1556_vm14 = vmor %vm1554_vm13, %vm1555_vm12 }
 0x28b   : > { %v1551_v3 = vsub.f32 1.0, %v1550_v58  ;;  %v8884_v52 = vsel %vm937_vm10, %v1639_v53, 0.0 }
 0x28c   : > { %7007 = vrcp.f32 %v1322_v47  ;;  %v1673_v56 = vmul.f32 %v8884_v52, %v8884_v52  ;;  %v1545_v62 = vand.u32 2147483648, %v1322_v47  ;;  %v1543_v37 = vand.u32 2147483647, %v1322_v47 }
 0x28d   : > { %v1552_v1 = vmul.f32 %v7004_v35, %v1551_v3  ;;  %vm1539_vm1 = vweird.f32 %v1322_v47 }
 0x28e   : > { %1698 = vadd.xlane.f32.xlu0 %v1673_v56  ;;  %v1546_v21 = vor.u32 1.1754944e-38, %v1545_v62  ;;  %vm1544_vm3 = vcmp.eq.f32.partialorder %v1543_v37, 8.507059e+37 }
 0x28f   : > { %v1553_v39 = vadd.f32 %v7004_v35, %v1552_v1 }
 0x291   : > { %v1557_v59 = vsel %vm1556_vm14, %v7004_v35, %v1553_v39 }
 0x292   : > { %v7008_v12 = vpop.eup %7007  ;;  %v1562_v29 = vsel %vm1559_vm15, %v1561_v44, %v1557_v59 }
 0x293   : > { %v8888_v19 = vmul.f32 %v1562_v29, %v1259_v13  ;;  %v1535_v0 = vmul.f32 %v7008_v12, %v1322_v47  ;;  %vm1540_vm0 = vweird.f32 %v7008_v12  ;;  %v6667_v13 = vld [vmem:[#allocation10 + $0x38] sm:$0xff] }
 0x294   : > { %vm1541_vm2 = vmor %vm1539_vm1, %vm1540_vm0  ;;  %2028 = vmatpush.bf16.msra.mxu0 %v6667_v13  ;;  %6732 = vmatpush.bf16.msra.mxu2 %v6667_v13 }
 0x295   : > { %1612 = vadd.xlane.f32.xlu1 %v8888_v19  ;;  %v1536_v61 = vsub.f32 1.0, %v1535_v0 }
 0x297   : > { %v1537_v20 = vmul.f32 %v7008_v12, %v1536_v61 }
 0x298   : > { %2029 = vmatpush.bf16.msra.mxu0 %v6666_v8  ;;  %6733 = vmatpush.bf16.msra.mxu2 %v6666_v8 }
 0x299   : > { %v1538_v7 = vadd.f32 %v7008_v12, %v1537_v20 }
 0x29b   : > { %v1542_v10 = vsel %vm1541_vm2, %v7008_v12, %v1538_v7  ;;  %v6661_v12 = vld [vmem:[#allocation10 + $0x8] sm:$0xff] }
 0x29c   : > { %v1547_v41 = vsel %vm1544_vm3, %v1546_v21, %v1542_v10  ;;  %2030 = vmatpush.bf16.msra.mxu0 %v6665_v16  ;;  %6734 = vmatpush.bf16.msra.mxu2 %v6665_v16 }
 0x29d   : > { %v8891_v32 = vmul.f32 %v1547_v41, %v1258_v23  ;;  %v6664_v23 = vld [vmem:[#allocation10 + $0x20] sm:$0xff] }
 0x29f   : > { %1610 = vadd.xlane.f32.xlu2 %v8891_v32 }
 0x2a0   : > { %2031 = vmatpush.bf16.msra.mxu0 %v6664_v23  ;;  %6735 = vmatpush.bf16.msra.mxu2 %v6664_v23 }
 0x2a4   : > { %2032 = vmatpush.bf16.msra.mxu0 %v6663_v14  ;;  %6736 = vmatpush.bf16.msra.mxu2 %v6663_v14  ;;  %v8967_v14 = vld [vmem:[#allocation17 + $0x5] ss:$0 sm:$0xff] }
 0x2a8   : > { %2033 = vmatpush.bf16.msra.mxu0 %v6662_v48  ;;  %6737 = vmatpush.bf16.msra.mxu2 %v6662_v48 }
 0x2ac   : > { %2034 = vmatpush.bf16.msra.mxu0 %v6661_v12  ;;  %6738 = vmatpush.bf16.msra.mxu2 %v6661_v12 }
 0x2d1   : > { %v1685_v15 = vpop.xlane.xlu2 %1684 }
 0x2d2   : > { %v1681_v57 = vpop.xlane.xlu1 %1680  ;;  %v1714_v60 = vmul.f32 0.03125, %v1685_v15 }
 0x2d3   : > { %v1712_v5 = vmul.f32 0.03125, %v1681_v57 }
 0x2d4   : > { %v8900_v27 = vadd.f32 0.1, %v1714_v60 }
 0x2d5   : > { %v8894_v50 = vadd.f32 0.1, %v1712_v5  ;;  %v6660_v5 = vld [vmem:[#allocation10] sm:$0xff] }
 0x2d6   : > { %2035 = vmatpush.bf16.msra.mxu0 %v6660_v5  ;;  %6739 = vmatpush.bf16.msra.mxu2 %v6660_v5  ;;  %vm1770_vm15 = vweird.f32 %v8900_v27 }
 0x2d7   : > { %7009 = vrsqrt.f32 %v8894_v50  ;;  %vm1750_vm5 = vweird.f32 %v8894_v50 }
 0x2d9   : > { %v1605_v17 = vpop.xlane.xlu2 %1604 }
 0x2da   : > { %v1625_v18 = vmul.f32 0.03125, %v1605_v17  ;;  %v1687_v33 = vpop.xlane.xlu1 %1686 }
 0x2db   : > { %v1715_v9 = vmul.f32 0.03125, %v1687_v33 }
 0x2dc   : > { %v1641_v22 = vsub.f32 %v8794_v31, %v1625_v18  ;;  %v1683_v25 = vpop.xlane.xlu0 %1682 }
 0x2dd   : > { %v8898_v26 = vpop.eup %7009  ;;  %v8902_v28 = vadd.f32 0.1, %v1715_v9  ;;  %v1713_v35 = vmul.f32 0.03125, %v1683_v25 }
 0x2de   : > { %v1745_v55 = vmul.f32 %v8898_v26, %v8894_v50  ;;  %v8908_v40 = vsel %vm937_vm10, %v1641_v22, 0.0  ;;  %vm1751_vm4 = vweird.f32 %v8898_v26 }
 0x2df   : > { %7011 = vrsqrt.f32 %v8902_v28  ;;  %v1675_v38 = vmul.f32 %v8908_v40, %v8908_v40  ;;  %v8915_v45 = vadd.f32 0.1, %v1713_v35  ;;  %vm8946_vm6 = vmor %vm1750_vm5, %vm1751_vm4  ;;  %vm1780_vm13 = vweird.f32 %v8902_v28 }
 0x2e0   : > { %v1746_v31 = vmul.f32 %v8898_v26, %v1745_v55  ;;  %7013 = vrsqrt.f32 %v8900_v27 }
 0x2e1   : > { %v1607_v58 = vpop.xlane.xlu2 %1606  ;;  %1702 = vadd.xlane.f32.xlu2 %v1675_v38  ;;  %7015 = vrsqrt.f32 %v8915_v45  ;;  %vm1760_vm8 = vweird.f32 %v8915_v45 }
 0x2e2   : > { %v1626_v46 = vmul.f32 0.03125, %v1607_v58  ;;  %v1689_v47 = vpop.xlane.xlu1 %1688  ;;  %v1747_v3 = vmul.f32 0.5, %v1746_v31 }
 0x2e3   : > { %v1716_v37 = vmul.f32 0.03125, %v1689_v47 }
 0x2e4   : > { %v1642_v53 = vsub.f32 %v8831_v63, %v1626_v46  ;;  %v1603_v51 = vpop.xlane.xlu0 %1602  ;;  %v1748_v44 = vsub.f32 1.5, %v1747_v3  ;;  %v8972_v3 = vld [vmem:[#allocation17 + $0xa] ss:$0 sm:$0xff] }
 0x2e5   : > { %v8919_v1 = vpop.eup %7011  ;;  %v1624_v59 = vmul.f32 0.03125, %v1603_v51  ;;  %v8950_v60 = vadd.f32 0.1, %v1716_v37 }
 0x2e6   : > { %v8923_v56 = vsel %vm937_vm10, %v1642_v53, 0.0  ;;  %v8925_v39 = vpop.eup %7013  ;;  %v1775_v63 = vmul.f32 %v8919_v1, %v8902_v28  ;;  %v1749_v21 = vmul.f32 %v8898_v26, %v1748_v44  ;;  %vm1781_vm11 = vweird.f32 %v8919_v1 }
 0x2e7   : > { %v1676_v29 = vmul.f32 %v8923_v56, %v8923_v56  ;;  %v7016_v0 = vpop.eup %7015  ;;  %v1640_v61 = vsub.f32 %v8844_v42, %v1624_v59  ;;  %v1765_v62 = vmul.f32 %v8925_v39, %v8900_v27  ;;  %7017 = vrsqrt.f32 %v8950_v60  ;;  %vm1782_vm14 = vmor %vm1780_vm13, %vm1781_vm11 }
 0x2e8   : > { %v1755_v20 = vmul.f32 %v7016_v0, %v8915_v45  ;;  %v1776_v15 = vmul.f32 %v8919_v1, %v1775_v63  ;;  %v1753_v50 = vsel %vm8946_vm6, %v8898_v26, %v1749_v21  ;;  %vm1761_vm7 = vweird.f32 %v7016_v0 }
 0x2e9   : > { %1704 = vadd.xlane.f32.xlu1 %v1676_v29  ;;  %v8939_v10 = vsel %vm937_vm10, %v1640_v61, 0.0  ;;  %v1766_v18 = vmul.f32 %v8925_v39, %v1765_v62  ;;  %v1904_v25 = vmul.f32 %v1753_v50, %v8773_v24  ;;  %vm1762_vm9 = vmor %vm1760_vm8, %vm1761_vm7  ;;  %vm1771_vm12 = vweird.f32 %v8925_v39 }
 0x2ea   : > { %v1609_v7 = vpop.xlane.xlu1 %1608  ;;  %v1756_v42 = vmul.f32 %v7016_v0, %v1755_v20  ;;  %v1674_v13 = vmul.f32 %v8939_v10, %v8939_v10  ;;  %v1777_v9 = vmul.f32 0.5, %v1776_v15  ;;  %vm1772_vm0 = vmor %vm1770_vm15, %vm1771_vm12  ;;  %vm1790_vm4 = vweird.f32 %v8950_v60 }
 0x2eb   : > { %v1627_v41 = vmul.f32 0.03125, %v1609_v7  ;;  %v1767_v35 = vmul.f32 0.5, %v1766_v18  ;;  %v1921_v47 = vmul.f32 %v8967_v14, %v1904_v25 }
 0x2ec   : > { %v1757_v16 = vmul.f32 0.5, %v1756_v42  ;;  %1700 = vadd.xlane.f32.xlu0 %v1674_v13  ;;  %v1691_v17 = vpop.xlane.xlu0 %1690  ;;  %v1778_v45 = vsub.f32 1.5, %v1777_v9 }
 0x2ed   : > { %v1643_v57 = vsub.f32 %v8849_v43, %v1627_v41  ;;  %v1717_v33 = vmul.f32 0.03125, %v1691_v17  ;;  %v1768_v53 = vsub.f32 1.5, %v1767_v35  ;;  %v8975_v51 = vpop.eup %7017  ;;  %v8985_v29 = vadd.f32 %v8972_v3, %v1921_v47 }
 0x2ee   : > { %v1758_v23 = vsub.f32 1.5, %v1757_v16  ;;  %v1779_v12 = vmul.f32 %v8919_v1, %v1778_v45  ;;  %v1785_v61 = vmul.f32 %v8975_v51, %v8950_v60  ;;  %vm1791_vm2 = vweird.f32 %v8975_v51 }
 0x2ef   : > { %v8958_v43 = vsel %vm937_vm10, %v1643_v57, 0.0  ;;  %v8961_v22 = vadd.f32 0.1, %v1717_v33  ;;  %v1769_v63 = vmul.f32 %v8925_v39, %v1768_v53  ;;  %vm1792_vm6 = vmor %vm1790_vm4, %vm1791_vm2 }
 0x2f0   : > { %v1759_v55 = vmul.f32 %v7016_v0, %v1758_v23  ;;  %v1677_v26 = vmul.f32 %v8958_v43, %v8958_v43  ;;  %v1783_v21 = vsel %vm1782_vm14, %v8919_v1, %v1779_v12  ;;  %v1786_v13 = vmul.f32 %v8975_v51, %v1785_v61 }
 0x2f1   : > { %7019 = vrsqrt.f32 %v8961_v22  ;;  %v1695_v38 = vpop.xlane.xlu2 %1694  ;;  %v1773_v28 = vsel %vm1772_vm0, %v8925_v39, %v1769_v63  ;;  %v1907_v57 = vmul.f32 %v1783_v21, %v8798_v34  ;;  %vm1800_vm3 = vweird.f32 %v8961_v22 }
 0x2f2   : > { %v1763_v31 = vsel %vm1762_vm9, %v7016_v0, %v1759_v55  ;;  %v1719_v48 = vmul.f32 0.03125, %v1695_v38  ;;  %v1906_v1 = vmul.f32 %v1773_v28, %v8759_v2  ;;  %v1787_v5 = vmul.f32 0.5, %v1786_v13 }
 0x2f3   : > { %v1905_v58 = vmul.f32 %v1763_v31, %v8813_v30  ;;  %v1924_v16 = vmul.f32 %v8967_v14, %v1907_v57 }
 0x2f4   : > { %v1693_v46 = vpop.xlane.xlu0 %1692  ;;  %1706 = vadd.xlane.f32.xlu0 %v1677_v26  ;;  %v8994_v62 = vadd.f32 0.1, %v1719_v48  ;;  %v1923_v33 = vmul.f32 %v8967_v14, %v1906_v1  ;;  %v1788_v34 = vsub.f32 1.5, %v1787_v5 }
 0x2f5   : > { %v1922_v24 = vmul.f32 %v8967_v14, %v1905_v58  ;;  %v1718_v44 = vmul.f32 0.03125, %v1693_v46  ;;  %v9021_v25 = vadd.f32 %v8972_v3, %v1924_v16 }
 0x2f6   : > { %7021 = vrsqrt.f32 %v8994_v62  ;;  %v9027_v58 = vadd.f32 %v8972_v3, %v1923_v33  ;;  %v1789_v46 = vmul.f32 %v8975_v51, %v1788_v34  ;;  %vm1820_vm0 = vweird.f32 %v8994_v62 }
 0x2f7   : > { %v8977_v59 = vpop.eup %7019  ;;  %v8988_v0 = vadd.f32 %v8972_v3, %v1922_v24  ;;  %v8996_v20 = vadd.f32 0.1, %v1718_v44 }
 0x2f8   : > { %v1795_v30 = vmul.f32 %v8977_v59, %v8961_v22  ;;  %vm1801_vm1 = vweird.f32 %v8977_v59  ;;  %v1955_v48 = vpack.c.bf16 %v9021_v25, %v9027_v58  ;;  %v1793_v63 = vsel %vm1792_vm6, %v8975_v51, %v1789_v46 }
 0x2f9   : > { %v1954_v37 = vpack.c.bf16 %v8988_v0, %v8985_v29  ;;  %v1697_v7 = vpop.xlane.xlu1 %1696  ;;  %7023 = vrsqrt.f32 %v8996_v20  ;;  %vm1802_vm5 = vmor %vm1800_vm3, %vm1801_vm1  ;;  %vm1810_vm2 = vweird.f32 %v8996_v20 }
 0x2fa   : > { %v1796_v41 = vmul.f32 %v8977_v59, %v1795_v30  ;;  %v1720_v42 = vmul.f32 0.03125, %v1697_v7 }
 0x2fb   : > { %2036 = vmatmul.bf16.vlgmr.msra.gmra.mxu0 %v1954_v37 }
 0x2fc   : > { %v1736_v15 = vadd.f32 0.1, %v1720_v42  ;;  %v1797_v27 = vmul.f32 0.5, %v1796_v41  ;;  %v9012_v17 = vpop.eup %7021  ;;  %v1908_v41 = vmul.f32 %v1793_v63, %v8824_v6 }
 0x2fd   : > { %v1815_v2 = vmul.f32 %v9012_v17, %v8994_v62  ;;  %vm1821_vm12 = vweird.f32 %v9012_v17 }
 0x2fe   : > { %7025 = vrsqrt.f32 %v1736_v15  ;;  %v1798_v39 = vsub.f32 1.5, %v1797_v27  ;;  %vm1830_vm8 = vweird.f32 %v1736_v15  ;;  %v1925_v16 = vmul.f32 %v8967_v14, %v1908_v41  ;;  %vm1822_vm1 = vmor %vm1820_vm0, %vm1821_vm12 }
 0x2ff   : > { %v9014_v50 = vpop.eup %7023  ;;  %v1816_v44 = vmul.f32 %v9012_v17, %v1815_v2 }
 0x300   : > { %v1799_v35 = vmul.f32 %v8977_v59, %v1798_v39  ;;  %v1805_v31 = vmul.f32 %v9014_v50, %v8996_v20  ;;  %vm1811_vm14 = vweird.f32 %v9014_v50  ;;  %v9069_v34 = vadd.f32 %v8972_v3, %v1925_v16 }
 0x301   : > { %v1699_v8 = vpop.xlane.xlu0 %1698  ;;  %v1817_v7 = vmul.f32 0.5, %v1816_v44  ;;  %vm1812_vm3 = vmor %vm1810_vm2, %vm1811_vm14 }
 0x302   : > { %v1721_v18 = vmul.f32 0.03125, %v1699_v8  ;;  %v1803_v24 = vsel %vm1802_vm5, %v8977_v59, %v1799_v35  ;;  %v1806_v12 = vmul.f32 %v9014_v50, %v1805_v31 }
 0x303   : > { %v1909_v61 = vmul.f32 %v1803_v24, %v8854_v54  ;;  %v1818_v51 = vsub.f32 1.5, %v1817_v7 }
 0x304   : > { %v7026_v23 = vpop.eup %7025  ;;  %v1737_v9 = vadd.f32 0.1, %v1721_v18  ;;  %v1807_v21 = vmul.f32 0.5, %v1806_v12 }
 0x305   : > { %v1825_v55 = vmul.f32 %v7026_v23, %v1736_v15  ;;  %vm1831_vm7 = vweird.f32 %v7026_v23  ;;  %v1926_v1 = vmul.f32 %v8967_v14, %v1909_v61 }
 0x306   : > { %7027 = vrsqrt.f32 %v1737_v9  ;;  %vm1832_vm9 = vmor %vm1830_vm8, %vm1831_vm7  ;;  %v1808_v5 = vsub.f32 1.5, %v1807_v21  ;;  %vm1840_vm13 = vweird.f32 %v1737_v9 }
 0x307   : > { %v1826_v45 = vmul.f32 %v7026_v23, %v1825_v55  ;;  %v9062_v33 = vadd.f32 %v8972_v3, %v1926_v1 }
 0x308   : > { %v1613_v26 = vpop.xlane.xlu1 %1612 }
 0x309   : > { %v1629_v38 = vmul.f32 0.03125, %v1613_v26  ;;  %v1827_v53 = vmul.f32 0.5, %v1826_v45  ;;  %v1956_v55 = vpack.c.bf16 %v9062_v33, %v9069_v34 }
 0x30b   : > { %v1645_v47 = vsub.f32 %v8888_v19, %v1629_v38  ;;  %v1828_v19 = vsub.f32 1.5, %v1827_v53  ;;  %2041 = vmatmul.bf16.gmra.mxu0 %v1955_v48 }
 0x30c   : > { %v7028_v30 = vpop.eup %7027 }
 0x30d   : > { %v9043_v22 = vsel %vm937_vm10, %v1645_v47, 0.0  ;;  %v1829_v59 = vmul.f32 %v7026_v23, %v1828_v19  ;;  %v1835_v37 = vmul.f32 %v7028_v30, %v1737_v9  ;;  %vm1841_vm11 = vweird.f32 %v7028_v30 }
 0x30e   : > { %v1679_v60 = vmul.f32 %v9043_v22, %v9043_v22  ;;  %vm1842_vm15 = vmor %vm1840_vm13, %vm1841_vm11 }
 0x30f   : > { %v1836_v42 = vmul.f32 %v7028_v30, %v1835_v37  ;;  %v1833_v57 = vsel %vm1832_vm9, %v7026_v23, %v1829_v59  ;;  %v1809_v23 = vmul.f32 %v9014_v50, %v1808_v5 }
 0x310   : > { %1710 = vadd.xlane.f32.xlu1 %v1679_v60  ;;  %v1912_v6 = vmul.f32 %v1833_v57, %v8877_v36 }
 0x311   : > { %v1837_v27 = vmul.f32 0.5, %v1836_v42  ;;  %v1813_v26 = vsel %vm1812_vm3, %v9014_v50, %v1809_v23 }
 0x312   : > { %v1611_v28 = vpop.xlane.xlu2 %1610  ;;  %v1929_v2 = vmul.f32 %v8967_v14, %v1912_v6  ;;  %v1910_v38 = vmul.f32 %v1813_v26, %v8867_v4 }
 0x313   : > { %v1628_v13 = vmul.f32 0.03125, %v1611_v28  ;;  %v1838_v8 = vsub.f32 1.5, %v1837_v27 }
 0x314   : > { %v9082_v31 = vadd.f32 %v8972_v3, %v1929_v2 }
 0x315   : > { %v1644_v54 = vsub.f32 %v8891_v32, %v1628_v13  ;;  %v1839_v39 = vmul.f32 %v7028_v30, %v1838_v8  ;;  %v1819_v32 = vmul.f32 %v9012_v17, %v1818_v51 }
 0x317   : > { %v9057_v15 = vsel %vm937_vm10, %v1644_v54, 0.0  ;;  %v1843_v36 = vsel %vm1842_vm15, %v7028_v30, %v1839_v39  ;;  %v1823_v62 = vsel %vm1822_vm1, %v9012_v17, %v1819_v32  ;;  %v1927_v17 = vmul.f32 %v8967_v14, %v1910_v38 }
 0x318   : > { %v1678_v18 = vmul.f32 %v9057_v15, %v9057_v15  ;;  %v1913_v9 = vmul.f32 %v1843_v36, %v8884_v52  ;;  %v1911_v52 = vmul.f32 %v1823_v62, %v8863_v11 }
 0x319   : > { %v9094_v46 = vadd.f32 %v8972_v3, %v1927_v17 }
 0x31a   : > { %1708 = vadd.xlane.f32.xlu2 %v1678_v18  ;;  %v1930_v35 = vmul.f32 %v8967_v14, %v1913_v9  ;;  %v1928_v50 = vmul.f32 %v8967_v14, %v1911_v52 }
 0x31b   : > { %2046 = vmatmul.bf16.gmra.mxu0 %v1956_v55  ;;  %v9103_v55 = vld [vmem:[#allocation17 + $0x1] ss:$0 sm:$0xff] }
 0x31c   : > { %v9085_v20 = vadd.f32 %v8972_v3, %v1930_v35  ;;  %v9097_v47 = vadd.f32 %v8972_v3, %v1928_v50 }
 0x31e   : > { %v1958_v45 = vpack.c.bf16 %v9085_v20, %v9082_v31  ;;  %v1957_v53 = vpack.c.bf16 %v9097_v47, %v9094_v46 }
 0x320   : > { %2056 = vmatmul.bf16.vlgmr.msra.gmra.mxu2 %v1958_v45 }
 0x32b   : > { %2051 = vmatmul.bf16.gmra.mxu0 %v1957_v53 }
 0x354   : > { %v1703_v11 = vpop.xlane.xlu2 %1702 }
 0x355   : > { %v1723_v4 = vmul.f32 0.03125, %v1703_v11 }
 0x357   : > { %v1739_v48 = vadd.f32 0.1, %v1723_v4 }
 0x359   : > { %7029 = vrsqrt.f32 %v1739_v48  ;;  %vm1860_vm5 = vweird.f32 %v1739_v48 }
 0x35c   : > { %v1705_v24 = vpop.xlane.xlu1 %1704 }
 0x35d   : > { %v1724_v44 = vmul.f32 0.03125, %v1705_v24 }
 0x35f   : > { %v7030_v12 = vpop.eup %7029  ;;  %v1740_v19 = vadd.f32 0.1, %v1724_v44  ;;  %v1701_v30 = vpop.xlane.xlu0 %1700 }
 0x360   : > { %v1855_v60 = vmul.f32 %v7030_v12, %v1739_v48  ;;  %v1722_v63 = vmul.f32 0.03125, %v1701_v30  ;;  %vm1861_vm4 = vweird.f32 %v7030_v12 }
 0x361   : > { %7031 = vrsqrt.f32 %v1740_v19  ;;  %vm1862_vm6 = vmor %vm1860_vm5, %vm1861_vm4  ;;  %vm1870_vm15 = vweird.f32 %v1740_v19 }
 0x362   : > { %v1856_v61 = vmul.f32 %v7030_v12, %v1855_v60  ;;  %v1738_v59 = vadd.f32 0.1, %v1722_v63 }
 0x364   : > { %v1857_v37 = vmul.f32 0.5, %v1856_v61  ;;  %7033 = vrsqrt.f32 %v1738_v59  ;;  %vm1850_vm8 = vweird.f32 %v1738_v59 }
 0x366   : > { %v1858_v7 = vsub.f32 1.5, %v1857_v37 }
 0x367   : > { %v1707_v21 = vpop.xlane.xlu0 %1706  ;;  %v7032_v41 = vpop.eup %7031 }
 0x368   : > { %v1725_v42 = vmul.f32 0.03125, %v1707_v21  ;;  %v1859_v57 = vmul.f32 %v7030_v12, %v1858_v7  ;;  %v1865_v1 = vmul.f32 %v7032_v41, %v1740_v19  ;;  %vm1871_vm12 = vweird.f32 %v7032_v41 }
 0x369   : > { %vm1872_vm0 = vmor %vm1870_vm15, %vm1871_vm12 }
 0x36a   : > { %v7034_v28 = vpop.eup %7033  ;;  %v1741_v13 = vadd.f32 0.1, %v1725_v42  ;;  %v1863_v5 = vsel %vm1862_vm6, %v7030_v12, %v1859_v57  ;;  %v1866_v8 = vmul.f32 %v7032_v41, %v1865_v1 }
 0x36b   : > { %v1845_v27 = vmul.f32 %v7034_v28, %v1738_v59  ;;  %vm1851_vm7 = vweird.f32 %v7034_v28  ;;  %v1915_v39 = vmul.f32 %v1863_v5, %v8908_v40 }
 0x36c   : > { %7035 = vrsqrt.f32 %v1741_v13  ;;  %v1867_v32 = vmul.f32 0.5, %v1866_v8  ;;  %vm1852_vm9 = vmor %vm1850_vm8, %vm1851_vm7  ;;  %vm1880_vm13 = vweird.f32 %v1741_v13 }
 0x36d   : > { %v1846_v51 = vmul.f32 %v7034_v28, %v1845_v27  ;;  %v1932_v62 = vmul.f32 %v8967_v14, %v1915_v39 }
 0x36e   : > { %v1868_v26 = vsub.f32 1.5, %v1867_v32 }
 0x36f   : > { %v1847_v54 = vmul.f32 0.5, %v1846_v51  ;;  %v9112_v50 = vadd.f32 %v8972_v3, %v1932_v62 }
 0x371   : > { %v1848_v16 = vsub.f32 1.5, %v1847_v54 }
 0x372   : > { %v7036_v6 = vpop.eup %7035 }
 0x373   : > { %v1849_v18 = vmul.f32 %v7034_v28, %v1848_v16  ;;  %v1875_v23 = vmul.f32 %v7036_v6, %v1741_v13  ;;  %vm1881_vm11 = vweird.f32 %v7036_v6 }
 0x374   : > { %vm1882_vm14 = vmor %vm1880_vm13, %vm1881_vm11 }
 0x375   : > { %v1853_v36 = vsel %vm1852_vm9, %v7034_v28, %v1849_v18  ;;  %v1876_v9 = vmul.f32 %v7036_v6, %v1875_v23 }
 0x376   : > { %v1914_v2 = vmul.f32 %v1853_v36, %v8939_v10  ;;  %v1869_v10 = vmul.f32 %v7032_v41, %v1868_v26 }
 0x377   : > { %v1877_v35 = vmul.f32 0.5, %v1876_v9 }
 0x378   : > { %v1931_v52 = vmul.f32 %v8967_v14, %v1914_v2  ;;  %v2037_v40 = vpop.f32.mrf.mxu0  ;;  %v1873_v44 = vsel %vm1872_vm0, %v7032_v41, %v1869_v10 }
 0x379   : > { %v1878_v38 = vsub.f32 1.5, %v1877_v35  ;;  %v2038_v45 = vadd.f32 %v9103_v55, %v2037_v40  ;;  %v1916_v63 = vmul.f32 %v1873_v44, %v8923_v56 }
 0x37a   : > { %v9109_v17 = vadd.f32 %v8972_v3, %v1931_v52 }
 0x37b   : > { %v1879_v53 = vmul.f32 %v7036_v6, %v1878_v38  ;;  %v9115_v11 = vadd.f32 %v2038_v45, %v8985_v29 }
 0x37c   : > { %v1959_v4 = vpack.c.bf16 %v9112_v50, %v9109_v17 }
 0x37d   : > { %v1883_v48 = vsel %vm1882_vm14, %v7036_v6, %v1879_v53  ;;  %v6415_v24 = vmul.f32 -1.442695, %v9115_v11 }
 0x37e   : > { %2061 = vmatmul.bf16.gmra.mxu2 %v1959_v4  ;;  %v1917_v12 = vmul.f32 %v1883_v48, %v8958_v43  ;;  %v1933_v43 = vmul.f32 %v8967_v14, %v1916_v63 }
 0x37f   : > { %7037 = vpow2.f32 %v6415_v24 }
 0x380   : > { %v2039_v60 = vpop.f32.mrf.mxu0  ;;  %v1934_v7 = vmul.f32 %v8967_v14, %v1917_v12  ;;  %v9137_v57 = vadd.f32 %v8972_v3, %v1933_v43 }
 0x381   : > { %v2040_v61 = vadd.f32 %v9103_v55, %v2039_v60 }
 0x382   : > { %v9133_v56 = vadd.f32 %v8972_v3, %v1934_v7 }
 0x383   : > { %v1711_v30 = vpop.xlane.xlu1 %1710  ;;  %v9124_v37 = vadd.f32 %v2040_v61, %v8988_v0 }
 0x384   : > { %v1727_v59 = vmul.f32 0.03125, %v1711_v30  ;;  %v1960_v54 = vpack.c.bf16 %v9133_v56, %v9137_v57 }
 0x385   : > { %v7038_v21 = vpop.eup %7037  ;;  %v6416_v41 = vmul.f32 -1.442695, %v9124_v37 }
 0x386   : > { %v9126_v19 = vadd.f32 0.1, %v1727_v59  ;;  %v2141_v42 = vadd.f32 1.0, %v7038_v21 }
 0x388   : > { %7039 = vrsqrt.f32 %v9126_v19  ;;  %v2042_v28 = vpop.f32.mrf.mxu0  ;;  %v2166_v35 = vand.u32 2147483647, %v2141_v42  ;;  %v2168_v52 = vand.u32 2147483648, %v2141_v42  ;;  %vm2162_vm2 = vweird.f32 %v2141_v42 }
 0x389   : > { %7041 = vpow2.f32 %v6416_v41  ;;  %v2043_v13 = vadd.f32 %v9103_v55, %v2042_v28  ;;  %vm1900_vm6 = vweird.f32 %v9126_v19 }
 0x38a   : > { %7043 = vrcp.f32 %v2141_v42  ;;  %vm2167_vm5 = vcmp.eq.f32.partialorder %v2166_v35, 8.507059e+37  ;;  %v2169_v44 = vor.u32 1.1754944e-38, %v2168_v52 }
 0x38b   : > { %v9142_v51 = vadd.f32 %v2043_v13, %v9027_v58 }
 0x38d   : > { %v1709_v27 = vpop.xlane.xlu2 %1708  ;;  %v6417_v6 = vmul.f32 -1.442695, %v9142_v51 }
 0x38e   : > { %v9139_v1 = vpop.eup %7039  ;;  %v1726_v5 = vmul.f32 0.03125, %v1709_v27  ;;  %2066 = vmatmul.bf16.gmra.mxu2 %v1960_v54 }
 0x38f   : > { %v1895_v8 = vmul.f32 %v9139_v1, %v9126_v19  ;;  %v7042_v16 = vpop.eup %7041  ;;  %7045 = vpow2.f32 %v6417_v6  ;;  %vm1901_vm3 = vweird.f32 %v9139_v1 }
 0x390   : > { %v9149_v39 = vadd.f32 0.1, %v1726_v5  ;;  %v7044_v18 = vpop.eup %7043  ;;  %v9151_v32 = vadd.f32 1.0, %v7042_v16  ;;  %v2044_v2 = vpop.f32.mrf.mxu0  ;;  %vm1902_vm7 = vmor %vm1900_vm6, %vm1901_vm3 }
 0x391   : > { %v1896_v23 = vmul.f32 %v9139_v1, %v1895_v8  ;;  %v2158_v36 = vmul.f32 %v7044_v18, %v2141_v42  ;;  %v2045_v62 = vadd.f32 %v9103_v55, %v2044_v2  ;;  %vm2163_vm1 = vweird.f32 %v7044_v18 }
 0x392   : > { %7047 = vrcp.f32 %v9151_v32  ;;  %vm2164_vm4 = vmor %vm2162_vm2, %vm2163_vm1  ;;  %v2183_v42 = vand.u32 2147483648, %v9151_v32  ;;  %v2181_v19 = vand.u32 2147483647, %v9151_v32  ;;  %vm2177_vm9 = vweird.f32 %v9151_v32 }
 0x393   : > { %v1897_v9 = vmul.f32 0.5, %v1896_v23  ;;  %7049 = vrsqrt.f32 %v9149_v39  ;;  %v2159_v26 = vsub.f32 1.0, %v2158_v36  ;;  %v9158_v40 = vadd.f32 %v2045_v62, %v9021_v25 }
 0x394   : > { %v2184_v6 = vor.u32 1.1754944e-38, %v2183_v42  ;;  %vm2182_vm13 = vcmp.eq.f32.partialorder %v2181_v19, 8.507059e+37  ;;  %vm1890_vm14 = vweird.f32 %v9149_v39 }
 0x395   : > { %v1898_v38 = vsub.f32 1.5, %v1897_v9  ;;  %v2160_v45 = vmul.f32 %v7044_v18, %v2159_v26  ;;  %v7046_v10 = vpop.eup %7045  ;;  %v6418_v53 = vmul.f32 -1.442695, %v9158_v40 }
 0x396   : > { %v9162_v24 = vadd.f32 1.0, %v7046_v10 }
 0x397   : > { %v2161_v4 = vadd.f32 %v7044_v18, %v2160_v45  ;;  %v1899_v60 = vmul.f32 %v9139_v1, %v1898_v38  ;;  %7051 = vpow2.f32 %v6418_v53 }
 0x398   : > { %v7048_v48 = vpop.eup %7047  ;;  %7053 = vrcp.f32 %v9162_v24  ;;  %v2047_v59 = vpop.f32.mrf.mxu0  ;;  %v2196_v10 = vand.u32 2147483647, %v9162_v24  ;;  %v2198_v53 = vand.u32 2147483648, %v9162_v24  ;;  %vm2192_vm1 = vweird.f32 %v9162_v24 }
 0x399   : > { %v7050_v12 = vpop.eup %7049  ;;  %v2165_v30 = vsel %vm2164_vm4, %v7044_v18, %v2161_v4  ;;  %v2173_v63 = vmul.f32 %v7048_v48, %v9151_v32  ;;  %v2048_v21 = vadd.f32 %v9103_v55, %v2047_v59  ;;  %v1903_v13 = vsel %vm1902_vm7, %v9139_v1, %v1899_v60 }
 0x39a   : > { %v1885_v61 = vmul.f32 %v7050_v12, %v9149_v39  ;;  %v2170_v7 = vsel %vm2167_vm5, %v2169_v44, %v2165_v30  ;;  %vm2178_vm8 = vweird.f32 %v7048_v48  ;;  %v1919_v23 = vmul.f32 %v1903_v13, %v9043_v22 }
 0x39b   : > { %v9171_v41 = vmul.f32 %v2170_v7, %v9115_v11  ;;  %v2174_v43 = vsub.f32 1.0, %v2173_v63  ;;  %v9179_v27 = vadd.f32 %v2048_v21, %v9069_v34  ;;  %vm1891_vm11 = vweird.f32 %v7050_v12  ;;  %vm2179_vm12 = vmor %vm2177_vm9, %vm2178_vm8 }
 0x39c   : > { %v1886_v28 = vmul.f32 %v7050_v12, %v1885_v61  ;;  %vm1892_vm15 = vmor %vm1890_vm14, %vm1891_vm11  ;;  %v1936_v45 = vmul.f32 %v8967_v14, %v1919_v23  ;;  %vm2197_vm3 = vcmp.eq.f32.partialorder %v2196_v10, 8.507059e+37  ;;  %v2199_v59 = vor.u32 1.1754944e-38, %v2198_v53 }
 0x39d   : > { %2415 = vadd.xlane.f32.xlu0 %v9171_v41  ;;  %v2175_v5 = vmul.f32 %v7048_v48, %v2174_v43  ;;  %v7052_v54 = vpop.eup %7051  ;;  %v6419_v8 = vmul.f32 -1.442695, %v9179_v27 }
 0x39e   : > { %v1887_v11 = vmul.f32 0.5, %v1886_v28  ;;  %v7054_v18 = vpop.eup %7053  ;;  %v9185_v1 = vadd.f32 1.0, %v7052_v54 }
 0x39f   : > { %v2176_v16 = vadd.f32 %v7048_v48, %v2175_v5  ;;  %7055 = vpow2.f32 %v6419_v8  ;;  %v2188_v2 = vmul.f32 %v7054_v18, %v9162_v24  ;;  %vm2193_vm0 = vweird.f32 %v7054_v18 }
 0x3a0   : > { %v1888_v36 = vsub.f32 1.5, %v1887_v11  ;;  %7057 = vrcp.f32 %v9185_v1  ;;  %v2049_v32 = vpop.f32.mrf.mxu0  ;;  %vm2194_vm2 = vmor %vm2192_vm1, %vm2193_vm0  ;;  %v2213_v5 = vand.u32 2147483648, %v9185_v1  ;;  %v2211_v8 = vand.u32 2147483647, %v9185_v1 }
 0x3a1   : > { %v2180_v9 = vsel %vm2179_vm12, %v7048_v48, %v2176_v16  ;;  %v2050_v22 = vadd.f32 %v9103_v55, %v2049_v32  ;;  %v2189_v52 = vsub.f32 1.0, %v2188_v2  ;;  %vm2207_vm5 = vweird.f32 %v9185_v1 }
 0x3a2   : > { %v1889_v62 = vmul.f32 %v7050_v12, %v1888_v36  ;;  %v2185_v26 = vsel %vm2182_vm13, %v2184_v6, %v2180_v9  ;;  %v2214_v2 = vor.u32 1.1754944e-38, %v2213_v5  ;;  %vm2212_vm7 = vcmp.eq.f32.partialorder %v2211_v8, 8.507059e+37 }
 0x3a3   : > { %v9192_v35 = vmul.f32 %v2185_v26, %v9124_v37  ;;  %v9199_v4 = vadd.f32 %v2050_v22, %v9062_v33  ;;  %v9202_v48 = vpop.f32.mrf.mxu2  ;;  %v2190_v44 = vmul.f32 %v7054_v18, %v2189_v52 }
 0x3a4   : > { %v1893_v38 = vsel %vm1892_vm15, %v7050_v12, %v1889_v62 }
 0x3a5   : > { %v1918_v39 = vmul.f32 %v1893_v38, %v9057_v15  ;;  %2417 = vadd.xlane.f32.xlu2 %v9192_v35  ;;  %v7056_v37 = vpop.eup %7055  ;;  %v6420_v12 = vmul.f32 -1.442695, %v9199_v4  ;;  %v2191_v30 = vadd.f32 %v7054_v18, %v2190_v44  ;;  %v9208_v15 = vadd.f32 %v8972_v3, %v1936_v45 }
 0x3a6   : > { %v7058_v63 = vpop.eup %7057  ;;  %v2145_v61 = vadd.f32 1.0, %v7056_v37 }
 0x3a7   : > { %v1935_v60 = vmul.f32 %v8967_v14, %v1918_v39  ;;  %7059 = vpow2.f32 %v6420_v12  ;;  %v2195_v21 = vsel %vm2194_vm2, %v7054_v18, %v2191_v30  ;;  %v2203_v43 = vmul.f32 %v7058_v63, %v9185_v1 }
 0x3a8   : > { %7061 = vrcp.f32 %v2145_v61  ;;  %v2052_v14 = vpop.f32.mrf.mxu0  ;;  %v2200_v42 = vsel %vm2197_vm3, %v2199_v59, %v2195_v21  ;;  %vm2208_vm4 = vweird.f32 %v7058_v63  ;;  %v2228_v1 = vand.u32 2147483648, %v2145_v61 }
 0x3a9   : > { %v9211_v7 = vadd.f32 %v8972_v3, %v1935_v60  ;;  %v2053_v24 = vadd.f32 %v9103_v55, %v2052_v14  ;;  %v9218_v19 = vmul.f32 %v2200_v42, %v9142_v51  ;;  %v2204_v13 = vsub.f32 1.0, %v2203_v43  ;;  %vm2209_vm6 = vmor %vm2207_vm5, %vm2208_vm4 }
 0x3aa   : > { %v2226_v10 = vand.u32 2147483647, %v2145_v61  ;;  %vm2222_vm9 = vweird.f32 %v2145_v61  ;;  %v2229_v12 = vor.u32 1.1754944e-38, %v2228_v1 }
 0x3ab   : > { %v1961_v28 = vpack.c.bf16 %v9208_v15, %v9211_v7  ;;  %v9222_v3 = vadd.f32 %v2053_v24, %v9094_v46  ;;  %2419 = vadd.xlane.f32.xlu1 %v9218_v19  ;;  %v2059_v11 = vpop.f32.mrf.mxu2  ;;  %v2205_v54 = vmul.f32 %v7058_v63, %v2204_v13 }
 0x3ac   : > { %v2060_v16 = vadd.f32 %v9103_v55, %v2059_v11  ;;  %vm2227_vm12 = vcmp.eq.f32.partialorder %v2226_v10, 8.507059e+37 }
 0x3ad   : > { %2071 = vmatmul.bf16.gmra.mxu2 %v1961_v28  ;;  %v7060_v6 = vpop.eup %7059  ;;  %v6421_v51 = vmul.f32 -1.442695, %v9222_v3  ;;  %v2206_v18 = vadd.f32 %v7058_v63, %v2205_v54 }
 0x3ae   : > { %v7062_v23 = vpop.eup %7061  ;;  %v2146_v36 = vadd.f32 1.0, %v7060_v6  ;;  %v9230_v9 = vadd.f32 %v2060_v16, %v9085_v20 }
 0x3af   : > { %7063 = vpow2.f32 %v6421_v51  ;;  %v2210_v62 = vsel %vm2209_vm6, %v7058_v63, %v2206_v18  ;;  %v2218_v32 = vmul.f32 %v7062_v23, %v2145_v61  ;;  %vm2223_vm8 = vweird.f32 %v7062_v23 }
 0x3b0   : > { %7065 = vrcp.f32 %v2146_v36  ;;  %v6424_v26 = vmul.f32 -1.442695, %v9230_v9  ;;  %v2215_v22 = vsel %vm2212_vm7, %v2214_v2, %v2210_v62  ;;  %vm2224_vm11 = vmor %vm2222_vm9, %vm2223_vm8  ;;  %v2243_v14 = vand.u32 2147483648, %v2146_v36 }
 0x3b1   : > { %v9234_v52 = vmul.f32 %v2215_v22, %v9158_v40  ;;  %v2219_v38 = vsub.f32 1.0, %v2218_v32  ;;  %v2241_v42 = vand.u32 2147483647, %v2146_v36  ;;  %vm2237_vm14 = vweird.f32 %v2146_v36 }
 0x3b2   : > { %7067 = vpow2.f32 %v6424_v26  ;;  %v2244_v13 = vor.u32 1.1754944e-38, %v2243_v14 }
 0x3b3   : > { %2421 = vadd.xlane.f32.xlu0 %v9234_v52  ;;  %v2220_v45 = vmul.f32 %v7062_v23, %v2219_v38  ;;  %vm2242_vm0 = vcmp.eq.f32.partialorder %v2241_v42, 8.507059e+37 }
 0x3b5   : > { %v7064_v53 = vpop.eup %7063  ;;  %v2221_v39 = vadd.f32 %v7062_v23, %v2220_v45 }
 0x3b6   : > { %v7066_v44 = vpop.eup %7065  ;;  %v2147_v37 = vadd.f32 1.0, %v7064_v53 }
 0x3b7   : > { %v2225_v60 = vsel %vm2224_vm11, %v7062_v23, %v2221_v39  ;;  %v2233_v30 = vmul.f32 %v7066_v44, %v2146_v36  ;;  %vm2238_vm13 = vweird.f32 %v7066_v44 }
 0x3b8   : > { %v7068_v40 = vpop.eup %7067  ;;  %7069 = vrcp.f32 %v2147_v37  ;;  %v2230_v63 = vsel %vm2227_vm12, %v2229_v12, %v2225_v60  ;;  %vm2239_vm15 = vmor %vm2237_vm14, %vm2238_vm13  ;;  %v2258_v6 = vand.u32 2147483648, %v2147_v37  ;;  %v2256_v23 = vand.u32 2147483647, %v2147_v37 }
 0x3b9   : > { %v2150_v59 = vadd.f32 1.0, %v7068_v40  ;;  %v9238_v21 = vmul.f32 %v2230_v63, %v9179_v27  ;;  %v2234_v43 = vsub.f32 1.0, %v2233_v30  ;;  %vm2252_vm2 = vweird.f32 %v2147_v37 }
 0x3ba   : > { %v2259_v62 = vor.u32 1.1754944e-38, %v2258_v6  ;;  %vm2257_vm4 = vcmp.eq.f32.partialorder %v2256_v23, 8.507059e+37  ;;  %v2058_v60 = vadd.f32 %v9103_v55, %v9202_v48 }
 0x3bb   : > { %7071 = vrcp.f32 %v2150_v59  ;;  %2423 = vadd.xlane.f32.xlu2 %v9238_v21  ;;  %v2235_v61 = vmul.f32 %v7066_v44, %v2234_v43  ;;  %v2303_v38 = vand.u32 2147483648, %v2150_v59  ;;  %vm2297_vm6 = vweird.f32 %v2150_v59 }
 0x3bc   : > { %v2301_v45 = vand.u32 2147483647, %v2150_v59  ;;  %v9261_v40 = vadd.f32 %v2058_v60, %v9082_v31 }
 0x3bd   : > { %v2236_v24 = vadd.f32 %v7066_v44, %v2235_v61  ;;  %v2304_v53 = vor.u32 1.1754944e-38, %v2303_v38 }
 0x3be   : > { %v7070_v28 = vpop.eup %7069  ;;  %vm2302_vm8 = vcmp.eq.f32.partialorder %v2301_v45, 8.507059e+37 }
 0x3bf   : > { %v2240_v5 = vsel %vm2239_vm15, %v7066_v44, %v2236_v24  ;;  %v2248_v11 = vmul.f32 %v7070_v28, %v2147_v37  ;;  %vm2253_vm1 = vweird.f32 %v7070_v28  ;;  %v2054_v37 = vpop.f32.mrf.mxu0 }
 0x3c0   : > { %v2245_v54 = vsel %vm2242_vm0, %v2244_v13, %v2240_v5  ;;  %vm2254_vm3 = vmor %vm2252_vm2, %vm2253_vm1  ;;  %v2055_v12 = vadd.f32 %v9103_v55, %v2054_v37 }
 0x3c1   : > { %v7072_v8 = vpop.eup %7071  ;;  %v9242_v27 = vmul.f32 %v2245_v54, %v9199_v4  ;;  %v2249_v16 = vsub.f32 1.0, %v2248_v11 }
 0x3c2   : > { %v2293_v51 = vmul.f32 %v7072_v8, %v2150_v59  ;;  %vm2298_vm5 = vweird.f32 %v7072_v8 }
 0x3c3   : > { %2425 = vadd.xlane.f32.xlu1 %v9242_v27  ;;  %v2250_v18 = vmul.f32 %v7070_v28, %v2249_v16  ;;  %vm2299_vm7 = vmor %vm2297_vm6, %vm2298_vm5 }
 0x3c4   : > { %v2294_v36 = vsub.f32 1.0, %v2293_v51 }
 0x3c5   : > { %v2251_v2 = vadd.f32 %v7070_v28, %v2250_v18 }
 0x3c6   : > { %v2295_v32 = vmul.f32 %v7072_v8, %v2294_v36 }
 0x3c7   : > { %v2255_v26 = vsel %vm2254_vm3, %v7070_v28, %v2251_v2 }
 0x3c8   : > { %v2260_v22 = vsel %vm2257_vm4, %v2259_v62, %v2255_v26  ;;  %v2296_v4 = vadd.f32 %v7072_v8, %v2295_v32 }
 0x3c9   : > { %v9246_v1 = vmul.f32 %v2260_v22, %v9222_v3  ;;  %v9255_v3 = vadd.f32 %v2055_v12, %v9097_v47 }
 0x3ca   : > { %v2300_v10 = vsel %vm2299_vm7, %v7072_v8, %v2296_v4 }
 0x3cb   : > { %2427 = vadd.xlane.f32.xlu1 %v9246_v1  ;;  %v2305_v39 = vsel %vm2302_vm8, %v2304_v53, %v2300_v10  ;;  %v6422_v30 = vmul.f32 -1.442695, %v9255_v3 }
 0x3cc   : > { %v9250_v44 = vmul.f32 %v2305_v39, %v9230_v9  ;;  %v6423_v9 = vmul.f32 -1.442695, %v9261_v40 }
 0x3cd   : > { %7073 = vpow2.f32 %v6422_v30 }
 0x3ce   : > { %7075 = vpow2.f32 %v6423_v9 }
 0x3d3   : > { %2433 = vadd.xlane.f32.xlu1 %v9250_v44  ;;  %v7074_v63 = vpop.eup %7073 }
 0x3d4   : > { %v2148_v59 = vadd.f32 1.0, %v7074_v63  ;;  %v7076_v43 = vpop.eup %7075 }
 0x3d5   : > { %v9264_v61 = vadd.f32 1.0, %v7076_v43 }
 0x3d6   : > { %7077 = vrcp.f32 %v2148_v59  ;;  %v2273_v53 = vand.u32 2147483648, %v2148_v59  ;;  %vm2267_vm11 = vweird.f32 %v2148_v59  ;;  %v2271_v37 = vand.u32 2147483647, %v2148_v59 }
 0x3d7   : > { %7079 = vrcp.f32 %v9264_v61  ;;  %vm2282_vm0 = vweird.f32 %v9264_v61 }
 0x3d8   : > { %vm2272_vm13 = vcmp.eq.f32.partialorder %v2271_v37, 8.507059e+37 }
 0x3dc   : > { %v7078_v24 = vpop.eup %7077 }
 0x3dd   : > { %v2263_v13 = vmul.f32 %v7078_v24, %v2148_v59  ;;  %v9273_v8 = vpop.eup %7079  ;;  %vm2268_vm9 = vweird.f32 %v7078_v24  ;;  %v2274_v59 = vor.u32 1.1754944e-38, %v2273_v53 }
 0x3de   : > { %v2278_v2 = vmul.f32 %v9273_v8, %v9264_v61  ;;  %vm9296_vm12 = vmor %vm2267_vm11, %vm2268_vm9  ;;  %vm2283_vm14 = vweird.f32 %v9273_v8 }
 0x3df   : > { %v2264_v54 = vsub.f32 1.0, %v2263_v13  ;;  %vm9330_vm2 = vmor %vm2282_vm0, %vm2283_vm14 }
 0x3e0   : > { %v2279_v38 = vsub.f32 1.0, %v2278_v2 }
 0x3e1   : > { %v2265_v36 = vmul.f32 %v7078_v24, %v2264_v54 }
 0x3e3   : > { %v2266_v4 = vadd.f32 %v7078_v24, %v2265_v36 }
 0x3e5   : > { %v2270_v43 = vsel %vm9296_vm12, %v7078_v24, %v2266_v4 }
 0x401   : > { %v2062_v14 = vpop.f32.mrf.mxu2 }
 0x402   : > { %v2063_v42 = vadd.f32 %v9103_v55, %v2062_v14  ;;  %v2280_v14 = vmul.f32 %v9273_v8, %v2279_v38 }
 0x404   : > { %v9268_v48 = vadd.f32 %v2063_v42, %v9109_v17  ;;  %v2281_v36 = vadd.f32 %v9273_v8, %v2280_v14 }
 0x406   : > { %v6425_v28 = vmul.f32 -1.442695, %v9268_v48 }
 0x408   : > { %7081 = vpow2.f32 %v6425_v28 }
 0x409   : > { %v2064_v5 = vpop.f32.mrf.mxu2 }
 0x40a   : > { %v2065_v11 = vadd.f32 %v9103_v55, %v2064_v5  ;;  %v2288_v5 = vand.u32 2147483648, %v9264_v61 }
 0x40c   : > { %v9276_v16 = vadd.f32 %v2065_v11, %v9112_v50  ;;  %v2289_v37 = vor.u32 1.1754944e-38, %v2288_v5 }
 0x40e   : > { %v7082_v6 = vpop.eup %7081  ;;  %v6426_v51 = vmul.f32 -1.442695, %v9276_v16 }
 0x40f   : > { %v9279_v18 = vadd.f32 1.0, %v7082_v6  ;;  %v2275_v6 = vsel %vm2272_vm13, %v2274_v59, %v2270_v43 }
 0x410   : > { %v2416_v23 = vpop.xlane.xlu0 %2415  ;;  %7083 = vpow2.f32 %v6426_v51 }
 0x411   : > { %v2447_v62 = vmul.f32 0.03125, %v2416_v23  ;;  %7085 = vrcp.f32 %v9279_v18  ;;  %v2067_v32 = vpop.f32.mrf.mxu2  ;;  %v2316_v24 = vand.u32 2147483647, %v9279_v18  ;;  %v2318_v23 = vand.u32 2147483648, %v9279_v18 }
 0x412   : > { %v2068_v22 = vadd.f32 %v9103_v55, %v2067_v32  ;;  %vm2312_vm1 = vweird.f32 %v9279_v18 }
 0x413   : > { %v2463_v26 = vsub.f32 %v9171_v41, %v2447_v62  ;;  %vm2317_vm4 = vcmp.eq.f32.partialorder %v2316_v24, 8.507059e+37 }
 0x414   : > { %v9287_v45 = vadd.f32 %v2068_v22, %v9137_v57  ;;  %v2286_v22 = vand.u32 2147483647, %v9264_v61  ;;  %v2319_v61 = vor.u32 1.1754944e-38, %v2318_v23 }
 0x415   : > { %v9291_v10 = vsel %vm937_vm10, %v2463_v26, 0.0  ;;  %v9324_v26 = vmul.f32 %v2275_v6, %v9255_v3 }
 0x416   : > { %v2495_v39 = vmul.f32 %v9291_v10, %v9291_v10  ;;  %v7084_v12 = vpop.eup %7083  ;;  %v6427_v41 = vmul.f32 -1.442695, %v9287_v45  ;;  %vm2287_vm5 = vcmp.eq.f32.partialorder %v2286_v22, 8.507059e+37 }
 0x417   : > { %v7086_v30 = vpop.eup %7085  ;;  %v9300_v9 = vadd.f32 1.0, %v7084_v12 }
 0x418   : > { %v2418_v63 = vpop.xlane.xlu2 %2417  ;;  %2511 = vadd.xlane.f32.xlu0 %v2495_v39  ;;  %7087 = vpow2.f32 %v6427_v41  ;;  %v2308_v28 = vmul.f32 %v7086_v30, %v9279_v18  ;;  %vm2313_vm15 = vweird.f32 %v7086_v30  ;;  %v2285_v18 = vsel %vm9330_vm2, %v9273_v8, %v2281_v36 }
 0x419   : > { %v2448_v42 = vmul.f32 0.03125, %v2418_v63  ;;  %7089 = vrcp.f32 %v9300_v9  ;;  %v2069_v13 = vpop.f32.mrf.mxu2  ;;  %vm2314_vm3 = vmor %vm2312_vm1, %vm2313_vm15  ;;  %v2333_v5 = vand.u32 2147483648, %v9300_v9  ;;  %vm2327_vm7 = vweird.f32 %v9300_v9 }
 0x41a   : > { %v2070_v54 = vadd.f32 %v9103_v55, %v2069_v13  ;;  %v2309_v51 = vsub.f32 1.0, %v2308_v28  ;;  %v2290_v28 = vsel %vm2287_vm5, %v2289_v37, %v2285_v18 }
 0x41b   : > { %v2464_v11 = vsub.f32 %v9192_v35, %v2448_v42 }
 0x41c   : > { %v9315_v2 = vadd.f32 %v2070_v54, %v9133_v56  ;;  %v2310_v35 = vmul.f32 %v7086_v30, %v2309_v51 }
 0x41d   : > { %v9319_v62 = vsel %vm937_vm10, %v2464_v11, 0.0  ;;  %v9354_v11 = vmul.f32 %v2290_v28, %v9261_v40  ;;  %v2334_v40 = vor.u32 1.1754944e-38, %v2333_v5 }
 0x41e   : > { %v2496_v32 = vmul.f32 %v9319_v62, %v9319_v62  ;;  %v7088_v4 = vpop.eup %7087  ;;  %v6428_v38 = vmul.f32 -1.442695, %v9315_v2  ;;  %v2311_v53 = vadd.f32 %v7086_v30, %v2310_v35  ;;  %v2420_v3 = vpop.xlane.xlu1 %2419 }
 0x41f   : > { %v7090_v12 = vpop.eup %7089  ;;  %v9334_v41 = vadd.f32 1.0, %v7088_v4  ;;  %v2449_v60 = vmul.f32 0.03125, %v2420_v3 }
 0x420   : > { %2513 = vadd.xlane.f32.xlu2 %v2496_v32  ;;  %2429 = vadd.xlane.f32.xlu0 %v9324_v26  ;;  %7091 = vpow2.f32 %v6428_v38  ;;  %v2315_v63 = vsel %vm2314_vm3, %v7086_v30, %v2311_v53  ;;  %v2323_v43 = vmul.f32 %v7090_v12, %v9300_v9  ;;  %vm2328_vm6 = vweird.f32 %v7090_v12 }
 0x421   : > { %7093 = vrcp.f32 %v9334_v41  ;;  %v2320_v14 = vsel %vm2317_vm4, %v2319_v61, %v2315_v63  ;;  %v2465_v42 = vsub.f32 %v9218_v19, %v2449_v60  ;;  %vm2329_vm8 = vmor %vm2327_vm7, %vm2328_vm6  ;;  %v2348_v39 = vand.u32 2147483648, %v9334_v41 }
 0x422   : > { %v9345_v59 = vmul.f32 %v2320_v14, %v9268_v48  ;;  %v2324_v13 = vsub.f32 1.0, %v2323_v43  ;;  %v2331_v48 = vand.u32 2147483647, %v9300_v9  ;;  %v2346_v3 = vand.u32 2147483647, %v9334_v41 }
 0x423   : > { %v9350_v8 = vsel %vm937_vm10, %v2465_v42, 0.0  ;;  %vm2342_vm12 = vweird.f32 %v9334_v41  ;;  %v2349_v43 = vor.u32 1.1754944e-38, %v2348_v39 }
 0x424   : > { %2435 = vadd.xlane.f32.xlu1 %v9345_v59  ;;  %v2325_v30 = vmul.f32 %v7090_v12, %v2324_v13  ;;  %v2497_v19 = vmul.f32 %v9350_v8, %v9350_v8  ;;  %vm2332_vm9 = vcmp.eq.f32.partialorder %v2331_v48, 8.507059e+37  ;;  %vm2347_vm14 = vcmp.eq.f32.partialorder %v2346_v3, 8.507059e+37 }
 0x426   : > { %v7092_v54 = vpop.eup %7091  ;;  %v2326_v6 = vadd.f32 %v7090_v12, %v2325_v30  ;;  %v2422_v23 = vpop.xlane.xlu0 %2421 }
 0x427   : > { %v7094_v51 = vpop.eup %7093  ;;  %v2154_v24 = vadd.f32 1.0, %v7092_v54  ;;  %v2450_v36 = vmul.f32 0.03125, %v2422_v23 }
 0x428   : > { %2431 = vadd.xlane.f32.xlu2 %v9354_v11  ;;  %2515 = vadd.xlane.f32.xlu0 %v2497_v19  ;;  %v2330_v35 = vsel %vm2329_vm8, %v7090_v12, %v2326_v6  ;;  %v2338_v32 = vmul.f32 %v7094_v51, %v9334_v41  ;;  %vm2343_vm11 = vweird.f32 %v7094_v51 }
 0x429   : > { %7095 = vrcp.f32 %v2154_v24  ;;  %v2466_v22 = vsub.f32 %v9234_v52, %v2450_v36  ;;  %v2335_v4 = vsel %vm2332_vm9, %v2334_v40, %v2330_v35  ;;  %vm2344_vm13 = vmor %vm2342_vm12, %vm2343_vm11  ;;  %v2363_v30 = vand.u32 2147483648, %v2154_v24 }
 0x42a   : > { %v2339_v38 = vsub.f32 1.0, %v2338_v32  ;;  %v9371_v12 = vmul.f32 %v2335_v4, %v9276_v16  ;;  %v2361_v48 = vand.u32 2147483647, %v2154_v24  ;;  %vm2357_vm0 = vweird.f32 %v2154_v24 }
 0x42b   : > { %v9365_v9 = vsel %vm937_vm10, %v2466_v22, 0.0  ;;  %v2364_v23 = vor.u32 1.1754944e-38, %v2363_v30  ;;  %v6674_v30 = vld [vmem:[#allocation11 + $0x30] sm:$0xff] }
 0x42c   : > { %v2340_v53 = vmul.f32 %v7094_v51, %v2339_v38  ;;  %v2498_v37 = vmul.f32 %v9365_v9, %v9365_v9  ;;  %vm2362_vm2 = vcmp.eq.f32.partialorder %v2361_v48, 8.507059e+37 }
 0x42e   : > { %v2341_v61 = vadd.f32 %v7094_v51, %v2340_v53  ;;  %v2424_v18 = vpop.xlane.xlu2 %2423 }
 0x42f   : > { %v7096_v52 = vpop.eup %7095  ;;  %v2451_v60 = vmul.f32 0.03125, %v2424_v18 }
 0x430   : > { %2517 = vadd.xlane.f32.xlu2 %v2498_v37  ;;  %2437 = vadd.xlane.f32.xlu0 %v9371_v12  ;;  %v2345_v63 = vsel %vm2344_vm13, %v7094_v51, %v2341_v61  ;;  %v2353_v14 = vmul.f32 %v7096_v52, %v2154_v24  ;;  %vm2358_vm15 = vweird.f32 %v7096_v52 }
 0x431   : > { %v2467_v42 = vsub.f32 %v9238_v21, %v2451_v60  ;;  %v2350_v16 = vsel %vm2347_vm14, %v2349_v43, %v2345_v63  ;;  %vm2359_vm1 = vmor %vm2357_vm0, %vm2358_vm15 }
 0x432   : > { %v2354_v28 = vsub.f32 1.0, %v2353_v14  ;;  %v9384_v19 = vmul.f32 %v2350_v16, %v9287_v45  ;;  %v6675_v16 = vld [vmem:[#allocation11 + $0x38] sm:$0xff] }
 0x433   : > { %v9379_v13 = vsel %vm937_vm10, %v2467_v42, 0.0  ;;  %2875 = vmatpush.bf16.msra.mxu1 %v6675_v16  ;;  %6740 = vmatpush.bf16.msra.mxu3 %v6675_v16 }
 0x434   : > { %v2355_v41 = vmul.f32 %v7096_v52, %v2354_v28  ;;  %v2499_v5 = vmul.f32 %v9379_v13, %v9379_v13 }
 0x436   : > { %v2356_v54 = vadd.f32 %v7096_v52, %v2355_v41  ;;  %v2426_v21 = vpop.xlane.xlu1 %2425 }
 0x437   : > { %v2452_v6 = vmul.f32 0.03125, %v2426_v21  ;;  %2876 = vmatpush.bf16.msra.mxu1 %v6674_v30  ;;  %6741 = vmatpush.bf16.msra.mxu3 %v6674_v30 }
 0x438   : > { %2519 = vadd.xlane.f32.xlu2 %v2499_v5  ;;  %2439 = vadd.xlane.f32.xlu0 %v9384_v19  ;;  %v2360_v51 = vsel %vm2359_vm1, %v7096_v52, %v2356_v54  ;;  %v6673_v5 = vld [vmem:[#allocation11 + $0x28] sm:$0xff] }
 0x439   : > { %v2468_v36 = vsub.f32 %v9242_v27, %v2452_v6  ;;  %v2365_v35 = vsel %vm2362_vm2, %v2364_v23, %v2360_v51  ;;  %v6672_v51 = vld [vmem:[#allocation11 + $0x20] sm:$0xff] }
 0x43a   : > { %v9393_v45 = vmul.f32 %v2365_v35, %v9315_v2  ;;  %v6671_v35 = vld [vmem:[#allocation11 + $0x18] sm:$0xff] }
 0x43b   : > { %v9390_v40 = vsel %vm937_vm10, %v2468_v36, 0.0  ;;  %2877 = vmatpush.bf16.msra.mxu1 %v6673_v5  ;;  %6742 = vmatpush.bf16.msra.mxu3 %v6673_v5  ;;  %v6669_v5 = vld [vmem:[#allocation11 + $0x8] sm:$0xff] }
 0x43c   : > { %v2500_v24 = vmul.f32 %v9390_v40, %v9390_v40 }
 0x43e   : > { %2521 = vadd.xlane.f32.xlu1 %v2500_v24  ;;  %v2428_v32 = vpop.xlane.xlu1 %2427 }
 0x43f   : > { %v2453_v22 = vmul.f32 0.03125, %v2428_v32  ;;  %2878 = vmatpush.bf16.msra.mxu1 %v6672_v51  ;;  %6743 = vmatpush.bf16.msra.mxu3 %v6672_v51 }
 0x440   : > { %2441 = vadd.xlane.f32.xlu2 %v9393_v45 }
 0x441   : > { %v2469_v4 = vsub.f32 %v9246_v1, %v2453_v22  ;;  %v2072_v1 = vpop.f32.mrf.mxu2 }
 0x442   : > { %v2073_v61 = vadd.f32 %v9103_v55, %v2072_v1 }
 0x443   : > { %v9401_v27 = vsel %vm937_vm10, %v2469_v4, 0.0  ;;  %2879 = vmatpush.bf16.msra.mxu1 %v6671_v35  ;;  %6744 = vmatpush.bf16.msra.mxu3 %v6671_v35 }
 0x444   : > { %v2501_v38 = vmul.f32 %v9401_v27, %v9401_v27  ;;  %v9414_v52 = vadd.f32 %v2073_v61, %v9211_v7 }
 0x446   : > { %2523 = vadd.xlane.f32.xlu1 %v2501_v38  ;;  %v2434_v2 = vpop.xlane.xlu1 %2433  ;;  %v6429_v60 = vmul.f32 -1.442695, %v9414_v52 }
 0x447   : > { %v2456_v53 = vmul.f32 0.03125, %v2434_v2 }
 0x448   : > { %7097 = vpow2.f32 %v6429_v60 }
 0x449   : > { %v2472_v39 = vsub.f32 %v9250_v44, %v2456_v53  ;;  %v2074_v18 = vpop.f32.mrf.mxu2 }
 0x44a   : > { %v2075_v63 = vadd.f32 %v9103_v55, %v2074_v18  ;;  %v6670_v18 = vld [vmem:[#allocation11 + $0x10] sm:$0xff] }
 0x44b   : > { %v9408_v37 = vsel %vm937_vm10, %v2472_v39, 0.0  ;;  %2880 = vmatpush.bf16.msra.mxu1 %v6670_v18  ;;  %6745 = vmatpush.bf16.msra.mxu3 %v6670_v18 }
 0x44c   : > { %v2504_v3 = vmul.f32 %v9408_v37, %v9408_v37  ;;  %v9419_v44 = vadd.f32 %v2075_v63, %v9208_v15 }
 0x44e   : > { %2529 = vadd.xlane.f32.xlu1 %v2504_v3  ;;  %v6430_v43 = vmul.f32 -1.442695, %v9419_v44  ;;  %v7098_v14 = vpop.eup %7097 }
 0x44f   : > { %v9422_v42 = vadd.f32 1.0, %v7098_v14  ;;  %2881 = vmatpush.bf16.msra.mxu1 %v6669_v5  ;;  %6746 = vmatpush.bf16.msra.mxu3 %v6669_v5 }
 0x450   : > { %7099 = vpow2.f32 %v6430_v43 }
 0x451   : > { %7101 = vrcp.f32 %v9422_v42  ;;  %v2376_v14 = vand.u32 2147483647, %v9422_v42  ;;  %vm2372_vm4 = vweird.f32 %v9422_v42 }
 0x453   : > { %vm2377_vm6 = vcmp.eq.f32.partialorder %v2376_v14, 8.507059e+37 }
 0x456   : > { %v7100_v28 = vpop.eup %7099 }
 0x457   : > { %v9425_v41 = vadd.f32 1.0, %v7100_v28  ;;  %v9427_v55 = vpop.eup %7101 }
 0x458   : > { %v2368_v54 = vmul.f32 %v9427_v55, %v9422_v42  ;;  %vm2373_vm3 = vweird.f32 %v9427_v55 }
 0x459   : > { %7103 = vrcp.f32 %v9425_v41  ;;  %vm9462_vm5 = vmor %vm2372_vm4, %vm2373_vm3  ;;  %vm2387_vm7 = vweird.f32 %v9425_v41  ;;  %v2391_v14 = vand.u32 2147483647, %v9425_v41 }
 0x45a   : > { %v2369_v23 = vsub.f32 1.0, %v2368_v54 }
 0x45b   : > { %vm2392_vm15 = vcmp.eq.f32.partialorder %v2391_v14, 8.507059e+37 }
 0x45c   : > { %v2370_v22 = vmul.f32 %v9427_v55, %v2369_v23 }
 0x45e   : > { %v2371_v61 = vadd.f32 %v9427_v55, %v2370_v22 }
 0x45f   : > { %v9434_v36 = vpop.eup %7103 }
 0x460   : > { %v2383_v4 = vmul.f32 %v9434_v36, %v9425_v41  ;;  %v2375_v35 = vsel %vm9462_vm5, %v9427_v55, %v2371_v61  ;;  %vm2388_vm8 = vweird.f32 %v9434_v36 }
 0x461   : > { %vm9503_vm12 = vmor %vm2387_vm7, %vm2388_vm8 }
 0x462   : > { %v2384_v60 = vsub.f32 1.0, %v2383_v4 }
 0x48b   : > { %v2512_v48 = vpop.xlane.xlu0 %2511 }
 0x48c   : > { %v2543_v21 = vmul.f32 0.03125, %v2512_v48 }
 0x48e   : > { %v9432_v6 = vadd.f32 0.1, %v2543_v21 }
 0x490   : > { %7105 = vrsqrt.f32 %v9432_v6  ;;  %vm2581_vm11 = vweird.f32 %v9432_v6 }
 0x493   : > { %v2514_v24 = vpop.xlane.xlu2 %2513  ;;  %v2430_v32 = vpop.xlane.xlu0 %2429 }
 0x494   : > { %v2544_v38 = vmul.f32 0.03125, %v2514_v24  ;;  %v2454_v2 = vmul.f32 0.03125, %v2430_v32 }
 0x496   : > { %v9440_v53 = vpop.eup %7105  ;;  %v9442_v39 = vadd.f32 0.1, %v2544_v38  ;;  %v2470_v3 = vsub.f32 %v9324_v26, %v2454_v2  ;;  %v2378_v26 = vand.u32 2147483648, %v9422_v42  ;;  %v2385_v42 = vmul.f32 %v9434_v36, %v2384_v60 }
 0x497   : > { %v2576_v1 = vmul.f32 %v9440_v53, %v9432_v6  ;;  %v2436_v63 = vpop.xlane.xlu1 %2435  ;;  %vm2582_vm9 = vweird.f32 %v9440_v53 }
 0x498   : > { %7107 = vrsqrt.f32 %v9442_v39  ;;  %v9452_v43 = vsel %vm937_vm10, %v2470_v3, 0.0  ;;  %v2457_v28 = vmul.f32 0.03125, %v2436_v63  ;;  %v2379_v22 = vor.u32 1.1754944e-38, %v2378_v26  ;;  %v6668_v63 = vld [vmem:[#allocation11] sm:$0xff]  ;;  %vm9509_vm13 = vmor %vm2581_vm11, %vm2582_vm9 }
 0x499   : > { %v2577_v16 = vmul.f32 %v9440_v53, %v2576_v1  ;;  %v2502_v30 = vmul.f32 %v9452_v43, %v9452_v43  ;;  %v2386_v60 = vadd.f32 %v9434_v36, %v2385_v42  ;;  %v2393_v26 = vand.u32 2147483648, %v9425_v41  ;;  %2882 = vmatpush.bf16.msra.mxu1 %v6668_v63  ;;  %6747 = vmatpush.bf16.msra.mxu3 %v6668_v63  ;;  %v9537_v63 = vld [vmem:[#allocation17 + $0xb] ss:$0 sm:$0xff] }
 0x49a   : > { %v2473_v21 = vsub.f32 %v9345_v59, %v2457_v28  ;;  %v2380_v1 = vsel %vm2377_vm6, %v2379_v22, %v2375_v35  ;;  %vm2591_vm0 = vweird.f32 %v9442_v39 }
 0x49b   : > { %v2578_v54 = vmul.f32 0.5, %v2577_v16  ;;  %v2432_v51 = vpop.xlane.xlu2 %2431  ;;  %2525 = vadd.xlane.f32.xlu0 %v2502_v30  ;;  %v2516_v23 = vpop.xlane.xlu0 %2515  ;;  %v9497_v30 = vmul.f32 %v2380_v1, %v9414_v52  ;;  %v2390_v41 = vsel %vm9503_vm12, %v9434_v36, %v2386_v60  ;;  %v2394_v35 = vor.u32 1.1754944e-38, %v2393_v26 }
 0x49c   : > { %v2455_v24 = vmul.f32 0.03125, %v2432_v51  ;;  %v2545_v32 = vmul.f32 0.03125, %v2516_v23  ;;  %v9473_v38 = vsel %vm937_vm10, %v2473_v21, 0.0 }
 0x49d   : > { %v2579_v4 = vsub.f32 1.5, %v2578_v54  ;;  %v2505_v3 = vmul.f32 %v9473_v38, %v9473_v38 }
 0x49e   : > { %v7108_v59 = vpop.eup %7107  ;;  %v2471_v55 = vsub.f32 %v9354_v11, %v2455_v24  ;;  %v9478_v2 = vadd.f32 0.1, %v2545_v32 }
 0x49f   : > { %v2580_v61 = vmul.f32 %v9440_v53, %v2579_v4  ;;  %v2586_v18 = vmul.f32 %v7108_v59, %v9442_v39  ;;  %2531 = vadd.xlane.f32.xlu1 %v2505_v3  ;;  %vm2592_vm14 = vweird.f32 %v7108_v59  ;;  %v2395_v4 = vsel %vm2392_vm15, %v2394_v35, %v2390_v41  ;;  %v9522_v3 = vld [vmem:[#allocation17 + $0x6] ss:$0 sm:$0xff] }
 0x4a0   : > { %7109 = vrsqrt.f32 %v9478_v2  ;;  %v9489_v11 = vsel %vm937_vm10, %v2471_v55, 0.0  ;;  %vm2593_vm1 = vmor %vm2591_vm0, %vm2592_vm14  ;;  %vm2601_vm3 = vweird.f32 %v9478_v2 }
 0x4a1   : > { %v2587_v16 = vmul.f32 %v7108_v59, %v2586_v18  ;;  %v2503_v28 = vmul.f32 %v9489_v11, %v9489_v11  ;;  %v2584_v21 = vsel %vm9509_vm13, %v9440_v53, %v2580_v61  ;;  %v9531_v18 = vmul.f32 %v2395_v4, %v9419_v44 }
 0x4a2   : > { %v2735_v55 = vmul.f32 %v2584_v21, %v9291_v10 }
 0x4a3   : > { %v2588_v48 = vmul.f32 0.5, %v2587_v16  ;;  %v2518_v54 = vpop.xlane.xlu2 %2517  ;;  %2527 = vadd.xlane.f32.xlu2 %v2503_v28  ;;  %2443 = vadd.xlane.f32.xlu0 %v9497_v30  ;;  %v2438_v52 = vpop.xlane.xlu0 %2437 }
 0x4a4   : > { %v2546_v51 = vmul.f32 0.03125, %v2518_v54  ;;  %v2458_v23 = vmul.f32 0.03125, %v2438_v52  ;;  %v2752_v39 = vmul.f32 %v9522_v3, %v2735_v55 }
 0x4a5   : > { %v2589_v42 = vsub.f32 1.5, %v2588_v48 }
 0x4a6   : > { %v7110_v24 = vpop.eup %7109  ;;  %v2562_v32 = vadd.f32 0.1, %v2546_v51  ;;  %v2474_v22 = vsub.f32 %v9371_v12, %v2458_v23 }
 0x4a7   : > { %v2590_v36 = vmul.f32 %v7108_v59, %v2589_v42  ;;  %v2596_v53 = vmul.f32 %v7110_v24, %v9478_v2  ;;  %vm2602_vm2 = vweird.f32 %v7110_v24 }
 0x4a8   : > { %7111 = vrsqrt.f32 %v2562_v32  ;;  %v9528_v1 = vsel %vm937_vm10, %v2474_v22, 0.0  ;;  %vm2603_vm4 = vmor %vm2601_vm3, %vm2602_vm2  ;;  %vm2611_vm6 = vweird.f32 %v2562_v32 }
 0x4a9   : > { %v2597_v61 = vmul.f32 %v7110_v24, %v2596_v53  ;;  %v2506_v10 = vmul.f32 %v9528_v1, %v9528_v1  ;;  %v2594_v12 = vsel %vm2593_vm1, %v7108_v59, %v2590_v36 }
 0x4aa   : > { %v2736_v60 = vmul.f32 %v2594_v12, %v9319_v62  ;;  %v9543_v62 = vadd.f32 %v9537_v63, %v2752_v39 }
 0x4ab   : > { %v2598_v14 = vmul.f32 0.5, %v2597_v61  ;;  %v2520_v26 = vpop.xlane.xlu2 %2519  ;;  %2445 = vadd.xlane.f32.xlu2 %v9531_v18  ;;  %2533 = vadd.xlane.f32.xlu0 %v2506_v10  ;;  %v2440_v16 = vpop.xlane.xlu0 %2439 }
 0x4ac   : > { %v2547_v28 = vmul.f32 0.03125, %v2520_v26  ;;  %v2459_v5 = vmul.f32 0.03125, %v2440_v16  ;;  %v2753_v44 = vmul.f32 %v9522_v3, %v2736_v60 }
 0x4ad   : > { %v2599_v6 = vsub.f32 1.5, %v2598_v14 }
 0x4ae   : > { %v7112_v48 = vpop.eup %7111  ;;  %v2563_v54 = vadd.f32 0.1, %v2547_v28  ;;  %v2475_v59 = vsub.f32 %v9384_v19, %v2459_v5  ;;  %v9546_v52 = vadd.f32 %v9537_v63, %v2753_v44 }
 0x4af   : > { %v2600_v41 = vmul.f32 %v7110_v24, %v2599_v6  ;;  %v2606_v21 = vmul.f32 %v7112_v48, %v2562_v32  ;;  %vm2612_vm5 = vweird.f32 %v7112_v48 }
 0x4b0   : > { %7113 = vrsqrt.f32 %v2563_v54  ;;  %v2801_v51 = vpack.c.bf16 %v9546_v52, %v9543_v62  ;;  %v9552_v23 = vsel %vm937_vm10, %v2475_v59, 0.0  ;;  %vm2613_vm7 = vmor %vm2611_vm6, %vm2612_vm5  ;;  %vm2621_vm9 = vweird.f32 %v2563_v54 }
 0x4b1   : > { %v2607_v19 = vmul.f32 %v7112_v48, %v2606_v21  ;;  %v2507_v35 = vmul.f32 %v9552_v23, %v9552_v23  ;;  %v2522_v4 = vpop.xlane.xlu1 %2521  ;;  %v2604_v55 = vsel %vm2603_vm4, %v7110_v24, %v2600_v41 }
 0x4b2   : > { %2883 = vmatmul.bf16.vlgmr.msra.gmra.mxu1 %v2801_v51  ;;  %v2548_v53 = vmul.f32 0.03125, %v2522_v4  ;;  %v2737_v2 = vmul.f32 %v2604_v55, %v9350_v8 }
 0x4b3   : > { %v2608_v42 = vmul.f32 0.5, %v2607_v19  ;;  %v2442_v22 = vpop.xlane.xlu2 %2441  ;;  %2535 = vadd.xlane.f32.xlu2 %v2507_v35 }
 0x4b4   : > { %v2460_v36 = vmul.f32 0.03125, %v2442_v22  ;;  %v2564_v60 = vadd.f32 0.1, %v2548_v53 }
 0x4b5   : > { %v2609_v61 = vsub.f32 1.5, %v2608_v42 }
 0x4b6   : > { %v7114_v10 = vpop.eup %7113  ;;  %v2476_v12 = vsub.f32 %v9393_v45, %v2460_v36  ;;  %7115 = vrsqrt.f32 %v2564_v60  ;;  %v2754_v45 = vmul.f32 %v9522_v3, %v2737_v2  ;;  %vm2631_vm13 = vweird.f32 %v2564_v60 }
 0x4b7   : > { %v2610_v39 = vmul.f32 %v7112_v48, %v2609_v61  ;;  %v2616_v14 = vmul.f32 %v7114_v10, %v2563_v54  ;;  %vm2622_vm8 = vweird.f32 %v7114_v10 }
 0x4b8   : > { %v9561_v26 = vsel %vm937_vm10, %v2476_v12, 0.0  ;;  %v9569_v59 = vadd.f32 %v9537_v63, %v2754_v45  ;;  %vm2623_vm11 = vmor %vm2621_vm9, %vm2622_vm8 }
 0x4b9   : > { %v2617_v24 = vmul.f32 %v7114_v10, %v2616_v14  ;;  %v2508_v16 = vmul.f32 %v9561_v26, %v9561_v26  ;;  %v2614_v28 = vsel %vm2613_vm7, %v7112_v48, %v2610_v39 }
 0x4ba   : > { %v2738_v5 = vmul.f32 %v2614_v28, %v9365_v9 }
 0x4bb   : > { %v2618_v44 = vmul.f32 0.5, %v2617_v24  ;;  %2537 = vadd.xlane.f32.xlu1 %v2508_v16 }
 0x4bc   : > { %v2755_v8 = vmul.f32 %v9522_v3, %v2738_v5  ;;  %v7116_v6 = vpop.eup %7115 }
 0x4bd   : > { %v2619_v32 = vsub.f32 1.5, %v2618_v44  ;;  %v2626_v51 = vmul.f32 %v7116_v6, %v2564_v60  ;;  %vm2632_vm12 = vweird.f32 %v7116_v6 }
 0x4be   : > { %v9572_v41 = vadd.f32 %v9537_v63, %v2755_v8  ;;  %vm2633_vm14 = vmor %vm2631_vm13, %vm2632_vm12 }
 0x4bf   : > { %v2620_v21 = vmul.f32 %v7114_v10, %v2619_v32  ;;  %v2627_v48 = vmul.f32 %v7116_v6, %v2626_v51 }
 0x4c0   : > { %v2802_v9 = vpack.c.bf16 %v9572_v41, %v9569_v59 }
 0x4c1   : > { %v2628_v19 = vmul.f32 0.5, %v2627_v48  ;;  %v2624_v35 = vsel %vm2623_vm11, %v7114_v10, %v2620_v21 }
 0x4c2   : > { %2888 = vmatmul.bf16.gmra.mxu1 %v2802_v9  ;;  %v2739_v22 = vmul.f32 %v2624_v35, %v9379_v13  ;;  %v2524_v13 = vpop.xlane.xlu1 %2523 }
 0x4c3   : > { %v2629_v42 = vsub.f32 1.5, %v2628_v19  ;;  %v2549_v60 = vmul.f32 0.03125, %v2524_v13 }
 0x4c4   : > { %v2756_v53 = vmul.f32 %v9522_v3, %v2739_v22 }
 0x4c5   : > { %v2630_v4 = vmul.f32 %v7116_v6, %v2629_v42  ;;  %v2565_v2 = vadd.f32 0.1, %v2549_v60 }
 0x4c6   : > { %v9581_v54 = vadd.f32 %v9537_v63, %v2756_v53 }
 0x4c7   : > { %v2634_v55 = vsel %vm2633_vm14, %v7116_v6, %v2630_v4  ;;  %7117 = vrsqrt.f32 %v2565_v2  ;;  %vm2641_vm0 = vweird.f32 %v2565_v2 }
 0x4c8   : > { %v2740_v36 = vmul.f32 %v2634_v55, %v9390_v40 }
 0x4ca   : > { %v2757_v61 = vmul.f32 %v9522_v3, %v2740_v36  ;;  %v2530_v39 = vpop.xlane.xlu1 %2529 }
 0x4cb   : > { %v2552_v14 = vmul.f32 0.03125, %v2530_v39 }
 0x4cc   : > { %v9584_v12 = vadd.f32 %v9537_v63, %v2757_v61 }
 0x4cd   : > { %v2568_v40 = vadd.f32 0.1, %v2552_v14  ;;  %v7118_v24 = vpop.eup %7117 }
 0x4ce   : > { %v2803_v10 = vpack.c.bf16 %v9584_v12, %v9581_v54  ;;  %v2636_v16 = vmul.f32 %v7118_v24, %v2565_v2  ;;  %vm2642_vm15 = vweird.f32 %v7118_v24 }
 0x4cf   : > { %7119 = vrsqrt.f32 %v2568_v40  ;;  %vm9602_vm1 = vmor %vm2641_vm0, %vm2642_vm15  ;;  %vm2671_vm5 = vweird.f32 %v2568_v40 }
 0x4d0   : > { %v2637_v5 = vmul.f32 %v7118_v24, %v2636_v16 }
 0x4d2   : > { %2893 = vmatmul.bf16.gmra.mxu1 %v2803_v10  ;;  %v2638_v6 = vmul.f32 0.5, %v2637_v5 }
 0x4d4   : > { %v2639_v48 = vsub.f32 1.5, %v2638_v6 }
 0x4d5   : > { %v9588_v28 = vpop.eup %7119 }
 0x4d6   : > { %v2666_v8 = vmul.f32 %v9588_v28, %v2568_v40  ;;  %v2640_v10 = vmul.f32 %v7118_v24, %v2639_v48  ;;  %vm2672_vm2 = vweird.f32 %v9588_v28 }
 0x4d7   : > { %vm2673_vm7 = vmor %vm2671_vm5, %vm2672_vm2 }
 0x4d8   : > { %v2667_v9 = vmul.f32 %v9588_v28, %v2666_v8  ;;  %v2644_v8 = vsel %vm9602_vm1, %v7118_v24, %v2640_v10 }
 0x4da   : > { %v2668_v36 = vmul.f32 0.5, %v2667_v9 }
 0x4dc   : > { %v2669_v5 = vsub.f32 1.5, %v2668_v36 }
 0x4de   : > { %v2670_v48 = vmul.f32 %v9588_v28, %v2669_v5 }
 0x4e0   : > { %v2674_v40 = vsel %vm2673_vm7, %v9588_v28, %v2670_v48 }
 0x50e   : > { %v2526_v45 = vpop.xlane.xlu0 %2525 }
 0x50f   : > { %v2550_v44 = vmul.f32 0.03125, %v2526_v45 }
 0x511   : > { %v2566_v32 = vadd.f32 0.1, %v2550_v44 }
 0x512   : > { %v2532_v21 = vpop.xlane.xlu1 %2531 }
 0x513   : > { %7121 = vrsqrt.f32 %v2566_v32  ;;  %v2553_v51 = vmul.f32 0.03125, %v2532_v21  ;;  %vm2651_vm4 = vweird.f32 %v2566_v32 }
 0x515   : > { %v9592_v19 = vadd.f32 0.1, %v2553_v51 }
 0x516   : > { %v2528_v35 = vpop.xlane.xlu2 %2527  ;;  %v2444_v42 = vpop.xlane.xlu0 %2443 }
 0x517   : > { %v2551_v22 = vmul.f32 0.03125, %v2528_v35  ;;  %v2461_v4 = vmul.f32 0.03125, %v2444_v42  ;;  %7123 = vrsqrt.f32 %v9592_v19  ;;  %vm2681_vm0 = vweird.f32 %v9592_v19 }
 0x519   : > { %v7122_v55 = vpop.eup %7121  ;;  %v2567_v53 = vadd.f32 0.1, %v2551_v22  ;;  %v2477_v61 = vsub.f32 %v9497_v30, %v2461_v4  ;;  %v2741_v22 = vmul.f32 %v2644_v8, %v9401_v27 }
 0x51a   : > { %v2646_v13 = vmul.f32 %v7122_v55, %v2566_v32  ;;  %vm2652_vm3 = vweird.f32 %v7122_v55 }
 0x51b   : > { %7125 = vrsqrt.f32 %v2567_v53  ;;  %v9598_v60 = vsel %vm937_vm10, %v2477_v61, 0.0  ;;  %vm2653_vm6 = vmor %vm2651_vm4, %vm2652_vm3  ;;  %vm2661_vm9 = vweird.f32 %v2567_v53 }
 0x51c   : > { %v2647_v39 = vmul.f32 %v7122_v55, %v2646_v13  ;;  %v2509_v14 = vmul.f32 %v9598_v60, %v9598_v60  ;;  %v2758_v13 = vmul.f32 %v9522_v3, %v2741_v22 }
 0x51d   : > { %v9608_v6 = vpop.eup %7123 }
 0x51e   : > { %v2648_v45 = vmul.f32 0.5, %v2647_v39  ;;  %v2446_v30 = vpop.xlane.xlu2 %2445  ;;  %2539 = vadd.xlane.f32.xlu0 %v2509_v14  ;;  %v2534_v44 = vpop.xlane.xlu0 %2533  ;;  %v2676_v24 = vmul.f32 %v9608_v6, %v9592_v19  ;;  %vm2682_vm13 = vweird.f32 %v9608_v6 }
 0x51f   : > { %v2462_v21 = vmul.f32 0.03125, %v2446_v30  ;;  %v2554_v2 = vmul.f32 0.03125, %v2534_v44  ;;  %v2744_v44 = vmul.f32 %v2674_v40, %v9408_v37  ;;  %vm2683_vm1 = vmor %vm2681_vm0, %vm2682_vm13 }
 0x520   : > { %v2649_v51 = vsub.f32 1.5, %v2648_v45  ;;  %v2677_v39 = vmul.f32 %v9608_v6, %v2676_v24 }
 0x521   : > { %v7126_v9 = vpop.eup %7125  ;;  %v2478_v35 = vsub.f32 %v9531_v18, %v2462_v21  ;;  %v9613_v42 = vadd.f32 0.1, %v2554_v2 }
 0x522   : > { %v2650_v4 = vmul.f32 %v7122_v55, %v2649_v51  ;;  %v2656_v36 = vmul.f32 %v7126_v9, %v2567_v53  ;;  %vm2662_vm8 = vweird.f32 %v7126_v9  ;;  %v2678_v21 = vmul.f32 0.5, %v2677_v39 }
 0x523   : > { %7127 = vrsqrt.f32 %v9613_v42  ;;  %v9621_v61 = vsel %vm937_vm10, %v2478_v35, 0.0  ;;  %vm2663_vm11 = vmor %vm2661_vm9, %vm2662_vm8  ;;  %v9645_v35 = vld [vmem:[#allocation17 + $0x2] ss:$0 sm:$0xff]  ;;  %vm2691_vm14 = vweird.f32 %v9613_v42 }
 0x524   : > { %v2657_v18 = vmul.f32 %v7126_v9, %v2656_v36  ;;  %v2510_v27 = vmul.f32 %v9621_v61, %v9621_v61  ;;  %v2654_v32 = vsel %vm2653_vm6, %v7122_v55, %v2650_v4  ;;  %v2761_v4 = vmul.f32 %v9522_v3, %v2744_v44 }
 0x525   : > { %v2742_v10 = vmul.f32 %v2654_v32, %v9452_v43  ;;  %v9636_v43 = vadd.f32 %v9537_v63, %v2758_v13  ;;  %v2679_v36 = vsub.f32 1.5, %v2678_v21  ;;  %v9651_v32 = vadd.f32 %v9543_v62, %v8985_v29 }
 0x526   : > { %v2658_v14 = vmul.f32 0.5, %v2657_v18  ;;  %2541 = vadd.xlane.f32.xlu2 %v2510_v27  ;;  %v2536_v16 = vpop.xlane.xlu2 %2535  ;;  %v9656_v39 = vadd.f32 %v9537_v63, %v2761_v4 }
 0x527   : > { %v2555_v5 = vmul.f32 0.03125, %v2536_v16  ;;  %v2759_v45 = vmul.f32 %v9522_v3, %v2742_v10  ;;  %v2680_v62 = vmul.f32 %v9608_v6, %v2679_v36 }
 0x528   : > { %v2659_v30 = vsub.f32 1.5, %v2658_v14 }
 0x529   : > { %v7128_v8 = vpop.eup %7127  ;;  %v9633_v55 = vadd.f32 0.1, %v2555_v5  ;;  %v9639_v28 = vadd.f32 %v9537_v63, %v2759_v45 }
 0x52a   : > { %v2660_v2 = vmul.f32 %v7126_v9, %v2659_v30  ;;  %v2686_v51 = vmul.f32 %v7128_v8, %v9613_v42  ;;  %vm2692_vm12 = vweird.f32 %v7128_v8 }
 0x52b   : > { %7129 = vrsqrt.f32 %v9633_v55  ;;  %v2804_v37 = vpack.c.bf16 %v9639_v28, %v9636_v43  ;;  %vm2693_vm15 = vmor %vm2691_vm14, %vm2692_vm12  ;;  %vm2701_vm6 = vweird.f32 %v9633_v55 }
 0x52c   : > { %v2687_v48 = vmul.f32 %v7128_v8, %v2686_v51  ;;  %v2664_v22 = vsel %vm2663_vm11, %v7126_v9, %v2660_v2  ;;  %v2684_v2 = vsel %vm2683_vm1, %v9608_v6, %v2680_v62 }
 0x52d   : > { %2898 = vmatmul.bf16.gmra.mxu1 %v2804_v37  ;;  %v2743_v24 = vmul.f32 %v2664_v22, %v9489_v11  ;;  %v2745_v4 = vmul.f32 %v2684_v2, %v9473_v38 }
 0x52e   : > { %v2688_v18 = vmul.f32 0.5, %v2687_v48  ;;  %v2538_v53 = vpop.xlane.xlu1 %2537  ;;  %v9680_v48 = vadd.f32 %v9546_v52, %v8988_v0 }
 0x52f   : > { %v2556_v27 = vmul.f32 0.03125, %v2538_v53  ;;  %v2884_v10 = vpop.f32.mrf.mxu1  ;;  %v2760_v13 = vmul.f32 %v9522_v3, %v2743_v24  ;;  %v2762_v0 = vmul.f32 %v9522_v3, %v2745_v4 }
 0x530   : > { %v2689_v40 = vsub.f32 1.5, %v2688_v18  ;;  %v2885_v9 = vadd.f32 %v9645_v35, %v2884_v10 }
 0x531   : > { %v9658_v14 = vpop.eup %7129  ;;  %v2572_v11 = vadd.f32 0.1, %v2556_v27  ;;  %v9663_v29 = vadd.f32 %v9537_v63, %v2760_v13 }
 0x532   : > { %v2690_v16 = vmul.f32 %v7128_v8, %v2689_v40  ;;  %v2696_v5 = vmul.f32 %v9658_v14, %v9633_v55  ;;  %v9669_v45 = vadd.f32 %v2885_v9, %v9651_v32  ;;  %v9695_v9 = vadd.f32 %v9569_v59, %v9027_v58 }
 0x533   : > { %7131 = vrsqrt.f32 %v2572_v11  ;;  %v2805_v30 = vpack.c.bf16 %v9656_v39, %v9663_v29  ;;  %vm2702_vm3 = vweird.f32 %v9658_v14  ;;  %vm2711_vm4 = vweird.f32 %v2572_v11 }
 0x534   : > { %v6463_v42 = vmul.f32 -1.442695, %v9669_v45  ;;  %v2694_v44 = vsel %vm2693_vm15, %v7128_v8, %v2690_v16  ;;  %v2697_v21 = vmul.f32 %v9658_v14, %v2696_v5  ;;  %v9700_v16 = vadd.f32 %v9537_v63, %v2762_v0  ;;  %vm2703_vm7 = vmor %vm2701_vm6, %vm2702_vm3 }
 0x535   : > { %2903 = vmatmul.bf16.vlgmr.msra.gmra.mxu3 %v2805_v30  ;;  %v2746_v37 = vmul.f32 %v2694_v44, %v9528_v1 }
 0x536   : > { %7133 = vpow2.f32 %v6463_v42  ;;  %v2698_v8 = vmul.f32 0.5, %v2697_v21 }
 0x537   : > { %v2886_v51 = vpop.f32.mrf.mxu1  ;;  %v2763_v18 = vmul.f32 %v9522_v3, %v2746_v37 }
 0x538   : > { %v2887_v22 = vadd.f32 %v9645_v35, %v2886_v51  ;;  %v2699_v52 = vsub.f32 1.5, %v2698_v8  ;;  %v9714_v8 = vadd.f32 %v9572_v41, %v9021_v25 }
 0x539   : > { %v7132_v19 = vpop.eup %7131  ;;  %v9691_v38 = vadd.f32 %v9537_v63, %v2763_v18 }
 0x53a   : > { %v2706_v24 = vmul.f32 %v7132_v19, %v2572_v11  ;;  %v9685_v36 = vadd.f32 %v2887_v22, %v9680_v48  ;;  %vm2712_vm2 = vweird.f32 %v7132_v19  ;;  %v2700_v5 = vmul.f32 %v9658_v14, %v2699_v52 }
 0x53b   : > { %vm2713_vm5 = vmor %vm2711_vm4, %vm2712_vm2  ;;  %v2806_v44 = vpack.c.bf16 %v9691_v38, %v9700_v16 }
 0x53c   : > { %v7134_v6 = vpop.eup %7133  ;;  %v2707_v53 = vmul.f32 %v7132_v19, %v2706_v24  ;;  %v6464_v1 = vmul.f32 -1.442695, %v9685_v36  ;;  %v2704_v11 = vsel %vm2703_vm7, %v9658_v14, %v2700_v5 }
 0x53d   : > { %v2988_v27 = vadd.f32 1.0, %v7134_v6  ;;  %v2747_v18 = vmul.f32 %v2704_v11, %v9552_v23 }
 0x53e   : > { %v2708_v10 = vmul.f32 0.5, %v2707_v53  ;;  %7135 = vpow2.f32 %v6464_v1 }
 0x53f   : > { %7137 = vrcp.f32 %v2988_v27  ;;  %v2889_v13 = vpop.f32.mrf.mxu1  ;;  %v3013_v14 = vand.u32 2147483647, %v2988_v27  ;;  %vm3009_vm9 = vweird.f32 %v2988_v27 }
 0x540   : > { %v2709_v40 = vsub.f32 1.5, %v2708_v10  ;;  %v2890_v62 = vadd.f32 %v9645_v35, %v2889_v13  ;;  %v2764_v13 = vmul.f32 %v9522_v3, %v2747_v18 }
 0x541   : > { %vm3014_vm12 = vcmp.eq.f32.partialorder %v3013_v14, 8.507059e+37 }
 0x542   : > { %v2710_v30 = vmul.f32 %v7132_v19, %v2709_v40  ;;  %v9704_v42 = vadd.f32 %v2890_v62, %v9695_v9 }
 0x544   : > { %v7136_v58 = vpop.eup %7135  ;;  %v6465_v59 = vmul.f32 -1.442695, %v9704_v42  ;;  %v2714_v21 = vsel %vm2713_vm5, %v7132_v19, %v2710_v30  ;;  %v3015_v19 = vand.u32 2147483648, %v2988_v27 }
 0x545   : > { %v7138_v2 = vpop.eup %7137  ;;  %v2989_v51 = vadd.f32 1.0, %v7136_v58  ;;  %2908 = vmatmul.bf16.gmra.mxu3 %v2806_v44  ;;  %v2748_v4 = vmul.f32 %v2714_v21, %v9561_v26  ;;  %v9729_v44 = vadd.f32 %v9581_v54, %v9069_v34  ;;  %v9736_v21 = vadd.f32 %v9537_v63, %v2764_v13 }
 0x546   : > { %7139 = vpow2.f32 %v6465_v59  ;;  %v3005_v37 = vmul.f32 %v7138_v2, %v2988_v27  ;;  %vm3010_vm8 = vweird.f32 %v7138_v2  ;;  %v3016_v10 = vor.u32 1.1754944e-38, %v3015_v19 }
 0x547   : > { %7141 = vrcp.f32 %v2989_v51  ;;  %v2891_v22 = vpop.f32.mrf.mxu1  ;;  %v2765_v1 = vmul.f32 %v9522_v3, %v2748_v4  ;;  %vm3011_vm11 = vmor %vm3009_vm9, %vm3010_vm8  ;;  %vm3024_vm14 = vweird.f32 %v2989_v51 }
 0x548   : > { %v2892_v55 = vadd.f32 %v9645_v35, %v2891_v22  ;;  %v3006_v24 = vsub.f32 1.0, %v3005_v37  ;;  %v3028_v22 = vand.u32 2147483647, %v2989_v51 }
 0x549   : > { %v9725_v30 = vadd.f32 %v9537_v63, %v2765_v1 }
 0x54a   : > { %v9719_v6 = vadd.f32 %v2892_v55, %v9714_v8  ;;  %v3007_v53 = vmul.f32 %v7138_v2, %v3006_v24  ;;  %vm3029_vm0 = vcmp.eq.f32.partialorder %v3028_v22, 8.507059e+37 }
 0x54b   : > { %v2807_v34 = vpack.c.bf16 %v9725_v30, %v9736_v21 }
 0x54c   : > { %v7140_v0 = vpop.eup %7139  ;;  %v6466_v26 = vmul.f32 -1.442695, %v9719_v6  ;;  %v3008_v52 = vadd.f32 %v7138_v2, %v3007_v53 }
 0x54d   : > { %v7142_v25 = vpop.eup %7141  ;;  %v2990_v41 = vadd.f32 1.0, %v7140_v0  ;;  %v9747_v0 = vadd.f32 %v9584_v12, %v9062_v33 }
 0x54e   : > { %7143 = vpow2.f32 %v6466_v26  ;;  %v3012_v23 = vsel %vm3011_vm11, %v7138_v2, %v3008_v52  ;;  %v3020_v40 = vmul.f32 %v7142_v25, %v2989_v51  ;;  %v3030_v2 = vand.u32 2147483648, %v2989_v51 }
 0x54f   : > { %7145 = vrcp.f32 %v2990_v41  ;;  %v2894_v62 = vpop.f32.mrf.mxu1  ;;  %v3017_v5 = vsel %vm3014_vm12, %v3016_v10, %v3012_v23  ;;  %vm3025_vm13 = vweird.f32 %v7142_v25  ;;  %v3045_v10 = vand.u32 2147483648, %v2990_v41 }
 0x550   : > { %v2895_v27 = vadd.f32 %v9645_v35, %v2894_v62  ;;  %v9733_v58 = vmul.f32 %v3017_v5, %v9669_v45  ;;  %v3021_v59 = vsub.f32 1.0, %v3020_v40  ;;  %vm3026_vm15 = vmor %vm3024_vm14, %vm3025_vm13  ;;  %v3031_v19 = vor.u32 1.1754944e-38, %v3030_v2 }
 0x551   : > { %v3043_v23 = vand.u32 2147483647, %v2990_v41  ;;  %vm3039_vm2 = vweird.f32 %v2990_v41 }
 0x552   : > { %v9739_v37 = vadd.f32 %v2895_v27, %v9729_v44  ;;  %3262 = vadd.xlane.f32.xlu1 %v9733_v58  ;;  %v3022_v11 = vmul.f32 %v7142_v25, %v3021_v59 }
 0x553   : > { %vm3044_vm4 = vcmp.eq.f32.partialorder %v3043_v23, 8.507059e+37 }
 0x554   : > { %v7144_v54 = vpop.eup %7143  ;;  %v6467_v45 = vmul.f32 -1.442695, %v9739_v37  ;;  %v3023_v4 = vadd.f32 %v7142_v25, %v3022_v11 }
 0x555   : > { %v7146_v55 = vpop.eup %7145  ;;  %v2991_v24 = vadd.f32 1.0, %v7144_v54  ;;  %2913 = vmatmul.bf16.gmra.mxu3 %v2807_v34 }
 0x556   : > { %7147 = vpow2.f32 %v6467_v45  ;;  %v3027_v18 = vsel %vm3026_vm15, %v7142_v25, %v3023_v4  ;;  %v3035_v53 = vmul.f32 %v7146_v55, %v2990_v41  ;;  %vm3040_vm1 = vweird.f32 %v7146_v55 }
 0x557   : > { %7149 = vrcp.f32 %v2991_v24  ;;  %v2896_v14 = vpop.f32.mrf.mxu1  ;;  %v3032_v1 = vsel %vm3029_vm0, %v3031_v19, %v3027_v18  ;;  %vm3041_vm3 = vmor %vm3039_vm2, %vm3040_vm1  ;;  %v3060_v34 = vand.u32 2147483648, %v2991_v24  ;;  %v3058_v41 = vand.u32 2147483647, %v2991_v24 }
 0x558   : > { %v2897_v26 = vadd.f32 %v9645_v35, %v2896_v14  ;;  %v9751_v51 = vmul.f32 %v3032_v1, %v9685_v36  ;;  %v3036_v52 = vsub.f32 1.0, %v3035_v53  ;;  %v3046_v36 = vor.u32 1.1754944e-38, %v3045_v10 }
 0x559   : > { %vm3054_vm6 = vweird.f32 %v2991_v24  ;;  %vm3059_vm8 = vcmp.eq.f32.partialorder %v3058_v41, 8.507059e+37 }
 0x55a   : > { %v9754_v13 = vadd.f32 %v2897_v26, %v9747_v0  ;;  %3264 = vadd.xlane.f32.xlu0 %v9751_v51  ;;  %v3037_v25 = vmul.f32 %v7146_v55, %v3036_v52 }
 0x55c   : > { %v7148_v40 = vpop.eup %7147  ;;  %v6468_v62 = vmul.f32 -1.442695, %v9754_v13  ;;  %v3038_v33 = vadd.f32 %v7146_v55, %v3037_v25 }
 0x55d   : > { %v7150_v12 = vpop.eup %7149  ;;  %v2992_v5 = vadd.f32 1.0, %v7148_v40 }
 0x55e   : > { %7151 = vpow2.f32 %v6468_v62  ;;  %v3042_v27 = vsel %vm3041_vm3, %v7146_v55, %v3038_v33  ;;  %v3050_v59 = vmul.f32 %v7150_v12, %v2991_v24  ;;  %vm3055_vm5 = vweird.f32 %v7150_v12 }
 0x55f   : > { %7153 = vrcp.f32 %v2992_v5  ;;  %v3047_v2 = vsel %vm3044_vm4, %v3046_v36, %v3042_v27  ;;  %vm3056_vm7 = vmor %vm3054_vm6, %vm3055_vm5  ;;  %v3061_v55 = vor.u32 1.1754944e-38, %v3060_v34  ;;  %v3075_v52 = vand.u32 2147483648, %v2992_v5 }
 0x560   : > { %v9759_v11 = vmul.f32 %v3047_v2, %v9704_v42  ;;  %v3051_v22 = vsub.f32 1.0, %v3050_v59  ;;  %v3073_v25 = vand.u32 2147483647, %v2992_v5  ;;  %vm3069_vm11 = vweird.f32 %v2992_v5 }
 0x561   : > { %v3076_v40 = vor.u32 1.1754944e-38, %v3075_v52 }
 0x562   : > { %3266 = vadd.xlane.f32.xlu2 %v9759_v11  ;;  %v3052_v54 = vmul.f32 %v7150_v12, %v3051_v22  ;;  %vm3074_vm13 = vcmp.eq.f32.partialorder %v3073_v25, 8.507059e+37 }
 0x564   : > { %v7152_v45 = vpop.eup %7151  ;;  %v3053_v4 = vadd.f32 %v7150_v12, %v3052_v54 }
 0x565   : > { %v7154_v19 = vpop.eup %7153  ;;  %v2993_v18 = vadd.f32 1.0, %v7152_v45 }
 0x566   : > { %v3057_v53 = vsel %vm3056_vm7, %v7150_v12, %v3053_v4  ;;  %v3065_v14 = vmul.f32 %v7154_v19, %v2992_v5  ;;  %vm3070_vm9 = vweird.f32 %v7154_v19 }
 0x567   : > { %7155 = vrcp.f32 %v2993_v18  ;;  %v3062_v42 = vsel %vm3059_vm8, %v3061_v55, %v3057_v53  ;;  %vm3071_vm12 = vmor %vm3069_vm11, %vm3070_vm9  ;;  %v3090_v27 = vand.u32 2147483648, %v2993_v18  ;;  %v3088_v2 = vand.u32 2147483647, %v2993_v18 }
 0x568   : > { %v9763_v1 = vmul.f32 %v3062_v42, %v9719_v6  ;;  %v3066_v26 = vsub.f32 1.0, %v3065_v14  ;;  %vm3084_vm15 = vweird.f32 %v2993_v18 }
 0x569   : > { %v3091_v5 = vor.u32 1.1754944e-38, %v3090_v27  ;;  %vm3089_vm1 = vcmp.eq.f32.partialorder %v3088_v2, 8.507059e+37 }
 0x56a   : > { %3268 = vadd.xlane.f32.xlu1 %v9763_v1  ;;  %v3067_v10 = vmul.f32 %v7154_v19, %v3066_v26 }
 0x56c   : > { %v3068_v24 = vadd.f32 %v7154_v19, %v3067_v10 }
 0x56d   : > { %v7156_v23 = vpop.eup %7155 }
 0x56e   : > { %v3072_v62 = vsel %vm3071_vm12, %v7154_v19, %v3068_v24  ;;  %v3080_v33 = vmul.f32 %v7156_v23, %v2993_v18  ;;  %vm3085_vm14 = vweird.f32 %v7156_v23 }
 0x56f   : > { %v3077_v12 = vsel %vm3074_vm13, %v3076_v40, %v3072_v62  ;;  %vm3086_vm0 = vmor %vm3084_vm15, %vm3085_vm14 }
 0x570   : > { %v9767_v36 = vmul.f32 %v3077_v12, %v9739_v37  ;;  %v3081_v6 = vsub.f32 1.0, %v3080_v33  ;;  %v9776_v12 = vadd.f32 %v9636_v43, %v9094_v46 }
 0x572   : > { %3270 = vadd.xlane.f32.xlu0 %v9767_v36  ;;  %v3082_v59 = vmul.f32 %v7156_v23, %v3081_v6 }
 0x574   : > { %v3083_v22 = vadd.f32 %v7156_v23, %v3082_v59 }
 0x576   : > { %v3087_v34 = vsel %vm3086_vm0, %v7156_v23, %v3083_v22 }
 0x577   : > { %v3092_v54 = vsel %vm3089_vm1, %v3091_v5, %v3087_v34 }
 0x578   : > { %v9771_v41 = vmul.f32 %v3092_v54, %v9754_v13 }
 0x57a   : > { %3272 = vadd.xlane.f32.xlu2 %v9771_v41 }
 0x591   : > { %v2540_v37 = vpop.xlane.xlu0 %2539 }
 0x592   : > { %v2557_v45 = vmul.f32 0.03125, %v2540_v37 }
 0x594   : > { %v2573_v4 = vadd.f32 0.1, %v2557_v45 }
 0x596   : > { %7157 = vrsqrt.f32 %v2573_v4  ;;  %vm2721_vm3 = vweird.f32 %v2573_v4 }
 0x599   : > { %v2542_v19 = vpop.xlane.xlu2 %2541 }
 0x59a   : > { %v2558_v55 = vmul.f32 0.03125, %v2542_v19 }
 0x59c   : > { %v7158_v53 = vpop.eup %7157  ;;  %v2574_v14 = vadd.f32 0.1, %v2558_v55 }
 0x59d   : > { %v2716_v42 = vmul.f32 %v7158_v53, %v2573_v4  ;;  %vm2722_vm2 = vweird.f32 %v7158_v53 }
 0x59e   : > { %7159 = vrsqrt.f32 %v2574_v14  ;;  %vm2723_vm4 = vmor %vm2721_vm3, %vm2722_vm2  ;;  %vm2731_vm6 = vweird.f32 %v2574_v14 }
 0x59f   : > { %v2717_v18 = vmul.f32 %v7158_v53, %v2716_v42 }
 0x5a1   : > { %v2718_v26 = vmul.f32 0.5, %v2717_v18 }
 0x5a3   : > { %v2719_v52 = vsub.f32 1.5, %v2718_v26 }
 0x5a4   : > { %v7160_v10 = vpop.eup %7159 }
 0x5a5   : > { %v2720_v25 = vmul.f32 %v7158_v53, %v2719_v52  ;;  %v2726_v13 = vmul.f32 %v7160_v10, %v2574_v14  ;;  %vm2732_vm5 = vweird.f32 %v7160_v10 }
 0x5a6   : > { %vm2733_vm7 = vmor %vm2731_vm6, %vm2732_vm5 }
 0x5a7   : > { %v2727_v24 = vmul.f32 %v7160_v10, %v2726_v13  ;;  %v2724_v40 = vsel %vm2723_vm4, %v7158_v53, %v2720_v25  ;;  %v9815_v25 = vadd.f32 %v9656_v39, %v9085_v20 }
 0x5a8   : > { %v2749_v27 = vmul.f32 %v2724_v40, %v9598_v60  ;;  %v9789_v60 = vadd.f32 %v9639_v28, %v9097_v47  ;;  %v9806_v28 = vadd.f32 %v9663_v29, %v9082_v31 }
 0x5a9   : > { %v2728_v23 = vmul.f32 0.5, %v2727_v24 }
 0x5aa   : > { %v2899_v62 = vpop.f32.mrf.mxu1  ;;  %v2766_v54 = vmul.f32 %v9522_v3, %v2749_v27 }
 0x5ab   : > { %v2729_v33 = vsub.f32 1.5, %v2728_v23  ;;  %v2900_v6 = vadd.f32 %v9645_v35, %v2899_v62 }
 0x5ac   : > { %v9793_v45 = vadd.f32 %v9537_v63, %v2766_v54 }
 0x5ad   : > { %v2730_v59 = vmul.f32 %v7160_v10, %v2729_v33  ;;  %v9781_v2 = vadd.f32 %v2900_v6, %v9776_v12 }
 0x5af   : > { %v6469_v22 = vmul.f32 -1.442695, %v9781_v2  ;;  %v2734_v5 = vsel %vm2733_vm7, %v7160_v10, %v2730_v59 }
 0x5b0   : > { %v2750_v34 = vmul.f32 %v2734_v5, %v9621_v61 }
 0x5b1   : > { %7161 = vpow2.f32 %v6469_v22 }
 0x5b2   : > { %v2901_v46 = vpop.f32.mrf.mxu1  ;;  %v2767_v43 = vmul.f32 %v9522_v3, %v2750_v34  ;;  %v9828_v34 = vadd.f32 %v9700_v16, %v9109_v17 }
 0x5b3   : > { %v2902_v37 = vadd.f32 %v9645_v35, %v2901_v46 }
 0x5b4   : > { %v9796_v4 = vadd.f32 %v9537_v63, %v2767_v43 }
 0x5b5   : > { %v9799_v61 = vadd.f32 %v2902_v37, %v9789_v60 }
 0x5b6   : > { %v2808_v19 = vpack.c.bf16 %v9796_v4, %v9793_v45 }
 0x5b7   : > { %v7162_v55 = vpop.eup %7161  ;;  %v6470_v3 = vmul.f32 -1.442695, %v9799_v61 }
 0x5b8   : > { %v2994_v53 = vadd.f32 1.0, %v7162_v55  ;;  %v2904_v47 = vpop.f32.mrf.mxu3  ;;  %2918 = vmatmul.bf16.gmra.mxu3 %v2808_v19 }
 0x5b9   : > { %7163 = vpow2.f32 %v6470_v3  ;;  %v2905_v63 = vadd.f32 %v9645_v35, %v2904_v47 }
 0x5ba   : > { %7165 = vrcp.f32 %v2994_v53  ;;  %v3105_v23 = vand.u32 2147483648, %v2994_v53  ;;  %v3103_v27 = vand.u32 2147483647, %v2994_v53  ;;  %vm3099_vm9 = vweird.f32 %v2994_v53 }
 0x5bb   : > { %v9810_v14 = vadd.f32 %v2905_v63, %v9806_v28 }
 0x5bc   : > { %v3106_v46 = vor.u32 1.1754944e-38, %v3105_v23  ;;  %vm3104_vm12 = vcmp.eq.f32.partialorder %v3103_v27, 8.507059e+37 }
 0x5bd   : > { %v6471_v42 = vmul.f32 -1.442695, %v9810_v14 }
 0x5bf   : > { %v7164_v18 = vpop.eup %7163  ;;  %7167 = vpow2.f32 %v6471_v42 }
 0x5c0   : > { %v7166_v26 = vpop.eup %7165  ;;  %v2995_v52 = vadd.f32 1.0, %v7164_v18  ;;  %v2906_v10 = vpop.f32.mrf.mxu3 }
 0x5c1   : > { %v2907_v31 = vadd.f32 %v9645_v35, %v2906_v10  ;;  %v3095_v29 = vmul.f32 %v7166_v26, %v2994_v53  ;;  %vm3100_vm8 = vweird.f32 %v7166_v26 }
 0x5c2   : > { %7169 = vrcp.f32 %v2995_v52  ;;  %vm3101_vm11 = vmor %vm3099_vm9, %vm3100_vm8  ;;  %v3118_v47 = vand.u32 2147483647, %v2995_v52  ;;  %v3120_v63 = vand.u32 2147483648, %v2995_v52  ;;  %vm3114_vm14 = vweird.f32 %v2995_v52 }
 0x5c3   : > { %v9819_v13 = vadd.f32 %v2907_v31, %v9815_v25  ;;  %v3096_v24 = vsub.f32 1.0, %v3095_v29 }
 0x5c4   : > { %vm3119_vm0 = vcmp.eq.f32.partialorder %v3118_v47, 8.507059e+37 }
 0x5c5   : > { %v7168_v40 = vpop.eup %7167  ;;  %v6472_v62 = vmul.f32 -1.442695, %v9819_v13  ;;  %v3263_v33 = vpop.xlane.xlu1 %3262  ;;  %v3097_v6 = vmul.f32 %v7166_v26, %v3096_v24  ;;  %v9849_v24 = vadd.f32 %v9691_v38, %v9112_v50 }
 0x5c6   : > { %v9822_v59 = vadd.f32 1.0, %v7168_v40  ;;  %v3294_v20 = vmul.f32 0.03125, %v3263_v33 }
 0x5c7   : > { %7171 = vpow2.f32 %v6472_v62  ;;  %v3098_v39 = vadd.f32 %v7166_v26, %v3097_v6  ;;  %v3121_v6 = vor.u32 1.1754944e-38, %v3120_v63 }
 0x5c8   : > { %v7170_v22 = vpop.eup %7169  ;;  %7173 = vrcp.f32 %v9822_v59  ;;  %v3310_v5 = vsub.f32 %v9733_v58, %v3294_v20  ;;  %v2909_v54 = vpop.f32.mrf.mxu3  ;;  %v3133_v50 = vand.u32 2147483647, %v9822_v59  ;;  %vm3129_vm2 = vweird.f32 %v9822_v59 }
 0x5c9   : > { %v2910_v43 = vadd.f32 %v9645_v35, %v2909_v54  ;;  %v3102_v37 = vsel %vm3101_vm11, %v7166_v26, %v3098_v39  ;;  %v3110_v19 = vmul.f32 %v7170_v22, %v2995_v52  ;;  %vm3115_vm13 = vweird.f32 %v7170_v22 }
 0x5ca   : > { %v3107_v55 = vsel %vm3104_vm12, %v3106_v46, %v3102_v37  ;;  %v9833_v3 = vsel %vm937_vm10, %v3310_v5, 0.0  ;;  %vm3116_vm15 = vmor %vm3114_vm14, %vm3115_vm13  ;;  %v3135_v5 = vand.u32 2147483648, %v9822_v59  ;;  %vm3134_vm4 = vcmp.eq.f32.partialorder %v3133_v50, 8.507059e+37  ;;  %v6683_v50 = vld [vmem:[#allocation13 + $0x38] sm:$0xff] }
 0x5cb   : > { %v9836_v53 = vadd.f32 %v2910_v43, %v9828_v34  ;;  %v9839_v58 = vmul.f32 %v3107_v55, %v9781_v2  ;;  %v3342_v17 = vmul.f32 %v9833_v3, %v9833_v3  ;;  %v3111_v16 = vsub.f32 1.0, %v3110_v19  ;;  %3722 = vmatpush.bf16.msrb.mxu2 %v6683_v50 }
 0x5cc   : > { %v3136_v63 = vor.u32 1.1754944e-38, %v3135_v5 }
 0x5cd   : > { %v7172_v42 = vpop.eup %7171  ;;  %v6473_v18 = vmul.f32 -1.442695, %v9836_v53  ;;  %v3265_v26 = vpop.xlane.xlu0 %3264  ;;  %3274 = vadd.xlane.f32.xlu2 %v9839_v58  ;;  %3358 = vadd.xlane.f32.xlu1 %v3342_v17  ;;  %v3112_v10 = vmul.f32 %v7170_v22, %v3111_v16 }
 0x5ce   : > { %v7174_v31 = vpop.eup %7173  ;;  %v9845_v29 = vadd.f32 1.0, %v7172_v42  ;;  %v3295_v2 = vmul.f32 0.03125, %v3265_v26 }
 0x5cf   : > { %7175 = vpow2.f32 %v6473_v18  ;;  %v3113_v23 = vadd.f32 %v7170_v22, %v3112_v10  ;;  %v3125_v40 = vmul.f32 %v7174_v31, %v9822_v59  ;;  %vm3130_vm1 = vweird.f32 %v7174_v31 }
 0x5d0   : > { %7177 = vrcp.f32 %v9845_v29  ;;  %v3311_v62 = vsub.f32 %v9751_v51, %v3295_v2  ;;  %v2911_v33 = vpop.f32.mrf.mxu3  ;;  %vm3131_vm3 = vmor %vm3129_vm2, %vm3130_vm1  ;;  %v9880_v59 = vadd.f32 %v9736_v21, %v9137_v57  ;;  %vm3144_vm6 = vweird.f32 %v9845_v29 }
 0x5d1   : > { %v2912_v27 = vadd.f32 %v9645_v35, %v2911_v33  ;;  %v3117_v20 = vsel %vm3116_vm15, %v7170_v22, %v3113_v23  ;;  %v3126_v39 = vsub.f32 1.0, %v3125_v40 }
 0x5d2   : > { %v9858_v38 = vsel %vm937_vm10, %v3311_v62, 0.0  ;;  %v3122_v52 = vsel %vm3119_vm0, %v3121_v6, %v3117_v20  ;;  %v3150_v62 = vand.u32 2147483648, %v9845_v29 }
 0x5d3   : > { %v9862_v51 = vadd.f32 %v2912_v27, %v9849_v24  ;;  %v3343_v54 = vmul.f32 %v9858_v38, %v9858_v38  ;;  %v9867_v46 = vmul.f32 %v3122_v52, %v9799_v61  ;;  %v3127_v22 = vmul.f32 %v7174_v31, %v3126_v39 }
 0x5d5   : > { %v7176_v43 = vpop.eup %7175  ;;  %v6474_v37 = vmul.f32 -1.442695, %v9862_v51  ;;  %v3267_v19 = vpop.xlane.xlu2 %3266  ;;  %3360 = vadd.xlane.f32.xlu0 %v3343_v54  ;;  %3276 = vadd.xlane.f32.xlu1 %v9867_v46  ;;  %v3128_v55 = vadd.f32 %v7174_v31, %v3127_v22  ;;  %v3151_v22 = vor.u32 1.1754944e-38, %v3150_v62 }
 0x5d6   : > { %v7178_v17 = vpop.eup %7177  ;;  %v9872_v16 = vadd.f32 1.0, %v7176_v43  ;;  %v3296_v47 = vmul.f32 0.03125, %v3267_v19 }
 0x5d7   : > { %7179 = vpow2.f32 %v6474_v37  ;;  %v3132_v61 = vsel %vm3131_vm3, %v7174_v31, %v3128_v55  ;;  %v3140_v42 = vmul.f32 %v7178_v17, %v9845_v29  ;;  %vm3145_vm5 = vweird.f32 %v7178_v17  ;;  %v6682_v37 = vld [vmem:[#allocation13 + $0x30] sm:$0xff] }
 0x5d8   : > { %7181 = vrcp.f32 %v9872_v16  ;;  %v3312_v18 = vsub.f32 %v9759_v11, %v3296_v47  ;;  %v2914_v26 = vpop.f32.mrf.mxu3  ;;  %v3137_v10 = vsel %vm3134_vm4, %v3136_v63, %v3132_v61  ;;  %v3148_v31 = vand.u32 2147483647, %v9845_v29  ;;  %vm3146_vm7 = vmor %vm3144_vm6, %vm3145_vm5  ;;  %3723 = vmatpush.bf16.msrb.mxu2 %v6682_v37 }
 0x5d9   : > { %v2915_v2 = vadd.f32 %v9645_v35, %v2914_v26  ;;  %v3141_v23 = vsub.f32 1.0, %v3140_v42  ;;  %v9895_v57 = vmul.f32 %v3137_v10, %v9810_v14  ;;  %v3163_v63 = vand.u32 2147483647, %v9872_v16 }
 0x5da   : > { %v9885_v40 = vsel %vm937_vm10, %v3312_v18, 0.0  ;;  %vm3149_vm8 = vcmp.eq.f32.partialorder %v3148_v31, 8.507059e+37  ;;  %v3165_v61 = vand.u32 2147483648, %v9872_v16  ;;  %vm3159_vm11 = vweird.f32 %v9872_v16 }
 0x5db   : > { %v9890_v11 = vadd.f32 %v2915_v2, %v9880_v59  ;;  %v3344_v33 = vmul.f32 %v9885_v40, %v9885_v40  ;;  %v3142_v21 = vmul.f32 %v7178_v17, %v3141_v23  ;;  %vm3164_vm13 = vcmp.eq.f32.partialorder %v3163_v63, 8.507059e+37 }
 0x5dd   : > { %v7180_v6 = vpop.eup %7179  ;;  %v6475_v27 = vmul.f32 -1.442695, %v9890_v11  ;;  %3362 = vadd.xlane.f32.xlu0 %v3344_v33  ;;  %3278 = vadd.xlane.f32.xlu1 %v9895_v57  ;;  %v3269_v20 = vpop.xlane.xlu1 %3268  ;;  %v3143_v39 = vadd.f32 %v7178_v17, %v3142_v21 }
 0x5de   : > { %v7182_v52 = vpop.eup %7181  ;;  %v2999_v5 = vadd.f32 1.0, %v7180_v6  ;;  %v3297_v54 = vmul.f32 0.03125, %v3269_v20 }
 0x5df   : > { %7183 = vpow2.f32 %v6475_v27  ;;  %v3147_v14 = vsel %vm3146_vm7, %v7178_v17, %v3143_v39  ;;  %v3155_v43 = vmul.f32 %v7182_v52, %v9872_v16  ;;  %vm3160_vm9 = vweird.f32 %v7182_v52 }
 0x5e0   : > { %7185 = vrcp.f32 %v2999_v5  ;;  %v3313_v19 = vsub.f32 %v9763_v1, %v3297_v54  ;;  %v3152_v55 = vsel %vm3149_vm8, %v3151_v22, %v3147_v14  ;;  %vm3161_vm12 = vmor %vm3159_vm11, %vm3160_vm9  ;;  %v3178_v39 = vand.u32 2147483647, %v2999_v5 }
 0x5e1   : > { %v3156_v47 = vsub.f32 1.0, %v3155_v43  ;;  %v9910_v17 = vmul.f32 %v3152_v55, %v9819_v13  ;;  %v3166_v13 = vor.u32 1.1754944e-38, %v3165_v61  ;;  %v3180_v50 = vand.u32 2147483648, %v2999_v5 }
 0x5e2   : > { %v9905_v29 = vsel %vm937_vm10, %v3313_v19, 0.0  ;;  %vm3174_vm15 = vweird.f32 %v2999_v5  ;;  %vm3179_vm1 = vcmp.eq.f32.partialorder %v3178_v39, 8.507059e+37  ;;  %v6681_v39 = vld [vmem:[#allocation13 + $0x28] sm:$0xff] }
 0x5e3   : > { %v3345_v42 = vmul.f32 %v9905_v29, %v9905_v29  ;;  %v3157_v18 = vmul.f32 %v7182_v52, %v3156_v47  ;;  %v3181_v37 = vor.u32 1.1754944e-38, %v3180_v50  ;;  %3724 = vmatpush.bf16.msrb.mxu2 %v6681_v39  ;;  %v6680_v50 = vld [vmem:[#allocation13 + $0x20] sm:$0xff] }
 0x5e5   : > { %v7184_v1 = vpop.eup %7183  ;;  %v3271_v26 = vpop.xlane.xlu0 %3270  ;;  %3280 = vadd.xlane.f32.xlu0 %v9910_v17  ;;  %3364 = vadd.xlane.f32.xlu2 %v3345_v42  ;;  %v3158_v10 = vadd.f32 %v7182_v52, %v3157_v18 }
 0x5e6   : > { %v7186_v2 = vpop.eup %7185  ;;  %v3000_v23 = vadd.f32 1.0, %v7184_v1  ;;  %v3298_v31 = vmul.f32 0.03125, %v3271_v26 }
 0x5e7   : > { %v3162_v62 = vsel %vm3161_vm12, %v7182_v52, %v3158_v10  ;;  %v3170_v33 = vmul.f32 %v7186_v2, %v2999_v5  ;;  %vm3175_vm14 = vweird.f32 %v7186_v2  ;;  %3725 = vmatpush.bf16.msrb.mxu2 %v6680_v50 }
 0x5e8   : > { %7187 = vrcp.f32 %v3000_v23  ;;  %v3314_v21 = vsub.f32 %v9767_v36, %v3298_v31  ;;  %v3167_v6 = vsel %vm3164_vm13, %v3166_v13, %v3162_v62  ;;  %vm3176_vm0 = vmor %vm3174_vm15, %vm3175_vm14  ;;  %v3193_v42 = vand.u32 2147483647, %v3000_v23  ;;  %v2916_v62 = vpop.f32.mrf.mxu3 }
 0x5e9   : > { %v3171_v27 = vsub.f32 1.0, %v3170_v33  ;;  %v9922_v16 = vmul.f32 %v3167_v6, %v9836_v53  ;;  %v3195_v18 = vand.u32 2147483648, %v3000_v23  ;;  %vm3189_vm3 = vweird.f32 %v3000_v23 }
 0x5ea   : > { %v9919_v20 = vsel %vm937_vm10, %v3314_v21, 0.0  ;;  %vm3194_vm5 = vcmp.eq.f32.partialorder %v3193_v42, 8.507059e+37  ;;  %v9945_v33 = vadd.f32 %v9725_v30, %v9133_v56  ;;  %v9953_v56 = vadd.f32 %v9793_v45, %v9211_v7 }
 0x5eb   : > { %v3346_v54 = vmul.f32 %v9919_v20, %v9919_v20  ;;  %v3172_v52 = vmul.f32 %v7186_v2, %v3171_v27  ;;  %v3196_v10 = vor.u32 1.1754944e-38, %v3195_v18  ;;  %v9965_v42 = vadd.f32 %v9796_v4, %v9208_v15 }
 0x5ed   : > { %v3273_v22 = vpop.xlane.xlu2 %3272  ;;  %3282 = vadd.xlane.f32.xlu0 %v9922_v16  ;;  %3366 = vadd.xlane.f32.xlu2 %v3346_v54  ;;  %v3173_v36 = vadd.f32 %v7186_v2, %v3172_v52 }
 0x5ee   : > { %v7188_v14 = vpop.eup %7187  ;;  %v3299_v43 = vmul.f32 0.03125, %v3273_v22 }
 0x5ef   : > { %v3177_v19 = vsel %vm3176_vm0, %v7186_v2, %v3173_v36  ;;  %v3185_v55 = vmul.f32 %v7188_v14, %v3000_v23  ;;  %vm3190_vm2 = vweird.f32 %v7188_v14 }
 0x5f0   : > { %v3315_v53 = vsub.f32 %v9771_v41, %v3299_v43  ;;  %v3182_v47 = vsel %vm3179_vm1, %v3181_v37, %v3177_v19  ;;  %vm3191_vm4 = vmor %vm3189_vm3, %vm3190_vm2 }
 0x5f1   : > { %v3186_v63 = vsub.f32 1.0, %v3185_v55  ;;  %v9935_v1 = vmul.f32 %v3182_v47, %v9862_v51  ;;  %v2917_v51 = vadd.f32 %v9645_v35, %v2916_v62 }
 0x5f2   : > { %v9930_v61 = vsel %vm937_vm10, %v3315_v53, 0.0 }
 0x5f3   : > { %v3347_v5 = vmul.f32 %v9930_v61, %v9930_v61  ;;  %v3187_v26 = vmul.f32 %v7188_v14, %v3186_v63  ;;  %v9948_v21 = vadd.f32 %v2917_v51, %v9945_v33 }
 0x5f5   : > { %3368 = vadd.xlane.f32.xlu1 %v3347_v5  ;;  %3284 = vadd.xlane.f32.xlu2 %v9935_v1  ;;  %v3188_v41 = vadd.f32 %v7188_v14, %v3187_v26  ;;  %v6476_v23 = vmul.f32 -1.442695, %v9948_v21  ;;  %v6678_v26 = vld [vmem:[#allocation13 + $0x10] sm:$0xff] }
 0x5f7   : > { %v3192_v2 = vsel %vm3191_vm4, %v7188_v14, %v3188_v41  ;;  %7189 = vpow2.f32 %v6476_v23  ;;  %v6679_v14 = vld [vmem:[#allocation13 + $0x18] sm:$0xff] }
 0x5f8   : > { %v3197_v31 = vsel %vm3194_vm5, %v3196_v10, %v3192_v2  ;;  %3726 = vmatpush.bf16.msrb.mxu2 %v6679_v14 }
 0x5f9   : > { %v9939_v13 = vmul.f32 %v3197_v31, %v9890_v11 }
 0x5fc   : > { %3727 = vmatpush.bf16.msrb.mxu2 %v6678_v26 }
 0x5fd   : > { %3286 = vadd.xlane.f32.xlu2 %v9939_v13  ;;  %v7190_v6 = vpop.eup %7189 }
 0x5fe   : > { %v3001_v27 = vadd.f32 1.0, %v7190_v6 }
 0x600   : > { %7191 = vrcp.f32 %v3001_v27  ;;  %v3210_v10 = vand.u32 2147483648, %v3001_v27  ;;  %vm3204_vm7 = vweird.f32 %v3001_v27  ;;  %v3208_v15 = vand.u32 2147483647, %v3001_v27 }
 0x602   : > { %vm3209_vm9 = vcmp.eq.f32.partialorder %v3208_v15, 8.507059e+37 }
 0x606   : > { %v7192_v11 = vpop.eup %7191 }
 0x607   : > { %v3200_v54 = vmul.f32 %v7192_v11, %v3001_v27  ;;  %vm3205_vm6 = vweird.f32 %v7192_v11 }
 0x608   : > { %vm9978_vm8 = vmor %vm3204_vm7, %vm3205_vm6 }
 0x609   : > { %v3201_v22 = vsub.f32 1.0, %v3200_v54  ;;  %v3211_v54 = vor.u32 1.1754944e-38, %v3210_v10 }
 0x60b   : > { %v3202_v55 = vmul.f32 %v7192_v11, %v3201_v22 }
 0x60d   : > { %v3203_v5 = vadd.f32 %v7192_v11, %v3202_v55 }
 0x60f   : > { %v3207_v23 = vsel %vm9978_vm8, %v7192_v11, %v3203_v5 }
 0x610   : > { %v3212_v22 = vsel %vm3209_vm9, %v3211_v54, %v3207_v23  ;;  %v6676_v23 = vld [vmem:[#allocation13] sm:$0xff] }
 0x63b   : > { %v2919_v52 = vpop.f32.mrf.mxu3 }
 0x63c   : > { %v2920_v30 = vadd.f32 %v9645_v35, %v2919_v52 }
 0x63e   : > { %v9957_v36 = vadd.f32 %v2920_v30, %v9953_v56 }
 0x640   : > { %v6477_v43 = vmul.f32 -1.442695, %v9957_v36  ;;  %v3275_v37 = vpop.xlane.xlu2 %3274  ;;  %v3359_v19 = vpop.xlane.xlu1 %3358 }
 0x641   : > { %v3300_v53 = vmul.f32 0.03125, %v3275_v37  ;;  %v3390_v47 = vmul.f32 0.03125, %v3359_v19  ;;  %v9998_v19 = vmul.f32 %v3212_v22, %v9948_v21 }
 0x642   : > { %7193 = vpow2.f32 %v6477_v43  ;;  %v6677_v43 = vld [vmem:[#allocation13 + $0x8] sm:$0xff] }
 0x643   : > { %v3316_v63 = vsub.f32 %v9839_v58, %v3300_v53  ;;  %v9961_v7 = vadd.f32 0.1, %v3390_v47  ;;  %v2921_v45 = vpop.f32.mrf.mxu3  ;;  %3728 = vmatpush.bf16.msrb.mxu2 %v6677_v43 }
 0x644   : > { %v2922_v18 = vadd.f32 %v9645_v35, %v2921_v45 }
 0x645   : > { %7195 = vrsqrt.f32 %v9961_v7  ;;  %v9971_v41 = vsel %vm937_vm10, %v3316_v63, 0.0  ;;  %vm3428_vm12 = vweird.f32 %v9961_v7 }
 0x646   : > { %v9974_v58 = vadd.f32 %v2922_v18, %v9965_v42  ;;  %v3348_v2 = vmul.f32 %v9971_v41, %v9971_v41 }
 0x647   : > { %3729 = vmatpush.bf16.msrb.mxu2 %v6676_v23 }
 0x648   : > { %v7194_v4 = vpop.eup %7193  ;;  %v6478_v31 = vmul.f32 -1.442695, %v9974_v58  ;;  %v3361_v62 = vpop.xlane.xlu0 %3360  ;;  %3370 = vadd.xlane.f32.xlu1 %v3348_v2 }
 0x649   : > { %v3277_v51 = vpop.xlane.xlu1 %3276  ;;  %v9985_v6 = vadd.f32 1.0, %v7194_v4  ;;  %v3391_v39 = vmul.f32 0.03125, %v3361_v62 }
 0x64a   : > { %v3301_v50 = vmul.f32 0.03125, %v3277_v51  ;;  %7197 = vpow2.f32 %v6478_v31 }
 0x64b   : > { %v7196_v27 = vpop.eup %7195  ;;  %7199 = vrcp.f32 %v9985_v6  ;;  %v9988_v52 = vadd.f32 0.1, %v3391_v39  ;;  %v3223_v51 = vand.u32 2147483647, %v9985_v6  ;;  %vm3219_vm15 = vweird.f32 %v9985_v6 }
 0x64c   : > { %v3317_v30 = vsub.f32 %v9867_v46, %v3301_v50  ;;  %v3423_v14 = vmul.f32 %v7196_v27, %v9961_v7  ;;  %vm3429_vm11 = vweird.f32 %v7196_v27  ;;  %v3225_v50 = vand.u32 2147483648, %v9985_v6 }
 0x64d   : > { %7201 = vrsqrt.f32 %v9988_v52  ;;  %vm10019_vm13 = vmor %vm3428_vm12, %vm3429_vm11  ;;  %vm10028_vm0 = vcmp.eq.f32.partialorder %v3223_v51, 8.507059e+37  ;;  %vm3438_vm3 = vweird.f32 %v9988_v52 }
 0x64e   : > { %v9995_v11 = vsel %vm937_vm10, %v3317_v30, 0.0  ;;  %v3424_v37 = vmul.f32 %v7196_v27, %v3423_v14 }
 0x64f   : > { %v3349_v55 = vmul.f32 %v9995_v11, %v9995_v11 }
 0x650   : > { %v7198_v53 = vpop.eup %7197  ;;  %v3425_v46 = vmul.f32 0.5, %v3424_v37  ;;  %v3363_v47 = vpop.xlane.xlu0 %3362  ;;  %3288 = vadd.xlane.f32.xlu1 %v9998_v19 }
 0x651   : > { %3372 = vadd.xlane.f32.xlu0 %v3349_v55  ;;  %v3279_v63 = vpop.xlane.xlu1 %3278  ;;  %v7200_v45 = vpop.eup %7199  ;;  %v10003_v18 = vadd.f32 1.0, %v7198_v53  ;;  %v3392_v5 = vmul.f32 0.03125, %v3363_v47 }
 0x652   : > { %v3302_v26 = vmul.f32 0.03125, %v3279_v63  ;;  %v3426_v10 = vsub.f32 1.5, %v3425_v46  ;;  %v3215_v21 = vmul.f32 %v7200_v45, %v9985_v6  ;;  %vm3220_vm14 = vweird.f32 %v7200_v45 }
 0x653   : > { %v7202_v2 = vpop.eup %7201  ;;  %7203 = vrcp.f32 %v10003_v18  ;;  %v10007_v15 = vadd.f32 0.1, %v3392_v5  ;;  %vm3221_vm2 = vmor %vm3219_vm15, %vm3220_vm14  ;;  %v3226_v5 = vor.u32 1.1754944e-38, %v3225_v50  ;;  %v3238_v23 = vand.u32 2147483647, %v10003_v18 }
 0x654   : > { %v3318_v35 = vsub.f32 %v9895_v57, %v3302_v26  ;;  %v3427_v4 = vmul.f32 %v7196_v27, %v3426_v10  ;;  %v3433_v31 = vmul.f32 %v7202_v2, %v9988_v52  ;;  %v3216_v62 = vsub.f32 1.0, %v3215_v21 }
 0x655   : > { %7205 = vrsqrt.f32 %v10007_v15  ;;  %vm3439_vm1 = vweird.f32 %v7202_v2  ;;  %v3240_v50 = vand.u32 2147483648, %v10003_v18  ;;  %vm3234_vm6 = vweird.f32 %v10003_v18 }
 0x656   : > { %v10016_v39 = vsel %vm937_vm10, %v3318_v35, 0.0  ;;  %v3434_v57 = vmul.f32 %v7202_v2, %v3433_v31  ;;  %v3217_v22 = vmul.f32 %v7200_v45, %v3216_v62  ;;  %v3431_v7 = vsel %vm10019_vm13, %v7196_v27, %v3427_v4  ;;  %v10034_v35 = vld [vmem:[#allocation17 + $0x7] ss:$0 sm:$0xff]  ;;  %vm3440_vm4 = vmor %vm3438_vm3, %vm3439_vm1 }
 0x657   : > { %v3350_v30 = vmul.f32 %v10016_v39, %v10016_v39  ;;  %v3582_v26 = vmul.f32 %v3431_v7, %v9833_v3  ;;  %vm3239_vm8 = vcmp.eq.f32.partialorder %v3238_v23, 8.507059e+37  ;;  %vm3448_vm11 = vweird.f32 %v10007_v15 }
 0x658   : > { %v3435_v14 = vmul.f32 0.5, %v3434_v57  ;;  %v3281_v43 = vpop.xlane.xlu0 %3280  ;;  %v3365_v37 = vpop.xlane.xlu2 %3364  ;;  %v3218_v55 = vadd.f32 %v7200_v45, %v3217_v22  ;;  %v10062_v22 = vld [vmem:[#allocation17 + $0xc] ss:$0 sm:$0xff] }
 0x659   : > { %3374 = vadd.xlane.f32.xlu0 %v3350_v30  ;;  %v7204_v46 = vpop.eup %7203  ;;  %v3303_v47 = vmul.f32 0.03125, %v3281_v43  ;;  %v3393_v63 = vmul.f32 0.03125, %v3365_v37  ;;  %v3599_v30 = vmul.f32 %v10034_v35, %v3582_v26  ;;  %v3241_v26 = vor.u32 1.1754944e-38, %v3240_v50 }
 0x65a   : > { %v3436_v27 = vsub.f32 1.5, %v3435_v14  ;;  %v3222_v10 = vsel %vm3221_vm2, %v7200_v45, %v3218_v55  ;;  %v3230_v21 = vmul.f32 %v7204_v46, %v10003_v18  ;;  %vm3235_vm5 = vweird.f32 %v7204_v46 }
 0x65b   : > { %v10036_v4 = vpop.eup %7205  ;;  %v3319_v6 = vsub.f32 %v9910_v17, %v3303_v47  ;;  %v10040_v31 = vadd.f32 0.1, %v3393_v63  ;;  %v3227_v62 = vsel %vm10028_vm0, %v3226_v5, %v3222_v10  ;;  %vm3236_vm7 = vmor %vm3234_vm6, %vm3235_vm5 }
 0x65c   : > { %v3437_v51 = vmul.f32 %v7202_v2, %v3436_v27  ;;  %v3443_v3 = vmul.f32 %v10036_v4, %v10007_v15  ;;  %v10047_v45 = vmul.f32 %v3227_v62, %v9957_v36  ;;  %v3231_v52 = vsub.f32 1.0, %v3230_v21 }
 0x65d   : > { %7207 = vrsqrt.f32 %v10040_v31  ;;  %v10054_v17 = vsel %vm937_vm10, %v3319_v6, 0.0  ;;  %v10068_v27 = vadd.f32 %v10062_v22, %v3599_v30  ;;  %vm3449_vm9 = vweird.f32 %v10036_v4 }
 0x65e   : > { %v3441_v54 = vsel %vm3440_vm4, %v7202_v2, %v3437_v51  ;;  %v3444_v57 = vmul.f32 %v10036_v4, %v3443_v3  ;;  %3290 = vadd.xlane.f32.xlu1 %v10047_v45  ;;  %v3351_v36 = vmul.f32 %v10054_v17, %v10054_v17  ;;  %v3232_v14 = vmul.f32 %v7204_v46, %v3231_v52  ;;  %vm10087_vm12 = vmor %vm3448_vm11, %vm3449_vm9 }
 0x65f   : > { %v3583_v7 = vmul.f32 %v3441_v54, %v9858_v38  ;;  %vm3458_vm14 = vweird.f32 %v10040_v31 }
 0x660   : > { %v3445_v43 = vmul.f32 0.5, %v3444_v57  ;;  %v3283_v37 = vpop.xlane.xlu0 %3282  ;;  %3376 = vadd.xlane.f32.xlu2 %v3351_v36  ;;  %v3367_v55 = vpop.xlane.xlu2 %3366  ;;  %v3233_v47 = vadd.f32 %v7204_v46, %v3232_v14 }
 0x661   : > { %v3304_v2 = vmul.f32 0.03125, %v3283_v37  ;;  %v3394_v53 = vmul.f32 0.03125, %v3367_v55  ;;  %v3600_v63 = vmul.f32 %v10034_v35, %v3583_v7 }
 0x662   : > { %v3446_v5 = vsub.f32 1.5, %v3445_v43  ;;  %v3237_v6 = vsel %vm3236_vm7, %v7204_v46, %v3233_v47 }
 0x663   : > { %v7208_v38 = vpop.eup %7207  ;;  %v3320_v10 = vsub.f32 %v9922_v16, %v3304_v2  ;;  %v3410_v21 = vadd.f32 0.1, %v3394_v53  ;;  %v10072_v62 = vadd.f32 %v10062_v22, %v3600_v63  ;;  %v3242_v3 = vsel %vm3239_vm8, %v3241_v26, %v3237_v6 }
 0x664   : > { %v3447_v18 = vmul.f32 %v10036_v4, %v3446_v5  ;;  %v3453_v51 = vmul.f32 %v7208_v38, %v10040_v31  ;;  %v10078_v23 = vmul.f32 %v3242_v3, %v9974_v58  ;;  %vm3459_vm13 = vweird.f32 %v7208_v38 }
 0x665   : > { %7209 = vrsqrt.f32 %v3410_v21  ;;  %v3648_v52 = vpack.c.bf16 %v10072_v62, %v10068_v27  ;;  %v10085_v46 = vsel %vm937_vm10, %v3320_v10, 0.0  ;;  %vm3460_vm15 = vmor %vm3458_vm14, %vm3459_vm13  ;;  %vm3468_vm1 = vweird.f32 %v3410_v21 }
 0x666   : > { %v3454_v16 = vmul.f32 %v7208_v38, %v3453_v51  ;;  %3292 = vadd.xlane.f32.xlu0 %v10078_v23  ;;  %v3352_v58 = vmul.f32 %v10085_v46, %v10085_v46  ;;  %v3451_v15 = vsel %vm10087_vm12, %v10036_v4, %v3447_v18 }
 0x667   : > { %3730 = vmatmul.bf16.vlgmr.msrb.gmra.mxu2 %v3648_v52  ;;  %v3584_v2 = vmul.f32 %v3451_v15, %v9885_v40 }
 0x668   : > { %v3455_v54 = vmul.f32 0.5, %v3454_v16  ;;  %v3285_v57 = vpop.xlane.xlu2 %3284  ;;  %v3369_v36 = vpop.xlane.xlu1 %3368  ;;  %3378 = vadd.xlane.f32.xlu2 %v3352_v58 }
 0x669   : > { %v3305_v30 = vmul.f32 0.03125, %v3285_v57  ;;  %v3395_v7 = vmul.f32 0.03125, %v3369_v36  ;;  %v3601_v10 = vmul.f32 %v10034_v35, %v3584_v2 }
 0x66a   : > { %v3456_v14 = vsub.f32 1.5, %v3455_v54 }
 0x66b   : > { %v7210_v43 = vpop.eup %7209  ;;  %v3321_v37 = vsub.f32 %v9935_v1, %v3305_v30  ;;  %v3411_v55 = vadd.f32 0.1, %v3395_v7  ;;  %v10111_v16 = vadd.f32 %v10062_v22, %v3601_v10 }
 0x66c   : > { %v3457_v53 = vmul.f32 %v7208_v38, %v3456_v14  ;;  %v3463_v47 = vmul.f32 %v7210_v43, %v3410_v21  ;;  %vm3469_vm0 = vweird.f32 %v7210_v43 }
 0x66d   : > { %7211 = vrsqrt.f32 %v3411_v55  ;;  %v10102_v4 = vsel %vm937_vm10, %v3321_v37, 0.0  ;;  %vm3470_vm2 = vmor %vm3468_vm1, %vm3469_vm0  ;;  %vm3478_vm4 = vweird.f32 %v3411_v55 }
 0x66e   : > { %v3464_v63 = vmul.f32 %v7210_v43, %v3463_v47  ;;  %v3353_v5 = vmul.f32 %v10102_v4, %v10102_v4  ;;  %v3461_v26 = vsel %vm3460_vm15, %v7208_v38, %v3457_v53 }
 0x66f   : > { %v3585_v1 = vmul.f32 %v3461_v26, %v9905_v29 }
 0x670   : > { %v3465_v40 = vmul.f32 0.5, %v3464_v63  ;;  %3380 = vadd.xlane.f32.xlu1 %v3353_v5  ;;  %v3287_v6 = vpop.xlane.xlu2 %3286 }
 0x671   : > { %v3306_v31 = vmul.f32 0.03125, %v3287_v6  ;;  %v3602_v18 = vmul.f32 %v10034_v35, %v3585_v1 }
 0x672   : > { %v3466_v51 = vsub.f32 1.5, %v3465_v40 }
 0x673   : > { %v7212_v3 = vpop.eup %7211  ;;  %v3322_v52 = vsub.f32 %v9939_v13, %v3306_v31  ;;  %v10114_v50 = vadd.f32 %v10062_v22, %v3602_v18 }
 0x674   : > { %v3467_v38 = vmul.f32 %v7210_v43, %v3466_v51  ;;  %v3473_v29 = vmul.f32 %v7212_v3, %v3411_v55  ;;  %vm3479_vm3 = vweird.f32 %v7212_v3 }
 0x675   : > { %v3649_v58 = vpack.c.bf16 %v10114_v50, %v10111_v16  ;;  %v10120_v54 = vsel %vm937_vm10, %v3322_v52, 0.0  ;;  %vm3480_vm5 = vmor %vm3478_vm4, %vm3479_vm3 }
 0x676   : > { %v3474_v57 = vmul.f32 %v7212_v3, %v3473_v29  ;;  %v3354_v13 = vmul.f32 %v10120_v54, %v10120_v54  ;;  %v3471_v15 = vsel %vm3470_vm2, %v7210_v43, %v3467_v38 }
 0x677   : > { %3735 = vmatmul.bf16.gmra.mxu2 %v3649_v58  ;;  %v3586_v7 = vmul.f32 %v3471_v15, %v9919_v20 }
 0x678   : > { %v3475_v36 = vmul.f32 0.5, %v3474_v57  ;;  %3382 = vadd.xlane.f32.xlu0 %v3354_v13 }
 0x679   : > { %v3603_v21 = vmul.f32 %v10034_v35, %v3586_v7 }
 0x67a   : > { %v3476_v30 = vsub.f32 1.5, %v3475_v36 }
 0x67b   : > { %v10129_v47 = vadd.f32 %v10062_v22, %v3603_v21 }
 0x67c   : > { %v3477_v14 = vmul.f32 %v7212_v3, %v3476_v30 }
 0x67e   : > { %v3481_v37 = vsel %vm3480_vm5, %v7212_v3, %v3477_v14 }
 0x67f   : > { %v3587_v2 = vmul.f32 %v3481_v37, %v9930_v61 }
 0x681   : > { %v3604_v53 = vmul.f32 %v10034_v35, %v3587_v2 }
 0x683   : > { %v10132_v63 = vadd.f32 %v10062_v22, %v3604_v53 }
 0x685   : > { %v3650_v43 = vpack.c.bf16 %v10132_v63, %v10129_v47 }
 0x687   : > { %3740 = vmatmul.bf16.gmra.mxu2 %v3650_v43 }
 0x6bb   : > { %v3371_v20 = vpop.xlane.xlu1 %3370 }
 0x6bc   : > { %v3396_v55 = vmul.f32 0.03125, %v3371_v20 }
 0x6be   : > { %v3412_v5 = vadd.f32 0.1, %v3396_v55 }
 0x6c0   : > { %7213 = vrsqrt.f32 %v3412_v5  ;;  %vm3488_vm7 = vweird.f32 %v3412_v5 }
 0x6c3   : > { %v3289_v61 = vpop.xlane.xlu1 %3288 }
 0x6c4   : > { %v3373_v26 = vpop.xlane.xlu0 %3372  ;;  %v3307_v10 = vmul.f32 0.03125, %v3289_v61 }
 0x6c5   : > { %v3397_v1 = vmul.f32 0.03125, %v3373_v26 }
 0x6c6   : > { %v7214_v40 = vpop.eup %7213  ;;  %v3323_v31 = vsub.f32 %v9998_v19, %v3307_v10 }
 0x6c7   : > { %v3413_v6 = vadd.f32 0.1, %v3397_v1  ;;  %v3483_v18 = vmul.f32 %v7214_v40, %v3412_v5  ;;  %vm3489_vm6 = vweird.f32 %v7214_v40 }
 0x6c8   : > { %v10139_v51 = vsel %vm937_vm10, %v3323_v31, 0.0  ;;  %vm3490_vm8 = vmor %vm3488_vm7, %vm3489_vm6 }
 0x6c9   : > { %7215 = vrsqrt.f32 %v3413_v6  ;;  %v3484_v3 = vmul.f32 %v7214_v40, %v3483_v18  ;;  %v3355_v52 = vmul.f32 %v10139_v51, %v10139_v51  ;;  %vm3498_vm11 = vweird.f32 %v3413_v6 }
 0x6cb   : > { %v3485_v38 = vmul.f32 0.5, %v3484_v3  ;;  %3384 = vadd.xlane.f32.xlu2 %v3355_v52 }
 0x6cc   : > { %v3375_v29 = vpop.xlane.xlu0 %3374 }
 0x6cd   : > { %v3398_v58 = vmul.f32 0.03125, %v3375_v29  ;;  %v3486_v57 = vsub.f32 1.5, %v3485_v38 }
 0x6cf   : > { %v7216_v13 = vpop.eup %7215  ;;  %v3414_v36 = vadd.f32 0.1, %v3398_v58  ;;  %v3487_v15 = vmul.f32 %v7214_v40, %v3486_v57 }
 0x6d0   : > { %v3493_v19 = vmul.f32 %v7216_v13, %v3413_v6  ;;  %vm3499_vm9 = vweird.f32 %v7216_v13 }
 0x6d1   : > { %7217 = vrsqrt.f32 %v3414_v36  ;;  %v3291_v7 = vpop.xlane.xlu1 %3290  ;;  %v3491_v21 = vsel %vm3490_vm8, %v7214_v40, %v3487_v15  ;;  %vm3500_vm12 = vmor %vm3498_vm11, %vm3499_vm9  ;;  %vm3508_vm14 = vweird.f32 %v3414_v36 }
 0x6d2   : > { %v3494_v30 = vmul.f32 %v7216_v13, %v3493_v19  ;;  %v3308_v14 = vmul.f32 0.03125, %v3291_v7  ;;  %v3588_v5 = vmul.f32 %v3491_v21, %v9971_v41 }
 0x6d3   : > { %v3377_v2 = vpop.xlane.xlu2 %3376 }
 0x6d4   : > { %v3495_v37 = vmul.f32 0.5, %v3494_v30  ;;  %v3324_v53 = vsub.f32 %v10047_v45, %v3308_v14  ;;  %v3399_v43 = vmul.f32 0.03125, %v3377_v2  ;;  %v3605_v52 = vmul.f32 %v10034_v35, %v3588_v5 }
 0x6d6   : > { %v3496_v20 = vsub.f32 1.5, %v3495_v37  ;;  %v3415_v26 = vadd.f32 0.1, %v3399_v43  ;;  %v10146_v61 = vsel %vm937_vm10, %v3324_v53, 0.0  ;;  %v10156_v30 = vadd.f32 %v10062_v22, %v3605_v52 }
 0x6d7   : > { %v7218_v55 = vpop.eup %7217  ;;  %v3356_v31 = vmul.f32 %v10146_v61, %v10146_v61 }
 0x6d8   : > { %v3497_v1 = vmul.f32 %v7216_v13, %v3496_v20  ;;  %v3503_v10 = vmul.f32 %v7218_v55, %v3414_v36  ;;  %7219 = vrsqrt.f32 %v3415_v26  ;;  %vm3509_vm13 = vweird.f32 %v7218_v55  ;;  %v10170_v36 = vld [vmem:[#allocation17 + $0x3] ss:$0 sm:$0xff] }
 0x6d9   : > { %3386 = vadd.xlane.f32.xlu1 %v3356_v31  ;;  %v3293_v18 = vpop.xlane.xlu0 %3292  ;;  %vm3510_vm15 = vmor %vm3508_vm14, %vm3509_vm13  ;;  %vm3518_vm1 = vweird.f32 %v3415_v26 }
 0x6da   : > { %v3504_v45 = vmul.f32 %v7218_v55, %v3503_v10  ;;  %v3501_v40 = vsel %vm3500_vm12, %v7216_v13, %v3497_v1  ;;  %v3309_v29 = vmul.f32 0.03125, %v3293_v18 }
 0x6db   : > { %v3589_v3 = vmul.f32 %v3501_v40, %v9995_v11  ;;  %v3379_v58 = vpop.xlane.xlu2 %3378 }
 0x6dc   : > { %v3505_v38 = vmul.f32 0.5, %v3504_v45  ;;  %v3325_v57 = vsub.f32 %v10078_v23, %v3309_v29  ;;  %v3400_v15 = vmul.f32 0.03125, %v3379_v58  ;;  %v10176_v58 = vadd.f32 %v10068_v27, %v9651_v32 }
 0x6dd   : > { %v3606_v41 = vmul.f32 %v10034_v35, %v3589_v3 }
 0x6de   : > { %v3506_v6 = vsub.f32 1.5, %v3505_v38  ;;  %v7220_v19 = vpop.eup %7219  ;;  %v3416_v14 = vadd.f32 0.1, %v3400_v15  ;;  %v10163_v37 = vsel %vm937_vm10, %v3325_v57, 0.0 }
 0x6df   : > { %v10159_v13 = vadd.f32 %v10062_v22, %v3606_v41  ;;  %v3513_v11 = vmul.f32 %v7220_v19, %v3415_v26  ;;  %v3357_v21 = vmul.f32 %v10163_v37, %v10163_v37  ;;  %vm3519_vm0 = vweird.f32 %v7220_v19 }
 0x6e0   : > { %v3507_v7 = vmul.f32 %v7218_v55, %v3506_v6  ;;  %7221 = vrsqrt.f32 %v3416_v14  ;;  %vm3520_vm2 = vmor %vm3518_vm1, %vm3519_vm0  ;;  %vm3528_vm4 = vweird.f32 %v3416_v14 }
 0x6e1   : > { %v3651_v2 = vpack.c.bf16 %v10159_v13, %v10156_v30  ;;  %v3514_v23 = vmul.f32 %v7220_v19, %v3513_v11  ;;  %3388 = vadd.xlane.f32.xlu0 %v3357_v21 }
 0x6e2   : > { %v3511_v20 = vsel %vm3510_vm15, %v7218_v55, %v3507_v7 }
 0x6e3   : > { %3745 = vmatmul.bf16.gmra.mxu2 %v3651_v2  ;;  %v3515_v53 = vmul.f32 0.5, %v3514_v23  ;;  %v3381_v43 = vpop.xlane.xlu1 %3380  ;;  %v3590_v31 = vmul.f32 %v3511_v20, %v10016_v39 }
 0x6e4   : > { %v3401_v5 = vmul.f32 0.03125, %v3381_v43 }
 0x6e5   : > { %v3516_v1 = vsub.f32 1.5, %v3515_v53  ;;  %v3607_v55 = vmul.f32 %v10034_v35, %v3590_v31  ;;  %v10194_v53 = vadd.f32 %v10072_v62, %v9680_v48 }
 0x6e6   : > { %v3417_v10 = vadd.f32 0.1, %v3401_v5  ;;  %v7222_v45 = vpop.eup %7221 }
 0x6e7   : > { %v3517_v40 = vmul.f32 %v7220_v19, %v3516_v1  ;;  %v3523_v18 = vmul.f32 %v7222_v45, %v3416_v14  ;;  %vm3529_vm3 = vweird.f32 %v7222_v45 }
 0x6e8   : > { %7223 = vrsqrt.f32 %v3417_v10  ;;  %vm3530_vm5 = vmor %vm3528_vm4, %vm3529_vm3  ;;  %vm3538_vm7 = vweird.f32 %v3417_v10 }
 0x6e9   : > { %v3521_v3 = vsel %vm3520_vm2, %v7220_v19, %v3517_v40  ;;  %v3524_v52 = vmul.f32 %v7222_v45, %v3523_v18  ;;  %v10184_v19 = vadd.f32 %v10062_v22, %v3607_v55 }
 0x6ea   : > { %v3731_v38 = vpop.f32.mrf.mxu2  ;;  %v3591_v29 = vmul.f32 %v3521_v3, %v10054_v17 }
 0x6eb   : > { %v3732_v39 = vadd.f32 %v10170_v36, %v3731_v38  ;;  %v3525_v41 = vmul.f32 0.5, %v3524_v52  ;;  %v10206_v38 = vadd.f32 %v10111_v16, %v9695_v9 }
 0x6ec   : > { %v3608_v26 = vmul.f32 %v10034_v35, %v3591_v29 }
 0x6ed   : > { %v10181_v6 = vadd.f32 %v3732_v39, %v10176_v58  ;;  %v3526_v15 = vsub.f32 1.5, %v3525_v41 }
 0x6ee   : > { %v7224_v57 = vpop.eup %7223  ;;  %v10187_v17 = vadd.f32 %v10062_v22, %v3608_v26 }
 0x6ef   : > { %v3533_v7 = vmul.f32 %v7224_v57, %v3417_v10  ;;  %v6511_v32 = vmul.f32 -1.442695, %v10181_v6  ;;  %v3527_v27 = vmul.f32 %v7222_v45, %v3526_v15  ;;  %vm3539_vm6 = vweird.f32 %v7224_v57 }
 0x6f0   : > { %v3652_v11 = vpack.c.bf16 %v10187_v17, %v10184_v19  ;;  %vm3540_vm8 = vmor %vm3538_vm7, %vm3539_vm6 }
 0x6f1   : > { %v3534_v2 = vmul.f32 %v7224_v57, %v3533_v7  ;;  %7225 = vpow2.f32 %v6511_v32  ;;  %v3531_v20 = vsel %vm3530_vm5, %v7222_v45, %v3527_v27  ;;  %v10224_v7 = vadd.f32 %v10114_v50, %v9714_v8 }
 0x6f2   : > { %v3733_v23 = vpop.f32.mrf.mxu2  ;;  %v3592_v14 = vmul.f32 %v3531_v20, %v10085_v46 }
 0x6f3   : > { %3750 = vmatmul.bf16.gmra.mxu2 %v3652_v11  ;;  %v3535_v21 = vmul.f32 0.5, %v3534_v2  ;;  %v3734_v43 = vadd.f32 %v10170_v36, %v3733_v23 }
 0x6f4   : > { %v3609_v52 = vmul.f32 %v10034_v35, %v3592_v14 }
 0x6f5   : > { %v3536_v5 = vsub.f32 1.5, %v3535_v21  ;;  %v10198_v1 = vadd.f32 %v3734_v43, %v10194_v53 }
 0x6f6   : > { %v10214_v55 = vadd.f32 %v10062_v22, %v3609_v52 }
 0x6f7   : > { %v7226_v31 = vpop.eup %7225  ;;  %v3537_v40 = vmul.f32 %v7224_v57, %v3536_v5  ;;  %v6512_v18 = vmul.f32 -1.442695, %v10198_v1 }
 0x6f8   : > { %v3835_v3 = vadd.f32 1.0, %v7226_v31 }
 0x6f9   : > { %7227 = vpow2.f32 %v6512_v18  ;;  %v3541_v48 = vsel %vm3540_vm8, %v7224_v57, %v3537_v40 }
 0x6fa   : > { %7229 = vrcp.f32 %v3835_v3  ;;  %v3736_v62 = vpop.f32.mrf.mxu2  ;;  %v3593_v45 = vmul.f32 %v3541_v48, %v10102_v4  ;;  %v3862_v11 = vand.u32 2147483648, %v3835_v3  ;;  %v3860_v21 = vand.u32 2147483647, %v3835_v3 }
 0x6fb   : > { %v3737_v46 = vadd.f32 %v10170_v36, %v3736_v62  ;;  %vm3856_vm11 = vweird.f32 %v3835_v3  ;;  %v10233_v62 = vadd.f32 %v10129_v47, %v9729_v44 }
 0x6fc   : > { %v3610_v10 = vmul.f32 %v10034_v35, %v3593_v45  ;;  %v3863_v8 = vor.u32 1.1754944e-38, %v3862_v11  ;;  %vm3861_vm13 = vcmp.eq.f32.partialorder %v3860_v21, 8.507059e+37 }
 0x6fd   : > { %v10211_v29 = vadd.f32 %v3737_v46, %v10206_v38 }
 0x6fe   : > { %v10217_v39 = vadd.f32 %v10062_v22, %v3610_v10 }
 0x6ff   : > { %v7228_v4 = vpop.eup %7227  ;;  %v6513_v41 = vmul.f32 -1.442695, %v10211_v29 }
 0x700   : > { %v7230_v26 = vpop.eup %7229  ;;  %v3836_v57 = vadd.f32 1.0, %v7228_v4  ;;  %v3653_v9 = vpack.c.bf16 %v10217_v39, %v10214_v55 }
 0x701   : > { %7231 = vpow2.f32 %v6513_v41  ;;  %v3852_v16 = vmul.f32 %v7230_v26, %v3835_v3  ;;  %vm3857_vm9 = vweird.f32 %v7230_v26 }
 0x702   : > { %7233 = vrcp.f32 %v3836_v57  ;;  %v3738_v15 = vpop.f32.mrf.mxu2  ;;  %vm3858_vm12 = vmor %vm3856_vm11, %vm3857_vm9  ;;  %v3877_v46 = vand.u32 2147483648, %v3836_v57  ;;  %v3875_v41 = vand.u32 2147483647, %v3836_v57  ;;  %vm3871_vm15 = vweird.f32 %v3836_v57 }
 0x703   : > { %3755 = vmatmul.bf16.gmra.mxu2 %v3653_v9  ;;  %v3739_v32 = vadd.f32 %v10170_v36, %v3738_v15  ;;  %v3853_v27 = vsub.f32 1.0, %v3852_v16 }
 0x704   : > { %vm3876_vm1 = vcmp.eq.f32.partialorder %v3875_v41, 8.507059e+37 }
 0x705   : > { %v10228_v2 = vadd.f32 %v3739_v32, %v10224_v7  ;;  %v3854_v23 = vmul.f32 %v7230_v26, %v3853_v27 }
 0x707   : > { %v7232_v43 = vpop.eup %7231  ;;  %v6514_v20 = vmul.f32 -1.442695, %v10228_v2  ;;  %v3855_v5 = vadd.f32 %v7230_v26, %v3854_v23  ;;  %v10246_v23 = vadd.f32 %v10132_v63, %v9747_v0 }
 0x708   : > { %v7234_v14 = vpop.eup %7233  ;;  %v3837_v31 = vadd.f32 1.0, %v7232_v43 }
 0x709   : > { %7235 = vpow2.f32 %v6514_v20  ;;  %v3859_v50 = vsel %vm3858_vm12, %v7230_v26, %v3855_v5  ;;  %v3867_v40 = vmul.f32 %v7234_v14, %v3836_v57  ;;  %vm3872_vm14 = vweird.f32 %v7234_v14 }
 0x70a   : > { %7237 = vrcp.f32 %v3837_v31  ;;  %v3741_v18 = vpop.f32.mrf.mxu2  ;;  %v3864_v48 = vsel %vm3861_vm13, %v3863_v8, %v3859_v50  ;;  %vm3873_vm0 = vmor %vm3871_vm15, %vm3872_vm14  ;;  %v3892_v20 = vand.u32 2147483648, %v3837_v31  ;;  %v3890_v8 = vand.u32 2147483647, %v3837_v31 }
 0x70b   : > { %v3742_v45 = vadd.f32 %v10170_v36, %v3741_v18  ;;  %v10237_v52 = vmul.f32 %v3864_v48, %v10181_v6  ;;  %v3868_v3 = vsub.f32 1.0, %v3867_v40  ;;  %v3878_v6 = vor.u32 1.1754944e-38, %v3877_v46 }
 0x70c   : > { %vm3886_vm3 = vweird.f32 %v3837_v31  ;;  %vm3891_vm5 = vcmp.eq.f32.partialorder %v3890_v8, 8.507059e+37 }
 0x70d   : > { %v10240_v10 = vadd.f32 %v3742_v45, %v10233_v62  ;;  %4109 = vadd.xlane.f32.xlu2 %v10237_v52  ;;  %v3869_v4 = vmul.f32 %v7234_v14, %v3868_v3 }
 0x70f   : > { %v7236_v26 = vpop.eup %7235  ;;  %v6515_v9 = vmul.f32 -1.442695, %v10240_v10  ;;  %v3870_v44 = vadd.f32 %v7234_v14, %v3869_v4 }
 0x710   : > { %v7238_v47 = vpop.eup %7237  ;;  %v3838_v16 = vadd.f32 1.0, %v7236_v26 }
 0x711   : > { %7239 = vpow2.f32 %v6515_v9  ;;  %v3874_v15 = vsel %vm3873_vm0, %v7234_v14, %v3870_v44  ;;  %v3882_v32 = vmul.f32 %v7238_v47, %v3837_v31  ;;  %vm3887_vm2 = vweird.f32 %v7238_v47 }
 0x712   : > { %7241 = vrcp.f32 %v3838_v16  ;;  %v3743_v27 = vpop.f32.mrf.mxu2  ;;  %v3879_v11 = vsel %vm3876_vm1, %v3878_v6, %v3874_v15  ;;  %vm3888_vm4 = vmor %vm3886_vm3, %vm3887_vm2  ;;  %v3907_v41 = vand.u32 2147483648, %v3838_v16  ;;  %v3905_v31 = vand.u32 2147483647, %v3838_v16 }
 0x713   : > { %v3744_v21 = vadd.f32 %v10170_v36, %v3743_v27  ;;  %v10250_v43 = vmul.f32 %v3879_v11, %v10198_v1  ;;  %v3883_v57 = vsub.f32 1.0, %v3882_v32  ;;  %v3893_v1 = vor.u32 1.1754944e-38, %v3892_v20 }
 0x714   : > { %vm3901_vm7 = vweird.f32 %v3838_v16  ;;  %vm3906_vm9 = vcmp.eq.f32.partialorder %v3905_v31, 8.507059e+37 }
 0x715   : > { %v10253_v5 = vadd.f32 %v3744_v21, %v10246_v23  ;;  %4111 = vadd.xlane.f32.xlu1 %v10250_v43  ;;  %v3884_v14 = vmul.f32 %v7238_v47, %v3883_v57 }
 0x717   : > { %v7240_v50 = vpop.eup %7239  ;;  %v6516_v40 = vmul.f32 -1.442695, %v10253_v5  ;;  %v3885_v0 = vadd.f32 %v7238_v47, %v3884_v14 }
 0x718   : > { %v7242_v63 = vpop.eup %7241  ;;  %v3839_v18 = vadd.f32 1.0, %v7240_v50 }
 0x719   : > { %7243 = vpow2.f32 %v6516_v40  ;;  %v3889_v48 = vsel %vm3888_vm4, %v7238_v47, %v3885_v0  ;;  %v3897_v45 = vmul.f32 %v7242_v63, %v3838_v16  ;;  %vm3902_vm6 = vweird.f32 %v7242_v63  ;;  %v3383_v16 = vpop.xlane.xlu0 %3382 }
 0x71a   : > { %7245 = vrcp.f32 %v3839_v18  ;;  %v3894_v3 = vsel %vm3891_vm5, %v3893_v1, %v3889_v48  ;;  %vm3903_vm8 = vmor %vm3901_vm7, %vm3902_vm6  ;;  %v3908_v47 = vor.u32 1.1754944e-38, %v3907_v41  ;;  %v3922_v57 = vand.u32 2147483648, %v3839_v18 }
 0x71b   : > { %v10258_v46 = vmul.f32 %v3894_v3, %v10211_v29  ;;  %v3898_v4 = vsub.f32 1.0, %v3897_v45  ;;  %v3920_v14 = vand.u32 2147483647, %v3839_v18  ;;  %vm3916_vm12 = vweird.f32 %v3839_v18 }
 0x71c   : > { %v3923_v40 = vor.u32 1.1754944e-38, %v3922_v57  ;;  %v3402_v0 = vmul.f32 0.03125, %v3383_v16 }
 0x71d   : > { %4113 = vadd.xlane.f32.xlu0 %v10258_v46  ;;  %v3899_v26 = vmul.f32 %v7242_v63, %v3898_v4  ;;  %vm3921_vm14 = vcmp.eq.f32.partialorder %v3920_v14, 8.507059e+37 }
 0x71e   : > { %v3418_v4 = vadd.f32 0.1, %v3402_v0 }
 0x71f   : > { %v7244_v9 = vpop.eup %7243  ;;  %v3900_v44 = vadd.f32 %v7242_v63, %v3899_v26 }
 0x720   : > { %v7246_v6 = vpop.eup %7245  ;;  %v3840_v15 = vadd.f32 1.0, %v7244_v9  ;;  %vm3548_vm4 = vweird.f32 %v3418_v4 }
 0x721   : > { %v3904_v32 = vsel %vm3903_vm8, %v7242_v63, %v3900_v44  ;;  %v3912_v27 = vmul.f32 %v7246_v6, %v3839_v18  ;;  %vm3917_vm11 = vweird.f32 %v7246_v6 }
 0x722   : > { %7247 = vrcp.f32 %v3840_v15  ;;  %v3909_v29 = vsel %vm3906_vm9, %v3908_v47, %v3904_v32  ;;  %vm3918_vm13 = vmor %vm3916_vm12, %vm3917_vm11  ;;  %v3937_v3 = vand.u32 2147483648, %v3840_v15  ;;  %v3935_v26 = vand.u32 2147483647, %v3840_v15 }
 0x723   : > { %v10262_v11 = vmul.f32 %v3909_v29, %v10228_v2  ;;  %v3913_v21 = vsub.f32 1.0, %v3912_v27  ;;  %vm3931_vm0 = vweird.f32 %v3840_v15  ;;  %7249 = vrsqrt.f32 %v3418_v4 }
 0x724   : > { %v3938_v31 = vor.u32 1.1754944e-38, %v3937_v3  ;;  %vm3936_vm2 = vcmp.eq.f32.partialorder %v3935_v26, 8.507059e+37 }
 0x725   : > { %4115 = vadd.xlane.f32.xlu2 %v10262_v11  ;;  %v3914_v20 = vmul.f32 %v7246_v6, %v3913_v21 }
 0x727   : > { %v3915_v8 = vadd.f32 %v7246_v6, %v3914_v20 }
 0x728   : > { %v7248_v50 = vpop.eup %7247 }
 0x729   : > { %v3919_v63 = vsel %vm3918_vm13, %v7246_v6, %v3915_v8  ;;  %v3927_v1 = vmul.f32 %v7248_v50, %v3840_v15  ;;  %vm3932_vm15 = vweird.f32 %v7248_v50 }
 0x72a   : > { %v3924_v48 = vsel %vm3921_vm14, %v3923_v40, %v3919_v63  ;;  %vm3933_vm1 = vmor %vm3931_vm0, %vm3932_vm15 }
 0x72b   : > { %v10266_v2 = vmul.f32 %v3924_v48, %v10240_v10  ;;  %v3928_v45 = vsub.f32 1.0, %v3927_v1  ;;  %v7250_v10 = vpop.eup %7249 }
 0x72c   : > { %v3543_v47 = vmul.f32 %v7250_v10, %v3418_v4  ;;  %vm3549_vm3 = vweird.f32 %v7250_v10 }
 0x72d   : > { %4117 = vadd.xlane.f32.xlu1 %v10266_v2  ;;  %v3929_v41 = vmul.f32 %v7248_v50, %v3928_v45  ;;  %vm3550_vm5 = vmor %vm3548_vm4, %vm3549_vm3 }
 0x72e   : > { %v3544_v32 = vmul.f32 %v7250_v10, %v3543_v47 }
 0x72f   : > { %v3930_v18 = vadd.f32 %v7248_v50, %v3929_v41 }
 0x730   : > { %v3545_v57 = vmul.f32 0.5, %v3544_v32 }
 0x731   : > { %v3934_v9 = vsel %vm3933_vm1, %v7248_v50, %v3930_v18 }
 0x732   : > { %v3939_v44 = vsel %vm3936_vm2, %v3938_v31, %v3934_v9  ;;  %v3546_v15 = vsub.f32 1.5, %v3545_v57 }
 0x733   : > { %v10270_v6 = vmul.f32 %v3939_v44, %v10253_v5 }
 0x734   : > { %v3547_v14 = vmul.f32 %v7250_v10, %v3546_v15 }
 0x735   : > { %4119 = vadd.xlane.f32.xlu0 %v10270_v6 }
 0x736   : > { %v3551_v0 = vsel %vm3550_vm5, %v7250_v10, %v3547_v14 }
 0x737   : > { %v3594_v48 = vmul.f32 %v3551_v0, %v10120_v54 }
 0x739   : > { %v3611_v4 = vmul.f32 %v10034_v35, %v3594_v48 }
 0x73b   : > { %v10278_v47 = vadd.f32 %v10062_v22, %v3611_v4 }
 0x73e   : > { %v3385_v27 = vpop.xlane.xlu2 %3384 }
 0x73f   : > { %v3403_v29 = vmul.f32 0.03125, %v3385_v27 }
 0x741   : > { %v3419_v21 = vadd.f32 0.1, %v3403_v29 }
 0x743   : > { %7251 = vrsqrt.f32 %v3419_v21  ;;  %vm3558_vm7 = vweird.f32 %v3419_v21 }
 0x749   : > { %v7252_v20 = vpop.eup %7251 }
 0x74a   : > { %v3553_v16 = vmul.f32 %v7252_v20, %v3419_v21  ;;  %vm3559_vm6 = vweird.f32 %v7252_v20 }
 0x74b   : > { %vm3560_vm8 = vmor %vm3558_vm7, %vm3559_vm6 }
 0x74c   : > { %v3554_v8 = vmul.f32 %v7252_v20, %v3553_v16  ;;  %v3387_v50 = vpop.xlane.xlu1 %3386 }
 0x74d   : > { %v3404_v5 = vmul.f32 0.03125, %v3387_v50 }
 0x74e   : > { %v3555_v40 = vmul.f32 0.5, %v3554_v8  ;;  %v10287_v8 = vadd.f32 %v10156_v30, %v9776_v12 }
 0x74f   : > { %v3420_v63 = vadd.f32 0.1, %v3404_v5 }
 0x750   : > { %v3556_v1 = vsub.f32 1.5, %v3555_v40 }
 0x751   : > { %7253 = vrsqrt.f32 %v3420_v63  ;;  %vm3568_vm11 = vweird.f32 %v3420_v63 }
 0x752   : > { %v3557_v45 = vmul.f32 %v7252_v20, %v3556_v1 }
 0x754   : > { %v3561_v3 = vsel %vm3560_vm8, %v7252_v20, %v3557_v45  ;;  %v3389_v26 = vpop.xlane.xlu0 %3388 }
 0x755   : > { %v3595_v41 = vmul.f32 %v3561_v3, %v10139_v51  ;;  %v3405_v31 = vmul.f32 0.03125, %v3389_v26 }
 0x757   : > { %v7254_v18 = vpop.eup %7253  ;;  %v3612_v9 = vmul.f32 %v10034_v35, %v3595_v41  ;;  %v3421_v10 = vadd.f32 0.1, %v3405_v31  ;;  %v10299_v41 = vadd.f32 %v10159_v13, %v9789_v60  ;;  %v10317_v13 = vadd.f32 %v10184_v19, %v9806_v28 }
 0x758   : > { %v3563_v44 = vmul.f32 %v7254_v18, %v3420_v63  ;;  %vm3569_vm9 = vweird.f32 %v7254_v18 }
 0x759   : > { %v10281_v54 = vadd.f32 %v10062_v22, %v3612_v9  ;;  %7255 = vrsqrt.f32 %v3421_v10  ;;  %vm3570_vm12 = vmor %vm3568_vm11, %vm3569_vm9  ;;  %vm3578_vm14 = vweird.f32 %v3421_v10 }
 0x75a   : > { %v3564_v32 = vmul.f32 %v7254_v18, %v3563_v44 }
 0x75b   : > { %v3654_v51 = vpack.c.bf16 %v10281_v54, %v10278_v47 }
 0x75c   : > { %v3565_v27 = vmul.f32 0.5, %v3564_v32 }
 0x75d   : > { %3760 = vmatmul.bf16.gmra.mxu2 %v3654_v51 }
 0x75e   : > { %v3566_v29 = vsub.f32 1.5, %v3565_v27 }
 0x75f   : > { %v7256_v21 = vpop.eup %7255 }
 0x760   : > { %v3567_v57 = vmul.f32 %v7254_v18, %v3566_v29  ;;  %v3573_v15 = vmul.f32 %v7256_v21, %v3421_v10  ;;  %vm3579_vm13 = vweird.f32 %v7256_v21 }
 0x761   : > { %vm3580_vm15 = vmor %vm3578_vm14, %vm3579_vm13 }
 0x762   : > { %v3574_v20 = vmul.f32 %v7256_v21, %v3573_v15  ;;  %v3571_v5 = vsel %vm3570_vm12, %v7254_v18, %v3567_v57  ;;  %v10326_v15 = vadd.f32 %v10187_v17, %v9815_v25 }
 0x763   : > { %v3596_v1 = vmul.f32 %v3571_v5, %v10146_v61 }
 0x764   : > { %v3575_v16 = vmul.f32 0.5, %v3574_v20 }
 0x765   : > { %v3613_v30 = vmul.f32 %v10034_v35, %v3596_v1 }
 0x766   : > { %v3746_v14 = vpop.f32.mrf.mxu2  ;;  %v3576_v40 = vsub.f32 1.5, %v3575_v16 }
 0x767   : > { %v3747_v50 = vadd.f32 %v10170_v36, %v3746_v14  ;;  %v10307_v18 = vadd.f32 %v10062_v22, %v3613_v30 }
 0x768   : > { %v3577_v48 = vmul.f32 %v7256_v21, %v3576_v40 }
 0x769   : > { %v10291_v0 = vadd.f32 %v3747_v50, %v10287_v8 }
 0x76a   : > { %v3581_v45 = vsel %vm3580_vm15, %v7256_v21, %v3577_v48 }
 0x76b   : > { %v6517_v63 = vmul.f32 -1.442695, %v10291_v0  ;;  %v3597_v12 = vmul.f32 %v3581_v45, %v10163_v37 }
 0x76d   : > { %7257 = vpow2.f32 %v6517_v63  ;;  %v3614_v61 = vmul.f32 %v10034_v35, %v3597_v12 }
 0x76e   : > { %v3748_v3 = vpop.f32.mrf.mxu2 }
 0x76f   : > { %v3749_v4 = vadd.f32 %v10170_v36, %v3748_v3  ;;  %v10310_v31 = vadd.f32 %v10062_v22, %v3614_v61 }
 0x771   : > { %v10304_v26 = vadd.f32 %v3749_v4, %v10299_v41  ;;  %v3655_v60 = vpack.c.bf16 %v10310_v31, %v10307_v18  ;;  %v10339_v4 = vadd.f32 %v10214_v55, %v9828_v34 }
 0x773   : > { %v7258_v37 = vpop.eup %7257  ;;  %v6518_v9 = vmul.f32 -1.442695, %v10304_v26  ;;  %3765 = vmatmul.bf16.gmra.mxu2 %v3655_v60 }
 0x774   : > { %v3841_v44 = vadd.f32 1.0, %v7258_v37 }
 0x775   : > { %7259 = vpow2.f32 %v6518_v9 }
 0x776   : > { %7261 = vrcp.f32 %v3841_v44  ;;  %v3751_v35 = vpop.f32.mrf.mxu2  ;;  %v3952_v20 = vand.u32 2147483648, %v3841_v44  ;;  %v3950_v5 = vand.u32 2147483647, %v3841_v44  ;;  %vm3946_vm1 = vweird.f32 %v3841_v44 }
 0x777   : > { %v3752_v10 = vadd.f32 %v10170_v36, %v3751_v35 }
 0x778   : > { %v3953_v3 = vor.u32 1.1754944e-38, %v3952_v20  ;;  %vm3951_vm3 = vcmp.eq.f32.partialorder %v3950_v5, 8.507059e+37 }
 0x779   : > { %v10321_v22 = vadd.f32 %v3752_v10, %v10317_v13 }
 0x77b   : > { %v7260_v32 = vpop.eup %7259  ;;  %v6519_v51 = vmul.f32 -1.442695, %v10321_v22 }
 0x77c   : > { %v7262_v27 = vpop.eup %7261  ;;  %v3842_v29 = vadd.f32 1.0, %v7260_v32 }
 0x77d   : > { %7263 = vpow2.f32 %v6519_v51  ;;  %v3942_v21 = vmul.f32 %v7262_v27, %v3841_v44  ;;  %vm3947_vm0 = vweird.f32 %v7262_v27 }
 0x77e   : > { %7265 = vrcp.f32 %v3842_v29  ;;  %v3753_v57 = vpop.f32.mrf.mxu2  ;;  %vm3948_vm2 = vmor %vm3946_vm1, %vm3947_vm0  ;;  %v3967_v10 = vand.u32 2147483648, %v3842_v29  ;;  %v3965_v51 = vand.u32 2147483647, %v3842_v29  ;;  %vm3961_vm5 = vweird.f32 %v3842_v29 }
 0x77f   : > { %v3754_v28 = vadd.f32 %v10170_v36, %v3753_v57  ;;  %v3943_v19 = vsub.f32 1.0, %v3942_v21 }
 0x780   : > { %v4110_v16 = vpop.xlane.xlu2 %4109  ;;  %vm3966_vm7 = vcmp.eq.f32.partialorder %v3965_v51, 8.507059e+37 }
 0x781   : > { %v10330_v14 = vadd.f32 %v3754_v28, %v10326_v15  ;;  %v3944_v50 = vmul.f32 %v7262_v27, %v3943_v19  ;;  %v4141_v40 = vmul.f32 0.03125, %v4110_v16  ;;  %v3968_v16 = vor.u32 1.1754944e-38, %v3967_v10 }
 0x783   : > { %v7264_v1 = vpop.eup %7263  ;;  %v6520_v48 = vmul.f32 -1.442695, %v10330_v14  ;;  %v3945_v63 = vadd.f32 %v7262_v27, %v3944_v50  ;;  %v4157_v17 = vsub.f32 %v10237_v52, %v4141_v40  ;;  %v10363_v40 = vadd.f32 %v10217_v39, %v9849_v24 }
 0x784   : > { %v7266_v45 = vpop.eup %7265  ;;  %v10333_v25 = vadd.f32 1.0, %v7264_v1 }
 0x785   : > { %7267 = vpow2.f32 %v6520_v48  ;;  %v3949_v12 = vsel %vm3948_vm2, %v7262_v27, %v3945_v63  ;;  %v3957_v30 = vmul.f32 %v7266_v45, %v3842_v29  ;;  %v10343_v9 = vsel %vm937_vm10, %v4157_v17, 0.0 }
 0x786   : > { %7269 = vrcp.f32 %v10333_v25  ;;  %v3756_v61 = vpop.f32.mrf.mxu2  ;;  %v3954_v37 = vsel %vm3951_vm3, %v3953_v3, %v3949_v12  ;;  %v4189_v60 = vmul.f32 %v10343_v9, %v10343_v9  ;;  %vm3962_vm4 = vweird.f32 %v7266_v45 }
 0x787   : > { %v3757_v52 = vadd.f32 %v10170_v36, %v3756_v61  ;;  %v10347_v44 = vmul.f32 %v3954_v37, %v10291_v0  ;;  %v3958_v35 = vsub.f32 1.0, %v3957_v30  ;;  %vm3963_vm6 = vmor %vm3961_vm5, %vm3962_vm4  ;;  %v3982_v3 = vand.u32 2147483648, %v10333_v25 }
 0x788   : > { %4205 = vadd.xlane.f32.xlu2 %v4189_v60  ;;  %v4112_v34 = vpop.xlane.xlu1 %4111  ;;  %v3980_v30 = vand.u32 2147483647, %v10333_v25  ;;  %vm3976_vm9 = vweird.f32 %v10333_v25 }
 0x789   : > { %v10352_v32 = vadd.f32 %v3757_v52, %v10339_v4  ;;  %4121 = vadd.xlane.f32.xlu0 %v10347_v44  ;;  %v3959_v55 = vmul.f32 %v7266_v45, %v3958_v35  ;;  %v4142_v27 = vmul.f32 0.03125, %v4112_v34  ;;  %v3983_v34 = vor.u32 1.1754944e-38, %v3982_v3 }
 0x78a   : > { %vm3981_vm12 = vcmp.eq.f32.partialorder %v3980_v30, 8.507059e+37 }
 0x78b   : > { %v7268_v21 = vpop.eup %7267  ;;  %v6521_v0 = vmul.f32 -1.442695, %v10352_v32  ;;  %v3960_v57 = vadd.f32 %v7266_v45, %v3959_v55  ;;  %v4158_v20 = vsub.f32 %v10250_v43, %v4142_v27 }
 0x78c   : > { %v7270_v28 = vpop.eup %7269  ;;  %v10356_v19 = vadd.f32 1.0, %v7268_v21 }
 0x78d   : > { %7271 = vpow2.f32 %v6521_v0  ;;  %v3964_v50 = vsel %vm3963_vm6, %v7266_v45, %v3960_v57  ;;  %v3972_v5 = vmul.f32 %v7270_v28, %v10333_v25  ;;  %v10367_v48 = vsel %vm937_vm10, %v4158_v20, 0.0 }
 0x78e   : > { %7273 = vrcp.f32 %v10356_v19  ;;  %v3758_v1 = vpop.f32.mrf.mxu2  ;;  %v3969_v29 = vsel %vm3966_vm7, %v3968_v16, %v3964_v50  ;;  %v4190_v45 = vmul.f32 %v10367_v48, %v10367_v48  ;;  %vm3977_vm8 = vweird.f32 %v7270_v28 }
 0x78f   : > { %v3759_v43 = vadd.f32 %v10170_v36, %v3758_v1  ;;  %v10371_v63 = vmul.f32 %v3969_v29, %v10304_v26  ;;  %v3973_v17 = vsub.f32 1.0, %v3972_v5  ;;  %vm3978_vm11 = vmor %vm3976_vm9, %vm3977_vm8  ;;  %v3997_v57 = vand.u32 2147483648, %v10356_v19 }
 0x790   : > { %v4114_v39 = vpop.xlane.xlu0 %4113  ;;  %4207 = vadd.xlane.f32.xlu1 %v4190_v45  ;;  %v3995_v16 = vand.u32 2147483647, %v10356_v19  ;;  %vm3991_vm14 = vweird.f32 %v10356_v19 }
 0x791   : > { %v10377_v24 = vadd.f32 %v3759_v43, %v10363_v40  ;;  %4123 = vadd.xlane.f32.xlu2 %v10371_v63  ;;  %v3974_v12 = vmul.f32 %v7270_v28, %v3973_v17  ;;  %v4143_v61 = vmul.f32 0.03125, %v4114_v39  ;;  %v3998_v45 = vor.u32 1.1754944e-38, %v3997_v57 }
 0x792   : > { %vm3996_vm0 = vcmp.eq.f32.partialorder %v3995_v16, 8.507059e+37 }
 0x793   : > { %v7272_v26 = vpop.eup %7271  ;;  %v6522_v37 = vmul.f32 -1.442695, %v10377_v24  ;;  %v3975_v52 = vadd.f32 %v7270_v28, %v3974_v12  ;;  %v4159_v10 = vsub.f32 %v10258_v46, %v4143_v61 }
 0x794   : > { %v7274_v60 = vpop.eup %7273  ;;  %v3845_v35 = vadd.f32 1.0, %v7272_v26 }
 0x795   : > { %7275 = vpow2.f32 %v6522_v37  ;;  %v3979_v55 = vsel %vm3978_vm11, %v7270_v28, %v3975_v52  ;;  %v3987_v51 = vmul.f32 %v7274_v60, %v10356_v19  ;;  %v10387_v21 = vsel %vm937_vm10, %v4159_v10, 0.0 }
 0x796   : > { %7277 = vrcp.f32 %v3845_v35  ;;  %v3984_v27 = vsel %vm3981_vm12, %v3983_v34, %v3979_v55  ;;  %v4191_v25 = vmul.f32 %v10387_v21, %v10387_v21  ;;  %vm3992_vm13 = vweird.f32 %v7274_v60 }
 0x797   : > { %v10390_v0 = vmul.f32 %v3984_v27, %v10321_v22  ;;  %v3988_v46 = vsub.f32 1.0, %v3987_v51  ;;  %vm3993_vm15 = vmor %vm3991_vm14, %vm3992_vm13  ;;  %v4012_v26 = vand.u32 2147483648, %v3845_v35  ;;  %v4010_v52 = vand.u32 2147483647, %v3845_v35 }
 0x798   : > { %v4116_v28 = vpop.xlane.xlu2 %4115  ;;  %4209 = vadd.xlane.f32.xlu1 %v4191_v25  ;;  %vm4006_vm2 = vweird.f32 %v3845_v35 }
 0x799   : > { %4125 = vadd.xlane.f32.xlu2 %v10390_v0  ;;  %v3989_v20 = vmul.f32 %v7274_v60, %v3988_v46  ;;  %v4144_v50 = vmul.f32 0.03125, %v4116_v28  ;;  %v4013_v51 = vor.u32 1.1754944e-38, %v4012_v26  ;;  %vm4011_vm4 = vcmp.eq.f32.partialorder %v4010_v52, 8.507059e+37  ;;  %v6689_v52 = vld [vmem:[#allocation14 + $0x28] sm:$0xff] }
 0x79b   : > { %v7276_v5 = vpop.eup %7275  ;;  %v3990_v1 = vadd.f32 %v7274_v60, %v3989_v20  ;;  %v4160_v43 = vsub.f32 %v10262_v11, %v4144_v50 }
 0x79c   : > { %v7278_v22 = vpop.eup %7277  ;;  %v3846_v29 = vadd.f32 1.0, %v7276_v5 }
 0x79d   : > { %v3994_v17 = vsel %vm3993_vm15, %v7274_v60, %v3990_v1  ;;  %v4002_v3 = vmul.f32 %v7278_v22, %v3845_v35  ;;  %v10401_v39 = vsel %vm937_vm10, %v4160_v43, 0.0  ;;  %vm4007_vm1 = vweird.f32 %v7278_v22 }
 0x79e   : > { %7279 = vrcp.f32 %v3846_v29  ;;  %v3999_v12 = vsel %vm3996_vm0, %v3998_v45, %v3994_v17  ;;  %v4192_v30 = vmul.f32 %v10401_v39, %v10401_v39  ;;  %vm4008_vm3 = vmor %vm4006_vm2, %vm4007_vm1  ;;  %v4027_v20 = vand.u32 2147483648, %v3846_v29 }
 0x79f   : > { %v10406_v19 = vmul.f32 %v3999_v12, %v10330_v14  ;;  %v4003_v61 = vsub.f32 1.0, %v4002_v3  ;;  %v4025_v50 = vand.u32 2147483647, %v3846_v29  ;;  %vm4021_vm6 = vweird.f32 %v3846_v29 }
 0x7a0   : > { %4211 = vadd.xlane.f32.xlu0 %v4192_v30  ;;  %v4118_v11 = vpop.xlane.xlu1 %4117 }
 0x7a1   : > { %4127 = vadd.xlane.f32.xlu1 %v10406_v19  ;;  %v4004_v37 = vmul.f32 %v7278_v22, %v4003_v61  ;;  %v4145_v60 = vmul.f32 0.03125, %v4118_v11  ;;  %vm4026_vm8 = vcmp.eq.f32.partialorder %v4025_v50, 8.507059e+37  ;;  %v10433_v61 = vadd.f32 %v10278_v47, %v9880_v59 }
 0x7a3   : > { %v4005_v10 = vadd.f32 %v7278_v22, %v4004_v37  ;;  %v4161_v55 = vsub.f32 %v10266_v2, %v4145_v60  ;;  %v10439_v60 = vadd.f32 %v10281_v54, %v9945_v33 }
 0x7a4   : > { %v7280_v34 = vpop.eup %7279 }
 0x7a5   : > { %v4009_v27 = vsel %vm4008_vm3, %v7278_v22, %v4005_v10  ;;  %v4017_v14 = vmul.f32 %v7280_v34, %v3846_v29  ;;  %v10412_v46 = vsel %vm937_vm10, %v4161_v55, 0.0  ;;  %vm4022_vm5 = vweird.f32 %v7280_v34  ;;  %v6691_v29 = vld [vmem:[#allocation14 + $0x38] sm:$0xff] }
 0x7a6   : > { %v4014_v25 = vsel %vm4011_vm4, %v4013_v51, %v4009_v27  ;;  %v4193_v28 = vmul.f32 %v10412_v46, %v10412_v46  ;;  %vm4023_vm7 = vmor %vm4021_vm6, %vm4022_vm5  ;;  %4569 = vmatpush.bf16.msrb.mxu3 %v6691_v29  ;;  %v6688_v51 = vld [vmem:[#allocation14 + $0x20] sm:$0xff] }
 0x7a7   : > { %v10415_v57 = vmul.f32 %v4014_v25, %v10352_v32  ;;  %v4018_v35 = vsub.f32 1.0, %v4017_v14  ;;  %v4028_v32 = vor.u32 1.1754944e-38, %v4027_v20 }
 0x7a8   : > { %v4120_v16 = vpop.xlane.xlu0 %4119  ;;  %4213 = vadd.xlane.f32.xlu0 %v4193_v28  ;;  %v10451_v28 = vadd.f32 %v10307_v18, %v9953_v56 }
 0x7a9   : > { %4129 = vadd.xlane.f32.xlu1 %v10415_v57  ;;  %v4019_v2 = vmul.f32 %v7280_v34, %v4018_v35  ;;  %v4146_v5 = vmul.f32 0.03125, %v4120_v16 }
 0x7ab   : > { %v4020_v1 = vadd.f32 %v7280_v34, %v4019_v2  ;;  %v4162_v22 = vsub.f32 %v10270_v6, %v4146_v5  ;;  %v6690_v6 = vld [vmem:[#allocation14 + $0x30] sm:$0xff] }
 0x7ac   : > { %4570 = vmatpush.bf16.msrb.mxu3 %v6690_v6 }
 0x7ad   : > { %v4024_v43 = vsel %vm4023_vm7, %v7280_v34, %v4020_v1  ;;  %v10423_v45 = vsel %vm937_vm10, %v4162_v22, 0.0 }
 0x7ae   : > { %v4029_v17 = vsel %vm4026_vm8, %v4028_v32, %v4024_v43  ;;  %v4194_v3 = vmul.f32 %v10423_v45, %v10423_v45  ;;  %v6687_v32 = vld [vmem:[#allocation14 + $0x18] sm:$0xff] }
 0x7af   : > { %v10428_v12 = vmul.f32 %v4029_v17, %v10377_v24 }
 0x7b0   : > { %4215 = vadd.xlane.f32.xlu2 %v4194_v3  ;;  %4571 = vmatpush.bf16.msrb.mxu3 %v6689_v52 }
 0x7b1   : > { %4131 = vadd.xlane.f32.xlu0 %v10428_v12 }
 0x7b4   : > { %4572 = vmatpush.bf16.msrb.mxu3 %v6688_v51 }
 0x7b8   : > { %4573 = vmatpush.bf16.msrb.mxu3 %v6687_v32 }
 0x7e0   : > { %v3761_v30 = vpop.f32.mrf.mxu2 }
 0x7e1   : > { %v3762_v26 = vadd.f32 %v10170_v36, %v3761_v30 }
 0x7e3   : > { %v3783_v11 = vadd.f32 %v3762_v26, %v10433_v61 }
 0x7e5   : > { %v6523_v37 = vmul.f32 -1.442695, %v3783_v11 }
 0x7e7   : > { %7281 = vpow2.f32 %v6523_v37 }
 0x7e8   : > { %v3763_v24 = vpop.f32.mrf.mxu2 }
 0x7e9   : > { %v3764_v10 = vadd.f32 %v10170_v36, %v3763_v24  ;;  %v10465_v24 = vadd.f32 %v10310_v31, %v9965_v42 }
 0x7eb   : > { %v10443_v34 = vadd.f32 %v3764_v10, %v10439_v60 }
 0x7ed   : > { %v7282_v59 = vpop.eup %7281  ;;  %v6524_v47 = vmul.f32 -1.442695, %v10443_v34 }
 0x7ee   : > { %v3847_v55 = vadd.f32 1.0, %v7282_v59  ;;  %v6686_v59 = vld [vmem:[#allocation14 + $0x10] sm:$0xff] }
 0x7ef   : > { %7283 = vpow2.f32 %v6524_v47  ;;  %4574 = vmatpush.bf16.msrb.mxu3 %v6686_v59 }
 0x7f0   : > { %7285 = vrcp.f32 %v3847_v55  ;;  %v4042_v16 = vand.u32 2147483648, %v3847_v55  ;;  %v4040_v22 = vand.u32 2147483647, %v3847_v55  ;;  %vm4036_vm11 = vweird.f32 %v3847_v55 }
 0x7f2   : > { %v4043_v30 = vor.u32 1.1754944e-38, %v4042_v16  ;;  %vm4041_vm13 = vcmp.eq.f32.partialorder %v4040_v22, 8.507059e+37 }
 0x7f5   : > { %v7284_v27 = vpop.eup %7283 }
 0x7f6   : > { %v7286_v14 = vpop.eup %7285  ;;  %v10446_v25 = vadd.f32 1.0, %v7284_v27  ;;  %v3766_v54 = vpop.f32.mrf.mxu2 }
 0x7f7   : > { %v4032_v33 = vmul.f32 %v7286_v14, %v3847_v55  ;;  %v3767_v35 = vadd.f32 %v10170_v36, %v3766_v54  ;;  %vm4037_vm9 = vweird.f32 %v7286_v14 }
 0x7f8   : > { %7287 = vrcp.f32 %v10446_v25  ;;  %vm4038_vm12 = vmor %vm4036_vm11, %vm4037_vm9  ;;  %vm4051_vm15 = vweird.f32 %v10446_v25 }
 0x7f9   : > { %v4033_v20 = vsub.f32 1.0, %v4032_v33  ;;  %v10455_v2 = vadd.f32 %v3767_v35, %v10451_v28 }
 0x7fb   : > { %v4206_v5 = vpop.xlane.xlu2 %4205  ;;  %v4034_v1 = vmul.f32 %v7286_v14, %v4033_v20  ;;  %v6525_v3 = vmul.f32 -1.442695, %v10455_v2 }
 0x7fc   : > { %v4122_v50 = vpop.xlane.xlu0 %4121  ;;  %v4237_v17 = vmul.f32 0.03125, %v4206_v5 }
 0x7fd   : > { %v4147_v43 = vmul.f32 0.03125, %v4122_v50  ;;  %v4035_v29 = vadd.f32 %v7286_v14, %v4034_v1  ;;  %7289 = vpow2.f32 %v6525_v3 }
 0x7fe   : > { %v7288_v56 = vpop.eup %7287  ;;  %v10459_v6 = vadd.f32 0.1, %v4237_v17  ;;  %v3768_v52 = vpop.f32.mrf.mxu2 }
 0x7ff   : > { %v4163_v18 = vsub.f32 %v10347_v44, %v4147_v43  ;;  %v4039_v26 = vsel %vm4038_vm12, %v7286_v14, %v4035_v29  ;;  %v4047_v37 = vmul.f32 %v7288_v56, %v10446_v25  ;;  %v3769_v47 = vadd.f32 %v10170_v36, %v3768_v52  ;;  %v6685_v29 = vld [vmem:[#allocation14 + $0x8] sm:$0xff] }
 0x800   : > { %7291 = vrsqrt.f32 %v10459_v6  ;;  %v4044_v44 = vsel %vm4041_vm13, %v4043_v30, %v4039_v26  ;;  %v4057_v14 = vand.u32 2147483648, %v10446_v25  ;;  %vm4052_vm14 = vweird.f32 %v7288_v56  ;;  %4575 = vmatpush.bf16.msrb.mxu3 %v6685_v29 }
 0x801   : > { %v10469_v10 = vsel %vm937_vm10, %v4163_v18, 0.0  ;;  %v10474_v51 = vmul.f32 %v4044_v44, %v3783_v11  ;;  %v4048_v27 = vsub.f32 1.0, %v4047_v37  ;;  %v10478_v42 = vadd.f32 %v3769_v47, %v10465_v24  ;;  %vm4053_vm0 = vmor %vm4051_vm15, %vm4052_vm14 }
 0x802   : > { %v4195_v55 = vmul.f32 %v10469_v10, %v10469_v10  ;;  %v4055_v36 = vand.u32 2147483647, %v10446_v25  ;;  %v4058_v43 = vor.u32 1.1754944e-38, %v4057_v14  ;;  %vm4275_vm3 = vweird.f32 %v10459_v6 }
 0x803   : > { %4133 = vadd.xlane.f32.xlu0 %v10474_v51  ;;  %v4208_v33 = vpop.xlane.xlu1 %4207  ;;  %v4049_v54 = vmul.f32 %v7288_v56, %v4048_v27  ;;  %v7290_v11 = vpop.eup %7289  ;;  %v6526_v16 = vmul.f32 -1.442695, %v10478_v42 }
 0x804   : > { %4217 = vadd.xlane.f32.xlu2 %v4195_v55  ;;  %v4124_v31 = vpop.xlane.xlu2 %4123  ;;  %v4238_v20 = vmul.f32 0.03125, %v4208_v33  ;;  %v10484_v1 = vadd.f32 1.0, %v7290_v11  ;;  %vm4056_vm1 = vcmp.eq.f32.partialorder %v4055_v36, 8.507059e+37 }
 0x805   : > { %v4148_v35 = vmul.f32 0.03125, %v4124_v31  ;;  %v4050_v50 = vadd.f32 %v7288_v56, %v4049_v54  ;;  %7293 = vpow2.f32 %v6526_v16 }
 0x806   : > { %v7292_v5 = vpop.eup %7291  ;;  %v10487_v32 = vadd.f32 0.1, %v4238_v20  ;;  %7295 = vrcp.f32 %v10484_v1  ;;  %vm4066_vm7 = vweird.f32 %v10484_v1 }
 0x807   : > { %v4164_v22 = vsub.f32 %v10371_v63, %v4148_v35  ;;  %v4270_v17 = vmul.f32 %v7292_v5, %v10459_v6  ;;  %v4054_v3 = vsel %vm4053_vm0, %v7288_v56, %v4050_v50  ;;  %vm4276_vm2 = vweird.f32 %v7292_v5  ;;  %v6684_v35 = vld [vmem:[#allocation14] sm:$0xff] }
 0x808   : > { %v4059_v18 = vsel %vm4056_vm1, %v4058_v43, %v4054_v3  ;;  %7297 = vrsqrt.f32 %v10487_v32  ;;  %vm10511_vm4 = vmor %vm4275_vm3, %vm4276_vm2  ;;  %v4070_v50 = vand.u32 2147483647, %v10484_v1  ;;  %4576 = vmatpush.bf16.msrb.mxu3 %v6684_v35  ;;  %vm4285_vm6 = vweird.f32 %v10487_v32 }
 0x809   : > { %v10493_v25 = vsel %vm937_vm10, %v4164_v22, 0.0  ;;  %v4271_v30 = vmul.f32 %v7292_v5, %v4270_v17  ;;  %v10497_v63 = vmul.f32 %v4059_v18, %v10443_v34  ;;  %v4072_v18 = vand.u32 2147483648, %v10484_v1 }
 0x80a   : > { %v4196_v26 = vmul.f32 %v10493_v25, %v10493_v25  ;;  %vm10529_vm8 = vcmp.eq.f32.partialorder %v4070_v50, 8.507059e+37 }
 0x80b   : > { %v4272_v56 = vmul.f32 0.5, %v4271_v30  ;;  %v4210_v52 = vpop.xlane.xlu1 %4209  ;;  %v7294_v47 = vpop.eup %7293 }
 0x80c   : > { %v4126_v37 = vpop.xlane.xlu2 %4125  ;;  %4135 = vadd.xlane.f32.xlu2 %v10497_v63  ;;  %4219 = vadd.xlane.f32.xlu1 %v4196_v26  ;;  %v4239_v59 = vmul.f32 0.03125, %v4210_v52  ;;  %v7296_v27 = vpop.eup %7295  ;;  %v10502_v14 = vadd.f32 1.0, %v7294_v47 }
 0x80d   : > { %v4149_v44 = vmul.f32 0.03125, %v4126_v37  ;;  %v4273_v55 = vsub.f32 1.5, %v4272_v56  ;;  %v4062_v36 = vmul.f32 %v7296_v27, %v10484_v1  ;;  %vm4067_vm5 = vweird.f32 %v7296_v27 }
 0x80e   : > { %v10505_v31 = vadd.f32 0.1, %v4239_v59  ;;  %v7298_v33 = vpop.eup %7297  ;;  %7299 = vrcp.f32 %v10502_v14  ;;  %vm4068_vm11 = vmor %vm4066_vm7, %vm4067_vm5  ;;  %v4085_v35 = vand.u32 2147483647, %v10502_v14  ;;  %vm4081_vm14 = vweird.f32 %v10502_v14 }
 0x80f   : > { %v4165_v34 = vsub.f32 %v10390_v0, %v4149_v44  ;;  %v4274_v54 = vmul.f32 %v7292_v5, %v4273_v55  ;;  %v4280_v20 = vmul.f32 %v7298_v33, %v10487_v32  ;;  %v4063_v16 = vsub.f32 1.0, %v4062_v36  ;;  %v10533_v44 = vld [vmem:[#allocation17 + $0x8] ss:$0 sm:$0xff] }
 0x810   : > { %7301 = vrsqrt.f32 %v10505_v31  ;;  %vm4286_vm9 = vweird.f32 %v7298_v33  ;;  %v4073_v36 = vor.u32 1.1754944e-38, %v4072_v18  ;;  %vm10567_vm15 = vcmp.eq.f32.partialorder %v4085_v35, 8.507059e+37 }
 0x811   : > { %v10518_v0 = vsel %vm937_vm10, %v4165_v34, 0.0  ;;  %v4278_v6 = vsel %vm10511_vm4, %v7292_v5, %v4274_v54  ;;  %v4281_v22 = vmul.f32 %v7298_v33, %v4280_v20  ;;  %v4064_v29 = vmul.f32 %v7296_v27, %v4063_v16  ;;  %vm4287_vm12 = vmor %vm4285_vm6, %vm4286_vm9 }
 0x812   : > { %v4197_v43 = vmul.f32 %v10518_v0, %v10518_v0  ;;  %v4429_v37 = vmul.f32 %v4278_v6, %v10343_v9  ;;  %v4087_v16 = vand.u32 2147483648, %v10502_v14  ;;  %vm4295_vm2 = vweird.f32 %v10505_v31 }
 0x813   : > { %v4212_v17 = vpop.xlane.xlu0 %4211  ;;  %v4282_v30 = vmul.f32 0.5, %v4281_v22  ;;  %v4065_v52 = vadd.f32 %v7296_v27, %v4064_v29 }
 0x814   : > { %v4128_v3 = vpop.xlane.xlu1 %4127  ;;  %v4240_v26 = vmul.f32 0.03125, %v4212_v17  ;;  %4221 = vadd.xlane.f32.xlu1 %v4197_v43  ;;  %v7300_v59 = vpop.eup %7299  ;;  %v4446_v6 = vmul.f32 %v10533_v44, %v4429_v37  ;;  %v4088_v5 = vor.u32 1.1754944e-38, %v4087_v16 }
 0x815   : > { %v4150_v56 = vmul.f32 0.03125, %v4128_v3  ;;  %v4283_v47 = vsub.f32 1.5, %v4282_v30  ;;  %v4069_v9 = vsel %vm4068_vm11, %v7296_v27, %v4065_v52  ;;  %v4077_v1 = vmul.f32 %v7300_v59, %v10502_v14  ;;  %v10562_v3 = vld [vmem:[#allocation17 + $0xd] ss:$0 sm:$0xff] }
 0x816   : > { %v10535_v55 = vadd.f32 0.1, %v4240_v26  ;;  %v10539_v54 = vpop.eup %7301  ;;  %vm4082_vm13 = vweird.f32 %v7300_v59 }
 0x817   : > { %v4166_v34 = vsub.f32 %v10406_v19, %v4150_v56  ;;  %v4284_v20 = vmul.f32 %v7298_v33, %v4283_v47  ;;  %v4290_v11 = vmul.f32 %v10539_v54, %v10505_v31  ;;  %v4074_v19 = vsel %vm10529_vm8, %v4073_v36, %v4069_v9  ;;  %vm4083_vm0 = vmor %vm4081_vm14, %vm4082_vm13 }
 0x818   : > { %7303 = vrsqrt.f32 %v10535_v55  ;;  %v4078_v50 = vsub.f32 1.0, %v4077_v1  ;;  %v10558_v17 = vmul.f32 %v4074_v19, %v10455_v2  ;;  %v10575_v1 = vadd.f32 %v10562_v3, %v4446_v6 }
 0x819   : > { %v10553_v27 = vsel %vm937_vm10, %v4166_v34, 0.0  ;;  %v4288_v22 = vsel %vm4287_vm12, %v7298_v33, %v4284_v20  ;;  %v4291_v43 = vmul.f32 %v10539_v54, %v4290_v11  ;;  %vm4296_vm1 = vweird.f32 %v10539_v54 }
 0x81a   : > { %v4198_v32 = vmul.f32 %v10553_v27, %v10553_v27  ;;  %v4430_v29 = vmul.f32 %v4288_v22, %v10367_v48  ;;  %v4079_v26 = vmul.f32 %v7300_v59, %v4078_v50  ;;  %4137 = vadd.xlane.f32.xlu2 %v10558_v17  ;;  %vm10595_vm3 = vmor %vm4295_vm2, %vm4296_vm1  ;;  %vm4305_vm5 = vweird.f32 %v10535_v55 }
 0x81b   : > { %v4214_v18 = vpop.xlane.xlu0 %4213  ;;  %v4292_v56 = vmul.f32 0.5, %v4291_v43 }
 0x81c   : > { %v4130_v30 = vpop.xlane.xlu1 %4129  ;;  %v4241_v33 = vmul.f32 0.03125, %v4214_v18  ;;  %4223 = vadd.xlane.f32.xlu0 %v4198_v32  ;;  %v4080_v2 = vadd.f32 %v7300_v59, %v4079_v26  ;;  %v4447_v48 = vmul.f32 %v10533_v44, %v4430_v29 }
 0x81d   : > { %v4151_v37 = vmul.f32 0.03125, %v4130_v30  ;;  %v4293_v34 = vsub.f32 1.5, %v4292_v56 }
 0x81e   : > { %v7304_v47 = vpop.eup %7303  ;;  %v4257_v9 = vadd.f32 0.1, %v4241_v33  ;;  %v4084_v35 = vsel %vm4083_vm0, %v7300_v59, %v4080_v2  ;;  %v10580_v20 = vadd.f32 %v10562_v3, %v4447_v48 }
 0x81f   : > { %v4167_v36 = vsub.f32 %v10415_v57, %v4151_v37  ;;  %v4300_v14 = vmul.f32 %v7304_v47, %v10535_v55  ;;  %v4294_v11 = vmul.f32 %v10539_v54, %v4293_v34  ;;  %v4089_v57 = vsel %vm10567_vm15, %v4088_v5, %v4084_v35 }
 0x820   : > { %7305 = vrsqrt.f32 %v4257_v9  ;;  %v10587_v19 = vmul.f32 %v4089_v57, %v10478_v42  ;;  %v4495_v50 = vpack.c.bf16 %v10580_v20, %v10575_v1  ;;  %vm4306_vm4 = vweird.f32 %v7304_v47 }
 0x821   : > { %v4301_v16 = vmul.f32 %v7304_v47, %v4300_v14  ;;  %v10593_v59 = vsel %vm937_vm10, %v4167_v36, 0.0  ;;  %v4298_v32 = vsel %vm10595_vm3, %v10539_v54, %v4294_v11  ;;  %vm4307_vm6 = vmor %vm4305_vm5, %vm4306_vm4  ;;  %vm4315_vm8 = vweird.f32 %v4257_v9 }
 0x822   : > { %v4199_v31 = vmul.f32 %v10593_v59, %v10593_v59  ;;  %4139 = vadd.xlane.f32.xlu1 %v10587_v19  ;;  %4577 = vmatmul.bf16.vlgmr.msrb.gmra.mxu3 %v4495_v50  ;;  %v4431_v37 = vmul.f32 %v4298_v32, %v10387_v21 }
 0x823   : > { %v4302_v22 = vmul.f32 0.5, %v4301_v16  ;;  %v4216_v42 = vpop.xlane.xlu2 %4215 }
 0x824   : > { %v4132_v43 = vpop.xlane.xlu0 %4131  ;;  %v4242_v29 = vmul.f32 0.03125, %v4216_v42  ;;  %4225 = vadd.xlane.f32.xlu0 %v4199_v31 }
 0x825   : > { %v4152_v18 = vmul.f32 0.03125, %v4132_v43  ;;  %v4303_v30 = vsub.f32 1.5, %v4302_v22 }
 0x826   : > { %v7306_v26 = vpop.eup %7305  ;;  %v4258_v56 = vadd.f32 0.1, %v4242_v29 }
 0x827   : > { %v4168_v33 = vsub.f32 %v10428_v12, %v4152_v18  ;;  %v4304_v2 = vmul.f32 %v7304_v47, %v4303_v30  ;;  %v4310_v52 = vmul.f32 %v7306_v26, %v4257_v9  ;;  %v4448_v12 = vmul.f32 %v10533_v44, %v4431_v37 }
 0x828   : > { %7307 = vrsqrt.f32 %v4258_v56  ;;  %vm4316_vm7 = vweird.f32 %v7306_v26  ;;  %vm4325_vm12 = vweird.f32 %v4258_v56 }
 0x829   : > { %v10610_v54 = vsel %vm937_vm10, %v4168_v33, 0.0  ;;  %v4311_v5 = vmul.f32 %v7306_v26, %v4310_v52  ;;  %v4308_v34 = vsel %vm4307_vm6, %v7304_v47, %v4304_v2  ;;  %v10618_v11 = vadd.f32 %v10562_v3, %v4448_v12  ;;  %vm4317_vm9 = vmor %vm4315_vm8, %vm4316_vm7 }
 0x82a   : > { %v4200_v48 = vmul.f32 %v10610_v54, %v10610_v54  ;;  %v4432_v36 = vmul.f32 %v4308_v34, %v10401_v39 }
 0x82b   : > { %v4312_v21 = vmul.f32 0.5, %v4311_v5 }
 0x82c   : > { %4227 = vadd.xlane.f32.xlu2 %v4200_v48  ;;  %v4449_v55 = vmul.f32 %v10533_v44, %v4432_v36 }
 0x82d   : > { %v4313_v14 = vsub.f32 1.5, %v4312_v21 }
 0x82e   : > { %v7308_v35 = vpop.eup %7307  ;;  %v10621_v57 = vadd.f32 %v10562_v3, %v4449_v55 }
 0x82f   : > { %v4314_v16 = vmul.f32 %v7306_v26, %v4313_v14  ;;  %v4320_v50 = vmul.f32 %v7308_v35, %v4258_v56  ;;  %vm4326_vm11 = vweird.f32 %v7308_v35 }
 0x830   : > { %v4496_v39 = vpack.c.bf16 %v10621_v57, %v10618_v11  ;;  %vm4327_vm13 = vmor %vm4325_vm12, %vm4326_vm11 }
 0x831   : > { %v4321_v47 = vmul.f32 %v7308_v35, %v4320_v50  ;;  %v4318_v31 = vsel %vm4317_vm9, %v7306_v26, %v4314_v16 }
 0x832   : > { %4582 = vmatmul.bf16.gmra.mxu3 %v4496_v39  ;;  %v4433_v42 = vmul.f32 %v4318_v31, %v10412_v46 }
 0x833   : > { %v4322_v6 = vmul.f32 0.5, %v4321_v47 }
 0x834   : > { %v4450_v18 = vmul.f32 %v10533_v44, %v4433_v42 }
 0x835   : > { %v4323_v22 = vsub.f32 1.5, %v4322_v6 }
 0x836   : > { %v10630_v9 = vadd.f32 %v10562_v3, %v4450_v18 }
 0x837   : > { %v4324_v43 = vmul.f32 %v7308_v35, %v4323_v22 }
 0x839   : > { %v4328_v32 = vsel %vm4327_vm13, %v7308_v35, %v4324_v43 }
 0x83a   : > { %v4434_v29 = vmul.f32 %v4328_v32, %v10423_v45 }
 0x83c   : > { %v4451_v30 = vmul.f32 %v10533_v44, %v4434_v29 }
 0x83e   : > { %v10633_v33 = vadd.f32 %v10562_v3, %v4451_v30 }
 0x840   : > { %v4497_v26 = vpack.c.bf16 %v10633_v33, %v10630_v9 }
 0x842   : > { %4587 = vmatmul.bf16.gmra.mxu3 %v4497_v26 }
 0x876   : > { %v4134_v56 = vpop.xlane.xlu0 %4133 }
 0x877   : > { %v4218_v46 = vpop.xlane.xlu2 %4217  ;;  %v4153_v2 = vmul.f32 0.03125, %v4134_v56 }
 0x878   : > { %v4243_v37 = vmul.f32 0.03125, %v4218_v46 }
 0x879   : > { %v4169_v45 = vsub.f32 %v10474_v51, %v4153_v2 }
 0x87a   : > { %v4259_v52 = vadd.f32 0.1, %v4243_v37 }
 0x87b   : > { %v10640_v5 = vsel %vm937_vm10, %v4169_v45, 0.0 }
 0x87c   : > { %7309 = vrsqrt.f32 %v4259_v52  ;;  %v4201_v48 = vmul.f32 %v10640_v5, %v10640_v5  ;;  %vm4335_vm15 = vweird.f32 %v4259_v52 }
 0x87e   : > { %4229 = vadd.xlane.f32.xlu1 %v4201_v48 }
 0x87f   : > { %v4136_v34 = vpop.xlane.xlu2 %4135  ;;  %v4220_v36 = vpop.xlane.xlu1 %4219 }
 0x880   : > { %v4154_v12 = vmul.f32 0.03125, %v4136_v34  ;;  %v4244_v21 = vmul.f32 0.03125, %v4220_v36 }
 0x882   : > { %v7310_v55 = vpop.eup %7309  ;;  %v4170_v14 = vsub.f32 %v10497_v63, %v4154_v12  ;;  %v4260_v35 = vadd.f32 0.1, %v4244_v21 }
 0x883   : > { %v4330_v16 = vmul.f32 %v7310_v55, %v4259_v52  ;;  %vm4336_vm14 = vweird.f32 %v7310_v55 }
 0x884   : > { %7311 = vrsqrt.f32 %v4260_v35  ;;  %v10647_v51 = vsel %vm937_vm10, %v4170_v14, 0.0  ;;  %vm4337_vm0 = vmor %vm4335_vm15, %vm4336_vm14  ;;  %vm4345_vm2 = vweird.f32 %v4260_v35 }
 0x885   : > { %v4331_v50 = vmul.f32 %v7310_v55, %v4330_v16  ;;  %v4202_v39 = vmul.f32 %v10647_v51, %v10647_v51 }
 0x887   : > { %v4332_v47 = vmul.f32 0.5, %v4331_v50  ;;  %4231 = vadd.xlane.f32.xlu0 %v4202_v39  ;;  %v4222_v6 = vpop.xlane.xlu1 %4221 }
 0x888   : > { %v4245_v22 = vmul.f32 0.03125, %v4222_v6 }
 0x889   : > { %v4333_v31 = vsub.f32 1.5, %v4332_v47 }
 0x88a   : > { %v7312_v42 = vpop.eup %7311  ;;  %v4261_v32 = vadd.f32 0.1, %v4245_v22 }
 0x88b   : > { %v4340_v43 = vmul.f32 %v7312_v42, %v4260_v35  ;;  %v4334_v63 = vmul.f32 %v7310_v55, %v4333_v31  ;;  %vm4346_vm1 = vweird.f32 %v7312_v42 }
 0x88c   : > { %7313 = vrsqrt.f32 %v4261_v32  ;;  %vm4347_vm3 = vmor %vm4345_vm2, %vm4346_vm1  ;;  %vm4355_vm5 = vweird.f32 %v4261_v32 }
 0x88d   : > { %v4341_v29 = vmul.f32 %v7312_v42, %v4340_v43  ;;  %v4138_v30 = vpop.xlane.xlu2 %4137  ;;  %v4338_v46 = vsel %vm4337_vm0, %v7310_v55, %v4334_v63 }
 0x88e   : > { %v4155_v37 = vmul.f32 0.03125, %v4138_v30  ;;  %v4435_v12 = vmul.f32 %v4338_v46, %v10469_v10 }
 0x88f   : > { %v4342_v18 = vmul.f32 0.5, %v4341_v29  ;;  %v4224_v26 = vpop.xlane.xlu0 %4223 }
 0x890   : > { %v4246_v2 = vmul.f32 0.03125, %v4224_v26  ;;  %v4171_v34 = vsub.f32 %v10558_v17, %v4155_v37  ;;  %v4452_v17 = vmul.f32 %v10533_v44, %v4435_v12 }
 0x891   : > { %v4343_v56 = vsub.f32 1.5, %v4342_v18 }
 0x892   : > { %v7314_v45 = vpop.eup %7313  ;;  %v4262_v36 = vadd.f32 0.1, %v4246_v2  ;;  %v10655_v52 = vsel %vm937_vm10, %v4171_v34, 0.0 }
 0x893   : > { %v4344_v48 = vmul.f32 %v7312_v42, %v4343_v56  ;;  %v4350_v21 = vmul.f32 %v7314_v45, %v4261_v32  ;;  %v4203_v16 = vmul.f32 %v10655_v52, %v10655_v52  ;;  %vm4356_vm4 = vweird.f32 %v7314_v45 }
 0x894   : > { %7315 = vrsqrt.f32 %v4262_v36  ;;  %vm4357_vm6 = vmor %vm4355_vm5, %vm4356_vm4  ;;  %vm4365_vm8 = vweird.f32 %v4262_v36 }
 0x895   : > { %v4348_v55 = vsel %vm4347_vm3, %v7312_v42, %v4344_v48  ;;  %v4351_v14 = vmul.f32 %v7314_v45, %v4350_v21  ;;  %v4140_v50 = vpop.xlane.xlu1 %4139  ;;  %4233 = vadd.xlane.f32.xlu2 %v4203_v16 }
 0x896   : > { %v4436_v35 = vmul.f32 %v4348_v55, %v10493_v25  ;;  %v4156_v10 = vmul.f32 0.03125, %v4140_v50  ;;  %v10667_v25 = vadd.f32 %v10562_v3, %v4452_v17  ;;  %v10678_v50 = vld [vmem:[#allocation17 + $0x4] ss:$0 sm:$0xff] }
 0x897   : > { %v4352_v39 = vmul.f32 0.5, %v4351_v14  ;;  %v4226_v47 = vpop.xlane.xlu0 %4225 }
 0x898   : > { %v4453_v6 = vmul.f32 %v10533_v44, %v4436_v35  ;;  %v4247_v31 = vmul.f32 0.03125, %v4226_v47  ;;  %v4172_v43 = vsub.f32 %v10587_v19, %v4156_v10 }
 0x899   : > { %v4353_v22 = vsub.f32 1.5, %v4352_v39 }
 0x89a   : > { %v10664_v42 = vadd.f32 %v10562_v3, %v4453_v6  ;;  %v7316_v63 = vpop.eup %7315  ;;  %v4263_v29 = vadd.f32 0.1, %v4247_v31  ;;  %v10671_v26 = vsel %vm937_vm10, %v4172_v43, 0.0  ;;  %v4479_v6 = vadd.f32 %v10575_v1, %v10176_v58 }
 0x89b   : > { %v4354_v18 = vmul.f32 %v7314_v45, %v4353_v22  ;;  %v4360_v30 = vmul.f32 %v7316_v63, %v4262_v36  ;;  %v4204_v46 = vmul.f32 %v10671_v26, %v10671_v26  ;;  %vm4366_vm7 = vweird.f32 %v7316_v63 }
 0x89c   : > { %7317 = vrsqrt.f32 %v4263_v29  ;;  %v4498_v19 = vpack.c.bf16 %v10664_v42, %v10667_v25  ;;  %vm4367_vm9 = vmor %vm4365_vm8, %vm4366_vm7  ;;  %vm4375_vm12 = vweird.f32 %v4263_v29 }
 0x89d   : > { %v4361_v56 = vmul.f32 %v7316_v63, %v4360_v30  ;;  %4235 = vadd.xlane.f32.xlu1 %v4204_v46  ;;  %v4358_v34 = vsel %vm4357_vm6, %v7314_v45, %v4354_v18 }
 0x89e   : > { %4592 = vmatmul.bf16.gmra.mxu3 %v4498_v19  ;;  %v4437_v14 = vmul.f32 %v4358_v34, %v10518_v0 }
 0x89f   : > { %v4228_v37 = vpop.xlane.xlu2 %4227  ;;  %v4362_v2 = vmul.f32 0.5, %v4361_v56 }
 0x8a0   : > { %v4248_v48 = vmul.f32 0.03125, %v4228_v37  ;;  %v4454_v45 = vmul.f32 %v10533_v44, %v4437_v14 }
 0x8a1   : > { %v4363_v12 = vsub.f32 1.5, %v4362_v2  ;;  %v4480_v2 = vadd.f32 %v10580_v20, %v10194_v53 }
 0x8a2   : > { %v4264_v21 = vadd.f32 0.1, %v4248_v48  ;;  %v7318_v55 = vpop.eup %7317 }
 0x8a3   : > { %v4364_v16 = vmul.f32 %v7316_v63, %v4363_v12  ;;  %v4370_v35 = vmul.f32 %v7318_v55, %v4263_v29  ;;  %vm4376_vm11 = vweird.f32 %v7318_v55 }
 0x8a4   : > { %7319 = vrsqrt.f32 %v4264_v21  ;;  %vm4377_vm13 = vmor %vm4375_vm12, %vm4376_vm11  ;;  %vm4385_vm15 = vweird.f32 %v4264_v21 }
 0x8a5   : > { %v4371_v32 = vmul.f32 %v7318_v55, %v4370_v35  ;;  %v4368_v17 = vsel %vm4367_vm9, %v7316_v63, %v4364_v16  ;;  %v4578_v39 = vpop.f32.mrf.mxu3  ;;  %v10689_v63 = vadd.f32 %v10562_v3, %v4454_v45 }
 0x8a6   : > { %v4438_v10 = vmul.f32 %v4368_v17, %v10553_v27  ;;  %v4579_v0 = vadd.f32 %v10678_v50, %v4578_v39  ;;  %v4481_v39 = vadd.f32 %v10618_v11, %v10206_v38 }
 0x8a7   : > { %v4372_v47 = vmul.f32 0.5, %v4371_v32 }
 0x8a8   : > { %v4455_v36 = vmul.f32 %v10533_v44, %v4438_v10  ;;  %v10686_v43 = vadd.f32 %v4579_v0, %v4479_v6 }
 0x8a9   : > { %v4373_v22 = vsub.f32 1.5, %v4372_v47 }
 0x8aa   : > { %v7320_v31 = vpop.eup %7319  ;;  %v10692_v27 = vadd.f32 %v10562_v3, %v4455_v36  ;;  %v6559_v46 = vmul.f32 -1.442695, %v10686_v43 }
 0x8ab   : > { %v4380_v18 = vmul.f32 %v7320_v31, %v4264_v21  ;;  %v4374_v30 = vmul.f32 %v7318_v55, %v4373_v22  ;;  %vm4386_vm14 = vweird.f32 %v7320_v31  ;;  %v4482_v22 = vadd.f32 %v10621_v57, %v10224_v7 }
 0x8ac   : > { %v4499_v1 = vpack.c.bf16 %v10692_v27, %v10689_v63  ;;  %7321 = vpow2.f32 %v6559_v46  ;;  %vm4387_vm0 = vmor %vm4385_vm15, %vm4386_vm14 }
 0x8ad   : > { %v4381_v58 = vmul.f32 %v7320_v31, %v4380_v18  ;;  %v4580_v56 = vpop.f32.mrf.mxu3  ;;  %v4378_v37 = vsel %vm4377_vm13, %v7318_v55, %v4374_v30 }
 0x8ae   : > { %4597 = vmatmul.bf16.gmra.mxu3 %v4499_v1  ;;  %v4581_v48 = vadd.f32 %v10678_v50, %v4580_v56  ;;  %v4439_v29 = vmul.f32 %v4378_v37, %v10593_v59 }
 0x8af   : > { %v4382_v19 = vmul.f32 0.5, %v4381_v58 }
 0x8b0   : > { %v10700_v12 = vadd.f32 %v4581_v48, %v4480_v2  ;;  %v4456_v53 = vmul.f32 %v10533_v44, %v4439_v29 }
 0x8b1   : > { %v4383_v34 = vsub.f32 1.5, %v4382_v19 }
 0x8b2   : > { %v7322_v16 = vpop.eup %7321  ;;  %v6560_v35 = vmul.f32 -1.442695, %v10700_v12  ;;  %v10713_v45 = vadd.f32 %v10562_v3, %v4456_v53 }
 0x8b3   : > { %v4384_v14 = vmul.f32 %v7320_v31, %v4383_v34  ;;  %v4682_v32 = vadd.f32 1.0, %v7322_v16 }
 0x8b4   : > { %7323 = vpow2.f32 %v6560_v35  ;;  %v4483_v35 = vadd.f32 %v10630_v9, %v10233_v62 }
 0x8b5   : > { %v4388_v17 = vsel %vm4387_vm0, %v7320_v31, %v4384_v14  ;;  %7325 = vrcp.f32 %v4682_v32  ;;  %v4583_v20 = vpop.f32.mrf.mxu3  ;;  %v4709_v46 = vand.u32 2147483648, %v4682_v32  ;;  %v4707_v19 = vand.u32 2147483647, %v4682_v32 }
 0x8b6   : > { %v4440_v55 = vmul.f32 %v4388_v17, %v10610_v54  ;;  %v4584_v59 = vadd.f32 %v10678_v50, %v4583_v20  ;;  %vm4703_vm2 = vweird.f32 %v4682_v32 }
 0x8b7   : > { %v4710_v29 = vor.u32 1.1754944e-38, %v4709_v46  ;;  %vm4708_vm4 = vcmp.eq.f32.partialorder %v4707_v19, 8.507059e+37 }
 0x8b8   : > { %v4457_v21 = vmul.f32 %v10533_v44, %v4440_v55  ;;  %v10710_v10 = vadd.f32 %v4584_v59, %v4481_v39 }
 0x8ba   : > { %v10716_v47 = vadd.f32 %v10562_v3, %v4457_v21  ;;  %v7324_v54 = vpop.eup %7323  ;;  %v6561_v6 = vmul.f32 -1.442695, %v10710_v10 }
 0x8bb   : > { %v7326_v36 = vpop.eup %7325  ;;  %v4683_v38 = vadd.f32 1.0, %v7324_v54 }
 0x8bc   : > { %v4500_v0 = vpack.c.bf16 %v10716_v47, %v10713_v45  ;;  %7327 = vpow2.f32 %v6561_v6  ;;  %v4699_v11 = vmul.f32 %v7326_v36, %v4682_v32  ;;  %vm4704_vm1 = vweird.f32 %v7326_v36 }
 0x8bd   : > { %7329 = vrcp.f32 %v4683_v38  ;;  %v4585_v31 = vpop.f32.mrf.mxu3  ;;  %vm4705_vm3 = vmor %vm4703_vm2, %vm4704_vm1  ;;  %v4724_v53 = vand.u32 2147483648, %v4683_v38  ;;  %v4722_v59 = vand.u32 2147483647, %v4683_v38  ;;  %vm4718_vm6 = vweird.f32 %v4683_v38 }
 0x8be   : > { %4602 = vmatmul.bf16.gmra.mxu3 %v4500_v0  ;;  %v4586_v18 = vadd.f32 %v10678_v50, %v4585_v31  ;;  %v4700_v30 = vsub.f32 1.0, %v4699_v11 }
 0x8bf   : > { %v4725_v0 = vor.u32 1.1754944e-38, %v4724_v53  ;;  %vm4723_vm8 = vcmp.eq.f32.partialorder %v4722_v59, 8.507059e+37 }
 0x8c0   : > { %v10724_v58 = vadd.f32 %v4586_v18, %v4482_v22  ;;  %v4701_v1 = vmul.f32 %v7326_v36, %v4700_v30  ;;  %v4484_v22 = vadd.f32 %v10633_v33, %v10246_v23 }
 0x8c2   : > { %v7328_v56 = vpop.eup %7327  ;;  %v6562_v37 = vmul.f32 -1.442695, %v10724_v58  ;;  %v4702_v2 = vadd.f32 %v7326_v36, %v4701_v1 }
 0x8c3   : > { %v7330_v48 = vpop.eup %7329  ;;  %v4684_v34 = vadd.f32 1.0, %v7328_v56 }
 0x8c4   : > { %7331 = vpow2.f32 %v6562_v37  ;;  %v4706_v7 = vsel %vm4705_vm3, %v7326_v36, %v4702_v2  ;;  %v4714_v57 = vmul.f32 %v7330_v48, %v4683_v38  ;;  %vm4719_vm5 = vweird.f32 %v7330_v48 }
 0x8c5   : > { %7333 = vrcp.f32 %v4684_v34  ;;  %v4588_v14 = vpop.f32.mrf.mxu3  ;;  %v4711_v16 = vsel %vm4708_vm4, %v4710_v29, %v4706_v7  ;;  %vm4720_vm7 = vmor %vm4718_vm6, %vm4719_vm5  ;;  %v4739_v46 = vand.u32 2147483648, %v4684_v34  ;;  %v4737_v56 = vand.u32 2147483647, %v4684_v34 }
 0x8c6   : > { %v4589_v17 = vadd.f32 %v10678_v50, %v4588_v14  ;;  %v10731_v55 = vmul.f32 %v4711_v16, %v10686_v43  ;;  %v4715_v32 = vsub.f32 1.0, %v4714_v57  ;;  %vm4733_vm11 = vweird.f32 %v4684_v34 }
 0x8c7   : > { %v4740_v29 = vor.u32 1.1754944e-38, %v4739_v46  ;;  %vm4738_vm13 = vcmp.eq.f32.partialorder %v4737_v56, 8.507059e+37 }
 0x8c8   : > { %v10733_v20 = vadd.f32 %v4589_v17, %v4483_v35  ;;  %4956 = vadd.xlane.f32.xlu0 %v10731_v55  ;;  %v4716_v39 = vmul.f32 %v7330_v48, %v4715_v32 }
 0x8ca   : > { %v7332_v21 = vpop.eup %7331  ;;  %v6563_v54 = vmul.f32 -1.442695, %v10733_v20  ;;  %v4717_v6 = vadd.f32 %v7330_v48, %v4716_v39 }
 0x8cb   : > { %v7334_v62 = vpop.eup %7333  ;;  %v4685_v9 = vadd.f32 1.0, %v7332_v21 }
 0x8cc   : > { %7335 = vpow2.f32 %v6563_v54  ;;  %v4721_v43 = vsel %vm4720_vm7, %v7330_v48, %v4717_v6  ;;  %v4729_v36 = vmul.f32 %v7334_v62, %v4684_v34  ;;  %vm4734_vm9 = vweird.f32 %v7334_v62 }
 0x8cd   : > { %7337 = vrcp.f32 %v4685_v9  ;;  %v4590_v11 = vpop.f32.mrf.mxu3  ;;  %v4726_v31 = vsel %vm4723_vm8, %v4725_v0, %v4721_v43  ;;  %vm4735_vm12 = vmor %vm4733_vm11, %vm4734_vm9  ;;  %v4754_v35 = vand.u32 2147483648, %v4685_v9  ;;  %v4752_v34 = vand.u32 2147483647, %v4685_v9 }
 0x8ce   : > { %v4591_v18 = vadd.f32 %v10678_v50, %v4590_v11  ;;  %v10741_v30 = vmul.f32 %v4726_v31, %v10700_v12  ;;  %v4730_v38 = vsub.f32 1.0, %v4729_v36  ;;  %vm4748_vm15 = vweird.f32 %v4685_v9 }
 0x8cf   : > { %v4755_v21 = vor.u32 1.1754944e-38, %v4754_v35  ;;  %vm4753_vm1 = vcmp.eq.f32.partialorder %v4752_v34, 8.507059e+37 }
 0x8d0   : > { %v10743_v1 = vadd.f32 %v4591_v18, %v4484_v22  ;;  %4958 = vadd.xlane.f32.xlu2 %v10741_v30  ;;  %v4731_v19 = vmul.f32 %v7334_v62, %v4730_v38 }
 0x8d2   : > { %v7336_v37 = vpop.eup %7335  ;;  %v6564_v2 = vmul.f32 -1.442695, %v10743_v1  ;;  %v4732_v48 = vadd.f32 %v7334_v62, %v4731_v19 }
 0x8d3   : > { %v7338_v23 = vpop.eup %7337  ;;  %v4686_v33 = vadd.f32 1.0, %v7336_v37 }
 0x8d4   : > { %7339 = vpow2.f32 %v6564_v2  ;;  %v4736_v12 = vsel %vm4735_vm12, %v7334_v62, %v4732_v48  ;;  %v4744_v7 = vmul.f32 %v7338_v23, %v4685_v9  ;;  %vm4749_vm14 = vweird.f32 %v7338_v23 }
 0x8d5   : > { %7341 = vrcp.f32 %v4686_v33  ;;  %v4741_v57 = vsel %vm4738_vm13, %v4740_v29, %v4736_v12  ;;  %vm4750_vm0 = vmor %vm4748_vm15, %vm4749_vm14  ;;  %v4769_v43 = vand.u32 2147483648, %v4686_v33  ;;  %v4767_v11 = vand.u32 2147483647, %v4686_v33 }
 0x8d6   : > { %v10748_v14 = vmul.f32 %v4741_v57, %v10710_v10  ;;  %v4745_v16 = vsub.f32 1.0, %v4744_v7  ;;  %vm4763_vm3 = vweird.f32 %v4686_v33 }
 0x8d7   : > { %v4770_v22 = vor.u32 1.1754944e-38, %v4769_v43  ;;  %vm4768_vm5 = vcmp.eq.f32.partialorder %v4767_v11, 8.507059e+37 }
 0x8d8   : > { %4960 = vadd.xlane.f32.xlu1 %v10748_v14  ;;  %v4746_v17 = vmul.f32 %v7338_v23, %v4745_v16 }
 0x8da   : > { %v7340_v32 = vpop.eup %7339  ;;  %v4747_v53 = vadd.f32 %v7338_v23, %v4746_v17 }
 0x8db   : > { %v7342_v39 = vpop.eup %7341  ;;  %v4687_v59 = vadd.f32 1.0, %v7340_v32 }
 0x8dc   : > { %v4751_v54 = vsel %vm4750_vm0, %v7338_v23, %v4747_v53  ;;  %v4759_v6 = vmul.f32 %v7342_v39, %v4686_v33  ;;  %vm4764_vm2 = vweird.f32 %v7342_v39 }
 0x8dd   : > { %7343 = vrcp.f32 %v4687_v59  ;;  %v4756_v10 = vsel %vm4753_vm1, %v4755_v21, %v4751_v54  ;;  %vm4765_vm4 = vmor %vm4763_vm3, %vm4764_vm2  ;;  %v4784_v56 = vand.u32 2147483648, %v4687_v59  ;;  %v4782_v2 = vand.u32 2147483647, %v4687_v59 }
 0x8de   : > { %v10752_v62 = vmul.f32 %v4756_v10, %v10724_v58  ;;  %v4760_v0 = vsub.f32 1.0, %v4759_v6  ;;  %vm4778_vm7 = vweird.f32 %v4687_v59 }
 0x8df   : > { %v4785_v23 = vor.u32 1.1754944e-38, %v4784_v56  ;;  %vm4783_vm9 = vcmp.eq.f32.partialorder %v4782_v2, 8.507059e+37 }
 0x8e0   : > { %4962 = vadd.xlane.f32.xlu0 %v10752_v62  ;;  %v4761_v36 = vmul.f32 %v7342_v39, %v4760_v0 }
 0x8e2   : > { %v4762_v9 = vadd.f32 %v7342_v39, %v4761_v36 }
 0x8e3   : > { %v7344_v31 = vpop.eup %7343 }
 0x8e4   : > { %v4766_v18 = vsel %vm4765_vm4, %v7342_v39, %v4762_v9  ;;  %v4774_v38 = vmul.f32 %v7344_v31, %v4687_v59  ;;  %vm4779_vm6 = vweird.f32 %v7344_v31 }
 0x8e5   : > { %v4771_v46 = vsel %vm4768_vm5, %v4770_v22, %v4766_v18  ;;  %vm4780_vm8 = vmor %vm4778_vm7, %vm4779_vm6 }
 0x8e6   : > { %v10756_v19 = vmul.f32 %v4771_v46, %v10733_v20  ;;  %v4775_v58 = vsub.f32 1.0, %v4774_v38 }
 0x8e8   : > { %4964 = vadd.xlane.f32.xlu2 %v10756_v19  ;;  %v4776_v37 = vmul.f32 %v7344_v31, %v4775_v58 }
 0x8ea   : > { %v4777_v48 = vadd.f32 %v7344_v31, %v4776_v37 }
 0x8ec   : > { %v4781_v33 = vsel %vm4780_vm8, %v7344_v31, %v4777_v48 }
 0x8ed   : > { %v4786_v29 = vsel %vm4783_vm9, %v4785_v23, %v4781_v33 }
 0x8ee   : > { %v10760_v12 = vmul.f32 %v4786_v29, %v10743_v1 }
 0x8f0   : > { %4966 = vadd.xlane.f32.xlu1 %v10760_v12 }
 0x8f1   : > { %v4230_v20 = vpop.xlane.xlu1 %4229 }
 0x8f2   : > { %v4249_v7 = vmul.f32 0.03125, %v4230_v20 }
 0x8f4   : > { %v4265_v57 = vadd.f32 0.1, %v4249_v7 }
 0x8f6   : > { %7345 = vrsqrt.f32 %v4265_v57  ;;  %vm4395_vm12 = vweird.f32 %v4265_v57 }
 0x8fa   : > { %v4232_v16 = vpop.xlane.xlu0 %4231 }
 0x8fb   : > { %v4250_v35 = vmul.f32 0.03125, %v4232_v16 }
 0x8fc   : > { %v7346_v17 = vpop.eup %7345 }
 0x8fd   : > { %v4266_v34 = vadd.f32 0.1, %v4250_v35  ;;  %v4390_v32 = vmul.f32 %v7346_v17, %v4265_v57  ;;  %vm4396_vm11 = vweird.f32 %v7346_v17 }
 0x8fe   : > { %vm4397_vm13 = vmor %vm4395_vm12, %vm4396_vm11 }
 0x8ff   : > { %7347 = vrsqrt.f32 %v4266_v34  ;;  %v4391_v53 = vmul.f32 %v7346_v17, %v4390_v32  ;;  %vm4405_vm15 = vweird.f32 %v4266_v34 }
 0x901   : > { %v4392_v39 = vmul.f32 0.5, %v4391_v53 }
 0x903   : > { %v4393_v59 = vsub.f32 1.5, %v4392_v39  ;;  %v4485_v39 = vadd.f32 %v10667_v25, %v10287_v8  ;;  %v4486_v25 = vadd.f32 %v10664_v42, %v10299_v41 }
 0x905   : > { %v7348_v21 = vpop.eup %7347  ;;  %v4394_v6 = vmul.f32 %v7346_v17, %v4393_v59 }
 0x906   : > { %v4400_v54 = vmul.f32 %v7348_v21, %v4266_v34  ;;  %vm4406_vm14 = vweird.f32 %v7348_v21 }
 0x907   : > { %v4398_v43 = vsel %vm4397_vm13, %v7346_v17, %v4394_v6  ;;  %vm4407_vm0 = vmor %vm4405_vm15, %vm4406_vm14 }
 0x908   : > { %v4401_v1 = vmul.f32 %v7348_v21, %v4400_v54  ;;  %v4234_v0 = vpop.xlane.xlu2 %4233  ;;  %v4441_v22 = vmul.f32 %v4398_v43, %v10640_v5 }
 0x909   : > { %v4251_v11 = vmul.f32 0.03125, %v4234_v0 }
 0x90a   : > { %v4402_v10 = vmul.f32 0.5, %v4401_v1  ;;  %v4458_v58 = vmul.f32 %v10533_v44, %v4441_v22 }
 0x90b   : > { %v4267_v31 = vadd.f32 0.1, %v4251_v11 }
 0x90c   : > { %v4403_v36 = vsub.f32 1.5, %v4402_v10  ;;  %v10771_v33 = vadd.f32 %v10562_v3, %v4458_v58 }
 0x90d   : > { %7349 = vrsqrt.f32 %v4267_v31  ;;  %vm4415_vm2 = vweird.f32 %v4267_v31 }
 0x90e   : > { %v4404_v9 = vmul.f32 %v7348_v21, %v4403_v36 }
 0x910   : > { %v4408_v18 = vsel %vm4407_vm0, %v7348_v21, %v4404_v9  ;;  %v4236_v46 = vpop.xlane.xlu1 %4235 }
 0x911   : > { %v4442_v38 = vmul.f32 %v4408_v18, %v10647_v51  ;;  %v4252_v56 = vmul.f32 0.03125, %v4236_v46 }
 0x913   : > { %v4459_v37 = vmul.f32 %v10533_v44, %v4442_v38  ;;  %v4268_v2 = vadd.f32 0.1, %v4252_v56  ;;  %v7350_v23 = vpop.eup %7349 }
 0x914   : > { %v4410_v5 = vmul.f32 %v7350_v23, %v4267_v31  ;;  %vm4416_vm1 = vweird.f32 %v7350_v23 }
 0x915   : > { %v10768_v48 = vadd.f32 %v10562_v3, %v4459_v37  ;;  %7351 = vrsqrt.f32 %v4268_v2  ;;  %vm4417_vm3 = vmor %vm4415_vm2, %vm4416_vm1  ;;  %vm4425_vm5 = vweird.f32 %v4268_v2 }
 0x916   : > { %v4411_v51 = vmul.f32 %v7350_v23, %v4410_v5 }
 0x917   : > { %v4501_v29 = vpack.c.bf16 %v10768_v48, %v10771_v33 }
 0x918   : > { %v4412_v20 = vmul.f32 0.5, %v4411_v51 }
 0x919   : > { %4607 = vmatmul.bf16.gmra.mxu3 %v4501_v29  ;;  %v4488_v29 = vadd.f32 %v10692_v27, %v10326_v15 }
 0x91a   : > { %v4413_v57 = vsub.f32 1.5, %v4412_v20 }
 0x91b   : > { %v7352_v7 = vpop.eup %7351 }
 0x91c   : > { %v4420_v16 = vmul.f32 %v7352_v7, %v4268_v2  ;;  %v4414_v35 = vmul.f32 %v7350_v23, %v4413_v57  ;;  %vm4426_vm4 = vweird.f32 %v7352_v7 }
 0x91d   : > { %vm4427_vm6 = vmor %vm4425_vm5, %vm4426_vm4 }
 0x91e   : > { %v4421_v17 = vmul.f32 %v7352_v7, %v4420_v16  ;;  %v4418_v53 = vsel %vm4417_vm3, %v7350_v23, %v4414_v35 }
 0x91f   : > { %v4443_v6 = vmul.f32 %v4418_v53, %v10655_v52 }
 0x920   : > { %v4422_v34 = vmul.f32 0.5, %v4421_v17 }
 0x921   : > { %v4593_v32 = vpop.f32.mrf.mxu3  ;;  %v4460_v36 = vmul.f32 %v10533_v44, %v4443_v6  ;;  %v4489_v6 = vadd.f32 %v10713_v45, %v10339_v4 }
 0x922   : > { %v4594_v59 = vadd.f32 %v10678_v50, %v4593_v32  ;;  %v4423_v21 = vsub.f32 1.5, %v4422_v34 }
 0x923   : > { %v10791_v31 = vadd.f32 %v10562_v3, %v4460_v36 }
 0x924   : > { %v10778_v54 = vadd.f32 %v4594_v59, %v4485_v39  ;;  %v4424_v1 = vmul.f32 %v7352_v7, %v4423_v21 }
 0x926   : > { %v6565_v10 = vmul.f32 -1.442695, %v10778_v54  ;;  %v4428_v0 = vsel %vm4427_vm6, %v7352_v7, %v4424_v1 }
 0x927   : > { %v4444_v43 = vmul.f32 %v4428_v0, %v10671_v26 }
 0x928   : > { %7353 = vpow2.f32 %v6565_v10 }
 0x929   : > { %v4595_v8 = vpop.f32.mrf.mxu3  ;;  %v4461_v9 = vmul.f32 %v10533_v44, %v4444_v43  ;;  %v4487_v44 = vadd.f32 %v10689_v63, %v10317_v13 }
 0x92a   : > { %v4596_v11 = vadd.f32 %v10678_v50, %v4595_v8 }
 0x92b   : > { %v10794_v22 = vadd.f32 %v10562_v3, %v4461_v9 }
 0x92c   : > { %v10788_v52 = vadd.f32 %v4596_v11, %v4486_v25 }
 0x92d   : > { %v4502_v38 = vpack.c.bf16 %v10794_v22, %v10791_v31 }
 0x92e   : > { %v7354_v18 = vpop.eup %7353  ;;  %v6566_v26 = vmul.f32 -1.442695, %v10788_v52 }
 0x92f   : > { %v4688_v46 = vadd.f32 1.0, %v7354_v18  ;;  %4612 = vmatmul.bf16.gmra.mxu3 %v4502_v38 }
 0x930   : > { %7355 = vpow2.f32 %v6566_v26 }
 0x931   : > { %7357 = vrcp.f32 %v4688_v46  ;;  %v4598_v41 = vpop.f32.mrf.mxu3  ;;  %v4799_v13 = vand.u32 2147483648, %v4688_v46  ;;  %v4797_v16 = vand.u32 2147483647, %v4688_v46  ;;  %vm4793_vm8 = vweird.f32 %v4688_v46 }
 0x932   : > { %v4599_v42 = vadd.f32 %v10678_v50, %v4598_v41 }
 0x933   : > { %v4800_v27 = vor.u32 1.1754944e-38, %v4799_v13  ;;  %vm4798_vm11 = vcmp.eq.f32.partialorder %v4797_v16, 8.507059e+37 }
 0x934   : > { %v10802_v58 = vadd.f32 %v4599_v42, %v4487_v44 }
 0x936   : > { %v7356_v3 = vpop.eup %7355  ;;  %v6567_v56 = vmul.f32 -1.442695, %v10802_v58 }
 0x937   : > { %v7358_v37 = vpop.eup %7357  ;;  %v4689_v2 = vadd.f32 1.0, %v7356_v3 }
 0x938   : > { %7359 = vpow2.f32 %v6567_v56  ;;  %v4789_v23 = vmul.f32 %v7358_v37, %v4688_v46  ;;  %vm4794_vm7 = vweird.f32 %v7358_v37 }
 0x939   : > { %7361 = vrcp.f32 %v4689_v2  ;;  %v4600_v5 = vpop.f32.mrf.mxu3  ;;  %vm4795_vm9 = vmor %vm4793_vm8, %vm4794_vm7  ;;  %v4814_v25 = vand.u32 2147483648, %v4689_v2  ;;  %v4812_v45 = vand.u32 2147483647, %v4689_v2  ;;  %vm4808_vm13 = vweird.f32 %v4689_v2 }
 0x93a   : > { %v4601_v51 = vadd.f32 %v10678_v50, %v4600_v5  ;;  %v4790_v20 = vsub.f32 1.0, %v4789_v23 }
 0x93b   : > { %v4957_v7 = vpop.xlane.xlu0 %4956  ;;  %v4815_v42 = vor.u32 1.1754944e-38, %v4814_v25  ;;  %vm4813_vm15 = vcmp.eq.f32.partialorder %v4812_v45, 8.507059e+37 }
 0x93c   : > { %v10808_v63 = vadd.f32 %v4601_v51, %v4488_v29  ;;  %v4791_v57 = vmul.f32 %v7358_v37, %v4790_v20  ;;  %v4988_v35 = vmul.f32 0.03125, %v4957_v7 }
 0x93e   : > { %v7360_v17 = vpop.eup %7359  ;;  %v6568_v34 = vmul.f32 -1.442695, %v10808_v63  ;;  %v4792_v32 = vadd.f32 %v7358_v37, %v4791_v57  ;;  %v5004_v15 = vsub.f32 %v10731_v55, %v4988_v35 }
 0x93f   : > { %v7362_v53 = vpop.eup %7361  ;;  %v10811_v39 = vadd.f32 1.0, %v7360_v17 }
 0x940   : > { %7363 = vpow2.f32 %v6568_v34  ;;  %v4796_v59 = vsel %vm4795_vm9, %v7358_v37, %v4792_v32  ;;  %v4804_v21 = vmul.f32 %v7362_v53, %v4689_v2  ;;  %v10819_v10 = vsel %vm937_vm10, %v5004_v15, 0.0 }
 0x941   : > { %7365 = vrcp.f32 %v10811_v39  ;;  %v4603_v1 = vpop.f32.mrf.mxu3  ;;  %v4801_v0 = vsel %vm4798_vm11, %v4800_v27, %v4796_v59  ;;  %v5036_v55 = vmul.f32 %v10819_v10, %v10819_v10  ;;  %vm4809_vm12 = vweird.f32 %v7362_v53 }
 0x942   : > { %v4604_v43 = vadd.f32 %v10678_v50, %v4603_v1  ;;  %v10825_v36 = vmul.f32 %v4801_v0, %v10778_v54  ;;  %v4805_v8 = vsub.f32 1.0, %v4804_v21  ;;  %vm4810_vm14 = vmor %vm4808_vm13, %vm4809_vm12  ;;  %v4490_v2 = vadd.f32 %v10716_v47, %v10363_v40 }
 0x943   : > { %v4959_v9 = vpop.xlane.xlu2 %4958  ;;  %5052 = vadd.xlane.f32.xlu0 %v5036_v55  ;;  %v4829_v13 = vand.u32 2147483648, %v10811_v39  ;;  %v4827_v47 = vand.u32 2147483647, %v10811_v39  ;;  %vm4823_vm1 = vweird.f32 %v10811_v39 }
 0x944   : > { %v10827_v11 = vadd.f32 %v4604_v43, %v4489_v6  ;;  %4968 = vadd.xlane.f32.xlu1 %v10825_v36  ;;  %v4806_v4 = vmul.f32 %v7362_v53, %v4805_v8  ;;  %v4989_v18 = vmul.f32 0.03125, %v4959_v9 }
 0x945   : > { %v4830_v15 = vor.u32 1.1754944e-38, %v4829_v13  ;;  %vm4828_vm3 = vcmp.eq.f32.partialorder %v4827_v47, 8.507059e+37 }
 0x946   : > { %v7364_v26 = vpop.eup %7363  ;;  %v6569_v38 = vmul.f32 -1.442695, %v10827_v11  ;;  %v4807_v46 = vadd.f32 %v7362_v53, %v4806_v4  ;;  %v5005_v44 = vsub.f32 %v10741_v30, %v4989_v18 }
 0x947   : > { %v7366_v41 = vpop.eup %7365  ;;  %v10831_v54 = vadd.f32 1.0, %v7364_v26 }
 0x948   : > { %7367 = vpow2.f32 %v6569_v38  ;;  %v4811_v3 = vsel %vm4810_vm14, %v7362_v53, %v4807_v46  ;;  %v4819_v56 = vmul.f32 %v7366_v41, %v10811_v39  ;;  %v10838_v37 = vsel %vm937_vm10, %v5005_v44, 0.0 }
 0x949   : > { %7369 = vrcp.f32 %v10831_v54  ;;  %v4605_v23 = vpop.f32.mrf.mxu3  ;;  %v4816_v5 = vsel %vm4813_vm15, %v4815_v42, %v4811_v3  ;;  %v5037_v29 = vmul.f32 %v10838_v37, %v10838_v37  ;;  %vm4824_vm0 = vweird.f32 %v7366_v41 }
 0x94a   : > { %v4606_v30 = vadd.f32 %v10678_v50, %v4605_v23  ;;  %v10846_v51 = vmul.f32 %v4816_v5, %v10788_v52  ;;  %v4820_v20 = vsub.f32 1.0, %v4819_v56  ;;  %vm4825_vm2 = vmor %vm4823_vm1, %vm4824_vm0  ;;  %v4844_v0 = vand.u32 2147483648, %v10831_v54 }
 0x94b   : > { %5054 = vadd.xlane.f32.xlu2 %v5037_v29  ;;  %v4961_v57 = vpop.xlane.xlu1 %4960  ;;  %v4842_v8 = vand.u32 2147483647, %v10831_v54  ;;  %vm4838_vm5 = vweird.f32 %v10831_v54 }
 0x94c   : > { %v10849_v7 = vadd.f32 %v4606_v30, %v4490_v2  ;;  %4970 = vadd.xlane.f32.xlu0 %v10846_v51  ;;  %v4821_v40 = vmul.f32 %v7366_v41, %v4820_v20  ;;  %v4990_v16 = vmul.f32 0.03125, %v4961_v57  ;;  %v4845_v26 = vor.u32 1.1754944e-38, %v4844_v0 }
 0x94d   : > { %vm4843_vm7 = vcmp.eq.f32.partialorder %v4842_v8, 8.507059e+37 }
 0x94e   : > { %v7368_v35 = vpop.eup %7367  ;;  %v6570_v17 = vmul.f32 -1.442695, %v10849_v7  ;;  %v4822_v34 = vadd.f32 %v7366_v41, %v4821_v40  ;;  %v5006_v53 = vsub.f32 %v10748_v14, %v4990_v16 }
 0x94f   : > { %v7370_v52 = vpop.eup %7369  ;;  %v4692_v32 = vadd.f32 1.0, %v7368_v35 }
 0x950   : > { %7371 = vpow2.f32 %v6570_v17  ;;  %v4826_v27 = vsel %vm4825_vm2, %v7366_v41, %v4822_v34  ;;  %v4834_v59 = vmul.f32 %v7370_v52, %v10831_v54  ;;  %v10859_v21 = vsel %vm937_vm10, %v5006_v53, 0.0 }
 0x951   : > { %7373 = vrcp.f32 %v4692_v32  ;;  %v4831_v6 = vsel %vm4828_vm3, %v4830_v15, %v4826_v27  ;;  %v5038_v39 = vmul.f32 %v10859_v21, %v10859_v21  ;;  %vm4839_vm4 = vweird.f32 %v7370_v52 }
 0x952   : > { %v10862_v1 = vmul.f32 %v4831_v6, %v10802_v58  ;;  %v4835_v14 = vsub.f32 1.0, %v4834_v59  ;;  %vm4840_vm6 = vmor %vm4838_vm5, %vm4839_vm4  ;;  %v4859_v56 = vand.u32 2147483648, %v4692_v32  ;;  %v4857_v23 = vand.u32 2147483647, %v4692_v32 }
 0x953   : > { %v4963_v43 = vpop.xlane.xlu0 %4962  ;;  %5056 = vadd.xlane.f32.xlu2 %v5038_v39  ;;  %vm4853_vm9 = vweird.f32 %v4692_v32 }
 0x954   : > { %4972 = vadd.xlane.f32.xlu0 %v10862_v1  ;;  %v4836_v55 = vmul.f32 %v7370_v52, %v4835_v14  ;;  %v4991_v25 = vmul.f32 0.03125, %v4963_v43  ;;  %v4860_v13 = vor.u32 1.1754944e-38, %v4859_v56  ;;  %vm4858_vm12 = vcmp.eq.f32.partialorder %v4857_v23, 8.507059e+37 }
 0x955   : > { %v4493_v23 = vadd.f32 %v10791_v31, %v10451_v28  ;;  %v6627_v28 = vld [vmem:[#allocation16 + $0x68] sm:$0xf0]  ;;  %v6617_v31 = vld [vmem:[#allocation16 + $0x50] sm:$0xf] }
 0x956   : > { %v7372_v9 = vpop.eup %7371  ;;  %v4837_v4 = vadd.f32 %v7370_v52, %v4836_v55  ;;  %v5007_v18 = vsub.f32 %v10752_v62, %v4991_v25 }
 0x957   : > { %v7374_v58 = vpop.eup %7373  ;;  %v4693_v45 = vadd.f32 1.0, %v7372_v9 }
 0x958   : > { %v4841_v38 = vsel %vm4840_vm6, %v7370_v52, %v4837_v4  ;;  %v4849_v46 = vmul.f32 %v7374_v58, %v4692_v32  ;;  %v10873_v41 = vsel %vm937_vm10, %v5007_v18, 0.0  ;;  %vm4854_vm8 = vweird.f32 %v7374_v58 }
 0x959   : > { %7375 = vrcp.f32 %v4693_v45  ;;  %v4846_v44 = vsel %vm4843_vm7, %v4845_v26, %v4841_v38  ;;  %v5039_v42 = vmul.f32 %v10873_v41, %v10873_v41  ;;  %vm4855_vm11 = vmor %vm4853_vm9, %vm4854_vm8  ;;  %v4874_v34 = vand.u32 2147483648, %v4693_v45  ;;  %v6706_v38 = vld [vmem:[#allocation16 + $0x74] sm:$0xf] }
 0x95a   : > { %v10878_v54 = vmul.f32 %v4846_v44, %v10808_v63  ;;  %v4850_v3 = vsub.f32 1.0, %v4849_v46  ;;  %v4872_v32 = vand.u32 2147483647, %v4693_v45  ;;  %vm4868_vm14 = vweird.f32 %v4693_v45  ;;  %v6635_v44 = vld [vmem:[#allocation16 + $0x78] sm:$0xf0] }
 0x95b   : > { %v4965_v62 = vpop.xlane.xlu2 %4964  ;;  %5058 = vadd.xlane.f32.xlu1 %v5039_v42  ;;  %v4875_v59 = vor.u32 1.1754944e-38, %v4874_v34  ;;  %v6638_v42 = vor.u32 %v6706_v38, %v6635_v44  ;;  %v6700_v38 = vld [vmem:[#allocation16 + $0x44] sm:$0xf] }
 0x95c   : > { %4974 = vadd.xlane.f32.xlu2 %v10878_v54  ;;  %v4851_v2 = vmul.f32 %v7374_v58, %v4850_v3  ;;  %v4992_v5 = vmul.f32 0.03125, %v4965_v62  ;;  %vm4873_vm0 = vcmp.eq.f32.partialorder %v4872_v32, 8.507059e+37 }
 0x95d   : > { %5485 = vmatpush.bf16.msrb.mxu1 %v6638_v42 }
 0x95e   : > { %v4852_v30 = vadd.f32 %v7374_v58, %v4851_v2  ;;  %v5008_v20 = vsub.f32 %v10756_v19, %v4992_v5 }
 0x95f   : > { %v7376_v29 = vpop.eup %7375 }
 0x960   : > { %v4856_v57 = vsel %vm4855_vm11, %v7374_v58, %v4852_v30  ;;  %v4864_v63 = vmul.f32 %v7376_v29, %v4693_v45  ;;  %v10884_v40 = vsel %vm937_vm10, %v5008_v20, 0.0  ;;  %vm4869_vm13 = vweird.f32 %v7376_v29 }
 0x961   : > { %v4861_v47 = vsel %vm4858_vm12, %v4860_v13, %v4856_v57  ;;  %v5040_v16 = vmul.f32 %v10884_v40, %v10884_v40  ;;  %vm4870_vm15 = vmor %vm4868_vm14, %vm4869_vm13  ;;  %v6625_v57 = vld [vmem:[#allocation16 + $0x60] sm:$0xf] }
 0x962   : > { %v10889_v35 = vmul.f32 %v4861_v47, %v10827_v11  ;;  %v4865_v17 = vsub.f32 1.0, %v4864_v63  ;;  %v6705_v63 = vld [vmem:[#allocation16 + $0x64] sm:$0xf0]  ;;  %v6704_v47 = vld [vmem:[#allocation16 + $0x64] sm:$0xf] }
 0x963   : > { %5060 = vadd.xlane.f32.xlu1 %v5040_v16  ;;  %v4967_v19 = vpop.xlane.xlu1 %4966 }
 0x964   : > { %4976 = vadd.xlane.f32.xlu2 %v10889_v35  ;;  %v4866_v52 = vmul.f32 %v7376_v29, %v4865_v17  ;;  %v4993_v53 = vmul.f32 0.03125, %v4967_v19  ;;  %v6626_v19 = vor.u32 %v6705_v63, %v6625_v57  ;;  %v6698_v63 = vld [vmem:[#allocation16 + $0x34] sm:$0xf] }
 0x966   : > { %v4867_v15 = vadd.f32 %v7376_v29, %v4866_v52  ;;  %v5009_v27 = vsub.f32 %v10760_v12, %v4993_v53  ;;  %v4491_v12 = vadd.f32 %v10771_v33, %v10433_v61  ;;  %v6633_v61 = vld [vmem:[#allocation16 + $0x70] sm:$0xf]  ;;  %v6707_v33 = vld [vmem:[#allocation16 + $0x74] sm:$0xf0] }
 0x967   : > { %v6634_v46 = vor.u32 %v6707_v33, %v6633_v61  ;;  %v6609_v33 = vld [vmem:[#allocation16 + $0x40] sm:$0xf] }
 0x968   : > { %v4871_v6 = vsel %vm4870_vm15, %v7376_v29, %v4867_v15  ;;  %v10895_v11 = vsel %vm937_vm10, %v5009_v27, 0.0  ;;  %v6630_v15 = vor.u32 %v6704_v47, %v6627_v28  ;;  %v6702_v27 = vld [vmem:[#allocation16 + $0x54] sm:$0xf]  ;;  %v6603_v47 = vld [vmem:[#allocation16 + $0x38] sm:$0xf0] }
 0x969   : > { %v4876_v39 = vsel %vm4873_vm0, %v4875_v59, %v4871_v6  ;;  %v5041_v0 = vmul.f32 %v10895_v11, %v10895_v11  ;;  %5436 = vmatpush.bf16.msrb.mxu0 %v6634_v46  ;;  %v7585_v46 = vld [vmem:[#allocation17 + $0x4] ss:$0 sm:$0xff] }
 0x96a   : > { %v10898_v14 = vmul.f32 %v4876_v39, %v10849_v7  ;;  %v4492_v7 = vadd.f32 %v10768_v48, %v10439_v60  ;;  %5486 = vmatpush.bf16.msrb.mxu1 %v6630_v15 }
 0x96b   : > { %5062 = vadd.xlane.f32.xlu0 %v5041_v0  ;;  %v6619_v0 = vld [vmem:[#allocation16 + $0x58] sm:$0xf0] }
 0x96c   : > { %4978 = vadd.xlane.f32.xlu1 %v10898_v14 }
 0x96d   : > { %5437 = vmatpush.bf16.msrb.mxu0 %v6626_v19  ;;  %v6579_v19 = vld [vmem:[#allocation16 + $0x8] sm:$0xf0] }
 0x99c   : > { %v4608_v43 = vpop.f32.mrf.mxu3 }
 0x99d   : > { %v4609_v55 = vadd.f32 %v10678_v50, %v4608_v43 }
 0x99f   : > { %v10906_v8 = vadd.f32 %v4609_v55, %v4491_v12 }
 0x9a1   : > { %v6571_v25 = vmul.f32 -1.442695, %v10906_v8 }
 0x9a3   : > { %7377 = vpow2.f32 %v6571_v25 }
 0x9a4   : > { %v4610_v9 = vpop.f32.mrf.mxu3 }
 0x9a5   : > { %v4611_v4 = vadd.f32 %v10678_v50, %v4610_v9 }
 0x9a7   : > { %v10912_v58 = vadd.f32 %v4611_v4, %v4492_v7  ;;  %v6622_v7 = vor.u32 %v6702_v27, %v6619_v0  ;;  %v4494_v4 = vadd.f32 %v10794_v22, %v10465_v24  ;;  %v6611_v22 = vld [vmem:[#allocation16 + $0x48] sm:$0xf0]  ;;  %v6606_v27 = vor.u32 %v6698_v63, %v6603_v47  ;;  %v6697_v0 = vld [vmem:[#allocation16 + $0x24] sm:$0xf0] }
 0x9a9   : > { %v7378_v45 = vpop.eup %7377  ;;  %v6572_v18 = vmul.f32 -1.442695, %v10912_v58  ;;  %5487 = vmatpush.bf16.msrb.mxu1 %v6622_v7 }
 0x9aa   : > { %v4694_v26 = vadd.f32 1.0, %v7378_v45 }
 0x9ab   : > { %7379 = vpow2.f32 %v6572_v18 }
 0x9ac   : > { %7381 = vrcp.f32 %v4694_v26  ;;  %v4887_v56 = vand.u32 2147483647, %v4694_v26  ;;  %v4889_v20 = vand.u32 2147483648, %v4694_v26  ;;  %vm4883_vm2 = vweird.f32 %v4694_v26 }
 0x9ae   : > { %vm10921_vm1 = vcmp.eq.f32.partialorder %v4887_v56, 8.507059e+37  ;;  %v4890_v6 = vor.u32 1.1754944e-38, %v4889_v20 }
 0x9b1   : > { %v7380_v3 = vpop.eup %7379 }
 0x9b2   : > { %v7382_v60 = vpop.eup %7381  ;;  %v10915_v48 = vadd.f32 1.0, %v7380_v3  ;;  %v4613_v62 = vpop.f32.mrf.mxu3 }
 0x9b3   : > { %v4879_v2 = vmul.f32 %v7382_v60, %v4694_v26  ;;  %v4614_v5 = vadd.f32 %v10678_v50, %v4613_v62  ;;  %vm4884_vm3 = vweird.f32 %v7382_v60  ;;  %v6703_v50 = vld [vmem:[#allocation16 + $0x54] sm:$0xf0] }
 0x9b4   : > { %7383 = vrcp.f32 %v10915_v48  ;;  %v6618_v39 = vor.u32 %v6703_v50, %v6617_v31  ;;  %v4902_v43 = vand.u32 2147483647, %v10915_v48  ;;  %vm10936_vm4 = vmor %vm4883_vm2, %vm4884_vm3  ;;  %v4904_v24 = vand.u32 2147483648, %v10915_v48 }
 0x9b5   : > { %v4880_v30 = vsub.f32 1.0, %v4879_v2  ;;  %v10925_v13 = vadd.f32 %v4614_v5, %v4493_v23  ;;  %v6614_v23 = vor.u32 %v6700_v38, %v6611_v22  ;;  %v6601_v5 = vld [vmem:[#allocation16 + $0x30] sm:$0xf]  ;;  %vm4898_vm5 = vweird.f32 %v10915_v48 }
 0x9b6   : > { %v5053_v16 = vpop.xlane.xlu0 %5052  ;;  %5438 = vmatpush.bf16.msrb.mxu0 %v6618_v39  ;;  %vm10966_vm7 = vcmp.eq.f32.partialorder %v4902_v43, 8.507059e+37  ;;  %v4905_v50 = vor.u32 1.1754944e-38, %v4904_v24  ;;  %v6593_v39 = vld [vmem:[#allocation16 + $0x20] sm:$0xf]  ;;  %v6696_v43 = vld [vmem:[#allocation16 + $0x24] sm:$0xf] }
 0x9b7   : > { %v4969_v17 = vpop.xlane.xlu1 %4968  ;;  %v4881_v34 = vmul.f32 %v7382_v60, %v4880_v30  ;;  %v6573_v52 = vmul.f32 -1.442695, %v10925_v13  ;;  %v5084_v32 = vmul.f32 0.03125, %v5053_v16  ;;  %v6699_v30 = vld [vmem:[#allocation16 + $0x34] sm:$0xf0]  ;;  %5488 = vmatpush.bf16.msrb.mxu1 %v6614_v23 }
 0x9b8   : > { %v4994_v53 = vmul.f32 0.03125, %v4969_v17 }
 0x9b9   : > { %v4882_v59 = vadd.f32 %v7382_v60, %v4881_v34  ;;  %7385 = vpow2.f32 %v6573_v52  ;;  %v10931_v55 = vadd.f32 0.1, %v5084_v32  ;;  %v6602_v52 = vor.u32 %v6699_v30, %v6601_v5 }
 0x9ba   : > { %v10929_v12 = vpop.eup %7383  ;;  %v5010_v25 = vsub.f32 %v10825_v36, %v4994_v53  ;;  %v4615_v45 = vpop.f32.mrf.mxu3  ;;  %v6701_v36 = vld [vmem:[#allocation16 + $0x44] sm:$0xf0] }
 0x9bb   : > { %v4886_v18 = vsel %vm10936_vm4, %v7382_v60, %v4882_v59  ;;  %v4894_v61 = vmul.f32 %v10929_v12, %v10915_v48  ;;  %7387 = vrsqrt.f32 %v10931_v55  ;;  %v4616_v44 = vadd.f32 %v7585_v46, %v4615_v45  ;;  %5489 = vmatpush.bf16.msrb.mxu1 %v6606_v27  ;;  %v6694_v46 = vld [vmem:[#allocation16 + $0x14] sm:$0xf] }
 0x9bc   : > { %v10949_v26 = vsel %vm937_vm10, %v5010_v25, 0.0  ;;  %v4891_v42 = vsel %vm10921_vm1, %v4890_v6, %v4886_v18  ;;  %v6610_v60 = vor.u32 %v6701_v36, %v6609_v33  ;;  %vm4899_vm6 = vweird.f32 %v10929_v12  ;;  %v6595_v25 = vld [vmem:[#allocation16 + $0x28] sm:$0xf0]  ;;  %v6585_v18 = vld [vmem:[#allocation16 + $0x10] sm:$0xf] }
 0x9bd   : > { %v5042_v3 = vmul.f32 %v10949_v26, %v10949_v26  ;;  %v4895_v56 = vsub.f32 1.0, %v4894_v61  ;;  %v10956_v62 = vadd.f32 %v4616_v44, %v4494_v4  ;;  %v10959_v2 = vmul.f32 %v4891_v42, %v10906_v8  ;;  %vm4900_vm8 = vmor %vm4898_vm5, %vm4899_vm6  ;;  %v6695_v61 = vld [vmem:[#allocation16 + $0x14] sm:$0xf0]  ;;  %v6587_v44 = vld [vmem:[#allocation16 + $0x18] sm:$0xf0] }
 0x9be   : > { %v5055_v20 = vpop.xlane.xlu2 %5054  ;;  %5439 = vmatpush.bf16.msrb.mxu0 %v6610_v60  ;;  %v6594_v4 = vor.u32 %v6697_v0, %v6593_v39  ;;  %v6598_v45 = vor.u32 %v6696_v43, %v6595_v25  ;;  %v6586_v60 = vor.u32 %v6695_v61, %v6585_v18  ;;  %vm5122_vm11 = vweird.f32 %v10931_v55 }
 0x9bf   : > { %v4971_v57 = vpop.xlane.xlu0 %4970  ;;  %5064 = vadd.xlane.f32.xlu0 %v5042_v3  ;;  %v4896_v29 = vmul.f32 %v10929_v12, %v4895_v56  ;;  %v7386_v16 = vpop.eup %7385  ;;  %v6574_v17 = vmul.f32 -1.442695, %v10956_v62  ;;  %v5085_v8 = vmul.f32 0.03125, %v5055_v20  ;;  %4980 = vadd.xlane.f32.xlu1 %v10959_v2 }
 0x9c0   : > { %v4995_v34 = vmul.f32 0.03125, %v4971_v57  ;;  %v10970_v28 = vadd.f32 1.0, %v7386_v16  ;;  %5490 = vmatpush.bf16.msrb.mxu1 %v6598_v45  ;;  %v6590_v57 = vor.u32 %v6694_v46, %v6587_v44  ;;  %v6577_v16 = vld [vmem:[#allocation16] sm:$0xf] }
 0x9c1   : > { %v4897_v31 = vadd.f32 %v10929_v12, %v4896_v29  ;;  %v10973_v32 = vpop.eup %7387  ;;  %7389 = vpow2.f32 %v6574_v17  ;;  %v10975_v53 = vadd.f32 0.1, %v5085_v8  ;;  %v6693_v17 = vld [vmem:[#allocation16 + $0x4] sm:$0xf0] }
 0x9c2   : > { %v5011_v15 = vsub.f32 %v10846_v51, %v4995_v34  ;;  %7391 = vrcp.f32 %v10970_v28  ;;  %v5117_v59 = vmul.f32 %v10973_v32, %v10931_v55  ;;  %5440 = vmatpush.bf16.msrb.mxu0 %v6602_v52  ;;  %vm5123_vm9 = vweird.f32 %v10973_v32  ;;  %v6692_v34 = vld [vmem:[#allocation16 + $0x4] sm:$0xf] }
 0x9c3   : > { %v4901_v6 = vsel %vm4900_vm8, %v10929_v12, %v4897_v31  ;;  %7393 = vrsqrt.f32 %v10975_v53  ;;  %v4917_v47 = vand.u32 2147483647, %v10970_v28  ;;  %vm11022_vm12 = vmor %vm5122_vm11, %vm5123_vm9  ;;  %v4919_v52 = vand.u32 2147483648, %v10970_v28 }
 0x9c4   : > { %v10989_v51 = vsel %vm937_vm10, %v5011_v15, 0.0  ;;  %v4906_v48 = vsel %vm10966_vm7, %v4905_v50, %v4901_v6  ;;  %v5118_v9 = vmul.f32 %v10973_v32, %v5117_v59  ;;  %v6578_v15 = vor.u32 %v6693_v17, %v6577_v16  ;;  %5491 = vmatpush.bf16.msrb.mxu1 %v6590_v57  ;;  %v11076_v16 = vld [vmem:[#allocation17 + $0xe] ss:$0 sm:$0xff] }
 0x9c5   : > { %v5043_v7 = vmul.f32 %v10989_v51, %v10989_v51  ;;  %v10997_v12 = vmul.f32 %v4906_v48, %v10912_v58  ;;  %v6582_v6 = vor.u32 %v6692_v34, %v6579_v19  ;;  %vm5132_vm14 = vweird.f32 %v10975_v53 }
 0x9c6   : > { %v5119_v33 = vmul.f32 0.5, %v5118_v9  ;;  %v5057_v38 = vpop.xlane.xlu2 %5056  ;;  %5441 = vmatpush.bf16.msrb.mxu0 %v6594_v4  ;;  %vm4913_vm15 = vweird.f32 %v10970_v28  ;;  %vm11035_vm0 = vcmp.eq.f32.partialorder %v4917_v47, 8.507059e+37  ;;  %v4920_v18 = vor.u32 1.1754944e-38, %v4919_v52 }
 0x9c7   : > { %v4973_v36 = vpop.xlane.xlu0 %4972  ;;  %5066 = vadd.xlane.f32.xlu2 %v5043_v7  ;;  %4982 = vadd.xlane.f32.xlu0 %v10997_v12  ;;  %v7390_v24 = vpop.eup %7389  ;;  %v5086_v42 = vmul.f32 0.03125, %v5057_v38 }
 0x9c8   : > { %v4996_v22 = vmul.f32 0.03125, %v4973_v36  ;;  %v7392_v3 = vpop.eup %7391  ;;  %v5120_v58 = vsub.f32 1.5, %v5119_v33  ;;  %v11001_v56 = vadd.f32 1.0, %v7390_v24  ;;  %5492 = vmatpush.bf16.msrb.mxu1 %v6582_v6 }
 0x9c9   : > { %v11003_v23 = vpop.eup %7393  ;;  %v11006_v30 = vadd.f32 0.1, %v5086_v42  ;;  %v4909_v20 = vmul.f32 %v7392_v3, %v10970_v28  ;;  %vm4914_vm13 = vweird.f32 %v7392_v3 }
 0x9ca   : > { %v5012_v5 = vsub.f32 %v10862_v1, %v4996_v22  ;;  %v5121_v29 = vmul.f32 %v10973_v32, %v5120_v58  ;;  %7395 = vrcp.f32 %v11001_v56  ;;  %v5127_v63 = vmul.f32 %v11003_v23, %v10975_v53  ;;  %5442 = vmatpush.bf16.msrb.mxu0 %v6586_v60  ;;  %vm4915_vm2 = vmor %vm4913_vm15, %vm4914_vm13  ;;  %v11054_v22 = vld [vmem:[#allocation17 + $0x9] ss:$0 sm:$0xff] }
 0x9cb   : > { %7397 = vrsqrt.f32 %v11006_v30  ;;  %v4910_v8 = vsub.f32 1.0, %v4909_v20  ;;  %vm5133_vm1 = vweird.f32 %v11003_v23  ;;  %v4932_v24 = vand.u32 2147483647, %v11001_v56 }
 0x9cc   : > { %v11017_v1 = vsel %vm937_vm10, %v5012_v5, 0.0  ;;  %v5128_v50 = vmul.f32 %v11003_v23, %v5127_v63  ;;  %v5125_v27 = vsel %vm11022_vm12, %v10973_v32, %v5121_v29  ;;  %vm5134_vm3 = vmor %vm5132_vm14, %vm5133_vm1  ;;  %vm4928_vm5 = vweird.f32 %v11001_v56 }
 0x9cd   : > { %v5044_v55 = vmul.f32 %v11017_v1, %v11017_v1  ;;  %v4911_v59 = vmul.f32 %v7392_v3, %v4910_v8  ;;  %v5276_v4 = vmul.f32 %v5125_v27, %v10819_v10  ;;  %vm4933_vm6 = vcmp.eq.f32.partialorder %v4932_v24, 8.507059e+37 }
 0x9ce   : > { %v5129_v39 = vmul.f32 0.5, %v5128_v50  ;;  %v5059_v43 = vpop.xlane.xlu1 %5058  ;;  %5443 = vmatpush.bf16.msrb.mxu0 %v6578_v15  ;;  %vm5142_vm9 = vweird.f32 %v11006_v30 }
 0x9cf   : > { %5068 = vadd.xlane.f32.xlu2 %v5044_v55  ;;  %v4975_v0 = vpop.xlane.xlu2 %4974  ;;  %v5087_v25 = vmul.f32 0.03125, %v5059_v43  ;;  %v4912_v9 = vadd.f32 %v7392_v3, %v4911_v59  ;;  %v5293_v47 = vmul.f32 %v11054_v22, %v5276_v4 }
 0x9d0   : > { %v4997_v48 = vmul.f32 0.03125, %v4975_v0  ;;  %v7396_v32 = vpop.eup %7395  ;;  %v5130_v45 = vsub.f32 1.5, %v5129_v39 }
 0x9d1   : > { %v11042_v61 = vpop.eup %7397  ;;  %v11045_v33 = vadd.f32 0.1, %v5087_v25  ;;  %v4916_v36 = vsel %vm4915_vm2, %v7392_v3, %v4912_v9  ;;  %v4924_v38 = vmul.f32 %v7396_v32, %v11001_v56  ;;  %v4934_v3 = vand.u32 2147483648, %v11001_v56 }
 0x9d2   : > { %v5013_v28 = vsub.f32 %v10878_v54, %v4997_v48  ;;  %v5131_v46 = vmul.f32 %v11003_v23, %v5130_v45  ;;  %v5137_v10 = vmul.f32 %v11042_v61, %v11006_v30  ;;  %v4921_v44 = vsel %vm11035_vm0, %v4920_v18, %v4916_v36 }
 0x9d3   : > { %7399 = vrsqrt.f32 %v11045_v33  ;;  %v11066_v42 = vmul.f32 %v4921_v44, %v10925_v13  ;;  %v4925_v53 = vsub.f32 1.0, %v4924_v38  ;;  %vm4929_vm4 = vweird.f32 %v7396_v32 }
 0x9d4   : > { %v11062_v54 = vsel %vm937_vm10, %v5013_v28, 0.0  ;;  %v5135_v58 = vsel %vm5134_vm3, %v11003_v23, %v5131_v46  ;;  %v5138_v60 = vmul.f32 %v11042_v61, %v5137_v10  ;;  %v4935_v19 = vor.u32 1.1754944e-38, %v4934_v3  ;;  %vm4930_vm8 = vmor %vm4928_vm5, %vm4929_vm4 }
 0x9d5   : > { %v5045_v5 = vmul.f32 %v11062_v54, %v11062_v54  ;;  %v5277_v20 = vmul.f32 %v5135_v58, %v10838_v37  ;;  %4984 = vadd.xlane.f32.xlu0 %v11066_v42  ;;  %v4926_v13 = vmul.f32 %v7396_v32, %v4925_v53  ;;  %vm5143_vm7 = vweird.f32 %v11042_v61 }
 0x9d6   : > { %v5139_v57 = vmul.f32 0.5, %v5138_v60  ;;  %v5061_v63 = vpop.xlane.xlu1 %5060  ;;  %v5310_v59 = vadd.f32 %v11076_v16, %v5293_v47  ;;  %vm11099_vm11 = vmor %vm5142_vm9, %vm5143_vm7  ;;  %vm5152_vm13 = vweird.f32 %v11045_v33 }
 0x9d7   : > { %5070 = vadd.xlane.f32.xlu1 %v5045_v5  ;;  %v4977_v29 = vpop.xlane.xlu2 %4976  ;;  %v5088_v17 = vmul.f32 0.03125, %v5061_v63  ;;  %v5294_v8 = vmul.f32 %v11054_v22, %v5277_v20  ;;  %v4927_v37 = vadd.f32 %v7396_v32, %v4926_v13 }
 0x9d8   : > { %v4998_v23 = vmul.f32 0.03125, %v4977_v29  ;;  %v5140_v34 = vsub.f32 1.5, %v5139_v57 }
 0x9d9   : > { %v7400_v31 = vpop.eup %7399  ;;  %v5104_v55 = vadd.f32 0.1, %v5088_v17  ;;  %v5311_v52 = vadd.f32 %v11076_v16, %v5294_v8  ;;  %v4931_v27 = vsel %vm4930_vm8, %v7396_v32, %v4927_v37 }
 0x9da   : > { %v5014_v50 = vsub.f32 %v10889_v35, %v4998_v23  ;;  %v5141_v15 = vmul.f32 %v11042_v61, %v5140_v34  ;;  %v5147_v56 = vmul.f32 %v7400_v31, %v11045_v33  ;;  %v4936_v35 = vsel %vm4933_vm6, %v4935_v19, %v4931_v27 }
 0x9db   : > { %7401 = vrsqrt.f32 %v5104_v55  ;;  %v11093_v0 = vmul.f32 %v4936_v35, %v10956_v62  ;;  %v5326_v43 = vpack.c.bf16 %v5311_v52, %v5310_v59  ;;  %vm5153_vm12 = vweird.f32 %v7400_v31 }
 0x9dc   : > { %v11090_v6 = vsel %vm937_vm10, %v5014_v50, 0.0  ;;  %v5148_v39 = vmul.f32 %v7400_v31, %v5147_v56  ;;  %v5145_v62 = vsel %vm11099_vm11, %v11042_v61, %v5141_v15  ;;  %vm5154_vm14 = vmor %vm5152_vm13, %vm5153_vm12  ;;  %vm5162_vm0 = vweird.f32 %v5104_v55 }
 0x9dd   : > { %v5046_v48 = vmul.f32 %v11090_v6, %v11090_v6  ;;  %4986 = vadd.xlane.f32.xlu2 %v11093_v0  ;;  %5444 = vmatmul.bf16.vlgmr.msrb.gmra.mxu0 %v5326_v43  ;;  %v5278_v38 = vmul.f32 %v5145_v62, %v10859_v21 }
 0x9de   : > { %v5149_v30 = vmul.f32 0.5, %v5148_v39  ;;  %v5063_v9 = vpop.xlane.xlu0 %5062  ;;  %5493 = vmatmul.bf16.vlgmr.msrb.gmra.mxu1 %v5326_v43 }
 0x9df   : > { %v4979_v7 = vpop.xlane.xlu1 %4978  ;;  %5072 = vadd.xlane.f32.xlu1 %v5046_v48  ;;  %v5089_v32 = vmul.f32 0.03125, %v5063_v9 }
 0x9e0   : > { %v4999_v4 = vmul.f32 0.03125, %v4979_v7  ;;  %v5150_v45 = vsub.f32 1.5, %v5149_v30 }
 0x9e1   : > { %v7402_v18 = vpop.eup %7401  ;;  %v5105_v28 = vadd.f32 0.1, %v5089_v32 }
 0x9e2   : > { %v5015_v36 = vsub.f32 %v10898_v14, %v4999_v4  ;;  %v5151_v46 = vmul.f32 %v7400_v31, %v5150_v45  ;;  %v5157_v10 = vmul.f32 %v7402_v18, %v5104_v55  ;;  %v5295_v14 = vmul.f32 %v11054_v22, %v5278_v38 }
 0x9e3   : > { %7403 = vrsqrt.f32 %v5105_v28  ;;  %vm5163_vm15 = vweird.f32 %v7402_v18  ;;  %vm5172_vm3 = vweird.f32 %v5105_v28 }
 0x9e4   : > { %v11112_v61 = vsel %vm937_vm10, %v5015_v36, 0.0  ;;  %v5158_v44 = vmul.f32 %v7402_v18, %v5157_v10  ;;  %v5155_v3 = vsel %vm5154_vm14, %v7400_v31, %v5151_v46  ;;  %v5312_v53 = vadd.f32 %v11076_v16, %v5295_v14  ;;  %vm5164_vm1 = vmor %vm5162_vm0, %vm5163_vm15 }
 0x9e5   : > { %v5047_v24 = vmul.f32 %v11112_v61, %v11112_v61  ;;  %v5279_v58 = vmul.f32 %v5155_v3, %v10873_v41 }
 0x9e6   : > { %v5159_v21 = vmul.f32 0.5, %v5158_v44 }
 0x9e7   : > { %5074 = vadd.xlane.f32.xlu0 %v5047_v24  ;;  %v5296_v33 = vmul.f32 %v11054_v22, %v5279_v58 }
 0x9e8   : > { %v5160_v60 = vsub.f32 1.5, %v5159_v21 }
 0x9e9   : > { %v7404_v5 = vpop.eup %7403  ;;  %v5313_v20 = vadd.f32 %v11076_v16, %v5296_v33 }
 0x9ea   : > { %v5161_v57 = vmul.f32 %v7402_v18, %v5160_v60  ;;  %v5167_v29 = vmul.f32 %v7404_v5, %v5105_v28  ;;  %vm5173_vm2 = vweird.f32 %v7404_v5 }
 0x9eb   : > { %v5327_v63 = vpack.c.bf16 %v5313_v20, %v5312_v53  ;;  %vm5174_vm4 = vmor %vm5172_vm3, %vm5173_vm2 }
 0x9ec   : > { %v5168_v13 = vmul.f32 %v7404_v5, %v5167_v29  ;;  %v5165_v47 = vsel %vm5164_vm1, %v7402_v18, %v5161_v57 }
 0x9ed   : > { %5449 = vmatmul.bf16.gmra.mxu0 %v5327_v63  ;;  %v5280_v17 = vmul.f32 %v5165_v47, %v10884_v40 }
 0x9ee   : > { %v5169_v41 = vmul.f32 0.5, %v5168_v13  ;;  %5498 = vmatmul.bf16.gmra.mxu1 %v5327_v63 }
 0x9ef   : > { %v5297_v19 = vmul.f32 %v11054_v22, %v5280_v17 }
 0x9f0   : > { %v5170_v23 = vsub.f32 1.5, %v5169_v41 }
 0x9f1   : > { %v5314_v50 = vadd.f32 %v11076_v16, %v5297_v19 }
 0x9f2   : > { %v5171_v8 = vmul.f32 %v7404_v5, %v5170_v23 }
 0x9f4   : > { %v5175_v34 = vsel %vm5174_vm4, %v7404_v5, %v5171_v8 }
 0x9f5   : > { %v5281_v37 = vmul.f32 %v5175_v34, %v10895_v11 }
 0x9f7   : > { %v5298_v31 = vmul.f32 %v11054_v22, %v5281_v37 }
 0x9f9   : > { %v5315_v55 = vadd.f32 %v11076_v16, %v5298_v31 }
 0x9fb   : > { %v5328_v52 = vpack.c.bf16 %v5315_v55, %v5314_v50 }
 0x9fd   : > { %5454 = vmatmul.bf16.gmra.mxu0 %v5328_v52 }
 0x9fe   : > { %5503 = vmatmul.bf16.gmra.mxu1 %v5328_v52 }
 0xa32   : > { %v5065_v15 = vpop.xlane.xlu0 %5064  ;;  %v4981_v40 = vpop.xlane.xlu1 %4980 }
 0xa33   : > { %v5090_v56 = vmul.f32 0.03125, %v5065_v15  ;;  %v5000_v27 = vmul.f32 0.03125, %v4981_v40 }
 0xa35   : > { %v5106_v59 = vadd.f32 0.1, %v5090_v56  ;;  %v5016_v35 = vsub.f32 %v10959_v2, %v5000_v27 }
 0xa37   : > { %7405 = vrsqrt.f32 %v5106_v59  ;;  %v11130_v11 = vsel %vm937_vm10, %v5016_v35, 0.0  ;;  %vm5182_vm6 = vweird.f32 %v5106_v59 }
 0xa38   : > { %v5048_v39 = vmul.f32 %v11130_v11, %v11130_v11 }
 0xa3a   : > { %v5067_v43 = vpop.xlane.xlu2 %5066  ;;  %v4983_v48 = vpop.xlane.xlu0 %4982  ;;  %5076 = vadd.xlane.f32.xlu2 %v5048_v39 }
 0xa3b   : > { %v5091_v25 = vmul.f32 0.03125, %v5067_v43  ;;  %v5001_v30 = vmul.f32 0.03125, %v4983_v48  ;;  %v5350_v43 = vld [vmem:[%s11342_s9] sm:$0x3] }
 0xa3c   : > { %v11164_v49 = vperm.slane %v5350_v43, 1 }
 0xa3d   : > { %v7406_v9 = vpop.eup %7405  ;;  %v5107_v7 = vadd.f32 0.1, %v5091_v25  ;;  %v5017_v62 = vsub.f32 %v10997_v12, %v5001_v30 }
 0xa3e   : > { %v5177_v32 = vmul.f32 %v7406_v9, %v5106_v59  ;;  %vm5183_vm5 = vweird.f32 %v7406_v9 }
 0xa3f   : > { %7407 = vrsqrt.f32 %v5107_v7  ;;  %v11137_v2 = vsel %vm937_vm10, %v5017_v62, 0.0  ;;  %vm5184_vm7 = vmor %vm5182_vm6, %vm5183_vm5  ;;  %vm5192_vm9 = vweird.f32 %v5107_v7 }
 0xa40   : > { %v5178_v4 = vmul.f32 %v7406_v9, %v5177_v32  ;;  %v5049_v45 = vmul.f32 %v11137_v2, %v11137_v2 }
 0xa42   : > { %v5179_v18 = vmul.f32 0.5, %v5178_v4  ;;  %v5069_v28 = vpop.xlane.xlu2 %5068  ;;  %5078 = vadd.xlane.f32.xlu1 %v5049_v45  ;;  %v11168_v45 = vperm.slane %v5350_v43, 0 }
 0xa43   : > { %v5092_v36 = vmul.f32 0.03125, %v5069_v28 }
 0xa44   : > { %v5180_v38 = vsub.f32 1.5, %v5179_v18 }
 0xa45   : > { %v7408_v46 = vpop.eup %7407  ;;  %v5108_v10 = vadd.f32 0.1, %v5092_v36 }
 0xa46   : > { %v5181_v44 = vmul.f32 %v7406_v9, %v5180_v38  ;;  %v5187_v12 = vmul.f32 %v7408_v46, %v5107_v7  ;;  %vm5193_vm8 = vweird.f32 %v7408_v46 }
 0xa47   : > { %7409 = vrsqrt.f32 %v5108_v10  ;;  %vm5194_vm11 = vmor %vm5192_vm9, %vm5193_vm8  ;;  %vm5202_vm13 = vweird.f32 %v5108_v10 }
 0xa48   : > { %v5188_v24 = vmul.f32 %v7408_v46, %v5187_v12  ;;  %v4985_v3 = vpop.xlane.xlu0 %4984  ;;  %v5185_v33 = vsel %vm5184_vm7, %v7406_v9, %v5181_v44 }
 0xa49   : > { %v5002_v14 = vmul.f32 0.03125, %v4985_v3  ;;  %v5282_v29 = vmul.f32 %v5185_v33, %v10949_v26 }
 0xa4a   : > { %v5189_v58 = vmul.f32 0.5, %v5188_v24  ;;  %v5071_v21 = vpop.xlane.xlu1 %5070 }
 0xa4b   : > { %v5093_v60 = vmul.f32 0.03125, %v5071_v21  ;;  %v5018_v53 = vsub.f32 %v11066_v42, %v5002_v14  ;;  %v5299_v8 = vmul.f32 %v11054_v22, %v5282_v29 }
 0xa4c   : > { %v5190_v5 = vsub.f32 1.5, %v5189_v58 }
 0xa4d   : > { %v7410_v20 = vpop.eup %7409  ;;  %v5109_v57 = vadd.f32 0.1, %v5093_v60  ;;  %v11145_v41 = vsel %vm937_vm10, %v5018_v53, 0.0  ;;  %v5316_v56 = vadd.f32 %v11076_v16, %v5299_v8 }
 0xa4e   : > { %v5191_v63 = vmul.f32 %v7408_v46, %v5190_v5  ;;  %v5197_v13 = vmul.f32 %v7410_v20, %v5108_v10  ;;  %v5050_v47 = vmul.f32 %v11145_v41, %v11145_v41  ;;  %vm5203_vm12 = vweird.f32 %v7410_v20 }
 0xa4f   : > { %7411 = vrsqrt.f32 %v5109_v57  ;;  %vm5204_vm14 = vmor %vm5202_vm13, %vm5203_vm12  ;;  %vm5212_vm15 = vweird.f32 %v5109_v57 }
 0xa50   : > { %v5198_v23 = vmul.f32 %v7410_v20, %v5197_v13  ;;  %v5195_v17 = vsel %vm5194_vm11, %v7408_v46, %v5191_v63  ;;  %5080 = vadd.xlane.f32.xlu0 %v5050_v47  ;;  %v4987_v34 = vpop.xlane.xlu2 %4986  ;;  %v5534_v46 = vld [vmem:[#allocation7] sm:$0xff] }
 0xa51   : > { %v5283_v42 = vmul.f32 %v5195_v17, %v10989_v51  ;;  %v5003_v37 = vmul.f32 0.03125, %v4987_v34  ;;  %v5550_v12 = vmul.f32 %v5534_v46, %v5534_v46 }
 0xa52   : > { %v5199_v26 = vmul.f32 0.5, %v5198_v23  ;;  %v5073_v19 = vpop.xlane.xlu1 %5072 }
 0xa53   : > { %v5300_v31 = vmul.f32 %v11054_v22, %v5283_v42  ;;  %v5094_v55 = vmul.f32 0.03125, %v5073_v19  ;;  %v5019_v15 = vsub.f32 %v11093_v0, %v5003_v37  ;;  %v5774_v5 = vmul.f32 4.539993e-05, %v5550_v12 }
 0xa54   : > { %v5200_v50 = vsub.f32 1.5, %v5199_v26  ;;  %v5566_v8 = vadd.f32 1.837877, %v5550_v12 }
 0xa55   : > { %v7412_v52 = vpop.eup %7411  ;;  %v5317_v40 = vadd.f32 %v11076_v16, %v5300_v31  ;;  %v5110_v59 = vadd.f32 0.1, %v5094_v55  ;;  %v11157_v35 = vsel %vm937_vm10, %v5019_v15, 0.0  ;;  %v5790_v26 = vadd.f32 11.837877, %v5774_v5 }
 0xa56   : > { %v5201_v27 = vmul.f32 %v7410_v20, %v5200_v50  ;;  %v5207_v51 = vmul.f32 %v7412_v52, %v5109_v57  ;;  %v5051_v0 = vmul.f32 %v11157_v35, %v11157_v35  ;;  %vm5213_vm10 = vweird.f32 %v7412_v52 }
 0xa57   : > { %v5329_v39 = vpack.c.bf16 %v5317_v40, %v5316_v56  ;;  %7413 = vrsqrt.f32 %v5110_v59  ;;  %vm5214_vm0 = vmor %vm5212_vm15, %vm5213_vm10  ;;  %vm5222_vm2 = vweird.f32 %v5110_v59 }
 0xa58   : > { %v5208_v48 = vmul.f32 %v7412_v52, %v5207_v51  ;;  %5082 = vadd.xlane.f32.xlu2 %v5051_v0  ;;  %v5205_v9 = vsel %vm5204_vm14, %v7410_v20, %v5201_v27  ;;  %v5582_v51 = vmul.f32 -0.5, %v5566_v8 }
 0xa59   : > { %5459 = vmatmul.bf16.gmra.mxu0 %v5329_v39  ;;  %5508 = vmatmul.bf16.gmra.mxu1 %v5329_v39  ;;  %v5284_v28 = vmul.f32 %v5205_v9, %v11017_v1 }
 0xa5a   : > { %v5209_v25 = vmul.f32 0.5, %v5208_v48  ;;  %v5075_v30 = vpop.xlane.xlu0 %5074  ;;  %v5445_v32 = vpop.f32.mrf.mxu0 }
 0xa5b   : > { %v5095_v7 = vmul.f32 0.03125, %v5075_v30  ;;  %v5494_v18 = vpop.f32.mrf.mxu1  ;;  %v5446_v14 = vadd.f32 %v5445_v32, %v11168_v45  ;;  %v5301_v1 = vmul.f32 %v11054_v22, %v5284_v28 }
 0xa5c   : > { %v5210_v62 = vsub.f32 1.5, %v5209_v25  ;;  %v5495_v10 = vadd.f32 %v5494_v18, %v11164_v49 }
 0xa5d   : > { %v11166_v4 = vadd.f32 0.1, %v5095_v7  ;;  %v7414_v36 = vpop.eup %7413  ;;  %v5614_v63 = vsub.f32 %v5534_v46, %v5446_v14  ;;  %v5318_v47 = vadd.f32 %v11076_v16, %v5301_v1 }
 0xa5e   : > { %v5211_v38 = vmul.f32 %v7412_v52, %v5210_v62  ;;  %v5217_v44 = vmul.f32 %v7414_v36, %v5110_v59  ;;  %v5662_v24 = vsub.f32 0.0, %v5495_v10  ;;  %vm5223_vm1 = vweird.f32 %v7414_v36 }
 0xa5f   : > { %7415 = vrsqrt.f32 %v11166_v4  ;;  %vm11182_vm3 = vmor %vm5222_vm2, %vm5223_vm1  ;;  %v5646_v55 = vmul.f32 %v5614_v63, %v5614_v63  ;;  %v5806_v59 = vmul.f32 -0.5, %v5790_v26  ;;  %v5630_v39 = vadd.f32 1.837877, %v5495_v10 }
 0xa60   : > { %v5215_v3 = vsel %vm5214_vm0, %v7412_v52, %v5211_v38  ;;  %v5218_v58 = vmul.f32 %v7414_v36, %v5217_v44  ;;  %v5678_v33 = vmul.f32 1.442695, %v5662_v24  ;;  %v5535_v52 = vld [vmem:[#allocation7 + $0x8] sm:$0xff]  ;;  %vm5232_vm5 = vweird.f32 %v11166_v4  ;;  %v5536_v24 = vld [vmem:[#allocation7 + $0x10] sm:$0xff] }
 0xa61   : > { %v5285_v21 = vmul.f32 %v5215_v3, %v11062_v54  ;;  %v5551_v0 = vmul.f32 %v5535_v52, %v5535_v52  ;;  %v5822_v10 = vadd.f32 -2.3025851, %v5806_v59  ;;  %v5552_v63 = vmul.f32 %v5536_v24, %v5536_v24 }
 0xa62   : > { %v5219_v60 = vmul.f32 0.5, %v5218_v58  ;;  %7417 = vpow2.f32 %v5678_v33  ;;  %v5447_v20 = vpop.f32.mrf.mxu0 }
 0xa63   : > { %v5302_v53 = vmul.f32 %v11054_v22, %v5285_v21  ;;  %v5496_v13 = vpop.f32.mrf.mxu1  ;;  %v5448_v19 = vadd.f32 %v5447_v20, %v11168_v45  ;;  %v5775_v18 = vmul.f32 4.539993e-05, %v5551_v0  ;;  %v5567_v44 = vadd.f32 1.837877, %v5551_v0 }
 0xa64   : > { %v5220_v29 = vsub.f32 1.5, %v5219_v60  ;;  %v5497_v17 = vadd.f32 %v5496_v13, %v11164_v49  ;;  %v5568_v8 = vadd.f32 1.837877, %v5552_v63  ;;  %v5776_v26 = vmul.f32 4.539993e-05, %v5552_v63 }
 0xa65   : > { %v7416_v57 = vpop.eup %7415  ;;  %v5319_v23 = vadd.f32 %v11076_v16, %v5302_v53  ;;  %v5615_v25 = vsub.f32 %v5535_v52, %v5448_v19  ;;  %v5791_v14 = vadd.f32 11.837877, %v5775_v18 }
 0xa66   : > { %v5227_v54 = vmul.f32 %v7416_v57, %v11166_v4  ;;  %v5221_v42 = vmul.f32 %v7414_v36, %v5220_v29  ;;  %v5663_v31 = vsub.f32 0.0, %v5497_v17  ;;  %vm5233_vm4 = vweird.f32 %v7416_v57 }
 0xa67   : > { %v5330_v34 = vpack.c.bf16 %v5319_v23, %v5318_v47  ;;  %vm5234_vm6 = vmor %vm5232_vm5, %vm5233_vm4  ;;  %v5647_v12 = vmul.f32 %v5615_v25, %v5615_v25  ;;  %v5631_v5 = vadd.f32 1.837877, %v5497_v17  ;;  %v5583_v29 = vmul.f32 -0.5, %v5567_v44  ;;  %v5537_v25 = vld [vmem:[#allocation7 + $0x18] sm:$0xff] }
 0xa68   : > { %v5228_v37 = vmul.f32 %v7416_v57, %v5227_v54  ;;  %v7418_v15 = vpop.eup %7417  ;;  %v5680_v40 = vmul.f32 1.442695, %v5663_v31  ;;  %v5225_v27 = vsel %vm11182_vm3, %v7414_v36, %v5221_v42  ;;  %v5598_v36 = vadd.f32 -1.89712, %v5582_v51 }
 0xa69   : > { %5464 = vmatmul.bf16.gmra.mxu0 %v5330_v34  ;;  %5513 = vmatmul.bf16.gmra.mxu1 %v5330_v34  ;;  %v5710_v43 = vmul.f32 %v7418_v15, %v5646_v55  ;;  %v5286_v62 = vmul.f32 %v5225_v27, %v11090_v6  ;;  %v5807_v23 = vmul.f32 -0.5, %v5791_v14  ;;  %v5599_v50 = vadd.f32 -1.89712, %v5583_v29 }
 0xa6a   : > { %v5229_v56 = vmul.f32 0.5, %v5228_v37  ;;  %7419 = vpow2.f32 %v5680_v40  ;;  %v5450_v30 = vpop.f32.mrf.mxu0  ;;  %v5792_v40 = vadd.f32 11.837877, %v5776_v26 }
 0xa6b   : > { %v5726_v9 = vadd.f32 %v5710_v43, %v5630_v39  ;;  %v5499_v7 = vpop.f32.mrf.mxu1  ;;  %v5451_v46 = vadd.f32 %v5450_v30, %v11168_v45  ;;  %v5303_v6 = vmul.f32 %v11054_v22, %v5286_v62  ;;  %v5823_v39 = vadd.f32 -2.3025851, %v5807_v23 }
 0xa6c   : > { %v5230_v48 = vsub.f32 1.5, %v5229_v56  ;;  %v5500_v28 = vadd.f32 %v5499_v7, %v11164_v49  ;;  %v5553_v7 = vmul.f32 %v5537_v25, %v5537_v25  ;;  %v5808_v62 = vmul.f32 -0.5, %v5792_v40 }
 0xa6d   : > { %v5742_v38 = vmul.f32 -0.5, %v5726_v9  ;;  %v5616_v20 = vsub.f32 %v5536_v24, %v5451_v46  ;;  %v5320_v42 = vadd.f32 %v11076_v16, %v5303_v6 }
 0xa6e   : > { %v5231_v32 = vmul.f32 %v7416_v57, %v5230_v48  ;;  %v5664_v3 = vsub.f32 0.0, %v5500_v28  ;;  %v5632_v52 = vadd.f32 1.837877, %v5500_v28  ;;  %v5584_v48 = vmul.f32 -0.5, %v5568_v8 }
 0xa6f   : > { %v5758_v58 = vadd.f32 -0.2876821, %v5742_v38  ;;  %v5648_v55 = vmul.f32 %v5616_v20, %v5616_v20  ;;  %v5777_v44 = vmul.f32 4.539993e-05, %v5553_v7 }
 0xa70   : > { %v5235_v21 = vsel %vm5234_vm6, %v7416_v57, %v5231_v32  ;;  %v7420_v1 = vpop.eup %7419  ;;  %v5682_v33 = vmul.f32 1.442695, %v5664_v3  ;;  %v5600_v46 = vadd.f32 -1.89712, %v5584_v48 }
 0xa71   : > { %v5287_v60 = vmul.f32 %v5235_v21, %v11112_v61  ;;  %v5838_v4 = vmax.f32 %v5598_v36, %v5758_v58  ;;  %v5711_v53 = vmul.f32 %v7420_v1, %v5647_v12  ;;  %v5824_v21 = vadd.f32 -2.3025851, %v5808_v62 }
 0xa72   : > { %7421 = vpow2.f32 %v5682_v33  ;;  %v5452_v31 = vpop.f32.mrf.mxu0  ;;  %v5569_v1 = vadd.f32 1.837877, %v5553_v7 }
 0xa73   : > { %v5304_v13 = vmul.f32 %v11054_v22, %v5287_v60  ;;  %v11195_v47 = vmax.f32 %v5838_v4, %v5822_v10  ;;  %v5727_v54 = vadd.f32 %v5711_v53, %v5631_v5  ;;  %v5501_v57 = vpop.f32.mrf.mxu1 }
 0xa74   : > { %v11199_v61 = vadd.f32 %v5501_v57, %v11164_v49 }
 0xa75   : > { %v5321_v17 = vadd.f32 %v11076_v16, %v5304_v13  ;;  %v5870_v34 = vsub.f32 %v5598_v36, %v11195_v47  ;;  %v5918_v37 = vsub.f32 %v5758_v58, %v11195_v47  ;;  %v5982_v22 = vsub.f32 %v5822_v10, %v11195_v47  ;;  %v5538_v13 = vld [vmem:[#allocation7 + $0x20] sm:$0xff] }
 0xa76   : > { %v5743_v19 = vmul.f32 -0.5, %v5727_v54  ;;  %v5453_v16 = vadd.f32 %v5452_v31, %v11168_v45  ;;  %v5665_v30 = vsub.f32 0.0, %v11199_v61  ;;  %v5793_v54 = vadd.f32 11.837877, %v5777_v44 }
 0xa77   : > { %v5886_v15 = vmul.f32 1.442695, %v5870_v34  ;;  %v5934_v56 = vmul.f32 1.442695, %v5918_v37  ;;  %v5331_v27 = vpack.c.bf16 %v5321_v17, %v5320_v42  ;;  %v5998_v59 = vmul.f32 1.442695, %v5982_v22 }
 0xa78   : > { %v7422_v51 = vpop.eup %7421  ;;  %v5759_v43 = vadd.f32 -0.2876821, %v5743_v19  ;;  %v5684_v18 = vmul.f32 1.442695, %v5665_v30  ;;  %v5617_v38 = vsub.f32 %v5537_v25, %v5453_v16  ;;  %v5554_v57 = vmul.f32 %v5538_v13, %v5538_v13 }
 0xa79   : > { %7423 = vpow2.f32 %v5886_v15  ;;  %v5712_v0 = vmul.f32 %v7422_v51, %v5648_v55  ;;  %5469 = vmatmul.bf16.gmra.mxu0 %v5331_v27  ;;  %5518 = vmatmul.bf16.gmra.mxu1 %v5331_v27  ;;  %v5633_v34 = vadd.f32 1.837877, %v11199_v61  ;;  %v5585_v37 = vmul.f32 -0.5, %v5569_v1 }
 0xa7a   : > { %7425 = vpow2.f32 %v5934_v56  ;;  %v5839_v9 = vmax.f32 %v5599_v50, %v5759_v43  ;;  %v5455_v53 = vpop.f32.mrf.mxu0  ;;  %v5649_v63 = vmul.f32 %v5617_v38, %v5617_v38  ;;  %v5778_v56 = vmul.f32 4.539993e-05, %v5554_v57 }
 0xa7b   : > { %v5728_v32 = vadd.f32 %v5712_v0, %v5632_v52  ;;  %v5504_v28 = vpop.f32.mrf.mxu1  ;;  %7427 = vpow2.f32 %v5998_v59  ;;  %v5456_v19 = vadd.f32 %v5455_v53, %v11168_v45  ;;  %v5809_v52 = vmul.f32 -0.5, %v5793_v54 }
 0xa7c   : > { %v11207_v36 = vmax.f32 %v5839_v9, %v5823_v39  ;;  %7429 = vpow2.f32 %v5684_v18  ;;  %v11213_v58 = vadd.f32 %v5504_v28, %v11164_v49  ;;  %v5570_v28 = vadd.f32 1.837877, %v5554_v57 }
 0xa7d   : > { %v5744_v10 = vmul.f32 -0.5, %v5728_v32  ;;  %v5618_v0 = vsub.f32 %v5538_v13, %v5456_v19  ;;  %v5825_v7 = vadd.f32 -2.3025851, %v5809_v52  ;;  %v5794_v38 = vadd.f32 11.837877, %v5778_v56 }
 0xa7e   : > { %v5871_v12 = vsub.f32 %v5599_v50, %v11207_v36  ;;  %v5919_v24 = vsub.f32 %v5759_v43, %v11207_v36  ;;  %v5983_v3 = vsub.f32 %v5823_v39, %v11207_v36  ;;  %v5666_v42 = vsub.f32 0.0, %v11213_v58 }
 0xa7f   : > { %v7424_v14 = vpop.eup %7423  ;;  %v5760_v6 = vadd.f32 -0.2876821, %v5744_v10  ;;  %v5601_v43 = vadd.f32 -1.89712, %v5585_v37  ;;  %v5810_v53 = vmul.f32 -0.5, %v5794_v38 }
 0xa80   : > { %v7426_v33 = vpop.eup %7425  ;;  %v5888_v60 = vmul.f32 1.442695, %v5871_v12  ;;  %v5936_v4 = vmul.f32 1.442695, %v5919_v24  ;;  %v6000_v5 = vmul.f32 1.442695, %v5983_v3  ;;  %v5650_v3 = vmul.f32 %v5618_v0, %v5618_v0 }
 0xa81   : > { %v5966_v20 = vadd.f32 %v7426_v33, %v7424_v14  ;;  %v5840_v29 = vmax.f32 %v5600_v46, %v5760_v6  ;;  %v7428_v23 = vpop.eup %7427  ;;  %v5686_v40 = vmul.f32 1.442695, %v5666_v42  ;;  %v5539_v12 = vld [vmem:[#allocation7 + $0x28] sm:$0xff] }
 0xa82   : > { %7431 = vpow2.f32 %v5888_v60  ;;  %v7430_v8 = vpop.eup %7429  ;;  %v5457_v32 = vpop.f32.mrf.mxu0 }
 0xa83   : > { %v6030_v26 = vadd.f32 %v7428_v23, %v5966_v20  ;;  %7433 = vpow2.f32 %v5936_v4  ;;  %v11216_v17 = vmax.f32 %v5840_v29, %v5824_v21  ;;  %v5713_v22 = vmul.f32 %v7430_v8, %v5649_v63  ;;  %v5506_v27 = vpop.f32.mrf.mxu1 }
 0xa84   : > { %7435 = vpow2.f32 %v6000_v5  ;;  %v5507_v25 = vadd.f32 %v5506_v27, %v11164_v49  ;;  %v5458_v14 = vadd.f32 %v5457_v32, %v11168_v45  ;;  %v5586_v5 = vmul.f32 -0.5, %v5570_v28 }
 0xa85   : > { %7437 = vlog2.f32 %v6030_v26  ;;  %v5872_v31 = vsub.f32 %v5600_v46, %v11216_v17  ;;  %v5920_v50 = vsub.f32 %v5760_v6, %v11216_v17  ;;  %v5984_v55 = vsub.f32 %v5824_v21, %v11216_v17 }
 0xa86   : > { %v5729_v15 = vadd.f32 %v5713_v22, %v5633_v34  ;;  %7439 = vpow2.f32 %v5686_v40  ;;  %v5667_v24 = vsub.f32 0.0, %v5507_v25  ;;  %v5555_v21 = vmul.f32 %v5539_v12, %v5539_v12 }
 0xa87   : > { %v5890_v51 = vmul.f32 1.442695, %v5872_v31  ;;  %v5938_v59 = vmul.f32 1.442695, %v5920_v50  ;;  %v6002_v61 = vmul.f32 1.442695, %v5984_v55  ;;  %v5619_v8 = vsub.f32 %v5539_v12, %v5458_v14 }
 0xa88   : > { %v7432_v39 = vpop.eup %7431  ;;  %v5745_v16 = vmul.f32 -0.5, %v5729_v15  ;;  %v5688_v60 = vmul.f32 1.442695, %v5667_v24  ;;  %v5634_v20 = vadd.f32 1.837877, %v11213_v58 }
 0xa89   : > { %v7434_v48 = vpop.eup %7433  ;;  %7441 = vpow2.f32 %v5890_v51  ;;  %v5779_v37 = vmul.f32 4.539993e-05, %v5555_v21  ;;  %v5602_v19 = vadd.f32 -1.89712, %v5586_v5  ;;  %v5826_v55 = vadd.f32 -2.3025851, %v5810_v53 }
 0xa8a   : > { %v7436_v30 = vpop.eup %7435  ;;  %v5967_v9 = vadd.f32 %v7434_v48, %v7432_v39  ;;  %7443 = vpow2.f32 %v5938_v59  ;;  %v5761_v62 = vadd.f32 -0.2876821, %v5745_v16  ;;  %v5571_v52 = vadd.f32 1.837877, %v5555_v21 }
 0xa8b   : > { %v7438_v18 = vpop.eup %7437  ;;  %7445 = vpow2.f32 %v6002_v61  ;;  %v5651_v40 = vmul.f32 %v5619_v8, %v5619_v8  ;;  %v5795_v51 = vadd.f32 11.837877, %v5779_v37  ;;  %v5635_v39 = vadd.f32 1.837877, %v5507_v25 }
 0xa8c   : > { %v6047_v46 = vmul.f32 0.6931472, %v7438_v18  ;;  %v6031_v10 = vadd.f32 %v7436_v30, %v5967_v9  ;;  %v5841_v44 = vmax.f32 %v5601_v43, %v5761_v62  ;;  %v7440_v6 = vpop.eup %7439  ;;  %v5587_v16 = vmul.f32 -0.5, %v5571_v52 }
 0xa8d   : > { %v5714_v29 = vmul.f32 %v7440_v6, %v5650_v3  ;;  %v5811_v9 = vmul.f32 -0.5, %v5795_v51 }
 0xa8e   : > { %v6078_v1 = vadd.f32 %v6047_v46, %v11195_v47  ;;  %7447 = vlog2.f32 %v6031_v10  ;;  %v11226_v33 = vmax.f32 %v5841_v44, %v5825_v7  ;;  %v5603_v10 = vadd.f32 -1.89712, %v5587_v16 }
 0xa8f   : > { %v7442_v4 = vpop.eup %7441  ;;  %7449 = vpow2.f32 %v5688_v60  ;;  %v5730_v42 = vadd.f32 %v5714_v29, %v5634_v20  ;;  %v5827_v14 = vadd.f32 -2.3025851, %v5811_v9 }
 0xa90   : > { %v7444_v63 = vpop.eup %7443  ;;  %6094 = vst [vmem:[#allocation19] sm:$0xff] %v6078_v1  ;;  %v5873_v13 = vsub.f32 %v5601_v43, %v11226_v33  ;;  %v5921_v23 = vsub.f32 %v5761_v62, %v11226_v33  ;;  %v5985_v54 = vsub.f32 %v5825_v7, %v11226_v33 }
 0xa91   : > { %v7446_v47 = vpop.eup %7445  ;;  %v5968_v57 = vadd.f32 %v7444_v63, %v7442_v4  ;;  %v5746_v58 = vmul.f32 -0.5, %v5730_v42 }
 0xa92   : > { %v5892_v26 = vmul.f32 1.442695, %v5873_v13  ;;  %v5940_v34 = vmul.f32 1.442695, %v5921_v23  ;;  %v6004_v50 = vmul.f32 1.442695, %v5985_v54 }
 0xa93   : > { %v6032_v22 = vadd.f32 %v7446_v47, %v5968_v57  ;;  %v5762_v56 = vadd.f32 -0.2876821, %v5746_v58 }
 0xa94   : > { %v7448_v31 = vpop.eup %7447  ;;  %7451 = vpow2.f32 %v5892_v26 }
 0xa95   : > { %v6049_v15 = vmul.f32 0.6931472, %v7448_v31  ;;  %7453 = vlog2.f32 %v6032_v22  ;;  %v7450_v27 = vpop.eup %7449  ;;  %v5842_v61 = vmax.f32 %v5602_v19, %v5762_v56 }
 0xa96   : > { %7455 = vpow2.f32 %v5940_v34  ;;  %v5715_v43 = vmul.f32 %v7450_v27, %v5651_v40 }
 0xa97   : > { %v6079_v59 = vadd.f32 %v6049_v15, %v11207_v36  ;;  %7457 = vpow2.f32 %v6004_v50  ;;  %v5858_v48 = vmax.f32 %v5842_v61, %v5826_v55 }
 0xa98   : > { %v5731_v0 = vadd.f32 %v5715_v43, %v5635_v39 }
 0xa99   : > { %6095 = vst [vmem:[#allocation19 + $0x8] sm:$0xff] %v6079_v59  ;;  %v5874_v62 = vsub.f32 %v5602_v19, %v5858_v48  ;;  %v5922_v32 = vsub.f32 %v5762_v56, %v5858_v48  ;;  %v5986_v18 = vsub.f32 %v5826_v55, %v5858_v48 }
 0xa9a   : > { %v7452_v30 = vpop.eup %7451  ;;  %v5747_v28 = vmul.f32 -0.5, %v5731_v0 }
 0xa9b   : > { %v7454_v7 = vpop.eup %7453  ;;  %v5894_v36 = vmul.f32 1.442695, %v5874_v62  ;;  %v5942_v12 = vmul.f32 1.442695, %v5922_v32  ;;  %v6006_v3 = vmul.f32 1.442695, %v5986_v18 }
 0xa9c   : > { %v7456_v38 = vpop.eup %7455  ;;  %v6051_v46 = vmul.f32 0.6931472, %v7454_v7  ;;  %v5763_v21 = vadd.f32 -0.2876821, %v5747_v28 }
 0xa9d   : > { %v5969_v44 = vadd.f32 %v7456_v38, %v7452_v30  ;;  %v7458_v25 = vpop.eup %7457  ;;  %7459 = vpow2.f32 %v5894_v36 }
 0xa9e   : > { %v6080_v24 = vadd.f32 %v6051_v46, %v11216_v17  ;;  %7461 = vpow2.f32 %v5942_v12  ;;  %v5843_v1 = vmax.f32 %v5603_v10, %v5763_v21 }
 0xa9f   : > { %v6033_v6 = vadd.f32 %v7458_v25, %v5969_v44  ;;  %v11237_v25 = vld [vmem:[#allocation17 + $0x9] ss:$0 sm:$0xff] }
 0xaa0   : > { %6096 = vst [vmem:[#allocation19 + $0x10] sm:$0xff] %v6080_v24  ;;  %v5859_v60 = vmax.f32 %v5843_v1, %v5827_v14 }
 0xaa1   : > { %7463 = vlog2.f32 %v6033_v6 }
 0xaa2   : > { %7465 = vpow2.f32 %v6006_v3  ;;  %v5875_v4 = vsub.f32 %v5603_v10, %v5859_v60  ;;  %v5923_v5 = vsub.f32 %v5763_v21, %v5859_v60  ;;  %v5987_v53 = vsub.f32 %v5827_v14, %v5859_v60 }
 0xaa3   : > { %v7460_v20 = vpop.eup %7459 }
 0xaa4   : > { %v7462_v29 = vpop.eup %7461  ;;  %v5896_v63 = vmul.f32 1.442695, %v5875_v4  ;;  %v5944_v13 = vmul.f32 1.442695, %v5923_v5  ;;  %v6008_v23 = vmul.f32 1.442695, %v5987_v53 }
 0xaa5   : > { %v5970_v54 = vadd.f32 %v7462_v29, %v7460_v20  ;;  %v11241_v4 = vld [vmem:[#allocation17 + $0xe] ss:$0 sm:$0xff] }
 0xaa6   : > { %7467 = vpow2.f32 %v5896_v63 }
 0xaa7   : > { %v7464_v17 = vpop.eup %7463  ;;  %7469 = vpow2.f32 %v5944_v13 }
 0xaa8   : > { %v7466_v47 = vpop.eup %7465  ;;  %v6053_v57 = vmul.f32 0.6931472, %v7464_v17  ;;  %7471 = vpow2.f32 %v6008_v23 }
 0xaa9   : > { %v6034_v42 = vadd.f32 %v7466_v47, %v5970_v54 }
 0xaaa   : > { %v6081_v8 = vadd.f32 %v6053_v57, %v11226_v33  ;;  %v5540_v57 = vld [vmem:[#allocation7 + $0x30] sm:$0xff] }
 0xaab   : > { %7473 = vlog2.f32 %v6034_v42  ;;  %v5556_v42 = vmul.f32 %v5540_v57, %v5540_v57 }
 0xaac   : > { %6097 = vst [vmem:[#allocation19 + $0x18] sm:$0xff] %v6081_v8  ;;  %v7468_v37 = vpop.eup %7467 }
 0xaad   : > { %v5077_v26 = vpop.xlane.xlu2 %5076  ;;  %v7470_v22 = vpop.eup %7469 }
 0xaae   : > { %v5096_v34 = vmul.f32 0.03125, %v5077_v26  ;;  %v7472_v58 = vpop.eup %7471  ;;  %v5971_v31 = vadd.f32 %v7470_v22, %v7468_v37 }
 0xab0   : > { %v5112_v19 = vadd.f32 0.1, %v5096_v34  ;;  %v6035_v52 = vadd.f32 %v7472_v58, %v5971_v31  ;;  %v5780_v58 = vmul.f32 4.539993e-05, %v5556_v42 }
 0xab1   : > { %v7474_v50 = vpop.eup %7473 }
 0xab2   : > { %7475 = vrsqrt.f32 %v5112_v19  ;;  %v6055_v55 = vmul.f32 0.6931472, %v7474_v50  ;;  %vm5242_vm8 = vweird.f32 %v5112_v19 }
 0xab3   : > { %7477 = vlog2.f32 %v6035_v52 }
 0xab4   : > { %v6082_v56 = vadd.f32 %v6055_v55, %v5858_v48 }
 0xab5   : > { %v5079_v15 = vpop.xlane.xlu1 %5078 }
 0xab6   : > { %v5097_v40 = vmul.f32 0.03125, %v5079_v15  ;;  %6098 = vst [vmem:[#allocation19 + $0x20] sm:$0xff] %v6082_v56  ;;  %v5572_v56 = vadd.f32 1.837877, %v5556_v42 }
 0xab8   : > { %v5113_v33 = vadd.f32 0.1, %v5097_v40  ;;  %v7476_v27 = vpop.eup %7475 }
 0xab9   : > { %v5237_v51 = vmul.f32 %v7476_v27, %v5112_v19  ;;  %v7478_v59 = vpop.eup %7477  ;;  %vm5243_vm7 = vweird.f32 %v7476_v27 }
 0xaba   : > { %7479 = vrsqrt.f32 %v5113_v33  ;;  %v6057_v39 = vmul.f32 0.6931472, %v7478_v59  ;;  %vm5244_vm9 = vmor %vm5242_vm8, %vm5243_vm7  ;;  %vm5252_vm12 = vweird.f32 %v5113_v33 }
 0xabb   : > { %v5238_v61 = vmul.f32 %v7476_v27, %v5237_v51 }
 0xabc   : > { %v6083_v16 = vadd.f32 %v6057_v39, %v5859_v60  ;;  %v5796_v39 = vadd.f32 11.837877, %v5780_v58 }
 0xabd   : > { %v5239_v43 = vmul.f32 0.5, %v5238_v61 }
 0xabe   : > { %6099 = vst [vmem:[#allocation19 + $0x28] sm:$0xff] %v6083_v16 }
 0xabf   : > { %v5240_v30 = vsub.f32 1.5, %v5239_v43  ;;  %v5541_v43 = vld [vmem:[#allocation7 + $0x38] sm:$0xff] }
 0xac0   : > { %v7480_v0 = vpop.eup %7479 }
 0xac1   : > { %v5247_v9 = vmul.f32 %v7480_v0, %v5113_v33  ;;  %v5241_v7 = vmul.f32 %v7476_v27, %v5240_v30  ;;  %vm5253_vm11 = vweird.f32 %v7480_v0  ;;  %v5588_v30 = vmul.f32 -0.5, %v5572_v56 }
 0xac2   : > { %vm5254_vm13 = vmor %vm5252_vm12, %vm5253_vm11 }
 0xac3   : > { %v5248_v48 = vmul.f32 %v7480_v0, %v5247_v9  ;;  %v5081_v62 = vpop.xlane.xlu0 %5080  ;;  %v5245_v28 = vsel %vm5244_vm9, %v7476_v27, %v5241_v7 }
 0xac4   : > { %v5098_v18 = vmul.f32 0.03125, %v5081_v62  ;;  %v5288_v10 = vmul.f32 %v5245_v28, %v11130_v11  ;;  %v5812_v28 = vmul.f32 -0.5, %v5796_v39 }
 0xac5   : > { %v5249_v32 = vmul.f32 0.5, %v5248_v48 }
 0xac6   : > { %v5114_v46 = vadd.f32 0.1, %v5098_v18  ;;  %v5305_v24 = vmul.f32 %v11237_v25, %v5288_v10 }
 0xac7   : > { %v5250_v38 = vsub.f32 1.5, %v5249_v32 }
 0xac8   : > { %7481 = vrsqrt.f32 %v5114_v46  ;;  %v5322_v11 = vadd.f32 %v11241_v4, %v5305_v24  ;;  %vm5262_vm10 = vweird.f32 %v5114_v46 }
 0xac9   : > { %v5251_v44 = vmul.f32 %v7480_v0, %v5250_v38 }
 0xacb   : > { %v5255_v36 = vsel %vm5254_vm13, %v7480_v0, %v5251_v44  ;;  %v5083_v3 = vpop.xlane.xlu2 %5082  ;;  %v5604_v44 = vadd.f32 -1.89712, %v5588_v30 }
 0xacc   : > { %v5289_v12 = vmul.f32 %v5255_v36, %v11137_v2  ;;  %v5099_v14 = vmul.f32 0.03125, %v5083_v3 }
 0xace   : > { %v5306_v21 = vmul.f32 %v11237_v25, %v5289_v12  ;;  %v7482_v6 = vpop.eup %7481  ;;  %v5115_v60 = vadd.f32 0.1, %v5099_v14 }
 0xacf   : > { %v5257_v1 = vmul.f32 %v7482_v6, %v5114_v46  ;;  %vm5263_vm14 = vweird.f32 %v7482_v6  ;;  %v5557_v46 = vmul.f32 %v5541_v43, %v5541_v43 }
 0xad0   : > { %v5323_v5 = vadd.f32 %v11241_v4, %v5306_v21  ;;  %7483 = vrsqrt.f32 %v5115_v60  ;;  %vm5264_vm15 = vmor %vm5262_vm10, %vm5263_vm14  ;;  %vm5272_vm1 = vweird.f32 %v5115_v60 }
 0xad1   : > { %v5258_v53 = vmul.f32 %v7482_v6, %v5257_v1  ;;  %v5573_v3 = vadd.f32 1.837877, %v5557_v46  ;;  %v5781_v14 = vmul.f32 4.539993e-05, %v5557_v46 }
 0xad2   : > { %v5332_v2 = vpack.c.bf16 %v5323_v5, %v5322_v11  ;;  %v5828_v11 = vadd.f32 -2.3025851, %v5812_v28 }
 0xad3   : > { %v5259_v20 = vmul.f32 0.5, %v5258_v53  ;;  %v5797_v5 = vadd.f32 11.837877, %v5781_v14 }
 0xad4   : > { %5474 = vmatmul.bf16.gmra.mxu0 %v5332_v2  ;;  %5523 = vmatmul.bf16.gmra.mxu1 %v5332_v2  ;;  %v5589_v2 = vmul.f32 -0.5, %v5573_v3 }
 0xad5   : > { %v5260_v29 = vsub.f32 1.5, %v5259_v20 }
 0xad6   : > { %v5460_v63 = vpop.f32.mrf.mxu0  ;;  %v5509_v13 = vpop.f32.mrf.mxu1 }
 0xad7   : > { %v5510_v23 = vadd.f32 %v5509_v13, %v11164_v49  ;;  %v7484_v17 = vpop.eup %7483  ;;  %v5261_v54 = vmul.f32 %v7482_v6, %v5260_v29  ;;  %v5461_v34 = vadd.f32 %v5460_v63, %v11168_v45  ;;  %v5542_v63 = vld [vmem:[#allocation7 + $0x40] sm:$0xff] }
 0xad8   : > { %v5267_v47 = vmul.f32 %v7484_v17, %v5115_v60  ;;  %vm5273_vm0 = vweird.f32 %v7484_v17 }
 0xad9   : > { %v5668_v8 = vsub.f32 0.0, %v5510_v23  ;;  %v5265_v22 = vsel %vm5264_vm15, %v7482_v6, %v5261_v54  ;;  %v5620_v52 = vsub.f32 %v5540_v57, %v5461_v34  ;;  %vm5274_vm2 = vmor %vm5272_vm1, %vm5273_vm0  ;;  %v5636_v48 = vadd.f32 1.837877, %v5510_v23 }
 0xada   : > { %v5268_v26 = vmul.f32 %v7484_v17, %v5267_v47  ;;  %v5290_v40 = vmul.f32 %v5265_v22, %v11145_v41  ;;  %v5813_v23 = vmul.f32 -0.5, %v5797_v5  ;;  %v5558_v57 = vmul.f32 %v5542_v63, %v5542_v63 }
 0xadb   : > { %v5690_v37 = vmul.f32 1.442695, %v5668_v8  ;;  %v5652_v61 = vmul.f32 %v5620_v52, %v5620_v52  ;;  %v5605_v8 = vadd.f32 -1.89712, %v5589_v2 }
 0xadc   : > { %v5269_v19 = vmul.f32 0.5, %v5268_v26  ;;  %v5307_v7 = vmul.f32 %v11237_v25, %v5290_v40  ;;  %v5574_v58 = vadd.f32 1.837877, %v5558_v57 }
 0xadd   : > { %7485 = vpow2.f32 %v5690_v37 }
 0xade   : > { %v5462_v31 = vpop.f32.mrf.mxu0  ;;  %v5511_v50 = vpop.f32.mrf.mxu1  ;;  %v5270_v55 = vsub.f32 1.5, %v5269_v19  ;;  %v5324_v12 = vadd.f32 %v11241_v4, %v5307_v7  ;;  %v5590_v39 = vmul.f32 -0.5, %v5574_v58 }
 0xadf   : > { %v5512_v15 = vadd.f32 %v5511_v50, %v11164_v49  ;;  %v5463_v51 = vadd.f32 %v5462_v31, %v11168_v45  ;;  %v5829_v31 = vadd.f32 -2.3025851, %v5813_v23 }
 0xae0   : > { %v5271_v33 = vmul.f32 %v7484_v17, %v5270_v55  ;;  %v5782_v55 = vmul.f32 4.539993e-05, %v5558_v57 }
 0xae1   : > { %v5669_v27 = vsub.f32 0.0, %v5512_v15  ;;  %v5621_v41 = vsub.f32 %v5541_v43, %v5463_v51  ;;  %v5637_v20 = vadd.f32 1.837877, %v5512_v15 }
 0xae2   : > { %v5275_v59 = vsel %vm5274_vm2, %v7484_v17, %v5271_v33 }
 0xae3   : > { %v5692_v16 = vmul.f32 1.442695, %v5669_v27  ;;  %v7486_v0 = vpop.eup %7485  ;;  %v5291_v9 = vmul.f32 %v5275_v59, %v11157_v35  ;;  %v5653_v21 = vmul.f32 %v5621_v41, %v5621_v41  ;;  %v5798_v59 = vadd.f32 11.837877, %v5782_v55 }
 0xae4   : > { %v5716_v62 = vmul.f32 %v7486_v0, %v5652_v61 }
 0xae5   : > { %7487 = vpow2.f32 %v5692_v16  ;;  %v5308_v18 = vmul.f32 %v11237_v25, %v5291_v9  ;;  %v5543_v9 = vld [vmem:[#allocation7 + $0x48] sm:$0xff]  ;;  %v5814_v7 = vmul.f32 -0.5, %v5798_v59 }
 0xae6   : > { %v5514_v32 = vpop.f32.mrf.mxu1  ;;  %v5732_v38 = vadd.f32 %v5716_v62, %v5636_v48  ;;  %v5465_v36 = vpop.f32.mrf.mxu0  ;;  %v5559_v62 = vmul.f32 %v5543_v9, %v5543_v9 }
 0xae7   : > { %v5515_v10 = vadd.f32 %v5514_v32, %v11164_v49  ;;  %v5325_v35 = vadd.f32 %v11241_v4, %v5308_v18  ;;  %v5466_v53 = vadd.f32 %v5465_v36, %v11168_v45  ;;  %v5830_v14 = vadd.f32 -2.3025851, %v5814_v7 }
 0xae8   : > { %v5748_v24 = vmul.f32 -0.5, %v5732_v38  ;;  %v5606_v38 = vadd.f32 -1.89712, %v5590_v39 }
 0xae9   : > { %v5670_v6 = vsub.f32 0.0, %v5515_v10  ;;  %v5333_v1 = vpack.c.bf16 %v5325_v35, %v5324_v12  ;;  %v5622_v42 = vsub.f32 %v5542_v63, %v5466_v53  ;;  %v5638_v61 = vadd.f32 1.837877, %v5515_v10 }
 0xaea   : > { %v5764_v25 = vadd.f32 -0.2876821, %v5748_v24  ;;  %v5783_v10 = vmul.f32 4.539993e-05, %v5559_v62 }
 0xaeb   : > { %v7488_v60 = vpop.eup %7487  ;;  %v5694_v13 = vmul.f32 1.442695, %v5670_v6  ;;  %5479 = vmatmul.bf16.gmra.mxu0 %v5333_v1  ;;  %5528 = vmatmul.bf16.gmra.mxu1 %v5333_v1  ;;  %v5654_v56 = vmul.f32 %v5622_v42, %v5622_v42  ;;  %v5575_v1 = vadd.f32 1.837877, %v5559_v62 }
 0xaec   : > { %v5717_v29 = vmul.f32 %v7488_v60, %v5653_v21  ;;  %v5844_v4 = vmax.f32 %v5604_v44, %v5764_v25  ;;  %v5799_v60 = vadd.f32 11.837877, %v5783_v10 }
 0xaed   : > { %7489 = vpow2.f32 %v5694_v13  ;;  %v5591_v23 = vmul.f32 -0.5, %v5575_v1 }
 0xaee   : > { %v5733_v17 = vadd.f32 %v5717_v29, %v5637_v20  ;;  %v5516_v54 = vpop.f32.mrf.mxu1  ;;  %v11257_v47 = vmax.f32 %v5844_v4, %v5828_v11  ;;  %v5467_v40 = vpop.f32.mrf.mxu0 }
 0xaef   : > { %v5517_v34 = vadd.f32 %v5516_v54, %v11164_v49  ;;  %v5468_v30 = vadd.f32 %v5467_v40, %v11168_v45  ;;  %v5544_v40 = vld [vmem:[#allocation7 + $0x50] sm:$0xff] }
 0xaf0   : > { %v5749_v26 = vmul.f32 -0.5, %v5733_v17  ;;  %v5876_v37 = vsub.f32 %v5604_v44, %v11257_v47  ;;  %v5924_v22 = vsub.f32 %v5764_v25, %v11257_v47  ;;  %v5988_v19 = vsub.f32 %v5828_v11, %v11257_v47 }
 0xaf1   : > { %v5671_v16 = vsub.f32 0.0, %v5517_v34  ;;  %v5623_v35 = vsub.f32 %v5543_v9, %v5468_v30  ;;  %v5639_v4 = vadd.f32 1.837877, %v5517_v34  ;;  %v5815_v17 = vmul.f32 -0.5, %v5799_v60 }
 0xaf2   : > { %v5765_v50 = vadd.f32 -0.2876821, %v5749_v26  ;;  %v5898_v52 = vmul.f32 1.442695, %v5876_v37  ;;  %v5946_v15 = vmul.f32 1.442695, %v5924_v22 }
 0xaf3   : > { %v7490_v33 = vpop.eup %7489  ;;  %v6010_v27 = vmul.f32 1.442695, %v5988_v19  ;;  %v5696_v41 = vmul.f32 1.442695, %v5671_v16  ;;  %v5655_v2 = vmul.f32 %v5623_v35, %v5623_v35 }
 0xaf4   : > { %v5845_v51 = vmax.f32 %v5605_v8, %v5765_v50  ;;  %7491 = vpow2.f32 %v5898_v52  ;;  %v5718_v43 = vmul.f32 %v7490_v33, %v5654_v56  ;;  %v5607_v52 = vadd.f32 -1.89712, %v5591_v23 }
 0xaf5   : > { %7493 = vpow2.f32 %v5946_v15 }
 0xaf6   : > { %v11263_v0 = vmax.f32 %v5845_v51, %v5829_v31  ;;  %v5734_v48 = vadd.f32 %v5718_v43, %v5638_v61  ;;  %7495 = vpow2.f32 %v6010_v27  ;;  %v5519_v44 = vpop.f32.mrf.mxu1  ;;  %v5470_v20 = vpop.f32.mrf.mxu0  ;;  %v5831_v27 = vadd.f32 -2.3025851, %v5815_v17 }
 0xaf7   : > { %7497 = vpow2.f32 %v5696_v41  ;;  %v11270_v11 = vadd.f32 %v5519_v44, %v11164_v49  ;;  %v5471_v56 = vadd.f32 %v5470_v20, %v11168_v45  ;;  %v5560_v51 = vmul.f32 %v5544_v40, %v5544_v40 }
 0xaf8   : > { %v5877_v32 = vsub.f32 %v5605_v8, %v11263_v0  ;;  %v5925_v18 = vsub.f32 %v5765_v50, %v11263_v0  ;;  %v5989_v28 = vsub.f32 %v5829_v31, %v11263_v0  ;;  %v5750_v46 = vmul.f32 -0.5, %v5734_v48 }
 0xaf9   : > { %v5672_v57 = vsub.f32 0.0, %v11270_v11  ;;  %v5624_v48 = vsub.f32 %v5544_v40, %v5471_v56 }
 0xafa   : > { %v5900_v36 = vmul.f32 1.442695, %v5877_v32  ;;  %v5948_v12 = vmul.f32 1.442695, %v5925_v18  ;;  %v7492_v24 = vpop.eup %7491  ;;  %v6012_v3 = vmul.f32 1.442695, %v5989_v28 }
 0xafb   : > { %v5766_v21 = vadd.f32 -0.2876821, %v5750_v46  ;;  %v7494_v6 = vpop.eup %7493  ;;  %v5698_v59 = vmul.f32 1.442695, %v5672_v57  ;;  %v5784_v32 = vmul.f32 4.539993e-05, %v5560_v51 }
 0xafc   : > { %7499 = vpow2.f32 %v5900_v36  ;;  %v5972_v25 = vadd.f32 %v7494_v6, %v7492_v24  ;;  %v7496_v53 = vpop.eup %7495  ;;  %v5545_v18 = vld [vmem:[#allocation7 + $0x58] sm:$0xff]  ;;  %v5576_v46 = vadd.f32 1.837877, %v5560_v51  ;;  %v5640_v6 = vadd.f32 1.837877, %v11270_v11 }
 0xafd   : > { %7501 = vpow2.f32 %v5948_v12  ;;  %v5846_v5 = vmax.f32 %v5606_v38, %v5766_v21  ;;  %v7498_v29 = vpop.eup %7497  ;;  %v5561_v44 = vmul.f32 %v5545_v18, %v5545_v18 }
 0xafe   : > { %v6036_v63 = vadd.f32 %v7496_v53, %v5972_v25  ;;  %7503 = vpow2.f32 %v6012_v3  ;;  %v5719_v54 = vmul.f32 %v7498_v29, %v5655_v2  ;;  %v5521_v55 = vpop.f32.mrf.mxu1  ;;  %v5472_v7 = vpop.f32.mrf.mxu0  ;;  %v5592_v23 = vmul.f32 -0.5, %v5576_v46 }
 0xaff   : > { %v11272_v13 = vmax.f32 %v5846_v5, %v5830_v14  ;;  %v5522_v43 = vadd.f32 %v5521_v55, %v11164_v49  ;;  %v5473_v10 = vadd.f32 %v5472_v7, %v11168_v45  ;;  %v5800_v5 = vadd.f32 11.837877, %v5784_v32 }
 0xb00   : > { %7505 = vlog2.f32 %v6036_v63  ;;  %v5735_v22 = vadd.f32 %v5719_v54, %v5639_v4  ;;  %v5785_v63 = vmul.f32 4.539993e-05, %v5561_v44  ;;  %v5577_v57 = vadd.f32 1.837877, %v5561_v44 }
 0xb01   : > { %v5878_v42 = vsub.f32 %v5606_v38, %v11272_v13  ;;  %v5926_v8 = vsub.f32 %v5766_v21, %v11272_v13  ;;  %v5990_v26 = vsub.f32 %v5830_v14, %v11272_v13  ;;  %v5673_v28 = vsub.f32 0.0, %v5522_v43 }
 0xb02   : > { %v7500_v37 = vpop.eup %7499  ;;  %v5751_v15 = vmul.f32 -0.5, %v5735_v22  ;;  %v5656_v21 = vmul.f32 %v5624_v48, %v5624_v48  ;;  %v5625_v29 = vsub.f32 %v5545_v18, %v5473_v10  ;;  %v5816_v11 = vmul.f32 -0.5, %v5800_v5 }
 0xb03   : > { %v7502_v19 = vpop.eup %7501  ;;  %v5902_v58 = vmul.f32 1.442695, %v5878_v42  ;;  %v5950_v31 = vmul.f32 1.442695, %v5926_v8  ;;  %v6014_v50 = vmul.f32 1.442695, %v5990_v26 }
 0xb04   : > { %v5973_v34 = vadd.f32 %v7502_v19, %v7500_v37  ;;  %v7504_v33 = vpop.eup %7503  ;;  %v5767_v39 = vadd.f32 -0.2876821, %v5751_v15  ;;  %v5700_v3 = vmul.f32 1.442695, %v5673_v28  ;;  %v5657_v8 = vmul.f32 %v5625_v29, %v5625_v29 }
 0xb05   : > { %7507 = vpow2.f32 %v5902_v58  ;;  %v5801_v26 = vadd.f32 11.837877, %v5785_v63  ;;  %v5608_v22 = vadd.f32 -1.89712, %v5592_v23  ;;  %v5593_v58 = vmul.f32 -0.5, %v5577_v57 }
 0xb06   : > { %v6037_v61 = vadd.f32 %v7504_v33, %v5973_v34  ;;  %7509 = vpow2.f32 %v5950_v31  ;;  %v7506_v16 = vpop.eup %7505  ;;  %v5847_v9 = vmax.f32 %v5607_v52, %v5767_v39  ;;  %v5641_v31 = vadd.f32 1.837877, %v5522_v43 }
 0xb07   : > { %7511 = vpow2.f32 %v6014_v50  ;;  %v6059_v30 = vmul.f32 0.6931472, %v7506_v16  ;;  %v5832_v34 = vadd.f32 -2.3025851, %v5816_v11 }
 0xb08   : > { %7513 = vlog2.f32 %v6037_v61  ;;  %v11281_v41 = vmax.f32 %v5847_v9, %v5831_v27 }
 0xb09   : > { %7515 = vpow2.f32 %v5698_v59  ;;  %v6084_v62 = vadd.f32 %v6059_v30, %v11257_v47  ;;  %v5609_v59 = vadd.f32 -1.89712, %v5593_v58 }
 0xb0a   : > { %v5879_v12 = vsub.f32 %v5607_v52, %v11281_v41  ;;  %v5927_v35 = vsub.f32 %v5767_v39, %v11281_v41  ;;  %v5991_v24 = vsub.f32 %v5831_v27, %v11281_v41  ;;  %7517 = vpow2.f32 %v5700_v3 }
 0xb0b   : > { %v7508_v38 = vpop.eup %7507  ;;  %6100 = vst [vmem:[#allocation19 + $0x30] sm:$0xff] %v6084_v62 }
 0xb0c   : > { %v7510_v36 = vpop.eup %7509  ;;  %v5904_v60 = vmul.f32 1.442695, %v5879_v12  ;;  %v5952_v25 = vmul.f32 1.442695, %v5927_v35  ;;  %v6016_v4 = vmul.f32 1.442695, %v5991_v24 }
 0xb0d   : > { %v7512_v47 = vpop.eup %7511  ;;  %v5974_v14 = vadd.f32 %v7510_v36, %v7508_v38 }
 0xb0e   : > { %v7514_v1 = vpop.eup %7513  ;;  %7519 = vpow2.f32 %v5904_v60 }
 0xb0f   : > { %v7516_v53 = vpop.eup %7515  ;;  %v6061_v2 = vmul.f32 0.6931472, %v7514_v1  ;;  %v6038_v20 = vadd.f32 %v7512_v47, %v5974_v14 }
 0xb10   : > { %v5720_v17 = vmul.f32 %v7516_v53, %v5656_v21  ;;  %v7518_v37 = vpop.eup %7517 }
 0xb11   : > { %v6085_v54 = vadd.f32 %v6061_v2, %v11263_v0  ;;  %7521 = vlog2.f32 %v6038_v20  ;;  %v5721_v50 = vmul.f32 %v7518_v37, %v5657_v8  ;;  %v5817_v0 = vmul.f32 -0.5, %v5801_v26  ;;  %v5546_v8 = vld [vmem:[#allocation7 + $0x60] sm:$0xff] }
 0xb12   : > { %7523 = vpow2.f32 %v5952_v25  ;;  %v5736_v42 = vadd.f32 %v5720_v17, %v5640_v6 }
 0xb13   : > { %6101 = vst [vmem:[#allocation19 + $0x38] sm:$0xff] %v6085_v54  ;;  %7525 = vpow2.f32 %v6016_v4  ;;  %v5737_v56 = vadd.f32 %v5721_v50, %v5641_v31  ;;  %v5833_v7 = vadd.f32 -2.3025851, %v5817_v0 }
 0xb14   : > { %v5752_v19 = vmul.f32 -0.5, %v5736_v42  ;;  %v7520_v55 = vpop.eup %7519 }
 0xb15   : > { %v5753_v61 = vmul.f32 -0.5, %v5737_v56 }
 0xb16   : > { %v5768_v52 = vadd.f32 -0.2876821, %v5752_v19 }
 0xb17   : > { %v7522_v15 = vpop.eup %7521  ;;  %v5769_v43 = vadd.f32 -0.2876821, %v5753_v61 }
 0xb18   : > { %v7524_v40 = vpop.eup %7523  ;;  %v6063_v33 = vmul.f32 0.6931472, %v7522_v15  ;;  %v5848_v27 = vmax.f32 %v5608_v22, %v5768_v52 }
 0xb19   : > { %v5975_v51 = vadd.f32 %v7524_v40, %v7520_v55  ;;  %v7526_v39 = vpop.eup %7525  ;;  %v5849_v18 = vmax.f32 %v5609_v59, %v5769_v43 }
 0xb1a   : > { %v6086_v16 = vadd.f32 %v6063_v33, %v11272_v13  ;;  %v5864_v30 = vmax.f32 %v5848_v27, %v5832_v34  ;;  %v5547_v27 = vld [vmem:[#allocation7 + $0x68] sm:$0xff] }
 0xb1b   : > { %v6039_v9 = vadd.f32 %v7526_v39, %v5975_v51  ;;  %v5865_v10 = vmax.f32 %v5849_v18, %v5833_v7 }
 0xb1c   : > { %6102 = vst [vmem:[#allocation19 + $0x40] sm:$0xff] %v6086_v16  ;;  %v5880_v48 = vsub.f32 %v5608_v22, %v5864_v30  ;;  %v5928_v62 = vsub.f32 %v5768_v52, %v5864_v30  ;;  %v5992_v32 = vsub.f32 %v5832_v34, %v5864_v30  ;;  %v5562_v22 = vmul.f32 %v5546_v8, %v5546_v8 }
 0xb1d   : > { %7527 = vlog2.f32 %v6039_v9  ;;  %v5881_v44 = vsub.f32 %v5609_v59, %v5865_v10  ;;  %v5929_v36 = vsub.f32 %v5769_v43, %v5865_v10  ;;  %v5993_v12 = vsub.f32 %v5833_v7, %v5865_v10 }
 0xb1e   : > { %v5906_v28 = vmul.f32 1.442695, %v5880_v48  ;;  %v5954_v38 = vmul.f32 1.442695, %v5928_v62  ;;  %v6018_v46 = vmul.f32 1.442695, %v5992_v32  ;;  %v5563_v7 = vmul.f32 %v5547_v27, %v5547_v27 }
 0xb1f   : > { %v5908_v35 = vmul.f32 1.442695, %v5881_v44  ;;  %v5956_v24 = vmul.f32 1.442695, %v5929_v36  ;;  %v6020_v47 = vmul.f32 1.442695, %v5993_v12 }
 0xb20   : > { %7529 = vpow2.f32 %v5906_v28  ;;  %v5786_v31 = vmul.f32 4.539993e-05, %v5562_v22  ;;  %v5578_v52 = vadd.f32 1.837877, %v5562_v22  ;;  %v5579_v62 = vadd.f32 1.837877, %v5563_v7 }
 0xb21   : > { %7531 = vpow2.f32 %v5954_v38  ;;  %v5787_v32 = vmul.f32 4.539993e-05, %v5563_v7  ;;  %v5549_v7 = vld [vmem:[#allocation7 + $0x78] sm:$0xff] }
 0xb22   : > { %7533 = vpow2.f32 %v6018_v46  ;;  %v5802_v56 = vadd.f32 11.837877, %v5786_v31  ;;  %v5594_v59 = vmul.f32 -0.5, %v5578_v52 }
 0xb23   : > { %v7528_v13 = vpop.eup %7527  ;;  %7535 = vpow2.f32 %v5908_v35 }
 0xb24   : > { %v6065_v3 = vmul.f32 0.6931472, %v7528_v13  ;;  %7537 = vpow2.f32 %v5956_v24  ;;  %v5818_v16 = vmul.f32 -0.5, %v5802_v56  ;;  %v5610_v43 = vadd.f32 -1.89712, %v5594_v59 }
 0xb25   : > { %7539 = vpow2.f32 %v6020_v47  ;;  %v5595_v13 = vmul.f32 -0.5, %v5579_v62 }
 0xb26   : > { %v7530_v14 = vpop.eup %7529  ;;  %v6087_v21 = vadd.f32 %v6065_v3, %v11281_v41  ;;  %v5834_v18 = vadd.f32 -2.3025851, %v5818_v16 }
 0xb27   : > { %v7532_v6 = vpop.eup %7531 }
 0xb28   : > { %6103 = vst [vmem:[#allocation19 + $0x48] sm:$0xff] %v6087_v21  ;;  %v5976_v1 = vadd.f32 %v7532_v6, %v7530_v14  ;;  %v7534_v60 = vpop.eup %7533 }
 0xb29   : > { %v7536_v5 = vpop.eup %7535 }
 0xb2a   : > { %v6040_v25 = vadd.f32 %v7534_v60, %v5976_v1  ;;  %v7538_v53 = vpop.eup %7537 }
 0xb2b   : > { %v5977_v2 = vadd.f32 %v7538_v53, %v7536_v5  ;;  %v7540_v20 = vpop.eup %7539  ;;  %v5611_v5 = vadd.f32 -1.89712, %v5595_v13  ;;  %v5548_v53 = vld [vmem:[#allocation7 + $0x70] sm:$0xff] }
 0xb2c   : > { %7541 = vlog2.f32 %v6040_v25 }
 0xb2d   : > { %v6041_v29 = vadd.f32 %v7540_v20, %v5977_v2 }
 0xb2f   : > { %7543 = vlog2.f32 %v6041_v29 }
 0xb32   : > { %v7542_v63 = vpop.eup %7541 }
 0xb33   : > { %v6067_v4 = vmul.f32 0.6931472, %v7542_v63 }
 0xb35   : > { %v6088_v23 = vadd.f32 %v6067_v4, %v5864_v30  ;;  %v7544_v17 = vpop.eup %7543 }
 0xb36   : > { %v6069_v41 = vmul.f32 0.6931472, %v7544_v17 }
 0xb37   : > { %6104 = vst [vmem:[#allocation19 + $0x50] sm:$0xff] %v6088_v23 }
 0xb38   : > { %v6089_v54 = vadd.f32 %v6069_v41, %v5865_v10  ;;  %v5803_v10 = vadd.f32 11.837877, %v5787_v32 }
 0xb3a   : > { %6105 = vst [vmem:[#allocation19 + $0x58] sm:$0xff] %v6089_v54  ;;  %v5819_v47 = vmul.f32 -0.5, %v5803_v10  ;;  %v5564_v54 = vmul.f32 %v5548_v53, %v5548_v53 }
 0xb3c   : > { %v5835_v4 = vadd.f32 -2.3025851, %v5819_v47 }
 0xb51   : > { %v5475_v57 = vpop.f32.mrf.mxu0  ;;  %v5524_v11 = vpop.f32.mrf.mxu1 }
 0xb52   : > { %v5525_v42 = vadd.f32 %v5524_v11, %v11164_v49  ;;  %v5476_v37 = vadd.f32 %v5475_v57, %v11168_v45 }
 0xb54   : > { %v5674_v26 = vsub.f32 0.0, %v5525_v42  ;;  %v5626_v58 = vsub.f32 %v5546_v8, %v5476_v37  ;;  %v5642_v61 = vadd.f32 1.837877, %v5525_v42  ;;  %v5788_v37 = vmul.f32 4.539993e-05, %v5564_v54 }
 0xb56   : > { %v5702_v19 = vmul.f32 1.442695, %v5674_v26  ;;  %v5658_v0 = vmul.f32 %v5626_v58, %v5626_v58 }
 0xb58   : > { %7545 = vpow2.f32 %v5702_v19 }
 0xb59   : > { %v5526_v50 = vpop.f32.mrf.mxu1  ;;  %v5477_v55 = vpop.f32.mrf.mxu0 }
 0xb5a   : > { %v5527_v34 = vadd.f32 %v5526_v50, %v11164_v49  ;;  %v5478_v40 = vadd.f32 %v5477_v55, %v11168_v45  ;;  %v5580_v50 = vadd.f32 1.837877, %v5564_v54 }
 0xb5c   : > { %v5675_v15 = vsub.f32 0.0, %v5527_v34  ;;  %v5627_v9 = vsub.f32 %v5547_v27, %v5478_v40  ;;  %v5643_v36 = vadd.f32 1.837877, %v5527_v34 }
 0xb5e   : > { %v7546_v33 = vpop.eup %7545  ;;  %v5704_v51 = vmul.f32 1.442695, %v5675_v15  ;;  %v5659_v38 = vmul.f32 %v5627_v9, %v5627_v9 }
 0xb5f   : > { %v5722_v39 = vmul.f32 %v7546_v33, %v5658_v0 }
 0xb60   : > { %7547 = vpow2.f32 %v5704_v51 }
 0xb61   : > { %v5738_v30 = vadd.f32 %v5722_v39, %v5642_v61 }
 0xb63   : > { %v5754_v48 = vmul.f32 -0.5, %v5738_v30  ;;  %v5596_v30 = vmul.f32 -0.5, %v5580_v50 }
 0xb65   : > { %v5770_v28 = vadd.f32 -0.2876821, %v5754_v48  ;;  %v5612_v32 = vadd.f32 -1.89712, %v5596_v30 }
 0xb66   : > { %v7548_v46 = vpop.eup %7547 }
 0xb67   : > { %v5850_v44 = vmax.f32 %v5610_v43, %v5770_v28  ;;  %v5723_v12 = vmul.f32 %v7548_v46, %v5659_v38 }
 0xb68   : > { %v5529_v3 = vpop.f32.mrf.mxu1  ;;  %v5480_v25 = vpop.f32.mrf.mxu0 }
 0xb69   : > { %v11295_v35 = vmax.f32 %v5850_v44, %v5834_v18  ;;  %v5739_v24 = vadd.f32 %v5723_v12, %v5643_v36  ;;  %v5530_v14 = vadd.f32 %v5529_v3, %v11164_v49  ;;  %v5481_v41 = vadd.f32 %v5480_v25, %v11168_v45 }
 0xb6b   : > { %v5882_v21 = vsub.f32 %v5610_v43, %v11295_v35  ;;  %v5930_v6 = vsub.f32 %v5770_v28, %v11295_v35  ;;  %v5994_v1 = vsub.f32 %v5834_v18, %v11295_v35  ;;  %v5755_v60 = vmul.f32 -0.5, %v5739_v24 }
 0xb6c   : > { %v5676_v2 = vsub.f32 0.0, %v5530_v14  ;;  %v5628_v26 = vsub.f32 %v5548_v53, %v5481_v41  ;;  %v5644_v59 = vadd.f32 1.837877, %v5530_v14  ;;  %v5565_v43 = vmul.f32 %v5549_v7, %v5549_v7 }
 0xb6d   : > { %v5910_v20 = vmul.f32 1.442695, %v5882_v21  ;;  %v5958_v29 = vmul.f32 1.442695, %v5930_v6  ;;  %v6022_v63 = vmul.f32 1.442695, %v5994_v1 }
 0xb6e   : > { %v5771_v23 = vadd.f32 -0.2876821, %v5755_v60  ;;  %v5706_v17 = vmul.f32 1.442695, %v5676_v2  ;;  %v5660_v27 = vmul.f32 %v5628_v26, %v5628_v26  ;;  %v5789_v46 = vmul.f32 4.539993e-05, %v5565_v43 }
 0xb6f   : > { %7549 = vpow2.f32 %v5910_v20  ;;  %v5581_v13 = vadd.f32 1.837877, %v5565_v43 }
 0xb70   : > { %7551 = vpow2.f32 %v5958_v29  ;;  %v5851_v57 = vmax.f32 %v5611_v5, %v5771_v23  ;;  %v5531_v11 = vpop.f32.mrf.mxu1  ;;  %v5482_v55 = vpop.f32.mrf.mxu0  ;;  %v5805_v1 = vadd.f32 11.837877, %v5789_v46 }
 0xb71   : > { %7553 = vpow2.f32 %v6022_v63  ;;  %v5532_v8 = vadd.f32 %v5531_v11, %v11164_v49  ;;  %v5804_v49 = vadd.f32 11.837877, %v5788_v37  ;;  %v5483_v61 = vadd.f32 %v5482_v55, %v11168_v45 }
 0xb72   : > { %v11302_v42 = vmax.f32 %v5851_v57, %v5835_v4  ;;  %7555 = vpow2.f32 %v5706_v17  ;;  %v5597_v2 = vmul.f32 -0.5, %v5581_v13 }
 0xb73   : > { %v5677_v34 = vsub.f32 0.0, %v5532_v8  ;;  %v5820_v48 = vmul.f32 -0.5, %v5804_v49  ;;  %v5629_v28 = vsub.f32 %v5549_v7, %v5483_v61  ;;  %v5645_v25 = vadd.f32 1.837877, %v5532_v8 }
 0xb74   : > { %v5883_v22 = vsub.f32 %v5611_v5, %v11302_v42  ;;  %v5931_v19 = vsub.f32 %v5771_v23, %v11302_v42  ;;  %v5995_v58 = vsub.f32 %v5835_v4, %v11302_v42  ;;  %v5821_v23 = vmul.f32 -0.5, %v5805_v1 }
 0xb75   : > { %v7550_v31 = vpop.eup %7549  ;;  %v5708_v39 = vmul.f32 1.442695, %v5677_v34  ;;  %v5836_v44 = vadd.f32 -2.3025851, %v5820_v48  ;;  %v5661_v47 = vmul.f32 %v5629_v28, %v5629_v28  ;;  %v5613_v57 = vadd.f32 -1.89712, %v5597_v2 }
 0xb76   : > { %v7552_v52 = vpop.eup %7551  ;;  %v5912_v15 = vmul.f32 1.442695, %v5883_v22  ;;  %v5960_v0 = vmul.f32 1.442695, %v5931_v19  ;;  %v6024_v56 = vmul.f32 1.442695, %v5995_v58 }
 0xb77   : > { %v7554_v40 = vpop.eup %7553  ;;  %v5978_v33 = vadd.f32 %v7552_v52, %v7550_v31  ;;  %v5837_v8 = vadd.f32 -2.3025851, %v5821_v23 }
 0xb78   : > { %v7556_v51 = vpop.eup %7555  ;;  %7557 = vpow2.f32 %v5912_v15 }
 0xb79   : > { %v6042_v16 = vadd.f32 %v7554_v40, %v5978_v33  ;;  %7559 = vpow2.f32 %v5960_v0  ;;  %v5724_v9 = vmul.f32 %v7556_v51, %v5660_v27 }
 0xb7a   : > { %7561 = vpow2.f32 %v6024_v56 }
 0xb7b   : > { %7563 = vlog2.f32 %v6042_v16  ;;  %v5740_v62 = vadd.f32 %v5724_v9, %v5644_v59 }
 0xb7c   : > { %7565 = vpow2.f32 %v5708_v39 }
 0xb7d   : > { %v5756_v18 = vmul.f32 -0.5, %v5740_v62 }
 0xb7e   : > { %v7558_v38 = vpop.eup %7557 }
 0xb7f   : > { %v7560_v10 = vpop.eup %7559  ;;  %v5772_v45 = vadd.f32 -0.2876821, %v5756_v18 }
 0xb80   : > { %v7562_v36 = vpop.eup %7561  ;;  %v5979_v12 = vadd.f32 %v7560_v10, %v7558_v38 }
 0xb81   : > { %v7564_v24 = vpop.eup %7563  ;;  %v5852_v3 = vmax.f32 %v5612_v32, %v5772_v45 }
 0xb82   : > { %v7566_v14 = vpop.eup %7565  ;;  %v6071_v21 = vmul.f32 0.6931472, %v7564_v24  ;;  %v6043_v6 = vadd.f32 %v7562_v36, %v5979_v12 }
 0xb83   : > { %v5868_v60 = vmax.f32 %v5852_v3, %v5836_v44  ;;  %v5725_v5 = vmul.f32 %v7566_v14, %v5661_v47 }
 0xb84   : > { %v6090_v53 = vadd.f32 %v6071_v21, %v11295_v35  ;;  %7567 = vlog2.f32 %v6043_v6 }
 0xb85   : > { %v5884_v20 = vsub.f32 %v5612_v32, %v5868_v60  ;;  %v5932_v29 = vsub.f32 %v5772_v45, %v5868_v60  ;;  %v5996_v63 = vsub.f32 %v5836_v44, %v5868_v60  ;;  %v5741_v4 = vadd.f32 %v5725_v5, %v5645_v25 }
 0xb86   : > { %6106 = vst [vmem:[#allocation19 + $0x60] sm:$0xff] %v6090_v53 }
 0xb87   : > { %v5914_v17 = vmul.f32 1.442695, %v5884_v20  ;;  %v5962_v41 = vmul.f32 1.442695, %v5932_v29  ;;  %v6026_v54 = vmul.f32 1.442695, %v5996_v63 }
 0xb88   : > { %v5757_v11 = vmul.f32 -0.5, %v5741_v4 }
 0xb89   : > { %7569 = vpow2.f32 %v5914_v17 }
 0xb8a   : > { %v7568_v26 = vpop.eup %7567  ;;  %7571 = vpow2.f32 %v5962_v41  ;;  %v5773_v37 = vadd.f32 -0.2876821, %v5757_v11 }
 0xb8b   : > { %v6073_v22 = vmul.f32 0.6931472, %v7568_v26  ;;  %7573 = vpow2.f32 %v6026_v54 }
 0xb8c   : > { %v5853_v35 = vmax.f32 %v5613_v57, %v5773_v37 }
 0xb8d   : > { %v6091_v19 = vadd.f32 %v6073_v22, %v11302_v42 }
 0xb8e   : > { %v5869_v58 = vmax.f32 %v5853_v35, %v5837_v8 }
 0xb8f   : > { %v7570_v31 = vpop.eup %7569  ;;  %6107 = vst [vmem:[#allocation19 + $0x68] sm:$0xff] %v6091_v19 }
 0xb90   : > { %v7572_v50 = vpop.eup %7571  ;;  %v5885_v55 = vsub.f32 %v5613_v57, %v5869_v58  ;;  %v5933_v34 = vsub.f32 %v5773_v37, %v5869_v58  ;;  %v5997_v52 = vsub.f32 %v5837_v8, %v5869_v58 }
 0xb91   : > { %v5980_v15 = vadd.f32 %v7572_v50, %v7570_v31  ;;  %v7574_v0 = vpop.eup %7573 }
 0xb92   : > { %v5916_v56 = vmul.f32 1.442695, %v5885_v55  ;;  %v5964_v40 = vmul.f32 1.442695, %v5933_v34  ;;  %v6028_v27 = vmul.f32 1.442695, %v5997_v52 }
 0xb93   : > { %v6044_v33 = vadd.f32 %v7574_v0, %v5980_v15 }
 0xb94   : > { %7575 = vpow2.f32 %v5916_v56 }
 0xb95   : > { %7577 = vlog2.f32 %v6044_v33 }
 0xb96   : > { %7579 = vpow2.f32 %v5964_v40 }
 0xb97   : > { %7581 = vpow2.f32 %v6028_v27 }
 0xb9a   : > { %v7576_v49 = vpop.eup %7575 }
 0xb9b   : > { %v7578_v51 = vpop.eup %7577 }
 0xb9c   : > { %v7580_v42 = vpop.eup %7579  ;;  %v6075_v59 = vmul.f32 0.6931472, %v7578_v51 }
 0xb9d   : > { %v5981_v61 = vadd.f32 %v7580_v42, %v7576_v49  ;;  %v7582_v39 = vpop.eup %7581 }
 0xb9e   : > { %v6092_v16 = vadd.f32 %v6075_v59, %v5868_v60 }
 0xb9f   : > { %v6045_v30 = vadd.f32 %v7582_v39, %v5981_v61 }
 0xba0   : > { %6108 = vst [vmem:[#allocation19 + $0x70] sm:$0xff] %v6092_v16 }
 0xba1   : > { %7583 = vlog2.f32 %v6045_v30 }
 0xba7   : > { %v7584_v9 = vpop.eup %7583 }
 0xba8   : > { %v6077_v7 = vmul.f32 0.6931472, %v7584_v9 }
 0xbaa   : > { %v6093_v43 = vadd.f32 %v6077_v7, %v5869_v58 }
 0xbac   : > { %6109 = vst [vmem:[#allocation19 + $0x78] sm:$0xff] %v6093_v43 }
 0xbad PF: > { %p6828_p3 = scmp.eq.s32.totalorder %s8069_s19, 2  ;;  %s6120_s11 = sshll.u32 %s11343_s10, 4  ;;  %s6121_s11 = int_to_ptr.hbm [resolvable:$true] %s6120_s11 }
 0xbae   : > { %s7980_s1 = smov [#allocation19]   ;;  %s7981_s29 = smov 128  }
 0xbaf   : > { %s6118_s28 = sshll.u32 %s7980_s1, 4  ;;  %s7982_s13 = smov 8   ;;  %s6119_s28 = int_to_ptr.vmem [resolvable:$true] %s6118_s28 }
 0xbb0   : > { %6781 = dma.vmem_to_hbm [thread:$0]  (%p6828_p3), %s6119_s28, 2048, %s6121_s11, [#allocation6], %s7981_s29, %s7981_s29, %s7982_s13  }
 0xbb1   : > { %7939 = dma.done.wait (%p6828_p3), [#allocation6], 2048  }
 0xbb2   : > { %7941 = vsyncadd (%p6828_p3), [#allocation6], 4294965248 }
 0xbb3 PF: > { %s11466_s27 = sld [smem:[#allocation29_spill]]  ;;  %s11470_s13 = smov %s7948_s14 }
 0xbb4   : > { %s11467_s22 = sld [smem:[#allocation28_spill]]  ;;  %s11472_s16 = smov %s7960_s17 }
 0xbb5   : > { %s11468_s15 = sld [smem:[#allocation31_spill]] }
 0xbb6   : > { %s11469_s19 = sld [smem:[#allocation30_spill]] }
 0xbb9   : > { %s28_s18 = sadd.s32 1, %s11466_s27  }
 0xbba   : > { %p25_p4 = scmp.ge.s32.totalorder %s28_s18, 5   ;;  %s11471_s14 = smov %s11467_s22 }
 0xbbc   : > { %s11473_s17 = smov %s11469_s19  ;;  %27 = sbr.rel (!%p25_p4) target bundleno = 16 (0x10), region = 146 }
 0xbc1   :  { %6137 = vsyncpa [#allocation5], 1 }
 0xbc2   :  { %6139 = vsyncpa [#allocation5 + $0x1], 1 }
 0xbc3   :  { %6140 = vsyncpa [#allocation8], 1 }
 0xbc4   :  { %6141 = vsyncpa [#allocation12], 1 }
 0xbc5   :  { %6142 = vsyncpa [#allocation15], 1 }
 0xbc6   :  { %6143 = vsyncpa [#allocation18], 1 }
 0xbc7   :  { %6144 = vsyncpa [#allocation6], 1 }
 0xbc8   :  { %6146 = vsyncpa [#allocation6 + $0x1], 1 }

</bundles_post_ra>
